<compile_context>
chip_gen: v6e
topology: v6e:2x2x1
jax: 0.10.0
libtpu: 0.0.40
codegen_flags: <defaults>
</compile_context>

<pallas_src>
import functools
import math

import jax
import jax.numpy as jnp
from jax import lax
from jax.experimental import pallas as pl
from jax.experimental.pallas import tpu as pltpu

BN_EPS = 1e-5
LANES = 128

# (Cin, Cout, conv_pad, pool_k, pool_s) for conv1..conv8 (kernel_size=3, stride=1)
BLOCK_CFG = [
    (1,   100, 2, 3, 2),
    (100, 64,  1, 2, 2),
    (64,  128, 1, 2, 2),
    (128, 128, 1, 2, 2),
    (128, 128, 1, 2, 2),
    (128, 128, 1, 2, 2),
    (128, 64,  1, 2, 2),
    (64,  32,  0, 2, 2),
]


def _pool_lengths(input_dim):
    """Sequence length after each conv block (conv k=3 s=1 + maxpool), per torch."""
    lens = []
    L = input_dim
    for (_, _, pad, pk, ps) in BLOCK_CFG:
        conv_len = L + 2 * pad - 2
        L = (conv_len - pk) // ps + 1
        lens.append(L)
    return tuple(lens)


# ------------------------------ fused kernel -------------------------------- #

def _fused_cnn_kernel(xs_ref, w1_ref, wst_ref, shifts_ref, wfc_ref, bfc_ref,
                      o_ref, buf0_ref, buf1_ref, *, pool_lens, next_pads):
    # xs_ref:     (5, P1, 1)      five stride-2 phases of the padded raw input
    # w1_ref:     (3, 1, 128)     conv1 taps (BN scale folded), f32
    # wst_ref:    (7, 3, 128,128) conv2..8 taps (scale folded, zero-padded), bf16
    # shifts_ref: (8, 1, 128)     folded BN shift (+conv bias) per layer, f32
    # wfc_ref:    (L_last,128,128) FC weight pre-permuted to (L, C, N), bf16
    # bfc_ref:    (1, 128)        FC bias (padded), f32
    # o_ref:      (1, 128)        logits (lane-dense, padded to 128)
    # buf0/buf1:  ping-pong VMEM activation buffers, layout (L + halo, 128)
    f32 = jnp.float32
    bf16 = jnp.bfloat16

    def emit(dst_ref, y, p, halo):
        # Store the pooled block at row offset `halo` and zero the halo rows so
        # the next layer's 3-tap conv reads its zero padding straight from VMEM.
        if halo:
            zrow = jnp.zeros((halo, LANES), f32)
            dst_ref[pl.ds(0, halo), :] = zrow
            dst_ref[pl.ds(halo + p, halo), :] = zrow
        dst_ref[pl.ds(halo, p), :] = y

    # --- conv1: Conv1d(1->100,k=3,p=2) + BN + ReLU + MaxPool(3,2) on the VPU ---
    # pooled[m] = max_{j=0..2} relu(sum_k x_pad[2m+j+k]*w[k] + shift); the five
    # strided phases x_pad[2m+j] arrive pre-sliced as xs_ref[j] (shape (P1, 1)).
    p1 = pool_lens[0]
    e = [xs_ref[j, :, :] for j in range(5)]          # (P1, 1) f32 each
    w = [w1_ref[k, :, :] for k in range(3)]          # (1, 128) f32
    y = e[0] * w[0] + e[1] * w[1] + e[2] * w[2]
    y = jnp.maximum(y, e[1] * w[0] + e[2] * w[1] + e[3] * w[2])
    y = jnp.maximum(y, e[2] * w[0] + e[3] * w[1] + e[4] * w[2])
    y = jnp.maximum(y + shifts_ref[0, :, :], 0.0)    # ReLU/pool/shift commute
    emit(buf0_ref, y, p1, next_pads[0])
    src = buf0_ref

    # --- conv2..conv8: 3-tap conv as shifted MXU matmuls, fused ReLU+MaxPool ----
    for i in range(7):
        p = pool_lens[i + 1]
        w0 = wst_ref[i, 0, :, :]                     # (128,128) bf16
        w1m = wst_ref[i, 1, :, :]
        w2m = wst_ref[i, 2, :, :]
        sh = shifts_ref[i + 1, :, :]                 # (1,128) f32
        # Even/odd stride-2 views of the zero-haloed source buffer: computing the
        # conv per pool phase avoids materializing the conv_len intermediate
        # (no extra VMEM round-trip for the maxpool).
        e0 = src[pl.ds(0, p, stride=2), :].astype(bf16)
        e1 = src[pl.ds(1, p, stride=2), :].astype(bf16)
        e2 = src[pl.ds(2, p, stride=2), :].astype(bf16)
        e3 = src[pl.ds(3, p, stride=2), :].astype(bf16)
        ce = (jnp.dot(e0, w0, preferred_element_type=f32)
              + jnp.dot(e1, w1m, preferred_element_type=f32)
              + jnp.dot(e2, w2m, preferred_element_type=f32))
        co = (jnp.dot(e1, w0, preferred_element_type=f32)
              + jnp.dot(e2, w1m, preferred_element_type=f32)
              + jnp.dot(e3, w2m, preferred_element_type=f32))
        y = jnp.maximum(jnp.maximum(ce, co) + sh, 0.0)
        if i < 6:
            dst = buf1_ref if i % 2 == 0 else buf0_ref
            emit(dst, y, p, next_pads[i + 1])
            src = dst
        # i == 6 (conv8): keep y (L_last, 128) for the FC head below.

    # --- fully connected head (PyTorch channel-major flatten, pre-permuted) ----
    acc = bfc_ref[...]
    for l in range(pool_lens[-1]):
        acc = acc + jnp.dot(y[l:l + 1, :].astype(bf16), wfc_ref[l, :, :],
                            preferred_element_type=f32)
    o_ref[...] = acc


def cnn_forward(x_ncl, fp, n_classes):
    """Forward pass matching PyTorch CNN.forward (BatchNorm in eval mode)."""
    B, _, L0 = x_ncl.shape
    pool_lens = _pool_lengths(L0)
    next_pads = tuple(BLOCK_CFG[i + 1][2] for i in range(7))
    l_last = pool_lens[-1]
    # Ping-pong buffer row counts (pooled length + next layer's conv halo).
    rows0 = max(pool_lens[i] + 2 * next_pads[i] for i in (0, 2, 4, 6))
    rows1 = max(pool_lens[i] + 2 * next_pads[i] for i in (1, 3, 5))
    p1 = pool_lens[0]

    # conv1 im2col-lite: pad the tiny single-channel input once and pre-slice the
    # five stride-2 phases x_pad[2m+j] (j=0..4) that the kernel's VPU conv1 uses.
    xp = jnp.pad(x_ncl.astype(jnp.float32).reshape(B, L0, 1),
                 ((0, 0), (2, 2), (0, 0)))
    xs = jnp.stack(
        [lax.slice_in_dim(xp, j, j + 2 * p1 - 1, stride=2, axis=1)
         for j in range(5)], axis=1)                          # (B, 5, P1, 1)

    kernel = functools.partial(_fused_cnn_kernel, pool_lens=pool_lens,
                               next_pads=next_pads)
    out = pl.pallas_call(
        kernel,
        out_shape=jax.ShapeDtypeStruct((B, 1, LANES), jnp.float32),
        grid=(B,),
        in_specs=[
            pl.BlockSpec((None, 5, p1, 1), lambda b: (b, 0, 0, 0)),
            pl.BlockSpec((3, 1, LANES), lambda b: (0, 0, 0)),
            pl.BlockSpec((7, 3, LANES, LANES), lambda b: (0, 0, 0, 0)),
            pl.BlockSpec((8, 1, LANES), lambda b: (0, 0, 0)),
            pl.BlockSpec((l_last, LANES, LANES), lambda b: (0, 0, 0)),
            pl.BlockSpec((1, LANES), lambda b: (0, 0)),
        ],
        out_specs=pl.BlockSpec((None, 1, LANES), lambda b: (b, 0, 0)),
        scratch_shapes=[pltpu.VMEM((rows0, LANES), jnp.float32),
                        pltpu.VMEM((rows1, LANES), jnp.float32)],
        compiler_params=pltpu.CompilerParams(
            dimension_semantics=("parallel",)),
    )(xs, fp["w1"], fp["wst"], fp["shifts"], fp["wfc"], fp["bfc"])
    return out[:, 0, :n_classes]


# ----------------------------- parameter setup ------------------------------ #

def init_params(key, input_dim, n_classes):
    conv_params = []
    for (cin, cout, pad, pk, ps) in BLOCK_CFG:
        key, kw, kb, kg, kbe, km, kv = jax.random.split(key, 7)
        bound = 1.0 / math.sqrt(cin * 3)
        conv_params.append(dict(
            w=jax.random.uniform(kw, (cout, cin, 3), jnp.float32, -bound, bound),
            b=jax.random.uniform(kb, (cout,), jnp.float32, -bound, bound),
            gamma=jax.random.uniform(kg, (cout,), jnp.float32, 0.8, 1.2),
            beta=jax.random.uniform(kbe, (cout,), jnp.float32, -0.1, 0.1),
            mean=jax.random.uniform(km, (cout,), jnp.float32, -0.1, 0.1),
            var=jax.random.uniform(kv, (cout,), jnp.float32, 0.8, 1.2),
            pad=pad, pool_k=pk, pool_s=ps,
        ))
    feat = _pool_lengths(input_dim)[-1] * BLOCK_CFG[-1][1]
    key, kw, kb = jax.random.split(key, 3)
    bound = 1.0 / math.sqrt(feat)
    fc_w = jax.random.uniform(kw, (n_classes, feat), jnp.float32, -bound, bound)
    fc_b = jax.random.uniform(kb, (n_classes,), jnp.float32, -bound, bound)
    return conv_params, (fc_w, fc_b)


def fold_params(conv_params, fc_params, input_dim, n_classes):
    """Fold eval-mode BatchNorm into conv weights, pad channels to 128 lanes, and
    pre-permute the FC weight to the kernel's (L, C) activation layout."""
    l_last = _pool_lengths(input_dim)[-1]
    w1 = None
    wst, shifts = [], []
    for idx, p in enumerate(conv_params):
        scale = p["gamma"] / jnp.sqrt(p["var"] + BN_EPS)
        shift = p["beta"] + (p["b"] - p["mean"]) * scale
        w = jnp.transpose(p["w"], (2, 1, 0)) * scale          # (3, Cin, Cout)
        cout = w.shape[-1]
        shifts.append(jnp.pad(shift, (0, LANES - cout)))
        if idx == 0:                                          # conv1: VPU path
            w1 = jnp.pad(w, ((0, 0), (0, 0), (0, LANES - cout))).astype(jnp.float32)
        else:
            cin = w.shape[1]
            w = jnp.pad(w, ((0, 0), (0, LANES - cin), (0, LANES - cout)))
            wst.append(w.astype(jnp.bfloat16))
    wst = jnp.stack(wst)                                      # (7, 3, 128, 128)
    shifts = jnp.stack(shifts)[:, None, :].astype(jnp.float32)  # (8, 1, 128)

    fc_w, fc_b = fc_params                                    # (N, 32*L), (N,)
    c_last = BLOCK_CFG[-1][1]
    wfc = fc_w.T.reshape(c_last, l_last, n_classes)           # torch index c*L+l
    wfc = jnp.transpose(wfc, (1, 0, 2))                       # (L, C, N)
    wfc = jnp.pad(wfc, ((0, 0), (0, LANES - c_last), (0, LANES - n_classes)))
    bfc = jnp.pad(fc_b, (0, LANES - n_classes))[None, :]
    return dict(w1=w1, wst=wst, shifts=shifts,
                wfc=wfc.astype(jnp.bfloat16), bfc=bfc.astype(jnp.float32))


# ------------------------------ pure-JAX reference --------------------------- #

def ref_forward(x_ncl, conv_params, fc_params):
    # PyTorch NCL semantics, f32, BatchNorm in eval mode.
    x = x_ncl.astype(jnp.float32)
    for p in conv_params:
        x = lax.conv_general_dilated(
            x, p["w"], window_strides=(1,), padding=[(p["pad"], p["pad"])],
            dimension_numbers=("NCH", "OIH", "NCH"))
        x = x + p["b"][None, :, None]
        scale = p["gamma"] / jnp.sqrt(p["var"] + BN_EPS)
        x = (x - p["mean"][None, :, None]) * scale[None, :, None] \
            + p["beta"][None, :, None]
        x = jnp.maximum(x, 0.0)
        x = lax.reduce_window(x, -jnp.inf, lax.max,
                              (1, 1, p["pool_k"]), (1, 1, p["pool_s"]), "VALID")
    feat = x.reshape(x.shape[0], -1)
    fc_w, fc_b = fc_params
    return feat @ fc_w.T + fc_b[None, :]


# ----------------------------------- main ------------------------------------ #

if __name__ == "__main__":
    INPUT_DIM = 1024     # small stand-in for the default 16000-sample input
    N_CLASSES = 10
    BATCH = 2

    key = jax.random.PRNGKey(0)
    key, kx = jax.random.split(key)
    x = jax.random.normal(kx, (BATCH, 1, INPUT_DIM), jnp.float32)

    conv_params, fc_params = init_params(key, INPUT_DIM, N_CLASSES)
    fp = fold_params(conv_params, fc_params, INPUT_DIM, N_CLASSES)

    forward = jax.jit(functools.partial(cnn_forward, n_classes=N_CLASSES))
    out = jax.block_until_ready(forward(x, fp))

    ref = jax.block_until_ready(ref_forward(x, conv_params, fc_params))
    assert out.shape == (BATCH, N_CLASSES), out.shape
    max_err = float(jnp.max(jnp.abs(out - ref)))
    ref_scale = float(jnp.max(jnp.abs(ref)))
    # bf16 MXU operands with f32 accumulation over 8 layers: small rel/abs slack.
    assert max_err < 2e-2 * max(1.0, ref_scale), (max_err, ref_scale)

    print("KERNEL_OK")
</pallas_src>

<mosaic_0001>
module attributes {stable_mosaic.version = 11 : i64} {
  func.func @_fused_cnn_kernel(%arg0: i32, %arg1: memref<1x5x512x1xf32, #tpu.memory_space<vmem>>, %arg2: memref<3x1x128xf32, #tpu.memory_space<vmem>>, %arg3: memref<7x3x128x128xbf16, #tpu.memory_space<vmem>>, %arg4: memref<8x1x128xf32, #tpu.memory_space<vmem>>, %arg5: memref<3x128x128xbf16, #tpu.memory_space<vmem>>, %arg6: memref<1x128xf32, #tpu.memory_space<vmem>>, %arg7: memref<1x1x128xf32, #tpu.memory_space<vmem>>, %arg8: memref<514x128xf32, #tpu.memory_space<vmem>>, %arg9: memref<258x128xf32, #tpu.memory_space<vmem>>) attributes {dimension_semantics = [#tpu.dimension_semantics<parallel>], iteration_bounds = array<i64: 2>, scalar_prefetch = 0 : i64, scratch_operands = 2 : i64, tpu.core_type = #tpu.core_type<tc>, window_params = [{transform_indices = @transform_0, window_bounds = array<i64: 1, 5, 512, 1>}, {pipeline_mode = #tpu.pipeline_mode<synchronous>, transform_indices = @transform_1, window_bounds = array<i64: 3, 1, 128>}, {pipeline_mode = #tpu.pipeline_mode<synchronous>, transform_indices = @transform_2, window_bounds = array<i64: 7, 3, 128, 128>}, {pipeline_mode = #tpu.pipeline_mode<synchronous>, transform_indices = @transform_3, window_bounds = array<i64: 8, 1, 128>}, {pipeline_mode = #tpu.pipeline_mode<synchronous>, transform_indices = @transform_4, window_bounds = array<i64: 3, 128, 128>}, {pipeline_mode = #tpu.pipeline_mode<synchronous>, transform_indices = @transform_5, window_bounds = array<i64: 1, 128>}, {transform_indices = @transform_6, window_bounds = array<i64: 1, 1, 128>}]} {
    %c0 = arith.constant 0 : index
    %c0_0 = arith.constant 0 : index
    %c0_1 = arith.constant 0 : index
    %c0_2 = arith.constant 0 : index
    %0 = vector.load %arg1[%c0, %c0_0, %c0_1, %c0_2] : memref<1x5x512x1xf32, #tpu.memory_space<vmem>>, vector<1x1x512x1xf32>
    %1 = vector.shape_cast %0 : vector<1x1x512x1xf32> to vector<512x1xf32>
    %c0_3 = arith.constant 0 : index
    %c1 = arith.constant 1 : index
    %c0_4 = arith.constant 0 : index
    %c0_5 = arith.constant 0 : index
    %2 = vector.load %arg1[%c0_3, %c1, %c0_4, %c0_5] : memref<1x5x512x1xf32, #tpu.memory_space<vmem>>, vector<1x1x512x1xf32>
    %3 = vector.shape_cast %2 : vector<1x1x512x1xf32> to vector<512x1xf32>
    %c0_6 = arith.constant 0 : index
    %c2 = arith.constant 2 : index
    %c0_7 = arith.constant 0 : index
    %c0_8 = arith.constant 0 : index
    %4 = vector.load %arg1[%c0_6, %c2, %c0_7, %c0_8] : memref<1x5x512x1xf32, #tpu.memory_space<vmem>>, vector<1x1x512x1xf32>
    %5 = vector.shape_cast %4 : vector<1x1x512x1xf32> to vector<512x1xf32>
    %c0_9 = arith.constant 0 : index
    %c3 = arith.constant 3 : index
    %c0_10 = arith.constant 0 : index
    %c0_11 = arith.constant 0 : index
    %6 = vector.load %arg1[%c0_9, %c3, %c0_10, %c0_11] : memref<1x5x512x1xf32, #tpu.memory_space<vmem>>, vector<1x1x512x1xf32>
    %7 = vector.shape_cast %6 : vector<1x1x512x1xf32> to vector<512x1xf32>
    %c0_12 = arith.constant 0 : index
    %c4 = arith.constant 4 : index
    %c0_13 = arith.constant 0 : index
    %c0_14 = arith.constant 0 : index
    %8 = vector.load %arg1[%c0_12, %c4, %c0_13, %c0_14] : memref<1x5x512x1xf32, #tpu.memory_space<vmem>>, vector<1x1x512x1xf32>
    %9 = vector.shape_cast %8 : vector<1x1x512x1xf32> to vector<512x1xf32>
    %c0_15 = arith.constant 0 : index
    %c0_16 = arith.constant 0 : index
    %c0_17 = arith.constant 0 : index
    %10 = vector.load %arg2[%c0_15, %c0_16, %c0_17] : memref<3x1x128xf32, #tpu.memory_space<vmem>>, vector<1x1x128xf32>
    %11 = vector.shape_cast %10 : vector<1x1x128xf32> to vector<1x128xf32>
    %c1_18 = arith.constant 1 : index
    %c0_19 = arith.constant 0 : index
    %c0_20 = arith.constant 0 : index
    %12 = vector.load %arg2[%c1_18, %c0_19, %c0_20] : memref<3x1x128xf32, #tpu.memory_space<vmem>>, vector<1x1x128xf32>
    %13 = vector.shape_cast %12 : vector<1x1x128xf32> to vector<1x128xf32>
    %c2_21 = arith.constant 2 : index
    %c0_22 = arith.constant 0 : index
    %c0_23 = arith.constant 0 : index
    %14 = vector.load %arg2[%c2_21, %c0_22, %c0_23] : memref<3x1x128xf32, #tpu.memory_space<vmem>>, vector<1x1x128xf32>
    %15 = vector.shape_cast %14 : vector<1x1x128xf32> to vector<1x128xf32>
    %16 = vector.broadcast %1 : vector<512x1xf32> to vector<512x128xf32>
    %17 = vector.broadcast %11 : vector<1x128xf32> to vector<512x128xf32>
    %18 = arith.mulf %16, %17 : vector<512x128xf32>
    %19 = vector.broadcast %3 : vector<512x1xf32> to vector<512x128xf32>
    %20 = vector.broadcast %13 : vector<1x128xf32> to vector<512x128xf32>
    %21 = arith.mulf %19, %20 : vector<512x128xf32>
    %22 = arith.addf %18, %21 : vector<512x128xf32>
    %23 = vector.broadcast %5 : vector<512x1xf32> to vector<512x128xf32>
    %24 = vector.broadcast %15 : vector<1x128xf32> to vector<512x128xf32>
    %25 = arith.mulf %23, %24 : vector<512x128xf32>
    %26 = arith.addf %22, %25 : vector<512x128xf32>
    %27 = vector.broadcast %3 : vector<512x1xf32> to vector<512x128xf32>
    %28 = vector.broadcast %11 : vector<1x128xf32> to vector<512x128xf32>
    %29 = arith.mulf %27, %28 : vector<512x128xf32>
    %30 = vector.broadcast %5 : vector<512x1xf32> to vector<512x128xf32>
    %31 = vector.broadcast %13 : vector<1x128xf32> to vector<512x128xf32>
    %32 = arith.mulf %30, %31 : vector<512x128xf32>
    %33 = arith.addf %29, %32 : vector<512x128xf32>
    %34 = vector.broadcast %7 : vector<512x1xf32> to vector<512x128xf32>
    %35 = vector.broadcast %15 : vector<1x128xf32> to vector<512x128xf32>
    %36 = arith.mulf %34, %35 : vector<512x128xf32>
    %37 = arith.addf %33, %36 : vector<512x128xf32>
    %38 = arith.maximumf %26, %37 : vector<512x128xf32>
    %39 = vector.broadcast %5 : vector<512x1xf32> to vector<512x128xf32>
    %40 = vector.broadcast %11 : vector<1x128xf32> to vector<512x128xf32>
    %41 = arith.mulf %39, %40 : vector<512x128xf32>
    %42 = vector.broadcast %7 : vector<512x1xf32> to vector<512x128xf32>
    %43 = vector.broadcast %13 : vector<1x128xf32> to vector<512x128xf32>
    %44 = arith.mulf %42, %43 : vector<512x128xf32>
    %45 = arith.addf %41, %44 : vector<512x128xf32>
    %46 = vector.broadcast %9 : vector<512x1xf32> to vector<512x128xf32>
    %47 = vector.broadcast %15 : vector<1x128xf32> to vector<512x128xf32>
    %48 = arith.mulf %46, %47 : vector<512x128xf32>
    %49 = arith.addf %45, %48 : vector<512x128xf32>
    %50 = arith.maximumf %38, %49 : vector<512x128xf32>
    %c0_24 = arith.constant 0 : index
    %c0_25 = arith.constant 0 : index
    %c0_26 = arith.constant 0 : index
    %51 = vector.load %arg4[%c0_24, %c0_25, %c0_26] : memref<8x1x128xf32, #tpu.memory_space<vmem>>, vector<1x1x128xf32>
    %52 = vector.shape_cast %51 : vector<1x1x128xf32> to vector<1x128xf32>
    %53 = vector.broadcast %52 : vector<1x128xf32> to vector<512x128xf32>
    %54 = arith.addf %50, %53 : vector<512x128xf32>
    %cst = arith.constant 0.000000e+00 : f32
    %55 = vector.broadcast %cst : f32 to vector<512x128xf32>
    %56 = arith.maximumf %54, %55 : vector<512x128xf32>
    %cst_27 = arith.constant 0.000000e+00 : f32
    %57 = vector.broadcast %cst_27 : f32 to vector<1x128xf32>
    %c0_28 = arith.constant 0 : index
    %c0_29 = arith.constant 0 : index
    %58 = vector.load %arg8[%c0_28, %c0_29] : memref<514x128xf32, #tpu.memory_space<vmem>>, vector<1x128xf32>
    tpu.vector_store %arg8[%c0_28, %c0_29], %57 {strides = array<i32>} : memref<514x128xf32, #tpu.memory_space<vmem>>, vector<1x128xf32>,
    %c513 = arith.constant 513 : index
    %c0_30 = arith.constant 0 : index
    %59 = vector.load %arg8[%c513, %c0_30] : memref<514x128xf32, #tpu.memory_space<vmem>>, vector<1x128xf32>
    tpu.vector_store %arg8[%c513, %c0_30], %57 {strides = array<i32>} : memref<514x128xf32, #tpu.memory_space<vmem>>, vector<1x128xf32>,
    %c1_31 = arith.constant 1 : index
    %c0_32 = arith.constant 0 : index
    %60 = vector.load %arg8[%c1_31, %c0_32] : memref<514x128xf32, #tpu.memory_space<vmem>>, vector<512x128xf32>
    tpu.vector_store %arg8[%c1_31, %c0_32], %56 {strides = array<i32>} : memref<514x128xf32, #tpu.memory_space<vmem>>, vector<512x128xf32>,
    %c0_33 = arith.constant 0 : index
    %c0_34 = arith.constant 0 : index
    %c0_35 = arith.constant 0 : index
    %c0_36 = arith.constant 0 : index
    %61 = vector.load %arg3[%c0_33, %c0_34, %c0_35, %c0_36] : memref<7x3x128x128xbf16, #tpu.memory_space<vmem>>, vector<1x1x128x128xbf16>
    %62 = vector.shape_cast %61 : vector<1x1x128x128xbf16> to vector<128x128xbf16>
    %c0_37 = arith.constant 0 : index
    %c1_38 = arith.constant 1 : index
    %c0_39 = arith.constant 0 : index
    %c0_40 = arith.constant 0 : index
    %63 = vector.load %arg3[%c0_37, %c1_38, %c0_39, %c0_40] : memref<7x3x128x128xbf16, #tpu.memory_space<vmem>>, vector<1x1x128x128xbf16>
    %64 = vector.shape_cast %63 : vector<1x1x128x128xbf16> to vector<128x128xbf16>
    %c0_41 = arith.constant 0 : index
    %c2_42 = arith.constant 2 : index
    %c0_43 = arith.constant 0 : index
    %c0_44 = arith.constant 0 : index
    %65 = vector.load %arg3[%c0_41, %c2_42, %c0_43, %c0_44] : memref<7x3x128x128xbf16, #tpu.memory_space<vmem>>, vector<1x1x128x128xbf16>
    %66 = vector.shape_cast %65 : vector<1x1x128x128xbf16> to vector<128x128xbf16>
    %c1_45 = arith.constant 1 : index
    %c0_46 = arith.constant 0 : index
    %c0_47 = arith.constant 0 : index
    %67 = vector.load %arg4[%c1_45, %c0_46, %c0_47] : memref<8x1x128xf32, #tpu.memory_space<vmem>>, vector<1x1x128xf32>
    %68 = vector.shape_cast %67 : vector<1x1x128xf32> to vector<1x128xf32>
    %c0_48 = arith.constant 0 : index
    %c0_49 = arith.constant 0 : index
    %69 = tpu.strided_load %arg8[%c0_48, %c0_49] {strides = array<i32: 2, 1>} : memref<514x128xf32, #tpu.memory_space<vmem>>, vector<256x128xf32>
    %70 = arith.truncf %69 : vector<256x128xf32> to vector<256x128xbf16>
    %c1_50 = arith.constant 1 : index
    %c0_51 = arith.constant 0 : index
    %71 = tpu.strided_load %arg8[%c1_50, %c0_51] {strides = array<i32: 2, 1>} : memref<514x128xf32, #tpu.memory_space<vmem>>, vector<256x128xf32>
    %72 = arith.truncf %71 : vector<256x128xf32> to vector<256x128xbf16>
    %c2_52 = arith.constant 2 : index
    %c0_53 = arith.constant 0 : index
    %73 = tpu.strided_load %arg8[%c2_52, %c0_53] {strides = array<i32: 2, 1>} : memref<514x128xf32, #tpu.memory_space<vmem>>, vector<256x128xf32>
    %74 = arith.truncf %73 : vector<256x128xf32> to vector<256x128xbf16>
    %c3_54 = arith.constant 3 : index
    %c0_55 = arith.constant 0 : index
    %75 = tpu.strided_load %arg8[%c3_54, %c0_55] {strides = array<i32: 2, 1>} : memref<514x128xf32, #tpu.memory_space<vmem>>, vector<256x128xf32>
    %76 = arith.truncf %75 : vector<256x128xf32> to vector<256x128xbf16>
    %cst_56 = arith.constant dense<0.000000e+00> : vector<256x128xf32>
    %77 = tpu.matmul %70, %62, %cst_56 {dimension_numbers = #tpu.dot_dimension_numbers<[1], [0], [0], [1], [0, 0, 1, 1], [], []>} : vector<256x128xbf16>, vector<128x128xbf16>, vector<256x128xf32> -> vector<256x128xf32>
    %cst_57 = arith.constant dense<0.000000e+00> : vector<256x128xf32>
    %78 = tpu.matmul %72, %64, %cst_57 {dimension_numbers = #tpu.dot_dimension_numbers<[1], [0], [0], [1], [0, 0, 1, 1], [], []>} : vector<256x128xbf16>, vector<128x128xbf16>, vector<256x128xf32> -> vector<256x128xf32>
    %79 = arith.addf %77, %78 : vector<256x128xf32>
    %cst_58 = arith.constant dense<0.000000e+00> : vector<256x128xf32>
    %80 = tpu.matmul %74, %66, %cst_58 {dimension_numbers = #tpu.dot_dimension_numbers<[1], [0], [0], [1], [0, 0, 1, 1], [], []>} : vector<256x128xbf16>, vector<128x128xbf16>, vector<256x128xf32> -> vector<256x128xf32>
    %81 = arith.addf %79, %80 : vector<256x128xf32>
    %cst_59 = arith.constant dense<0.000000e+00> : vector<256x128xf32>
    %82 = tpu.matmul %72, %62, %cst_59 {dimension_numbers = #tpu.dot_dimension_numbers<[1], [0], [0], [1], [0, 0, 1, 1], [], []>} : vector<256x128xbf16>, vector<128x128xbf16>, vector<256x128xf32> -> vector<256x128xf32>
    %cst_60 = arith.constant dense<0.000000e+00> : vector<256x128xf32>
    %83 = tpu.matmul %74, %64, %cst_60 {dimension_numbers = #tpu.dot_dimension_numbers<[1], [0], [0], [1], [0, 0, 1, 1], [], []>} : vector<256x128xbf16>, vector<128x128xbf16>, vector<256x128xf32> -> vector<256x128xf32>
    %84 = arith.addf %82, %83 : vector<256x128xf32>
    %cst_61 = arith.constant dense<0.000000e+00> : vector<256x128xf32>
    %85 = tpu.matmul %76, %66, %cst_61 {dimension_numbers = #tpu.dot_dimension_numbers<[1], [0], [0], [1], [0, 0, 1, 1], [], []>} : vector<256x128xbf16>, vector<128x128xbf16>, vector<256x128xf32> -> vector<256x128xf32>
    %86 = arith.addf %84, %85 : vector<256x128xf32>
    %87 = arith.maximumf %81, %86 : vector<256x128xf32>
    %88 = vector.broadcast %68 : vector<1x128xf32> to vector<256x128xf32>
    %89 = arith.addf %87, %88 : vector<256x128xf32>
    %cst_62 = arith.constant 0.000000e+00 : f32
    %90 = vector.broadcast %cst_62 : f32 to vector<256x128xf32>
    %91 = arith.maximumf %89, %90 : vector<256x128xf32>
    %cst_63 = arith.constant 0.000000e+00 : f32
    %92 = vector.broadcast %cst_63 : f32 to vector<1x128xf32>
    %c0_64 = arith.constant 0 : index
    %c0_65 = arith.constant 0 : index
    %93 = vector.load %arg9[%c0_64, %c0_65] : memref<258x128xf32, #tpu.memory_space<vmem>>, vector<1x128xf32>
    tpu.vector_store %arg9[%c0_64, %c0_65], %92 {strides = array<i32>} : memref<258x128xf32, #tpu.memory_space<vmem>>, vector<1x128xf32>,
    %c257 = arith.constant 257 : index
    %c0_66 = arith.constant 0 : index
    %94 = vector.load %arg9[%c257, %c0_66] : memref<258x128xf32, #tpu.memory_space<vmem>>, vector<1x128xf32>
    tpu.vector_store %arg9[%c257, %c0_66], %92 {strides = array<i32>} : memref<258x128xf32, #tpu.memory_space<vmem>>, vector<1x128xf32>,
    %c1_67 = arith.constant 1 : index
    %c0_68 = arith.constant 0 : index
    %95 = vector.load %arg9[%c1_67, %c0_68] : memref<258x128xf32, #tpu.memory_space<vmem>>, vector<256x128xf32>
    tpu.vector_store %arg9[%c1_67, %c0_68], %91 {strides = array<i32>} : memref<258x128xf32, #tpu.memory_space<vmem>>, vector<256x128xf32>,
    %c1_69 = arith.constant 1 : index
    %c0_70 = arith.constant 0 : index
    %c0_71 = arith.constant 0 : index
    %c0_72 = arith.constant 0 : index
    %96 = vector.load %arg3[%c1_69, %c0_70, %c0_71, %c0_72] : memref<7x3x128x128xbf16, #tpu.memory_space<vmem>>, vector<1x1x128x128xbf16>
    %97 = vector.shape_cast %96 : vector<1x1x128x128xbf16> to vector<128x128xbf16>
    %c1_73 = arith.constant 1 : index
    %c1_74 = arith.constant 1 : index
    %c0_75 = arith.constant 0 : index
    %c0_76 = arith.constant 0 : index
    %98 = vector.load %arg3[%c1_73, %c1_74, %c0_75, %c0_76] : memref<7x3x128x128xbf16, #tpu.memory_space<vmem>>, vector<1x1x128x128xbf16>
    %99 = vector.shape_cast %98 : vector<1x1x128x128xbf16> to vector<128x128xbf16>
    %c1_77 = arith.constant 1 : index
    %c2_78 = arith.constant 2 : index
    %c0_79 = arith.constant 0 : index
    %c0_80 = arith.constant 0 : index
    %100 = vector.load %arg3[%c1_77, %c2_78, %c0_79, %c0_80] : memref<7x3x128x128xbf16, #tpu.memory_space<vmem>>, vector<1x1x128x128xbf16>
    %101 = vector.shape_cast %100 : vector<1x1x128x128xbf16> to vector<128x128xbf16>
    %c2_81 = arith.constant 2 : index
    %c0_82 = arith.constant 0 : index
    %c0_83 = arith.constant 0 : index
    %102 = vector.load %arg4[%c2_81, %c0_82, %c0_83] : memref<8x1x128xf32, #tpu.memory_space<vmem>>, vector<1x1x128xf32>
    %103 = vector.shape_cast %102 : vector<1x1x128xf32> to vector<1x128xf32>
    %c0_84 = arith.constant 0 : index
    %c0_85 = arith.constant 0 : index
    %104 = tpu.strided_load %arg9[%c0_84, %c0_85] {strides = array<i32: 2, 1>} : memref<258x128xf32, #tpu.memory_space<vmem>>, vector<128x128xf32>
    %105 = arith.truncf %104 : vector<128x128xf32> to vector<128x128xbf16>
    %c1_86 = arith.constant 1 : index
    %c0_87 = arith.constant 0 : index
    %106 = tpu.strided_load %arg9[%c1_86, %c0_87] {strides = array<i32: 2, 1>} : memref<258x128xf32, #tpu.memory_space<vmem>>, vector<128x128xf32>
    %107 = arith.truncf %106 : vector<128x128xf32> to vector<128x128xbf16>
    %c2_88 = arith.constant 2 : index
    %c0_89 = arith.constant 0 : index
    %108 = tpu.strided_load %arg9[%c2_88, %c0_89] {strides = array<i32: 2, 1>} : memref<258x128xf32, #tpu.memory_space<vmem>>, vector<128x128xf32>
    %109 = arith.truncf %108 : vector<128x128xf32> to vector<128x128xbf16>
    %c3_90 = arith.constant 3 : index
    %c0_91 = arith.constant 0 : index
    %110 = tpu.strided_load %arg9[%c3_90, %c0_91] {strides = array<i32: 2, 1>} : memref<258x128xf32, #tpu.memory_space<vmem>>, vector<128x128xf32>
    %111 = arith.truncf %110 : vector<128x128xf32> to vector<128x128xbf16>
    %cst_92 = arith.constant dense<0.000000e+00> : vector<128x128xf32>
    %112 = tpu.matmul %105, %97, %cst_92 {dimension_numbers = #tpu.dot_dimension_numbers<[1], [0], [0], [1], [0, 0, 1, 1], [], []>} : vector<128x128xbf16>, vector<128x128xbf16>, vector<128x128xf32> -> vector<128x128xf32>
    %cst_93 = arith.constant dense<0.000000e+00> : vector<128x128xf32>
    %113 = tpu.matmul %107, %99, %cst_93 {dimension_numbers = #tpu.dot_dimension_numbers<[1], [0], [0], [1], [0, 0, 1, 1], [], []>} : vector<128x128xbf16>, vector<128x128xbf16>, vector<128x128xf32> -> vector<128x128xf32>
    %114 = arith.addf %112, %113 : vector<128x128xf32>
    %cst_94 = arith.constant dense<0.000000e+00> : vector<128x128xf32>
    %115 = tpu.matmul %109, %101, %cst_94 {dimension_numbers = #tpu.dot_dimension_numbers<[1], [0], [0], [1], [0, 0, 1, 1], [], []>} : vector<128x128xbf16>, vector<128x128xbf16>, vector<128x128xf32> -> vector<128x128xf32>
    %116 = arith.addf %114, %115 : vector<128x128xf32>
    %cst_95 = arith.constant dense<0.000000e+00> : vector<128x128xf32>
    %117 = tpu.matmul %107, %97, %cst_95 {dimension_numbers = #tpu.dot_dimension_numbers<[1], [0], [0], [1], [0, 0, 1, 1], [], []>} : vector<128x128xbf16>, vector<128x128xbf16>, vector<128x128xf32> -> vector<128x128xf32>
    %cst_96 = arith.constant dense<0.000000e+00> : vector<128x128xf32>
    %118 = tpu.matmul %109, %99, %cst_96 {dimension_numbers = #tpu.dot_dimension_numbers<[1], [0], [0], [1], [0, 0, 1, 1], [], []>} : vector<128x128xbf16>, vector<128x128xbf16>, vector<128x128xf32> -> vector<128x128xf32>
    %119 = arith.addf %117, %118 : vector<128x128xf32>
    %cst_97 = arith.constant dense<0.000000e+00> : vector<128x128xf32>
    %120 = tpu.matmul %111, %101, %cst_97 {dimension_numbers = #tpu.dot_dimension_numbers<[1], [0], [0], [1], [0, 0, 1, 1], [], []>} : vector<128x128xbf16>, vector<128x128xbf16>, vector<128x128xf32> -> vector<128x128xf32>
    %121 = arith.addf %119, %120 : vector<128x128xf32>
    %122 = arith.maximumf %116, %121 : vector<128x128xf32>
    %123 = vector.broadcast %103 : vector<1x128xf32> to vector<128x128xf32>
    %124 = arith.addf %122, %123 : vector<128x128xf32>
    %cst_98 = arith.constant 0.000000e+00 : f32
    %125 = vector.broadcast %cst_98 : f32 to vector<128x128xf32>
    %126 = arith.maximumf %124, %125 : vector<128x128xf32>
    %cst_99 = arith.constant 0.000000e+00 : f32
    %127 = vector.broadcast %cst_99 : f32 to vector<1x128xf32>
    %c0_100 = arith.constant 0 : index
    %c0_101 = arith.constant 0 : index
    %128 = vector.load %arg8[%c0_100, %c0_101] : memref<514x128xf32, #tpu.memory_space<vmem>>, vector<1x128xf32>
    tpu.vector_store %arg8[%c0_100, %c0_101], %127 {strides = array<i32>} : memref<514x128xf32, #tpu.memory_space<vmem>>, vector<1x128xf32>,
    %c129 = arith.constant 129 : index
    %c0_102 = arith.constant 0 : index
    %129 = vector.load %arg8[%c129, %c0_102] : memref<514x128xf32, #tpu.memory_space<vmem>>, vector<1x128xf32>
    tpu.vector_store %arg8[%c129, %c0_102], %127 {strides = array<i32>} : memref<514x128xf32, #tpu.memory_space<vmem>>, vector<1x128xf32>,
    %c1_103 = arith.constant 1 : index
    %c0_104 = arith.constant 0 : index
    %130 = vector.load %arg8[%c1_103, %c0_104] : memref<514x128xf32, #tpu.memory_space<vmem>>, vector<128x128xf32>
    tpu.vector_store %arg8[%c1_103, %c0_104], %126 {strides = array<i32>} : memref<514x128xf32, #tpu.memory_space<vmem>>, vector<128x128xf32>,
    %c2_105 = arith.constant 2 : index
    %c0_106 = arith.constant 0 : index
    %c0_107 = arith.constant 0 : index
    %c0_108 = arith.constant 0 : index
    %131 = vector.load %arg3[%c2_105, %c0_106, %c0_107, %c0_108] : memref<7x3x128x128xbf16, #tpu.memory_space<vmem>>, vector<1x1x128x128xbf16>
    %132 = vector.shape_cast %131 : vector<1x1x128x128xbf16> to vector<128x128xbf16>
    %c2_109 = arith.constant 2 : index
    %c1_110 = arith.constant 1 : index
    %c0_111 = arith.constant 0 : index
    %c0_112 = arith.constant 0 : index
    %133 = vector.load %arg3[%c2_109, %c1_110, %c0_111, %c0_112] : memref<7x3x128x128xbf16, #tpu.memory_space<vmem>>, vector<1x1x128x128xbf16>
    %134 = vector.shape_cast %133 : vector<1x1x128x128xbf16> to vector<128x128xbf16>
    %c2_113 = arith.constant 2 : index
    %c2_114 = arith.constant 2 : index
    %c0_115 = arith.constant 0 : index
    %c0_116 = arith.constant 0 : index
    %135 = vector.load %arg3[%c2_113, %c2_114, %c0_115, %c0_116] : memref<7x3x128x128xbf16, #tpu.memory_space<vmem>>, vector<1x1x128x128xbf16>
    %136 = vector.shape_cast %135 : vector<1x1x128x128xbf16> to vector<128x128xbf16>
    %c3_117 = arith.constant 3 : index
    %c0_118 = arith.constant 0 : index
    %c0_119 = arith.constant 0 : index
    %137 = vector.load %arg4[%c3_117, %c0_118, %c0_119] : memref<8x1x128xf32, #tpu.memory_space<vmem>>, vector<1x1x128xf32>
    %138 = vector.shape_cast %137 : vector<1x1x128xf32> to vector<1x128xf32>
    %c0_120 = arith.constant 0 : index
    %c0_121 = arith.constant 0 : index
    %139 = tpu.strided_load %arg8[%c0_120, %c0_121] {strides = array<i32: 2, 1>} : memref<514x128xf32, #tpu.memory_space<vmem>>, vector<64x128xf32>
    %140 = arith.truncf %139 : vector<64x128xf32> to vector<64x128xbf16>
    %c1_122 = arith.constant 1 : index
    %c0_123 = arith.constant 0 : index
    %141 = tpu.strided_load %arg8[%c1_122, %c0_123] {strides = array<i32: 2, 1>} : memref<514x128xf32, #tpu.memory_space<vmem>>, vector<64x128xf32>
    %142 = arith.truncf %141 : vector<64x128xf32> to vector<64x128xbf16>
    %c2_124 = arith.constant 2 : index
    %c0_125 = arith.constant 0 : index
    %143 = tpu.strided_load %arg8[%c2_124, %c0_125] {strides = array<i32: 2, 1>} : memref<514x128xf32, #tpu.memory_space<vmem>>, vector<64x128xf32>
    %144 = arith.truncf %143 : vector<64x128xf32> to vector<64x128xbf16>
    %c3_126 = arith.constant 3 : index
    %c0_127 = arith.constant 0 : index
    %145 = tpu.strided_load %arg8[%c3_126, %c0_127] {strides = array<i32: 2, 1>} : memref<514x128xf32, #tpu.memory_space<vmem>>, vector<64x128xf32>
    %146 = arith.truncf %145 : vector<64x128xf32> to vector<64x128xbf16>
    %cst_128 = arith.constant dense<0.000000e+00> : vector<64x128xf32>
    %147 = tpu.matmul %140, %132, %cst_128 {dimension_numbers = #tpu.dot_dimension_numbers<[1], [0], [0], [1], [0, 0, 1, 1], [], []>} : vector<64x128xbf16>, vector<128x128xbf16>, vector<64x128xf32> -> vector<64x128xf32>
    %cst_129 = arith.constant dense<0.000000e+00> : vector<64x128xf32>
    %148 = tpu.matmul %142, %134, %cst_129 {dimension_numbers = #tpu.dot_dimension_numbers<[1], [0], [0], [1], [0, 0, 1, 1], [], []>} : vector<64x128xbf16>, vector<128x128xbf16>, vector<64x128xf32> -> vector<64x128xf32>
    %149 = arith.addf %147, %148 : vector<64x128xf32>
    %cst_130 = arith.constant dense<0.000000e+00> : vector<64x128xf32>
    %150 = tpu.matmul %144, %136, %cst_130 {dimension_numbers = #tpu.dot_dimension_numbers<[1], [0], [0], [1], [0, 0, 1, 1], [], []>} : vector<64x128xbf16>, vector<128x128xbf16>, vector<64x128xf32> -> vector<64x128xf32>
    %151 = arith.addf %149, %150 : vector<64x128xf32>
    %cst_131 = arith.constant dense<0.000000e+00> : vector<64x128xf32>
    %152 = tpu.matmul %142, %132, %cst_131 {dimension_numbers = #tpu.dot_dimension_numbers<[1], [0], [0], [1], [0, 0, 1, 1], [], []>} : vector<64x128xbf16>, vector<128x128xbf16>, vector<64x128xf32> -> vector<64x128xf32>
    %cst_132 = arith.constant dense<0.000000e+00> : vector<64x128xf32>
    %153 = tpu.matmul %144, %134, %cst_132 {dimension_numbers = #tpu.dot_dimension_numbers<[1], [0], [0], [1], [0, 0, 1, 1], [], []>} : vector<64x128xbf16>, vector<128x128xbf16>, vector<64x128xf32> -> vector<64x128xf32>
    %154 = arith.addf %152, %153 : vector<64x128xf32>
    %cst_133 = arith.constant dense<0.000000e+00> : vector<64x128xf32>
    %155 = tpu.matmul %146, %136, %cst_133 {dimension_numbers = #tpu.dot_dimension_numbers<[1], [0], [0], [1], [0, 0, 1, 1], [], []>} : vector<64x128xbf16>, vector<128x128xbf16>, vector<64x128xf32> -> vector<64x128xf32>
    %156 = arith.addf %154, %155 : vector<64x128xf32>
    %157 = arith.maximumf %151, %156 : vector<64x128xf32>
    %158 = vector.broadcast %138 : vector<1x128xf32> to vector<64x128xf32>
    %159 = arith.addf %157, %158 : vector<64x128xf32>
    %cst_134 = arith.constant 0.000000e+00 : f32
    %160 = vector.broadcast %cst_134 : f32 to vector<64x128xf32>
    %161 = arith.maximumf %159, %160 : vector<64x128xf32>
    %cst_135 = arith.constant 0.000000e+00 : f32
    %162 = vector.broadcast %cst_135 : f32 to vector<1x128xf32>
    %c0_136 = arith.constant 0 : index
    %c0_137 = arith.constant 0 : index
    %163 = vector.load %arg9[%c0_136, %c0_137] : memref<258x128xf32, #tpu.memory_space<vmem>>, vector<1x128xf32>
    tpu.vector_store %arg9[%c0_136, %c0_137], %162 {strides = array<i32>} : memref<258x128xf32, #tpu.memory_space<vmem>>, vector<1x128xf32>,
    %c65 = arith.constant 65 : index
    %c0_138 = arith.constant 0 : index
    %164 = vector.load %arg9[%c65, %c0_138] : memref<258x128xf32, #tpu.memory_space<vmem>>, vector<1x128xf32>
    tpu.vector_store %arg9[%c65, %c0_138], %162 {strides = array<i32>} : memref<258x128xf32, #tpu.memory_space<vmem>>, vector<1x128xf32>,
    %c1_139 = arith.constant 1 : index
    %c0_140 = arith.constant 0 : index
    %165 = vector.load %arg9[%c1_139, %c0_140] : memref<258x128xf32, #tpu.memory_space<vmem>>, vector<64x128xf32>
    tpu.vector_store %arg9[%c1_139, %c0_140], %161 {strides = array<i32>} : memref<258x128xf32, #tpu.memory_space<vmem>>, vector<64x128xf32>,
    %c3_141 = arith.constant 3 : index
    %c0_142 = arith.constant 0 : index
    %c0_143 = arith.constant 0 : index
    %c0_144 = arith.constant 0 : index
    %166 = vector.load %arg3[%c3_141, %c0_142, %c0_143, %c0_144] : memref<7x3x128x128xbf16, #tpu.memory_space<vmem>>, vector<1x1x128x128xbf16>
    %167 = vector.shape_cast %166 : vector<1x1x128x128xbf16> to vector<128x128xbf16>
    %c3_145 = arith.constant 3 : index
    %c1_146 = arith.constant 1 : index
    %c0_147 = arith.constant 0 : index
    %c0_148 = arith.constant 0 : index
    %168 = vector.load %arg3[%c3_145, %c1_146, %c0_147, %c0_148] : memref<7x3x128x128xbf16, #tpu.memory_space<vmem>>, vector<1x1x128x128xbf16>
    %169 = vector.shape_cast %168 : vector<1x1x128x128xbf16> to vector<128x128xbf16>
    %c3_149 = arith.constant 3 : index
    %c2_150 = arith.constant 2 : index
    %c0_151 = arith.constant 0 : index
    %c0_152 = arith.constant 0 : index
    %170 = vector.load %arg3[%c3_149, %c2_150, %c0_151, %c0_152] : memref<7x3x128x128xbf16, #tpu.memory_space<vmem>>, vector<1x1x128x128xbf16>
    %171 = vector.shape_cast %170 : vector<1x1x128x128xbf16> to vector<128x128xbf16>
    %c4_153 = arith.constant 4 : index
    %c0_154 = arith.constant 0 : index
    %c0_155 = arith.constant 0 : index
    %172 = vector.load %arg4[%c4_153, %c0_154, %c0_155] : memref<8x1x128xf32, #tpu.memory_space<vmem>>, vector<1x1x128xf32>
    %173 = vector.shape_cast %172 : vector<1x1x128xf32> to vector<1x128xf32>
    %c0_156 = arith.constant 0 : index
    %c0_157 = arith.constant 0 : index
    %174 = tpu.strided_load %arg9[%c0_156, %c0_157] {strides = array<i32: 2, 1>} : memref<258x128xf32, #tpu.memory_space<vmem>>, vector<32x128xf32>
    %175 = arith.truncf %174 : vector<32x128xf32> to vector<32x128xbf16>
    %c1_158 = arith.constant 1 : index
    %c0_159 = arith.constant 0 : index
    %176 = tpu.strided_load %arg9[%c1_158, %c0_159] {strides = array<i32: 2, 1>} : memref<258x128xf32, #tpu.memory_space<vmem>>, vector<32x128xf32>
    %177 = arith.truncf %176 : vector<32x128xf32> to vector<32x128xbf16>
    %c2_160 = arith.constant 2 : index
    %c0_161 = arith.constant 0 : index
    %178 = tpu.strided_load %arg9[%c2_160, %c0_161] {strides = array<i32: 2, 1>} : memref<258x128xf32, #tpu.memory_space<vmem>>, vector<32x128xf32>
    %179 = arith.truncf %178 : vector<32x128xf32> to vector<32x128xbf16>
    %c3_162 = arith.constant 3 : index
    %c0_163 = arith.constant 0 : index
    %180 = tpu.strided_load %arg9[%c3_162, %c0_163] {strides = array<i32: 2, 1>} : memref<258x128xf32, #tpu.memory_space<vmem>>, vector<32x128xf32>
    %181 = arith.truncf %180 : vector<32x128xf32> to vector<32x128xbf16>
    %cst_164 = arith.constant dense<0.000000e+00> : vector<32x128xf32>
    %182 = tpu.matmul %175, %167, %cst_164 {dimension_numbers = #tpu.dot_dimension_numbers<[1], [0], [0], [1], [0, 0, 1, 1], [], []>} : vector<32x128xbf16>, vector<128x128xbf16>, vector<32x128xf32> -> vector<32x128xf32>
    %cst_165 = arith.constant dense<0.000000e+00> : vector<32x128xf32>
    %183 = tpu.matmul %177, %169, %cst_165 {dimension_numbers = #tpu.dot_dimension_numbers<[1], [0], [0], [1], [0, 0, 1, 1], [], []>} : vector<32x128xbf16>, vector<128x128xbf16>, vector<32x128xf32> -> vector<32x128xf32>
    %184 = arith.addf %182, %183 : vector<32x128xf32>
    %cst_166 = arith.constant dense<0.000000e+00> : vector<32x128xf32>
    %185 = tpu.matmul %179, %171, %cst_166 {dimension_numbers = #tpu.dot_dimension_numbers<[1], [0], [0], [1], [0, 0, 1, 1], [], []>} : vector<32x128xbf16>, vector<128x128xbf16>, vector<32x128xf32> -> vector<32x128xf32>
    %186 = arith.addf %184, %185 : vector<32x128xf32>
    %cst_167 = arith.constant dense<0.000000e+00> : vector<32x128xf32>
    %187 = tpu.matmul %177, %167, %cst_167 {dimension_numbers = #tpu.dot_dimension_numbers<[1], [0], [0], [1], [0, 0, 1, 1], [], []>} : vector<32x128xbf16>, vector<128x128xbf16>, vector<32x128xf32> -> vector<32x128xf32>
    %cst_168 = arith.constant dense<0.000000e+00> : vector<32x128xf32>
    %188 = tpu.matmul %179, %169, %cst_168 {dimension_numbers = #tpu.dot_dimension_numbers<[1], [0], [0], [1], [0, 0, 1, 1], [], []>} : vector<32x128xbf16>, vector<128x128xbf16>, vector<32x128xf32> -> vector<32x128xf32>
    %189 = arith.addf %187, %188 : vector<32x128xf32>
    %cst_169 = arith.constant dense<0.000000e+00> : vector<32x128xf32>
    %190 = tpu.matmul %181, %171, %cst_169 {dimension_numbers = #tpu.dot_dimension_numbers<[1], [0], [0], [1], [0, 0, 1, 1], [], []>} : vector<32x128xbf16>, vector<128x128xbf16>, vector<32x128xf32> -> vector<32x128xf32>
    %191 = arith.addf %189, %190 : vector<32x128xf32>
    %192 = arith.maximumf %186, %191 : vector<32x128xf32>
    %193 = vector.broadcast %173 : vector<1x128xf32> to vector<32x128xf32>
    %194 = arith.addf %192, %193 : vector<32x128xf32>
    %cst_170 = arith.constant 0.000000e+00 : f32
    %195 = vector.broadcast %cst_170 : f32 to vector<32x128xf32>
    %196 = arith.maximumf %194, %195 : vector<32x128xf32>
    %cst_171 = arith.constant 0.000000e+00 : f32
    %197 = vector.broadcast %cst_171 : f32 to vector<1x128xf32>
    %c0_172 = arith.constant 0 : index
    %c0_173 = arith.constant 0 : index
    %198 = vector.load %arg8[%c0_172, %c0_173] : memref<514x128xf32, #tpu.memory_space<vmem>>, vector<1x128xf32>
    tpu.vector_store %arg8[%c0_172, %c0_173], %197 {strides = array<i32>} : memref<514x128xf32, #tpu.memory_space<vmem>>, vector<1x128xf32>,
    %c33 = arith.constant 33 : index
    %c0_174 = arith.constant 0 : index
    %199 = vector.load %arg8[%c33, %c0_174] : memref<514x128xf32, #tpu.memory_space<vmem>>, vector<1x128xf32>
    tpu.vector_store %arg8[%c33, %c0_174], %197 {strides = array<i32>} : memref<514x128xf32, #tpu.memory_space<vmem>>, vector<1x128xf32>,
    %c1_175 = arith.constant 1 : index
    %c0_176 = arith.constant 0 : index
    %200 = vector.load %arg8[%c1_175, %c0_176] : memref<514x128xf32, #tpu.memory_space<vmem>>, vector<32x128xf32>
    tpu.vector_store %arg8[%c1_175, %c0_176], %196 {strides = array<i32>} : memref<514x128xf32, #tpu.memory_space<vmem>>, vector<32x128xf32>,
    %c4_177 = arith.constant 4 : index
    %c0_178 = arith.constant 0 : index
    %c0_179 = arith.constant 0 : index
    %c0_180 = arith.constant 0 : index
    %201 = vector.load %arg3[%c4_177, %c0_178, %c0_179, %c0_180] : memref<7x3x128x128xbf16, #tpu.memory_space<vmem>>, vector<1x1x128x128xbf16>
    %202 = vector.shape_cast %201 : vector<1x1x128x128xbf16> to vector<128x128xbf16>
    %c4_181 = arith.constant 4 : index
    %c1_182 = arith.constant 1 : index
    %c0_183 = arith.constant 0 : index
    %c0_184 = arith.constant 0 : index
    %203 = vector.load %arg3[%c4_181, %c1_182, %c0_183, %c0_184] : memref<7x3x128x128xbf16, #tpu.memory_space<vmem>>, vector<1x1x128x128xbf16>
    %204 = vector.shape_cast %203 : vector<1x1x128x128xbf16> to vector<128x128xbf16>
    %c4_185 = arith.constant 4 : index
    %c2_186 = arith.constant 2 : index
    %c0_187 = arith.constant 0 : index
    %c0_188 = arith.constant 0 : index
    %205 = vector.load %arg3[%c4_185, %c2_186, %c0_187, %c0_188] : memref<7x3x128x128xbf16, #tpu.memory_space<vmem>>, vector<1x1x128x128xbf16>
    %206 = vector.shape_cast %205 : vector<1x1x128x128xbf16> to vector<128x128xbf16>
    %c5 = arith.constant 5 : index
    %c0_189 = arith.constant 0 : index
    %c0_190 = arith.constant 0 : index
    %207 = vector.load %arg4[%c5, %c0_189, %c0_190] : memref<8x1x128xf32, #tpu.memory_space<vmem>>, vector<1x1x128xf32>
    %208 = vector.shape_cast %207 : vector<1x1x128xf32> to vector<1x128xf32>
    %c0_191 = arith.constant 0 : index
    %c0_192 = arith.constant 0 : index
    %209 = tpu.strided_load %arg8[%c0_191, %c0_192] {strides = array<i32: 2, 1>} : memref<514x128xf32, #tpu.memory_space<vmem>>, vector<16x128xf32>
    %210 = arith.truncf %209 : vector<16x128xf32> to vector<16x128xbf16>
    %c1_193 = arith.constant 1 : index
    %c0_194 = arith.constant 0 : index
    %211 = tpu.strided_load %arg8[%c1_193, %c0_194] {strides = array<i32: 2, 1>} : memref<514x128xf32, #tpu.memory_space<vmem>>, vector<16x128xf32>
    %212 = arith.truncf %211 : vector<16x128xf32> to vector<16x128xbf16>
    %c2_195 = arith.constant 2 : index
    %c0_196 = arith.constant 0 : index
    %213 = tpu.strided_load %arg8[%c2_195, %c0_196] {strides = array<i32: 2, 1>} : memref<514x128xf32, #tpu.memory_space<vmem>>, vector<16x128xf32>
    %214 = arith.truncf %213 : vector<16x128xf32> to vector<16x128xbf16>
    %c3_197 = arith.constant 3 : index
    %c0_198 = arith.constant 0 : index
    %215 = tpu.strided_load %arg8[%c3_197, %c0_198] {strides = array<i32: 2, 1>} : memref<514x128xf32, #tpu.memory_space<vmem>>, vector<16x128xf32>
    %216 = arith.truncf %215 : vector<16x128xf32> to vector<16x128xbf16>
    %cst_199 = arith.constant dense<0.000000e+00> : vector<16x128xf32>
    %217 = tpu.matmul %210, %202, %cst_199 {dimension_numbers = #tpu.dot_dimension_numbers<[1], [0], [0], [1], [0, 0, 1, 1], [], []>} : vector<16x128xbf16>, vector<128x128xbf16>, vector<16x128xf32> -> vector<16x128xf32>
    %cst_200 = arith.constant dense<0.000000e+00> : vector<16x128xf32>
    %218 = tpu.matmul %212, %204, %cst_200 {dimension_numbers = #tpu.dot_dimension_numbers<[1], [0], [0], [1], [0, 0, 1, 1], [], []>} : vector<16x128xbf16>, vector<128x128xbf16>, vector<16x128xf32> -> vector<16x128xf32>
    %219 = arith.addf %217, %218 : vector<16x128xf32>
    %cst_201 = arith.constant dense<0.000000e+00> : vector<16x128xf32>
    %220 = tpu.matmul %214, %206, %cst_201 {dimension_numbers = #tpu.dot_dimension_numbers<[1], [0], [0], [1], [0, 0, 1, 1], [], []>} : vector<16x128xbf16>, vector<128x128xbf16>, vector<16x128xf32> -> vector<16x128xf32>
    %221 = arith.addf %219, %220 : vector<16x128xf32>
    %cst_202 = arith.constant dense<0.000000e+00> : vector<16x128xf32>
    %222 = tpu.matmul %212, %202, %cst_202 {dimension_numbers = #tpu.dot_dimension_numbers<[1], [0], [0], [1], [0, 0, 1, 1], [], []>} : vector<16x128xbf16>, vector<128x128xbf16>, vector<16x128xf32> -> vector<16x128xf32>
    %cst_203 = arith.constant dense<0.000000e+00> : vector<16x128xf32>
    %223 = tpu.matmul %214, %204, %cst_203 {dimension_numbers = #tpu.dot_dimension_numbers<[1], [0], [0], [1], [0, 0, 1, 1], [], []>} : vector<16x128xbf16>, vector<128x128xbf16>, vector<16x128xf32> -> vector<16x128xf32>
    %224 = arith.addf %222, %223 : vector<16x128xf32>
    %cst_204 = arith.constant dense<0.000000e+00> : vector<16x128xf32>
    %225 = tpu.matmul %216, %206, %cst_204 {dimension_numbers = #tpu.dot_dimension_numbers<[1], [0], [0], [1], [0, 0, 1, 1], [], []>} : vector<16x128xbf16>, vector<128x128xbf16>, vector<16x128xf32> -> vector<16x128xf32>
    %226 = arith.addf %224, %225 : vector<16x128xf32>
    %227 = arith.maximumf %221, %226 : vector<16x128xf32>
    %228 = vector.broadcast %208 : vector<1x128xf32> to vector<16x128xf32>
    %229 = arith.addf %227, %228 : vector<16x128xf32>
    %cst_205 = arith.constant 0.000000e+00 : f32
    %230 = vector.broadcast %cst_205 : f32 to vector<16x128xf32>
    %231 = arith.maximumf %229, %230 : vector<16x128xf32>
    %cst_206 = arith.constant 0.000000e+00 : f32
    %232 = vector.broadcast %cst_206 : f32 to vector<1x128xf32>
    %c0_207 = arith.constant 0 : index
    %c0_208 = arith.constant 0 : index
    %233 = vector.load %arg9[%c0_207, %c0_208] : memref<258x128xf32, #tpu.memory_space<vmem>>, vector<1x128xf32>
    tpu.vector_store %arg9[%c0_207, %c0_208], %232 {strides = array<i32>} : memref<258x128xf32, #tpu.memory_space<vmem>>, vector<1x128xf32>,
    %c17 = arith.constant 17 : index
    %c0_209 = arith.constant 0 : index
    %234 = vector.load %arg9[%c17, %c0_209] : memref<258x128xf32, #tpu.memory_space<vmem>>, vector<1x128xf32>
    tpu.vector_store %arg9[%c17, %c0_209], %232 {strides = array<i32>} : memref<258x128xf32, #tpu.memory_space<vmem>>, vector<1x128xf32>,
    %c1_210 = arith.constant 1 : index
    %c0_211 = arith.constant 0 : index
    %235 = vector.load %arg9[%c1_210, %c0_211] : memref<258x128xf32, #tpu.memory_space<vmem>>, vector<16x128xf32>
    tpu.vector_store %arg9[%c1_210, %c0_211], %231 {strides = array<i32>} : memref<258x128xf32, #tpu.memory_space<vmem>>, vector<16x128xf32>,
    %c5_212 = arith.constant 5 : index
    %c0_213 = arith.constant 0 : index
    %c0_214 = arith.constant 0 : index
    %c0_215 = arith.constant 0 : index
    %236 = vector.load %arg3[%c5_212, %c0_213, %c0_214, %c0_215] : memref<7x3x128x128xbf16, #tpu.memory_space<vmem>>, vector<1x1x128x128xbf16>
    %237 = vector.shape_cast %236 : vector<1x1x128x128xbf16> to vector<128x128xbf16>
    %c5_216 = arith.constant 5 : index
    %c1_217 = arith.constant 1 : index
    %c0_218 = arith.constant 0 : index
    %c0_219 = arith.constant 0 : index
    %238 = vector.load %arg3[%c5_216, %c1_217, %c0_218, %c0_219] : memref<7x3x128x128xbf16, #tpu.memory_space<vmem>>, vector<1x1x128x128xbf16>
    %239 = vector.shape_cast %238 : vector<1x1x128x128xbf16> to vector<128x128xbf16>
    %c5_220 = arith.constant 5 : index
    %c2_221 = arith.constant 2 : index
    %c0_222 = arith.constant 0 : index
    %c0_223 = arith.constant 0 : index
    %240 = vector.load %arg3[%c5_220, %c2_221, %c0_222, %c0_223] : memref<7x3x128x128xbf16, #tpu.memory_space<vmem>>, vector<1x1x128x128xbf16>
    %241 = vector.shape_cast %240 : vector<1x1x128x128xbf16> to vector<128x128xbf16>
    %c6 = arith.constant 6 : index
    %c0_224 = arith.constant 0 : index
    %c0_225 = arith.constant 0 : index
    %242 = vector.load %arg4[%c6, %c0_224, %c0_225] : memref<8x1x128xf32, #tpu.memory_space<vmem>>, vector<1x1x128xf32>
    %243 = vector.shape_cast %242 : vector<1x1x128xf32> to vector<1x128xf32>
    %c0_226 = arith.constant 0 : index
    %c0_227 = arith.constant 0 : index
    %244 = tpu.strided_load %arg9[%c0_226, %c0_227] {strides = array<i32: 2, 1>} : memref<258x128xf32, #tpu.memory_space<vmem>>, vector<8x128xf32>
    %245 = arith.truncf %244 : vector<8x128xf32> to vector<8x128xbf16>
    %c1_228 = arith.constant 1 : index
    %c0_229 = arith.constant 0 : index
    %246 = tpu.strided_load %arg9[%c1_228, %c0_229] {strides = array<i32: 2, 1>} : memref<258x128xf32, #tpu.memory_space<vmem>>, vector<8x128xf32>
    %247 = arith.truncf %246 : vector<8x128xf32> to vector<8x128xbf16>
    %c2_230 = arith.constant 2 : index
    %c0_231 = arith.constant 0 : index
    %248 = tpu.strided_load %arg9[%c2_230, %c0_231] {strides = array<i32: 2, 1>} : memref<258x128xf32, #tpu.memory_space<vmem>>, vector<8x128xf32>
    %249 = arith.truncf %248 : vector<8x128xf32> to vector<8x128xbf16>
    %c3_232 = arith.constant 3 : index
    %c0_233 = arith.constant 0 : index
    %250 = tpu.strided_load %arg9[%c3_232, %c0_233] {strides = array<i32: 2, 1>} : memref<258x128xf32, #tpu.memory_space<vmem>>, vector<8x128xf32>
    %251 = arith.truncf %250 : vector<8x128xf32> to vector<8x128xbf16>
    %cst_234 = arith.constant dense<0.000000e+00> : vector<8x128xf32>
    %252 = tpu.matmul %245, %237, %cst_234 {dimension_numbers = #tpu.dot_dimension_numbers<[1], [0], [0], [1], [0, 0, 1, 1], [], []>} : vector<8x128xbf16>, vector<128x128xbf16>, vector<8x128xf32> -> vector<8x128xf32>
    %cst_235 = arith.constant dense<0.000000e+00> : vector<8x128xf32>
    %253 = tpu.matmul %247, %239, %cst_235 {dimension_numbers = #tpu.dot_dimension_numbers<[1], [0], [0], [1], [0, 0, 1, 1], [], []>} : vector<8x128xbf16>, vector<128x128xbf16>, vector<8x128xf32> -> vector<8x128xf32>
    %254 = arith.addf %252, %253 : vector<8x128xf32>
    %cst_236 = arith.constant dense<0.000000e+00> : vector<8x128xf32>
    %255 = tpu.matmul %249, %241, %cst_236 {dimension_numbers = #tpu.dot_dimension_numbers<[1], [0], [0], [1], [0, 0, 1, 1], [], []>} : vector<8x128xbf16>, vector<128x128xbf16>, vector<8x128xf32> -> vector<8x128xf32>
    %256 = arith.addf %254, %255 : vector<8x128xf32>
    %cst_237 = arith.constant dense<0.000000e+00> : vector<8x128xf32>
    %257 = tpu.matmul %247, %237, %cst_237 {dimension_numbers = #tpu.dot_dimension_numbers<[1], [0], [0], [1], [0, 0, 1, 1], [], []>} : vector<8x128xbf16>, vector<128x128xbf16>, vector<8x128xf32> -> vector<8x128xf32>
    %cst_238 = arith.constant dense<0.000000e+00> : vector<8x128xf32>
    %258 = tpu.matmul %249, %239, %cst_238 {dimension_numbers = #tpu.dot_dimension_numbers<[1], [0], [0], [1], [0, 0, 1, 1], [], []>} : vector<8x128xbf16>, vector<128x128xbf16>, vector<8x128xf32> -> vector<8x128xf32>
    %259 = arith.addf %257, %258 : vector<8x128xf32>
    %cst_239 = arith.constant dense<0.000000e+00> : vector<8x128xf32>
    %260 = tpu.matmul %251, %241, %cst_239 {dimension_numbers = #tpu.dot_dimension_numbers<[1], [0], [0], [1], [0, 0, 1, 1], [], []>} : vector<8x128xbf16>, vector<128x128xbf16>, vector<8x128xf32> -> vector<8x128xf32>
    %261 = arith.addf %259, %260 : vector<8x128xf32>
    %262 = arith.maximumf %256, %261 : vector<8x128xf32>
    %263 = vector.broadcast %243 : vector<1x128xf32> to vector<8x128xf32>
    %264 = arith.addf %262, %263 : vector<8x128xf32>
    %cst_240 = arith.constant 0.000000e+00 : f32
    %265 = vector.broadcast %cst_240 : f32 to vector<8x128xf32>
    %266 = arith.maximumf %264, %265 : vector<8x128xf32>
    %c0_241 = arith.constant 0 : index
    %c0_242 = arith.constant 0 : index
    %267 = vector.load %arg8[%c0_241, %c0_242] : memref<514x128xf32, #tpu.memory_space<vmem>>, vector<8x128xf32>
    tpu.vector_store %arg8[%c0_241, %c0_242], %266 {strides = array<i32>} : memref<514x128xf32, #tpu.memory_space<vmem>>, vector<8x128xf32>,
    %c6_243 = arith.constant 6 : index
    %c0_244 = arith.constant 0 : index
    %c0_245 = arith.constant 0 : index
    %c0_246 = arith.constant 0 : index
    %268 = vector.load %arg3[%c6_243, %c0_244, %c0_245, %c0_246] : memref<7x3x128x128xbf16, #tpu.memory_space<vmem>>, vector<1x1x128x128xbf16>
    %269 = vector.shape_cast %268 : vector<1x1x128x128xbf16> to vector<128x128xbf16>
    %c6_247 = arith.constant 6 : index
    %c1_248 = arith.constant 1 : index
    %c0_249 = arith.constant 0 : index
    %c0_250 = arith.constant 0 : index
    %270 = vector.load %arg3[%c6_247, %c1_248, %c0_249, %c0_250] : memref<7x3x128x128xbf16, #tpu.memory_space<vmem>>, vector<1x1x128x128xbf16>
    %271 = vector.shape_cast %270 : vector<1x1x128x128xbf16> to vector<128x128xbf16>
    %c6_251 = arith.constant 6 : index
    %c2_252 = arith.constant 2 : index
    %c0_253 = arith.constant 0 : index
    %c0_254 = arith.constant 0 : index
    %272 = vector.load %arg3[%c6_251, %c2_252, %c0_253, %c0_254] : memref<7x3x128x128xbf16, #tpu.memory_space<vmem>>, vector<1x1x128x128xbf16>
    %273 = vector.shape_cast %272 : vector<1x1x128x128xbf16> to vector<128x128xbf16>
    %c7 = arith.constant 7 : index
    %c0_255 = arith.constant 0 : index
    %c0_256 = arith.constant 0 : index
    %274 = vector.load %arg4[%c7, %c0_255, %c0_256] : memref<8x1x128xf32, #tpu.memory_space<vmem>>, vector<1x1x128xf32>
    %275 = vector.shape_cast %274 : vector<1x1x128xf32> to vector<1x128xf32>
    %c0_257 = arith.constant 0 : index
    %c0_258 = arith.constant 0 : index
    %276 = tpu.strided_load %arg8[%c0_257, %c0_258] {strides = array<i32: 2, 1>} : memref<514x128xf32, #tpu.memory_space<vmem>>, vector<3x128xf32>
    %277 = arith.truncf %276 : vector<3x128xf32> to vector<3x128xbf16>
    %c1_259 = arith.constant 1 : index
    %c0_260 = arith.constant 0 : index
    %278 = tpu.strided_load %arg8[%c1_259, %c0_260] {strides = array<i32: 2, 1>} : memref<514x128xf32, #tpu.memory_space<vmem>>, vector<3x128xf32>
    %279 = arith.truncf %278 : vector<3x128xf32> to vector<3x128xbf16>
    %c2_261 = arith.constant 2 : index
    %c0_262 = arith.constant 0 : index
    %280 = tpu.strided_load %arg8[%c2_261, %c0_262] {strides = array<i32: 2, 1>} : memref<514x128xf32, #tpu.memory_space<vmem>>, vector<3x128xf32>
    %281 = arith.truncf %280 : vector<3x128xf32> to vector<3x128xbf16>
    %c3_263 = arith.constant 3 : index
    %c0_264 = arith.constant 0 : index
    %282 = tpu.strided_load %arg8[%c3_263, %c0_264] {strides = array<i32: 2, 1>} : memref<514x128xf32, #tpu.memory_space<vmem>>, vector<3x128xf32>
    %283 = arith.truncf %282 : vector<3x128xf32> to vector<3x128xbf16>
    %cst_265 = arith.constant dense<0.000000e+00> : vector<3x128xf32>
    %284 = tpu.matmul %277, %269, %cst_265 {dimension_numbers = #tpu.dot_dimension_numbers<[1], [0], [0], [1], [0, 0, 1, 1], [], []>} : vector<3x128xbf16>, vector<128x128xbf16>, vector<3x128xf32> -> vector<3x128xf32>
    %cst_266 = arith.constant dense<0.000000e+00> : vector<3x128xf32>
    %285 = tpu.matmul %279, %271, %cst_266 {dimension_numbers = #tpu.dot_dimension_numbers<[1], [0], [0], [1], [0, 0, 1, 1], [], []>} : vector<3x128xbf16>, vector<128x128xbf16>, vector<3x128xf32> -> vector<3x128xf32>
    %286 = arith.addf %284, %285 : vector<3x128xf32>
    %cst_267 = arith.constant dense<0.000000e+00> : vector<3x128xf32>
    %287 = tpu.matmul %281, %273, %cst_267 {dimension_numbers = #tpu.dot_dimension_numbers<[1], [0], [0], [1], [0, 0, 1, 1], [], []>} : vector<3x128xbf16>, vector<128x128xbf16>, vector<3x128xf32> -> vector<3x128xf32>
    %288 = arith.addf %286, %287 : vector<3x128xf32>
    %cst_268 = arith.constant dense<0.000000e+00> : vector<3x128xf32>
    %289 = tpu.matmul %279, %269, %cst_268 {dimension_numbers = #tpu.dot_dimension_numbers<[1], [0], [0], [1], [0, 0, 1, 1], [], []>} : vector<3x128xbf16>, vector<128x128xbf16>, vector<3x128xf32> -> vector<3x128xf32>
    %cst_269 = arith.constant dense<0.000000e+00> : vector<3x128xf32>
    %290 = tpu.matmul %281, %271, %cst_269 {dimension_numbers = #tpu.dot_dimension_numbers<[1], [0], [0], [1], [0, 0, 1, 1], [], []>} : vector<3x128xbf16>, vector<128x128xbf16>, vector<3x128xf32> -> vector<3x128xf32>
    %291 = arith.addf %289, %290 : vector<3x128xf32>
    %cst_270 = arith.constant dense<0.000000e+00> : vector<3x128xf32>
    %292 = tpu.matmul %283, %273, %cst_270 {dimension_numbers = #tpu.dot_dimension_numbers<[1], [0], [0], [1], [0, 0, 1, 1], [], []>} : vector<3x128xbf16>, vector<128x128xbf16>, vector<3x128xf32> -> vector<3x128xf32>
    %293 = arith.addf %291, %292 : vector<3x128xf32>
    %294 = arith.maximumf %288, %293 : vector<3x128xf32>
    %295 = vector.broadcast %275 : vector<1x128xf32> to vector<3x128xf32>
    %296 = arith.addf %294, %295 : vector<3x128xf32>
    %cst_271 = arith.constant 0.000000e+00 : f32
    %297 = vector.broadcast %cst_271 : f32 to vector<3x128xf32>
    %298 = arith.maximumf %296, %297 : vector<3x128xf32>
    %c0_272 = arith.constant 0 : index
    %c0_273 = arith.constant 0 : index
    %299 = vector.load %arg6[%c0_272, %c0_273] : memref<1x128xf32, #tpu.memory_space<vmem>>, vector<1x128xf32>
    %300 = vector.extract_strided_slice %298 {offsets = [0, 0], sizes = [1, 128], strides = [1, 1]} : vector<3x128xf32> to vector<1x128xf32>
    %301 = arith.truncf %300 : vector<1x128xf32> to vector<1x128xbf16>
    %c0_274 = arith.constant 0 : index
    %c0_275 = arith.constant 0 : index
    %c0_276 = arith.constant 0 : index
    %302 = vector.load %arg5[%c0_274, %c0_275, %c0_276] : memref<3x128x128xbf16, #tpu.memory_space<vmem>>, vector<1x128x128xbf16>
    %303 = vector.shape_cast %302 : vector<1x128x128xbf16> to vector<128x128xbf16>
    %cst_277 = arith.constant dense<0.000000e+00> : vector<1x128xf32>
    %304 = tpu.matmul %301, %303, %cst_277 {dimension_numbers = #tpu.dot_dimension_numbers<[1], [0], [0], [1], [0, 0, 1, 1], [], []>} : vector<1x128xbf16>, vector<128x128xbf16>, vector<1x128xf32> -> vector<1x128xf32>
    %305 = arith.addf %299, %304 : vector<1x128xf32>
    %306 = vector.extract_strided_slice %298 {offsets = [1, 0], sizes = [1, 128], strides = [1, 1]} : vector<3x128xf32> to vector<1x128xf32>
    %307 = arith.truncf %306 : vector<1x128xf32> to vector<1x128xbf16>
    %c1_278 = arith.constant 1 : index
    %c0_279 = arith.constant 0 : index
    %c0_280 = arith.constant 0 : index
    %308 = vector.load %arg5[%c1_278, %c0_279, %c0_280] : memref<3x128x128xbf16, #tpu.memory_space<vmem>>, vector<1x128x128xbf16>
    %309 = vector.shape_cast %308 : vector<1x128x128xbf16> to vector<128x128xbf16>
    %cst_281 = arith.constant dense<0.000000e+00> : vector<1x128xf32>
    %310 = tpu.matmul %307, %309, %cst_281 {dimension_numbers = #tpu.dot_dimension_numbers<[1], [0], [0], [1], [0, 0, 1, 1], [], []>} : vector<1x128xbf16>, vector<128x128xbf16>, vector<1x128xf32> -> vector<1x128xf32>
    %311 = arith.addf %305, %310 : vector<1x128xf32>
    %312 = vector.extract_strided_slice %298 {offsets = [2, 0], sizes = [1, 128], strides = [1, 1]} : vector<3x128xf32> to vector<1x128xf32>
    %313 = arith.truncf %312 : vector<1x128xf32> to vector<1x128xbf16>
    %c2_282 = arith.constant 2 : index
    %c0_283 = arith.constant 0 : index
    %c0_284 = arith.constant 0 : index
    %314 = vector.load %arg5[%c2_282, %c0_283, %c0_284] : memref<3x128x128xbf16, #tpu.memory_space<vmem>>, vector<1x128x128xbf16>
    %315 = vector.shape_cast %314 : vector<1x128x128xbf16> to vector<128x128xbf16>
    %cst_285 = arith.constant dense<0.000000e+00> : vector<1x128xf32>
    %316 = tpu.matmul %313, %315, %cst_285 {dimension_numbers = #tpu.dot_dimension_numbers<[1], [0], [0], [1], [0, 0, 1, 1], [], []>} : vector<1x128xbf16>, vector<128x128xbf16>, vector<1x128xf32> -> vector<1x128xf32>
    %317 = arith.addf %311, %316 : vector<1x128xf32>
    %c0_286 = arith.constant 0 : index
    %c0_287 = arith.constant 0 : index
    %c0_288 = arith.constant 0 : index
    %318 = vector.load %arg7[%c0_286, %c0_287, %c0_288] : memref<1x1x128xf32, #tpu.memory_space<vmem>>, vector<1x1x128xf32>
    %319 = vector.shape_cast %318 : vector<1x1x128xf32> to vector<1x128xf32>
    %320 = vector.shape_cast %317 : vector<1x128xf32> to vector<1x1x128xf32>
    tpu.vector_store %arg7[%c0_286, %c0_287, %c0_288], %320 {strides = array<i32>} : memref<1x1x128xf32, #tpu.memory_space<vmem>>, vector<1x1x128xf32>,
    return
  }
  func.func @transform_0(%arg0: i32) -> (i32, i32, i32, i32) {
    %c0_i32 = arith.constant 0 : i32
    %c0_i32_0 = arith.constant 0 : i32
    %c0_i32_1 = arith.constant 0 : i32
    %c0_i32_2 = arith.constant 0 : i32
    return %arg0, %c0_i32, %c0_i32_0, %c0_i32_1 : i32, i32, i32, i32
  }
  func.func @transform_1(%arg0: i32) -> (i32, i32, i32) {
    %c0_i32 = arith.constant 0 : i32
    %c0_i32_0 = arith.constant 0 : i32
    %c0_i32_1 = arith.constant 0 : i32
    %c0_i32_2 = arith.constant 0 : i32
    return %c0_i32, %c0_i32_0, %c0_i32_1 : i32, i32, i32
  }
  func.func @transform_2(%arg0: i32) -> (i32, i32, i32, i32) {
    %c0_i32 = arith.constant 0 : i32
    %c0_i32_0 = arith.constant 0 : i32
    %c0_i32_1 = arith.constant 0 : i32
    %c0_i32_2 = arith.constant 0 : i32
    %c0_i32_3 = arith.constant 0 : i32
    return %c0_i32, %c0_i32_0, %c0_i32_1, %c0_i32_2 : i32, i32, i32, i32
  }
  func.func @transform_3(%arg0: i32) -> (i32, i32, i32) {
    %c0_i32 = arith.constant 0 : i32
    %c0_i32_0 = arith.constant 0 : i32
    %c0_i32_1 = arith.constant 0 : i32
    %c0_i32_2 = arith.constant 0 : i32
    return %c0_i32, %c0_i32_0, %c0_i32_1 : i32, i32, i32
  }
  func.func @transform_4(%arg0: i32) -> (i32, i32, i32) {
    %c0_i32 = arith.constant 0 : i32
    %c0_i32_0 = arith.constant 0 : i32
    %c0_i32_1 = arith.constant 0 : i32
    %c0_i32_2 = arith.constant 0 : i32
    return %c0_i32, %c0_i32_0, %c0_i32_1 : i32, i32, i32
  }
  func.func @transform_5(%arg0: i32) -> (i32, i32) {
    %c0_i32 = arith.constant 0 : i32
    %c0_i32_0 = arith.constant 0 : i32
    %c0_i32_1 = arith.constant 0 : i32
    return %c0_i32, %c0_i32_0 : i32, i32
  }
  func.func @transform_6(%arg0: i32) -> (i32, i32, i32) {
    %c0_i32 = arith.constant 0 : i32
    %c0_i32_0 = arith.constant 0 : i32
    %c0_i32_1 = arith.constant 0 : i32
    return %arg0, %c0_i32, %c0_i32_0 : i32, i32, i32
  }
}

</mosaic_0001>

<bundles_post_ra>
// kernel: cnn_forward.1
= control target key start
LH: loop header
LB: loop body
LE: loop exit
PB: predicated region body
PF: predicated region fallthrough
CT: control target
= control target key end

     0   :  { %11 = vsyncpa [#allocation5], 0  ;;  %s16814_s0 = inlined_call_operand.vmem [shape: f32[2,5,512,1], index: 0, kind: input, shape index: {}]   ;;  %s16815_s1 = inlined_call_operand.vmem [shape: f32[3,1,128], index: 1, kind: input, shape index: {}]   ;;  %s16816_s2 = inlined_call_operand.vmem [shape: bf16[7,3,128,128], index: 2, kind: input, shape index: {}]   ;;  %s16817_s3 = inlined_call_operand.vmem [shape: f32[8,1,128], index: 3, kind: input, shape index: {}]   ;;  %s16818_s4 = inlined_call_operand.vmem [shape: bf16[3,128,128], index: 4, kind: input, shape index: {}]   ;;  %s16819_s5 = inlined_call_operand.vmem [shape: f32[1,128], index: 5, kind: input, shape index: {}]   ;;  %s16820_s6 = inlined_call_operand.hbm [shape: f32[2,1,128], index: 6, kind: output, shape index: {}]  }
   0x1   :  { %13 = vsyncpa [#allocation5 + $0x1], 0  ;;  %s12176_s21 = smov 0   ;;  %s12178_s22 = smov 0  }
   0x2   :  { %s12180_s23 = smov 0   ;;  %s12182_s24 = smov 0  }
   0x3 LB: > { %s12197_s25 = sadd.s32 4294967295, %s12135_s24   ;;  %s9242_s26 = sadd.s32 4294967294, %s12135_s24   ;;  %s12135_s24 = sphi %s12182_s24, %s17111_s24   ;;  %s12131_s23 = sphi %s12180_s23, %s17110_s23   ;;  %s12127_s22 = sphi %s12178_s22, %s17109_s22   ;;  %s12123_s21 = sphi %s12176_s21, %s17108_s21  }
   0x4   : > { %s12201_s27 = sadd.s32 1, %s12135_s24   ;;  %s157_s28 = sadd.s32 1, %s12131_s23 }
   0x5   : > { %s154_s29 = ssub.s32 %s12135_s24, %s12201_s27  ;;  %p167_p0 = scmp.ne.s32.totalorder %s12131_s23, %s12127_s22 }
   0x6   : > { %p155_p1 = scmp.eq.s32.totalorder %s154_s29, 0  ;;  %p168_p2 = scmp.eq.s32.totalorder %s12197_s25, 1 }
   0x7   : > { %p173_p3 = scmp.ne.s32.totalorder %s12127_s22, %s12123_s21  ;;  %p174_p4 = scmp.eq.s32.totalorder %s9242_s26, 1 }
   0x8   : > { %s12212_s30 = scalar_select %p155_p1, %s12131_s23, %s157_s28  }
   0x9   : > { %p12214_p5 = por %p168_p2, %p167_p0  ;;  %p12218_p6 = por %p174_p4, %p173_p3 }
   0xa   : > { %p9245_p7 = scmp.ge.s32.totalorder %s12135_s24, 1  ;;  %p215_p8 = scmp.lt.s32.totalorder %s12135_s24, 3 }
   0xc   : > { %p216_p9 = pnand %p9245_p7, %p215_p8 }
   0xe   : > { %219 = sbr.rel (%p216_p9) target bundleno = 3066 (0xbfa), region = 44 }
  0x13   : > { %p244_p10 = scmp.lt.s32.totalorder %s12197_s25, 1  ;;  %v12137_v0 = vmov 0   ;;  %v12266_v33 = vld [vmem:[%s16816_s2 + $0x78] sm:$0xff]   ;;  %v11842_v37 = vld [vmem:[%s16816_s2 + $0x70] sm:$0xff]   ;;  %v11844_v41 = vld [vmem:[%s16816_s2 + $0x68] sm:$0xff]   ;;  %v16821_v47 = vmov 0.0  }
  0x14   : > { %11839 = vset.pattern.permute.xlu1 %v12137_v0  ;;  %11838 = vset.pattern.permute.xlu0 %v12137_v0  ;;  %v11841_v34 = vld [vmem:[%s16816_s2 + $0x38] sm:$0xff]   ;;  %v11843_v38 = vld [vmem:[%s16816_s2 + $0x30] sm:$0xff]   ;;  %v11845_v42 = vld [vmem:[%s16816_s2 + $0x28] sm:$0xff]   ;;  %3420 = vst [vmem:[#allocation2] sm:$0x1] %v16821_v47  ;;  %vm12139_vm0 = vmmov 0  }
  0x15   : > { %s245_s9 = scalar_select %p244_p10, %s12197_s25, 1  ;;  %10631 = vmatprep.subr.bf16.mxu0 %v12266_v33  ;;  %10679 = vmatprep.subr.bf16.mxu1 %v11841_v34  ;;  %v11846_v45 = vld [vmem:[%s16816_s2 + $0x60] sm:$0xff]   ;;  %3421 = vst [vmem:[#allocation2 + $0x201] sm:$0x1] %v16821_v47  ;;  %5133 = vst [vmem:[#allocation3] sm:$0x1] %v16821_v47 }
  0x16   : > { %10632 = vmatpush3.bf16.msra.mxu0 %v12266_v33  ;;  %10680 = vmatpush3.bf16.msra.mxu1 %v11841_v34  ;;  %v11847_v46 = vld [vmem:[%s16816_s2 + $0x20] sm:$0xff]   ;;  %5134 = vst [vmem:[#allocation3 + $0x101] sm:$0x1] %v16821_v47  ;;  %v11848_v50 = vld [vmem:[%s16816_s2 + $0x58] sm:$0xff]   ;;  %v11850_v54 = vld [vmem:[%s16816_s2 + $0x50] sm:$0xff]   ;;  %s242_s18 = sand.u32 1, %s12127_s22  }
  0x17   : > { %s11795_s10 = smul.u32 2560, %s245_s9  ;;  %10633 = vmatprep.subr.bf16.mxu0 %v11842_v37  ;;  %10681 = vmatprep.subr.bf16.mxu1 %v11843_v38  ;;  %v11849_v51 = vld [vmem:[%s16816_s2 + $0x18] sm:$0xff]   ;;  %v11851_v55 = vld [vmem:[%s16816_s2 + $0x10] sm:$0xff]   ;;  %v11852_v58 = vld [vmem:[%s16816_s2 + $0x48] sm:$0xff]   ;;  %s10067_s19 = sshll.u32 %s12197_s25, 4 }
  0x18   : > { %v11853_v59 = vld [vmem:[%s16816_s2 + $0x8] sm:$0xff]   ;;  %v11854_v62 = vld [vmem:[%s16816_s2 + $0x40] sm:$0xff]   ;;  %s243_s20 = scalar_lea.vmem [#allocation4], %s242_s18  ;;  %s16773_s9 = scalar_lea.hbm %s16820_s6, %s10067_s19 }
  0x19   : > { %s12229_s13 = scalar_lea.vmem %s16814_s0, %s11795_s10  ;;  %v11855_v63 = vld [vmem:[%s16816_s2] sm:$0xff]   ;;  %s9187_s26 = sshll.u32 %s243_s20, 4  ;;  %s16775_s26 = int_to_ptr.vmem [resolvable:$true] %s9187_s26 }
  0x1a   : > { %v252_v1 = vld [vmem:[%s12229_s13 + $0x10] sm:$0xff]  ;;  %v250_v2 = vld [vmem:[%s12229_s13] sm:$0xff]  ;;  %v253_v3 = vld [vmem:[%s12229_s13 + $0x18] sm:$0xff]  ;;  %10634 = vmatpush3.bf16.msra.mxu0 %v11842_v37  ;;  %10682 = vmatpush3.bf16.msra.mxu1 %v11843_v38  ;;  %s9175_s10 = scalar_lea.sflag [#allocation5], %s242_s18  ;;  %s12075_s25 = scalar_lea.vmem %s16775_s26, 16 }
  0x1b   : > { %591 = vperm.xlu1 %11839, %v252_v1   ;;  %581 = vperm.xlu0 %11838, %v250_v2   ;;  %v251_v4 = vld [vmem:[%s12229_s13 + $0x8] sm:$0xff]  ;;  %v9247_v6 = vld [vmem:[%s12229_s13 + $0x200] sm:$0xff]  ;;  %v9250_v7 = vld [vmem:[%s12229_s13 + $0x218] sm:$0xff]  ;;  %p12076_p11 = scmp.ne.s32.totalorder %s16775_s26, %s12075_s25  ;;  %s12140_s11 = smov [#allocation4]  }
  0x1c   : > { %v9248_v5 = vld [vmem:[%s12229_s13 + $0x208] sm:$0xff]  ;;  %v9249_v8 = vld [vmem:[%s12229_s13 + $0x210] sm:$0xff]  ;;  %v9311_v10 = vld [vmem:[%s12229_s13 + $0x400] sm:$0xff]  ;;  %10635 = vmatprep.subr.bf16.mxu0 %v11844_v41  ;;  %10683 = vmatprep.subr.bf16.mxu1 %v11845_v42  ;;  %s12079_s12 = sshll.u32 %s12140_s11, 4  ;;  %s12080_s12 = int_to_ptr.vmem [resolvable:$false] %s12079_s12 }
  0x1d   : > { %v9312_v9 = vld [vmem:[%s12229_s13 + $0x408] sm:$0xff]  ;;  %v9314_v11 = vld [vmem:[%s12229_s13 + $0x418] sm:$0xff]  ;;  %v9313_v12 = vld [vmem:[%s12229_s13 + $0x410] sm:$0xff]  ;;  %p12077_p12 = pnand %p12076_p11, %p12214_p5  ;;  %s12081_s14 = scalar_lea.vmem %s12080_s12, 32 }
  0x1e   : > { %v255_v13 = vld [vmem:[%s12229_s13 + $0x28] sm:$0xff]  ;;  %v254_v14 = vld [vmem:[%s12229_s13 + $0x20] sm:$0xff]  ;;  %v257_v15 = vld [vmem:[%s12229_s13 + $0x38] sm:$0xff]  ;;  %10636 = vmatpush3.bf16.msra.mxu0 %v11844_v41  ;;  %10684 = vmatpush3.bf16.msra.mxu1 %v11845_v42  ;;  %p12082_p0 = scmp.lt.s32.totalorder %s16775_s26, %s12080_s12  ;;  %p12083_p1 = scmp.lt.s32.totalorder %s12081_s14, %s12075_s25 }
  0x1f   : > { %596 = vperm.xlu1 %11839, %v253_v3   ;;  %586 = vperm.xlu0 %11838, %v251_v4   ;;  %v256_v16 = vld [vmem:[%s12229_s13 + $0x30] sm:$0xff]  ;;  %v9252_v17 = vld [vmem:[%s12229_s13 + $0x228] sm:$0xff]  ;;  %v9251_v18 = vld [vmem:[%s12229_s13 + $0x220] sm:$0xff]  ;;  %p12078_p13 = pneg %p12077_p12 }
  0x20   : > { %v9254_v19 = vld [vmem:[%s12229_s13 + $0x238] sm:$0xff]  ;;  %v9253_v20 = vld [vmem:[%s12229_s13 + $0x230] sm:$0xff]  ;;  %v9316_v21 = vld [vmem:[%s12229_s13 + $0x428] sm:$0xff]  ;;  %10637 = vmatprep.subr.bf16.mxu0 %v11846_v45  ;;  %10685 = vmatprep.subr.bf16.mxu1 %v11847_v46  ;;  %p12084_p2 = por %p12083_p1, %p12082_p0 }
  0x21   : > { %v9315_v22 = vld [vmem:[%s12229_s13 + $0x420] sm:$0xff]  ;;  %v9318_v23 = vld [vmem:[%s12229_s13 + $0x438] sm:$0xff]  ;;  %v9317_v24 = vld [vmem:[%s12229_s13 + $0x430] sm:$0xff] }
  0x22   : > { %v9376_v25 = vld [vmem:[%s12229_s13 + $0x608] sm:$0xff]  ;;  %v9375_v26 = vld [vmem:[%s12229_s13 + $0x600] sm:$0xff]  ;;  %v9378_v27 = vld [vmem:[%s12229_s13 + $0x618] sm:$0xff]  ;;  %10638 = vmatpush3.bf16.msra.mxu0 %v11846_v45  ;;  %10686 = vmatpush3.bf16.msra.mxu1 %v11847_v46  ;;  %p12085_p3 = pnand %p12084_p2, %p12078_p13 }
  0x23   : > { %976 = vperm.xlu1 %11839, %v9248_v5   ;;  %971 = vperm.xlu0 %11838, %v9247_v6   ;;  %v9377_v28 = vld [vmem:[%s12229_s13 + $0x610] sm:$0xff]  ;;  %v9380_v29 = vld [vmem:[%s12229_s13 + $0x628] sm:$0xff]  ;;  %v9379_v30 = vld [vmem:[%s12229_s13 + $0x620] sm:$0xff] }
  0x24   : > { %v9382_v31 = vld [vmem:[%s12229_s13 + $0x638] sm:$0xff]  ;;  %v9381_v32 = vld [vmem:[%s12229_s13 + $0x630] sm:$0xff]  ;;  %v9440_v35 = vld [vmem:[%s12229_s13 + $0x808] sm:$0xff]  ;;  %10639 = vmatprep.subr.bf16.mxu0 %v11848_v50  ;;  %10687 = vmatprep.subr.bf16.mxu1 %v11849_v51 }
  0x25   : > { %v9439_v36 = vld [vmem:[%s12229_s13 + $0x800] sm:$0xff]  ;;  %v9442_v39 = vld [vmem:[%s12229_s13 + $0x818] sm:$0xff]  ;;  %v9441_v40 = vld [vmem:[%s12229_s13 + $0x810] sm:$0xff] }
  0x26   : > { %v9444_v43 = vld [vmem:[%s12229_s13 + $0x828] sm:$0xff]  ;;  %v9443_v44 = vld [vmem:[%s12229_s13 + $0x820] sm:$0xff]  ;;  %v9446_v48 = vld [vmem:[%s12229_s13 + $0x838] sm:$0xff]  ;;  %10640 = vmatpush3.bf16.msra.mxu0 %v11848_v50  ;;  %10688 = vmatpush3.bf16.msra.mxu1 %v11849_v51 }
  0x27   : > { %986 = vperm.xlu1 %11839, %v9250_v7   ;;  %981 = vperm.xlu0 %11838, %v9249_v8   ;;  %v9445_v49 = vld [vmem:[%s12229_s13 + $0x830] sm:$0xff]  ;;  %v259_v52 = vld [vmem:[%s12229_s13 + $0x48] sm:$0xff]  ;;  %v258_v53 = vld [vmem:[%s12229_s13 + $0x40] sm:$0xff] }
  0x28   : > { %v261_v56 = vld [vmem:[%s12229_s13 + $0x58] sm:$0xff]  ;;  %v260_v57 = vld [vmem:[%s12229_s13 + $0x50] sm:$0xff]  ;;  %10641 = vmatprep.subr.bf16.mxu0 %v11850_v54  ;;  %10689 = vmatprep.subr.bf16.mxu1 %v11851_v55  ;;  %v9256_v60 = vld [vmem:[%s12229_s13 + $0x248] sm:$0xff] }
  0x29   : > { %v9255_v61 = vld [vmem:[%s12229_s13 + $0x240] sm:$0xff]  ;;  %v9258_v0 = vld [vmem:[%s12229_s13 + $0x258] sm:$0xff]  ;;  %v9257_v1 = vld [vmem:[%s12229_s13 + $0x250] sm:$0xff] }
  0x2a   : > { %10642 = vmatpush3.bf16.msra.mxu0 %v11850_v54  ;;  %10690 = vmatpush3.bf16.msra.mxu1 %v11851_v55  ;;  %v9320_v2 = vld [vmem:[%s12229_s13 + $0x448] sm:$0xff]  ;;  %v9319_v3 = vld [vmem:[%s12229_s13 + $0x440] sm:$0xff]  ;;  %v9322_v4 = vld [vmem:[%s12229_s13 + $0x458] sm:$0xff] }
  0x2b   : > { %1430 = vperm.xlu1 %11839, %v9312_v9   ;;  %1425 = vperm.xlu0 %11838, %v9311_v10   ;;  %v9321_v5 = vld [vmem:[%s12229_s13 + $0x450] sm:$0xff]  ;;  %v263_v6 = vld [vmem:[%s12229_s13 + $0x68] sm:$0xff]  ;;  %v262_v7 = vld [vmem:[%s12229_s13 + $0x60] sm:$0xff] }
  0x2c   : > { %10643 = vmatprep.subr.bf16.mxu0 %v11852_v58  ;;  %10691 = vmatprep.subr.bf16.mxu1 %v11853_v59  ;;  %v265_v8 = vld [vmem:[%s12229_s13 + $0x78] sm:$0xff]  ;;  %v264_v9 = vld [vmem:[%s12229_s13 + $0x70] sm:$0xff]  ;;  %v9260_v10 = vld [vmem:[%s12229_s13 + $0x268] sm:$0xff] }
  0x2d   : > { %v9447_v37 = vld [vmem:[%s12229_s13 + $0x840] sm:$0xff]  ;;  %v9449_v41 = vld [vmem:[%s12229_s13 + $0x850] sm:$0xff] }
  0x2e   : > { %10644 = vmatpush3.bf16.msra.mxu0 %v11852_v58  ;;  %10692 = vmatpush3.bf16.msra.mxu1 %v11853_v59  ;;  %v9451_v45 = vld [vmem:[%s12229_s13 + $0x860] sm:$0xff]  ;;  %v9453_v50 = vld [vmem:[%s12229_s13 + $0x870] sm:$0xff]  ;;  %v269_v58 = vld [vmem:[%s12229_s13 + $0x98] sm:$0xff] }
  0x2f   : > { %1440 = vperm.xlu1 %11839, %v9314_v11   ;;  %1435 = vperm.xlu0 %11838, %v9313_v12   ;;  %v9259_v11 = vld [vmem:[%s12229_s13 + $0x260] sm:$0xff]  ;;  %v9262_v12 = vld [vmem:[%s12229_s13 + $0x278] sm:$0xff]  ;;  %v268_v59 = vld [vmem:[%s12229_s13 + $0x90] sm:$0xff] }
  0x30   : > { %10645 = vmatprep.subr.bf16.mxu0 %v11854_v62  ;;  %10693 = vmatprep.subr.bf16.mxu1 %v11855_v63  ;;  %v266_v54 = vld [vmem:[%s12229_s13 + $0x80] sm:$0xff] }
  0x32   : > { %10646 = vmatpush3.bf16.msra.mxu0 %v11854_v62  ;;  %10694 = vmatpush3.bf16.msra.mxu1 %v11855_v63  ;;  %v12429_v63 = vld [vmem:[%s16815_s1 + $0x2] ss:$0 sm:$0xff] }
  0x33   : > { %606 = vperm.xlu1 %11839, %v255_v13   ;;  %601 = vperm.xlu0 %11838, %v254_v14   ;;  %v9261_v13 = vld [vmem:[%s12229_s13 + $0x270] sm:$0xff]  ;;  %v9324_v14 = vld [vmem:[%s12229_s13 + $0x468] sm:$0xff] }
  0x34   : > { %10775 = vmatprep.subr.bf16.mxu1 %v12266_v33  ;;  %v9389_v33 = vld [vmem:[%s12229_s13 + $0x670] sm:$0xff] }
  0x37   : > { %616 = vperm.xlu1 %11839, %v257_v15   ;;  %611 = vperm.xlu0 %11838, %v256_v16   ;;  %v9323_v15 = vld [vmem:[%s12229_s13 + $0x460] sm:$0xff]  ;;  %v9326_v16 = vld [vmem:[%s12229_s13 + $0x478] sm:$0xff] }
  0x3b   : > { %996 = vperm.xlu1 %11839, %v9252_v17   ;;  %991 = vperm.xlu0 %11838, %v9251_v18   ;;  %v9325_v17 = vld [vmem:[%s12229_s13 + $0x470] sm:$0xff] }
  0x3f   : > { %1006 = vperm.xlu1 %11839, %v9254_v19   ;;  %1001 = vperm.xlu0 %11838, %v9253_v20   ;;  %v9384_v20 = vld [vmem:[%s12229_s13 + $0x648] sm:$0xff] }
  0x43   : > { %1450 = vperm.xlu1 %11839, %v9316_v21   ;;  %1445 = vperm.xlu0 %11838, %v9315_v22   ;;  %v9383_v21 = vld [vmem:[%s12229_s13 + $0x640] sm:$0xff] }
  0x47   : > { %1460 = vperm.xlu1 %11839, %v9318_v23   ;;  %1455 = vperm.xlu0 %11838, %v9317_v24   ;;  %v9386_v24 = vld [vmem:[%s12229_s13 + $0x658] sm:$0xff] }
  0x4b   : > { %2076 = vperm.xlu1 %11839, %v9376_v25   ;;  %2071 = vperm.xlu0 %11838, %v9375_v26   ;;  %v9385_v25 = vld [vmem:[%s12229_s13 + $0x650] sm:$0xff] }
  0x4f   : > { %2086 = vperm.xlu1 %11839, %v9378_v27   ;;  %2081 = vperm.xlu0 %11838, %v9377_v28   ;;  %v9388_v28 = vld [vmem:[%s12229_s13 + $0x668] sm:$0xff] }
  0x53   : > { %2096 = vperm.xlu1 %11839, %v9380_v29   ;;  %2091 = vperm.xlu0 %11838, %v9379_v30   ;;  %v9387_v29 = vld [vmem:[%s12229_s13 + $0x660] sm:$0xff] }
  0x57   : > { %2106 = vperm.xlu1 %11839, %v9382_v31   ;;  %2101 = vperm.xlu0 %11838, %v9381_v32   ;;  %v9390_v32 = vld [vmem:[%s12229_s13 + $0x678] sm:$0xff] }
  0x5b   : > { %2780 = vperm.xlu1 %11839, %v9440_v35   ;;  %2775 = vperm.xlu0 %11838, %v9439_v36   ;;  %v9448_v36 = vld [vmem:[%s12229_s13 + $0x848] sm:$0xff] }
  0x5f   : > { %2790 = vperm.xlu1 %11839, %v9442_v39   ;;  %2785 = vperm.xlu0 %11838, %v9441_v40   ;;  %v9450_v40 = vld [vmem:[%s12229_s13 + $0x858] sm:$0xff] }
  0x63   : > { %2800 = vperm.xlu1 %11839, %v9444_v43   ;;  %2795 = vperm.xlu0 %11838, %v9443_v44   ;;  %v9452_v44 = vld [vmem:[%s12229_s13 + $0x868] sm:$0xff] }
  0x67   : > { %2810 = vperm.xlu1 %11839, %v9446_v48   ;;  %2805 = vperm.xlu0 %11838, %v9445_v49   ;;  %v9454_v49 = vld [vmem:[%s12229_s13 + $0x878] sm:$0xff] }
  0x6b   : > { %626 = vperm.xlu1 %11839, %v259_v52   ;;  %621 = vperm.xlu0 %11838, %v258_v53   ;;  %v267_v53 = vld [vmem:[%s12229_s13 + $0x88] sm:$0xff] }
  0x6f   : > { %636 = vperm.xlu1 %11839, %v261_v56   ;;  %631 = vperm.xlu0 %11838, %v260_v57   ;;  %v12413_v57 = vld [vmem:[%s16815_s1 + $0x1] ss:$0 sm:$0xff] }
  0x73   : > { %1016 = vperm.xlu1 %11839, %v9256_v60   ;;  %1011 = vperm.xlu0 %11838, %v9255_v61   ;;  %v12420_v60 = vld [vmem:[%s16815_s1] ss:$0 sm:$0xff] }
  0x77   : > { %1026 = vperm.xlu1 %11839, %v9258_v0   ;;  %1021 = vperm.xlu0 %11838, %v9257_v1   ;;  %v9264_v0 = vld [vmem:[%s12229_s13 + $0x288] sm:$0xff]  ;;  %v9263_v1 = vld [vmem:[%s12229_s13 + $0x280] sm:$0xff] }
  0x7b   : > { %1470 = vperm.xlu1 %11839, %v9320_v2   ;;  %1465 = vperm.xlu0 %11838, %v9319_v3  }
  0x7f   : > { %1480 = vperm.xlu1 %11839, %v9322_v4   ;;  %1475 = vperm.xlu0 %11838, %v9321_v5  }
  0x83   : > { %646 = vperm.xlu1 %11839, %v263_v6   ;;  %641 = vperm.xlu0 %11838, %v262_v7  }
  0x87   : > { %656 = vperm.xlu1 %11839, %v265_v8   ;;  %651 = vperm.xlu0 %11838, %v264_v9  }
  0x8b   : > { %1036 = vperm.xlu1 %11839, %v9260_v10   ;;  %1031 = vperm.xlu0 %11838, %v9259_v11  }
  0x8f   : > { %1046 = vperm.xlu1 %11839, %v9262_v12   ;;  %1041 = vperm.xlu0 %11838, %v9261_v13  }
  0x93   : > { %1490 = vperm.xlu1 %11839, %v9324_v14   ;;  %1485 = vperm.xlu0 %11838, %v9323_v15  }
  0x96   : > { %v12352_v18 = vpop.permute.xlu1 %591  ;;  %v12354_v19 = vpop.permute.xlu0 %581 }
  0x97   : > { %1500 = vperm.xlu1 %11839, %v9326_v16   ;;  %1495 = vperm.xlu0 %11838, %v9325_v17   ;;  %v907_v4 = vmul.f32 %v12420_v60, %v12352_v18  ;;  %v905_v5 = vmul.f32 %v12420_v60, %v12354_v19  ;;  %v9266_v16 = vld [vmem:[%s12229_s13 + $0x298] sm:$0xff]  ;;  %v9265_v17 = vld [vmem:[%s12229_s13 + $0x290] sm:$0xff] }
  0x9a   : > { %v12358_v22 = vpop.permute.xlu1 %596  ;;  %v12360_v23 = vpop.permute.xlu0 %586 }
  0x9b   : > { %2116 = vperm.xlu1 %11839, %v9384_v20   ;;  %2111 = vperm.xlu0 %11838, %v9383_v21   ;;  %v908_v8 = vmul.f32 %v12420_v60, %v12358_v22  ;;  %v906_v9 = vmul.f32 %v12420_v60, %v12360_v23 }
  0x9e   : > { %v12364_v26 = vpop.permute.xlu1 %976  ;;  %v12366_v27 = vpop.permute.xlu0 %971 }
  0x9f   : > { %2126 = vperm.xlu1 %11839, %v9386_v24   ;;  %2121 = vperm.xlu0 %11838, %v9385_v25   ;;  %v1296_v2 = vmul.f32 %v12413_v57, %v12364_v26  ;;  %v1295_v3 = vmul.f32 %v12413_v57, %v12366_v27  ;;  %v1878_v12 = vmul.f32 %v12420_v60, %v12364_v26 }
  0xa0   : > { %v1877_v13 = vmul.f32 %v12420_v60, %v12366_v27 }
  0xa1   : > { %v1360_v18 = vadd.f32 %v1296_v2, %v906_v9  ;;  %v1359_v19 = vadd.f32 %v1295_v3, %v905_v5  ;;  %v9329_v9 = vld [vmem:[%s12229_s13 + $0x490] sm:$0xff] }
  0xa2   : > { %v12370_v30 = vpop.permute.xlu1 %986  ;;  %v12372_v31 = vpop.permute.xlu0 %981 }
  0xa3   : > { %2136 = vperm.xlu1 %11839, %v9388_v28   ;;  %2131 = vperm.xlu0 %11838, %v9387_v29   ;;  %v1298_v10 = vmul.f32 %v12413_v57, %v12370_v30  ;;  %v1297_v11 = vmul.f32 %v12413_v57, %v12372_v31  ;;  %v1880_v22 = vmul.f32 %v12420_v60, %v12370_v30 }
  0xa4   : > { %v1879_v23 = vmul.f32 %v12420_v60, %v12372_v31 }
  0xa5   : > { %v1362_v28 = vadd.f32 %v1298_v10, %v908_v8  ;;  %v1361_v29 = vadd.f32 %v1297_v11, %v907_v4  ;;  %v9330_v8 = vld [vmem:[%s12229_s13 + $0x498] sm:$0xff] }
  0xa6   : > { %v12376_v34 = vpop.permute.xlu1 %1430  ;;  %v12378_v35 = vpop.permute.xlu0 %1425 }
  0xa7   : > { %2146 = vperm.xlu1 %11839, %v9390_v32   ;;  %2141 = vperm.xlu0 %11838, %v9389_v33   ;;  %v1750_v14 = vmul.f32 %v12429_v63, %v12376_v34  ;;  %v1749_v15 = vmul.f32 %v12429_v63, %v12378_v35  ;;  %v1942_v20 = vmul.f32 %v12413_v57, %v12376_v34 }
  0xa8   : > { %v1941_v21 = vmul.f32 %v12413_v57, %v12378_v35  ;;  %v12487_v33 = vmul.f32 %v12420_v60, %v12376_v34 }
  0xa9   : > { %v12483_v31 = vadd.f32 %v1750_v14, %v1360_v18 }
  0xaa   : > { %v12382_v38 = vpop.permute.xlu1 %1440  ;;  %v12384_v39 = vpop.permute.xlu0 %1435  ;;  %v2005_v34 = vadd.f32 %v1941_v21, %v1877_v13 }
  0xab   : > { %2820 = vperm.xlu1 %11839, %v9448_v36   ;;  %2815 = vperm.xlu0 %11838, %v9447_v37   ;;  %v1752_v24 = vmul.f32 %v12429_v63, %v12382_v38  ;;  %v1751_v25 = vmul.f32 %v12429_v63, %v12384_v39  ;;  %v1944_v30 = vmul.f32 %v12413_v57, %v12382_v38 }
  0xac   : > { %v1943_v32 = vmul.f32 %v12413_v57, %v12384_v39  ;;  %v12489_v36 = vadd.f32 %v1749_v15, %v1359_v19  ;;  %v12493_v37 = vmul.f32 %v12420_v60, %v12378_v35 }
  0xae   : > { %v12388_v42 = vpop.permute.xlu1 %606  ;;  %v12390_v43 = vpop.permute.xlu0 %601 }
  0xaf   : > { %2830 = vperm.xlu1 %11839, %v9450_v40   ;;  %2825 = vperm.xlu0 %11838, %v9449_v41   ;;  %v9328_v40 = vld [vmem:[%s12229_s13 + $0x488] sm:$0xff]  ;;  %v9327_v41 = vld [vmem:[%s12229_s13 + $0x480] sm:$0xff]  ;;  %v910_v2 = vmul.f32 %v12420_v60, %v12388_v42  ;;  %v909_v3 = vmul.f32 %v12420_v60, %v12390_v43 }
  0xb2   : > { %v12394_v46 = vpop.permute.xlu1 %616  ;;  %v12396_v48 = vpop.permute.xlu0 %611 }
  0xb3   : > { %2840 = vperm.xlu1 %11839, %v9452_v44   ;;  %2835 = vperm.xlu0 %11838, %v9451_v45   ;;  %v12499_v44 = vmul.f32 %v12420_v60, %v12382_v38  ;;  %v12503_v45 = vmul.f32 %v12420_v60, %v12384_v39  ;;  %v912_v4 = vmul.f32 %v12420_v60, %v12394_v46 }
  0xb4   : > { %v911_v5 = vmul.f32 %v12420_v60, %v12396_v48 }
  0xb6   : > { %v12400_v51 = vpop.permute.xlu1 %996  ;;  %v12402_v52 = vpop.permute.xlu0 %991 }
  0xb7   : > { %2850 = vperm.xlu1 %11839, %v9454_v49   ;;  %2845 = vperm.xlu0 %11838, %v9453_v50   ;;  %v2006_v49 = vadd.f32 %v1942_v20, %v1878_v12  ;;  %v12505_v50 = vadd.f32 %v1752_v24, %v1362_v28  ;;  %v1300_v35 = vmul.f32 %v12413_v57, %v12400_v51  ;;  %v271_v20 = vld [vmem:[%s12229_s13 + $0xa8] sm:$0xff] }
  0xb8   : > { %v1882_v10 = vmul.f32 %v12420_v60, %v12400_v51  ;;  %v1881_v11 = vmul.f32 %v12420_v60, %v12402_v52 }
  0xb9   : > { %v1364_v12 = vadd.f32 %v1300_v35, %v910_v2 }
  0xba   : > { %v12406_v55 = vpop.permute.xlu1 %1006  ;;  %v12408_v56 = vpop.permute.xlu0 %1001 }
  0xbb   : > { %666 = vperm.xlu1 %11839, %v267_v53   ;;  %661 = vperm.xlu0 %11838, %v266_v54   ;;  %v12507_v53 = vadd.f32 %v1751_v25, %v1361_v29  ;;  %v1299_v54 = vmul.f32 %v12413_v57, %v12402_v52  ;;  %v1302_v39 = vmul.f32 %v12413_v57, %v12406_v55 }
  0xbc   : > { %v1884_v48 = vmul.f32 %v12420_v60, %v12406_v55  ;;  %v1883_v13 = vmul.f32 %v12420_v60, %v12408_v56 }
  0xbd   : > { %v1363_v46 = vadd.f32 %v1299_v54, %v909_v3  ;;  %v1366_v52 = vadd.f32 %v1302_v39, %v912_v4  ;;  %v273_v4 = vld [vmem:[%s12229_s13 + $0xb8] sm:$0xff] }
  0xbe   : > { %v12422_v61 = vpop.permute.xlu1 %1450  ;;  %v12424_v62 = vpop.permute.xlu0 %1445 }
  0xbf   : > { %676 = vperm.xlu1 %11839, %v269_v58   ;;  %671 = vperm.xlu0 %11838, %v268_v59   ;;  %v1301_v59 = vmul.f32 %v12413_v57, %v12408_v56  ;;  %v1754_v42 = vmul.f32 %v12429_v63, %v12422_v61  ;;  %v1753_v43 = vmul.f32 %v12429_v63, %v12424_v62 }
  0xc0   : > { %v12549_v55 = vmul.f32 %v12420_v60, %v12422_v61  ;;  %v12553_v56 = vmul.f32 %v12420_v60, %v12424_v62 }
  0xc1   : > { %v1365_v15 = vadd.f32 %v1301_v59, %v911_v5  ;;  %v12560_v21 = vadd.f32 %v1754_v42, %v1364_v12 }
  0xc2   : > { %v12441_v6 = vpop.permute.xlu1 %1460  ;;  %v12443_v7 = vpop.permute.xlu0 %1455 }
  0xc3   : > { %1056 = vperm.xlu1 %11839, %v9264_v0   ;;  %1051 = vperm.xlu0 %11838, %v9263_v1   ;;  %v2008_v0 = vadd.f32 %v1944_v30, %v1880_v22  ;;  %v2007_v1 = vadd.f32 %v1943_v32, %v1879_v23  ;;  %v12562_v22 = vadd.f32 %v1753_v43, %v1363_v46 }
  0xc4   : > { %v1755_v23 = vmul.f32 %v12429_v63, %v12443_v7  ;;  %v1948_v24 = vmul.f32 %v12413_v57, %v12441_v6  ;;  %v1947_v25 = vmul.f32 %v12413_v57, %v12443_v7  ;;  %v12585_v39 = vmul.f32 %v12420_v60, %v12441_v6 }
  0xc5   : > { %v12589_v59 = vmul.f32 %v12420_v60, %v12443_v7 }
  0xc6   : > { %v12475_v26 = vpop.permute.xlu1 %2076  ;;  %v12477_v27 = vpop.permute.xlu0 %2071  ;;  %v2011_v42 = vadd.f32 %v1947_v25, %v1883_v13 }
  0xc7   : > { %1066 = vperm.xlu1 %11839, %v9266_v16   ;;  %1061 = vperm.xlu0 %11838, %v9265_v17   ;;  %v1946_v16 = vmul.f32 %v12413_v57, %v12422_v61  ;;  %v1945_v17 = vmul.f32 %v12413_v57, %v12424_v62  ;;  %v2390_v18 = vmul.f32 %v12429_v63, %v12475_v26  ;;  %v270_v62 = vld [vmem:[%s12229_s13 + $0xa0] sm:$0xff] }
  0xc8   : > { %v2389_v19 = vmul.f32 %v12429_v63, %v12477_v27  ;;  %v1756_v61 = vmul.f32 %v12429_v63, %v12441_v6 }
  0xc9   : > { %v2010_v35 = vadd.f32 %v1946_v16, %v1882_v10  ;;  %v2009_v54 = vadd.f32 %v1945_v17, %v1881_v11  ;;  %v2454_v2 = vadd.f32 %v2390_v18, %v2006_v49  ;;  %v2012_v11 = vadd.f32 %v1948_v24, %v1884_v48  ;;  %v9268_v48 = vld [vmem:[%s12229_s13 + $0x2a8] sm:$0xff] }
  0xca   : > { %v2087_v38 = vpop.permute.xlu1 %2086  ;;  %v2082_v58 = vpop.permute.xlu0 %2081  ;;  %v2453_v3 = vadd.f32 %v2389_v19, %v2005_v34  ;;  %v12592_v5 = vadd.f32 %v1756_v61, %v1366_v52 }
  0xcb   : > { %1510 = vperm.xlu1 %11839, %v9328_v40   ;;  %1505 = vperm.xlu0 %11838, %v9327_v41   ;;  %v2392_v28 = vmul.f32 %v12429_v63, %v2087_v38  ;;  %v2391_v29 = vmul.f32 %v12429_v63, %v2082_v58  ;;  %v2646_v40 = vmul.f32 %v12413_v57, %v12475_v26 }
  0xcc   : > { %v2645_v41 = vmul.f32 %v12413_v57, %v12477_v27  ;;  %v12594_v26 = vadd.f32 %v1755_v23, %v1365_v15  ;;  %v2648_v27 = vmul.f32 %v12413_v57, %v2087_v38  ;;  %v2518_v38 = vmax.f32 %v12483_v31, %v2454_v2  ;;  %v9267_v15 = vld [vmem:[%s12229_s13 + $0x2a0] sm:$0xff] }
  0xcd   : > { %v2456_v10 = vadd.f32 %v2392_v28, %v2008_v0  ;;  %v2455_v6 = vadd.f32 %v2391_v29, %v2007_v1  ;;  %v2710_v49 = vadd.f32 %v2646_v40, %v12487_v33  ;;  %v9269_v40 = vld [vmem:[%s12229_s13 + $0x2b0] sm:$0xff] }
  0xce   : > { %v12539_v14 = vpop.permute.xlu1 %2096  ;;  %v12541_v51 = vpop.permute.xlu0 %2091  ;;  %v2709_v34 = vadd.f32 %v2645_v41, %v12493_v37  ;;  %v2712_v33 = vadd.f32 %v2648_v27, %v12499_v44  ;;  %v12622_v44 = vld [vmem:[%s16817_s3] ss:$0 sm:$0xff] }
  0xcf   : > { %1520 = vperm.xlu1 %11839, %v9330_v8   ;;  %1515 = vperm.xlu0 %11838, %v9329_v9   ;;  %v2647_v8 = vmul.f32 %v12413_v57, %v2082_v58  ;;  %v272_v9 = vld [vmem:[%s12229_s13 + $0xb0] sm:$0xff]  ;;  %v2517_v58 = vmax.f32 %v12489_v36, %v2453_v3  ;;  %v2394_v0 = vmul.f32 %v12429_v63, %v12539_v14 }
  0xd0   : > { %v2393_v1 = vmul.f32 %v12429_v63, %v12541_v51  ;;  %v2520_v16 = vmax.f32 %v12505_v50, %v2456_v10  ;;  %v2519_v31 = vmax.f32 %v12507_v53, %v2455_v6  ;;  %v2650_v36 = vmul.f32 %v12413_v57, %v12539_v14 }
  0xd1   : > { %v2711_v37 = vadd.f32 %v2647_v8, %v12503_v45  ;;  %v2649_v17 = vmul.f32 %v12413_v57, %v12541_v51  ;;  %v2458_v61 = vadd.f32 %v2394_v0, %v2010_v35 }
  0xd2   : > { %v12575_v30 = vpop.permute.xlu1 %2106  ;;  %v12577_v32 = vpop.permute.xlu0 %2101  ;;  %v2457_v14 = vadd.f32 %v2393_v1, %v2009_v54  ;;  %v2714_v41 = vadd.f32 %v2650_v36, %v12549_v55 }
  0xd3   : > { %686 = vperm.xlu1 %11839, %v271_v20   ;;  %681 = vperm.xlu0 %11838, %v270_v62   ;;  %v2396_v51 = vmul.f32 %v12429_v63, %v12575_v30  ;;  %v2395_v23 = vmul.f32 %v12429_v63, %v12577_v32  ;;  %v9270_v62 = vld [vmem:[%s12229_s13 + $0x2b8] sm:$0xff]  ;;  %v2713_v35 = vadd.f32 %v2649_v17, %v12553_v56 }
  0xd4   : > { %v2652_v54 = vmul.f32 %v12413_v57, %v12575_v30  ;;  %v2651_v2 = vmul.f32 %v12413_v57, %v12577_v32  ;;  %v2522_v6 = vmax.f32 %v12560_v21, %v2458_v61  ;;  %v2521_v55 = vmax.f32 %v12562_v22, %v2457_v14  ;;  %v9332_v30 = vld [vmem:[%s12229_s13 + $0x4a8] sm:$0xff]  ;;  %v9391_v14 = vld [vmem:[%s12229_s13 + $0x680] sm:$0xff] }
  0xd5   : > { %v2459_v32 = vadd.f32 %v2395_v23, %v2011_v42 }
  0xd6   : > { %v2781_v7 = vpop.permute.xlu1 %2780  ;;  %v2776_v43 = vpop.permute.xlu0 %2775  ;;  %v2716_v21 = vadd.f32 %v2652_v54, %v12585_v39  ;;  %v2715_v22 = vadd.f32 %v2651_v2, %v12589_v59 }
  0xd7   : > { %v3094_v12 = vmul.f32 %v12429_v63, %v2781_v7  ;;  %v3093_v46 = vmul.f32 %v12429_v63, %v2776_v43  ;;  %696 = vperm.xlu1 %11839, %v273_v4   ;;  %691 = vperm.xlu0 %11838, %v272_v9   ;;  %v2460_v43 = vadd.f32 %v2396_v51, %v2012_v11 }
  0xd8   : > { %v2523_v59 = vmax.f32 %v12594_v26, %v2459_v32 }
  0xd9   : > { %v3158_v13 = vadd.f32 %v3094_v12, %v2710_v49  ;;  %v3157_v52 = vadd.f32 %v3093_v46, %v2709_v34  ;;  %v9331_v12 = vld [vmem:[%s12229_s13 + $0x4a0] sm:$0xff]  ;;  %v2524_v39 = vmax.f32 %v12592_v5, %v2460_v43 }
  0xda   : > { %v2791_v45 = vpop.permute.xlu1 %2790  ;;  %v2786_v18 = vpop.permute.xlu0 %2785 }
  0xdb   : > { %v3222_v19 = vmax.f32 %v2518_v38, %v3158_v13  ;;  %v3221_v20 = vmax.f32 %v2517_v58, %v3157_v52  ;;  %v3096_v50 = vmul.f32 %v12429_v63, %v2791_v45  ;;  %v3095_v53 = vmul.f32 %v12429_v63, %v2786_v18  ;;  %1076 = vperm.xlu1 %11839, %v9268_v48   ;;  %v9334_v13 = vld [vmem:[%s12229_s13 + $0x4b8] sm:$0xff] }
  0xdc   : > { %1071 = vperm.xlu0 %11838, %v9267_v15  }
  0xdd   : > { %v3293_v24 = vadd.f32 %v12622_v44, %v3222_v19  ;;  %v3292_v25 = vadd.f32 %v12622_v44, %v3221_v20  ;;  %v3160_v28 = vadd.f32 %v3096_v50, %v2712_v33  ;;  %v3159_v29 = vadd.f32 %v3095_v53, %v2711_v37  ;;  %v9392_v20 = vld [vmem:[%s12229_s13 + $0x688] sm:$0xff] }
  0xde   : > { %v2801_v3 = vpop.permute.xlu1 %2800  ;;  %v2796_v4 = vpop.permute.xlu0 %2795 }
  0xdf   : > { %v3357_v27 = vmax.f32 %v3293_v24, 0.0  ;;  %v3356_v8 = vmax.f32 %v3292_v25, 0.0  ;;  %v3224_v9 = vmax.f32 %v2520_v16, %v3160_v28  ;;  %v3223_v10 = vmax.f32 %v2519_v31, %v3159_v29  ;;  %1086 = vperm.xlu1 %11839, %v9270_v62   ;;  %v9333_v16 = vld [vmem:[%s12229_s13 + $0x4b0] sm:$0xff]  ;;  %v9394_v25 = vld [vmem:[%s12229_s13 + $0x698] sm:$0xff] }
  0xe0   : > { %v3098_v56 = vmul.f32 %v12429_v63, %v2801_v3  ;;  %v3097_v7 = vmul.f32 %v12429_v63, %v2796_v4  ;;  %1081 = vperm.xlu0 %11838, %v9269_v40   ;;  %v9396_v4 = vld [vmem:[%s12229_s13 + $0x6a8] sm:$0xff] }
  0xe1   : > { %3423 = vst [vmem:[#allocation2 + $0x9] sm:$0xff] %v3357_v27  ;;  %3422 = vst [vmem:[#allocation2 + $0x1] sm:$0xff] %v3356_v8  ;;  %v3295_v49 = vadd.f32 %v12622_v44, %v3224_v9  ;;  %v3294_v34 = vadd.f32 %v12622_v44, %v3223_v10  ;;  %v9395_v27 = vld [vmem:[%s12229_s13 + $0x6a0] sm:$0xff]  ;;  %v9398_v10 = vld [vmem:[%s12229_s13 + $0x6b8] sm:$0xff] }
  0xe2   : > { %v3162_v46 = vadd.f32 %v3098_v56, %v2714_v41  ;;  %v3161_v38 = vadd.f32 %v3097_v7, %v2713_v35  ;;  %v2811_v58 = vpop.permute.xlu1 %2810  ;;  %v2806_v0 = vpop.permute.xlu0 %2805  ;;  %v9393_v41 = vld [vmem:[%s12229_s13 + $0x690] sm:$0xff] }
  0xe3   : > { %v3359_v1 = vmax.f32 %v3295_v49, 0.0  ;;  %v3358_v11 = vmax.f32 %v3294_v34, 0.0  ;;  %v3100_v42 = vmul.f32 %v12429_v63, %v2811_v58  ;;  %v3099_v48 = vmul.f32 %v12429_v63, %v2806_v0  ;;  %1530 = vperm.xlu1 %11839, %v9332_v30   ;;  %v9397_v30 = vld [vmem:[%s12229_s13 + $0x6b0] sm:$0xff]  ;;  %v9458_v58 = vld [vmem:[%s12229_s13 + $0x898] sm:$0xff] }
  0xe4   : > { %v3226_v33 = vmax.f32 %v2522_v6, %v3162_v46  ;;  %v3225_v37 = vmax.f32 %v2521_v55, %v3161_v38  ;;  %1525 = vperm.xlu0 %11838, %v9331_v12   ;;  %v9456_v12 = vld [vmem:[%s12229_s13 + $0x888] sm:$0xff]  ;;  %v12032_v38 = vld [vmem:[%s16816_s2 + $0x78] sm:$0xff]   ;;  %v12033_v0 = vld [vmem:[%s16816_s2 + $0x70] sm:$0xff]  }
  0xe5   : > { %3425 = vst [vmem:[#allocation2 + $0x19] sm:$0xff] %v3359_v1  ;;  %3424 = vst [vmem:[#allocation2 + $0x11] sm:$0xff] %v3358_v11  ;;  %v3164_v52 = vadd.f32 %v3100_v42, %v2716_v21  ;;  %v3163_v15 = vadd.f32 %v3099_v48, %v2715_v22  ;;  %v9455_v21 = vld [vmem:[%s12229_s13 + $0x880] sm:$0xff]  ;;  %v9457_v1 = vld [vmem:[%s12229_s13 + $0x890] sm:$0xff] }
  0xe6   : > { %v3297_v31 = vadd.f32 %v12622_v44, %v3226_v33  ;;  %v3296_v36 = vadd.f32 %v12622_v44, %v3225_v37  ;;  %v12658_v17 = vpop.permute.xlu1 %626  ;;  %v12660_v45 = vpop.permute.xlu0 %621  ;;  %v12034_v48 = vld [vmem:[%s16816_s2 + $0x68] sm:$0xff]   ;;  %v9459_v37 = vld [vmem:[%s12229_s13 + $0x8a0] sm:$0xff] }
  0xe7   : > { %v3228_v18 = vmax.f32 %v2524_v39, %v3164_v52  ;;  %v3227_v19 = vmax.f32 %v2523_v59, %v3163_v15  ;;  %1540 = vperm.xlu1 %11839, %v9334_v13   ;;  %v9460_v33 = vld [vmem:[%s12229_s13 + $0x8a8] sm:$0xff]  ;;  %v12035_v59 = vld [vmem:[%s16816_s2 + $0x60] sm:$0xff]   ;;  %v9462_v52 = vld [vmem:[%s12229_s13 + $0x8b8] sm:$0xff] }
  0xe8   : > { %v3361_v5 = vmax.f32 %v3297_v31, 0.0  ;;  %v3360_v26 = vmax.f32 %v3296_v36, 0.0  ;;  %1535 = vperm.xlu0 %11838, %v9333_v16   ;;  %v3538_v50 = vld [vmem:[#allocation2] ss:$2 sm:$0xff]  ;;  %v3618_v28 = vld [vmem:[#allocation2 + $0x1] ss:$2 sm:$0xff] }
  0xe9   : > { %v3299_v53 = vadd.f32 %v12622_v44, %v3228_v18  ;;  %v3298_v61 = vadd.f32 %v12622_v44, %v3227_v19  ;;  %6191 = vst [vmem:[#allocation2] sm:$0x1] %v16821_v47  ;;  %v9461_v15 = vld [vmem:[%s12229_s13 + $0x8b0] sm:$0xff]  ;;  %v275_v36 = vld [vmem:[%s12229_s13 + $0xc8] sm:$0xff]  ;;  %v12036_v18 = vld [vmem:[%s16816_s2 + $0x58] sm:$0xff]  }
  0xea   : > { %3427 = vst [vmem:[#allocation2 + $0x29] sm:$0xff] %v3361_v5  ;;  %3426 = vst [vmem:[#allocation2 + $0x21] sm:$0xff] %v3360_v26  ;;  %v12667_v51 = vpop.permute.xlu1 %636  ;;  %v12669_v23 = vpop.permute.xlu0 %631  ;;  %v274_v19 = vld [vmem:[%s12229_s13 + $0xc0] sm:$0xff] }
  0xeb   : > { %v3363_v62 = vmax.f32 %v3299_v53, 0.0  ;;  %v3362_v24 = vmax.f32 %v3298_v61, 0.0  ;;  %2156 = vperm.xlu1 %11839, %v9392_v20   ;;  %v277_v20 = vld [vmem:[%s12229_s13 + $0xd8] sm:$0xff]  ;;  %v276_v53 = vld [vmem:[%s12229_s13 + $0xd0] sm:$0xff] }
  0xec   : > { %2151 = vperm.xlu0 %11838, %v9391_v14   ;;  %v3620_v29 = vld [vmem:[#allocation2 + $0x11] ss:$2 sm:$0xff]  ;;  %v3540_v40 = vld [vmem:[#allocation2 + $0x10] ss:$2 sm:$0xff] }
  0xed   : > { %3429 = vst [vmem:[#allocation2 + $0x39] sm:$0xff] %v3363_v62  ;;  %3428 = vst [vmem:[#allocation2 + $0x31] sm:$0xff] %v3362_v24  ;;  %v12673_v35 = vpack.c.bf16 %v3620_v29, %v3618_v28  ;;  %v3601_v54 = vpack.c.bf16 %v3540_v40, %v3538_v50  ;;  %v12037_v50 = vld [vmem:[%s16816_s2 + $0x50] sm:$0xff]   ;;  %v9272_v62 = vld [vmem:[%s12229_s13 + $0x2c8] sm:$0xff]  ;;  %v914_v28 = vmul.f32 %v12420_v60, %v12658_v17 }
  0xee   : > { %v12675_v2 = vpop.permute.xlu1 %1016  ;;  %v12677_v3 = vpop.permute.xlu0 %1011  ;;  %v12038_v24 = vld [vmem:[%s16816_s2 + $0x48] sm:$0xff]   ;;  %v915_v17 = vmul.f32 %v12420_v60, %v12669_v23 }
  0xef   : > { %2166 = vperm.xlu1 %11839, %v9394_v25   ;;  %10647 = vmatprep.mubr.bf16.mxu0 %v12673_v35  ;;  %v9271_v25 = vld [vmem:[%s12229_s13 + $0x2c0] sm:$0xff]  ;;  %v1304_v29 = vmul.f32 %v12413_v57, %v12675_v2  ;;  %v1303_v40 = vmul.f32 %v12413_v57, %v12677_v3 }
  0xf0   : > { %2161 = vperm.xlu0 %11838, %v9393_v41   ;;  %10695 = vmatprep.mubr.bf16.mxu1 %v3601_v54 }
  0xf1   : > { %v3622_v6 = vld [vmem:[#allocation2 + $0x21] ss:$2 sm:$0xff]  ;;  %v3542_v56 = vld [vmem:[#allocation2 + $0x20] ss:$2 sm:$0xff] }
  0xf2   : > { %v12682_v8 = vpop.permute.xlu1 %1026  ;;  %v12684_v9 = vpop.permute.xlu0 %1021 }
  0xf3   : > { %2176 = vperm.xlu1 %11839, %v9396_v4   ;;  %v913_v4 = vmul.f32 %v12420_v60, %v12660_v45  ;;  %v1305_v45 = vmul.f32 %v12413_v57, %v12684_v9 }
  0xf4   : > { %2171 = vperm.xlu0 %11838, %v9395_v27   ;;  %v3624_v55 = vld [vmem:[#allocation2 + $0x31] ss:$2 sm:$0xff]  ;;  %v3544_v7 = vld [vmem:[#allocation2 + $0x30] ss:$2 sm:$0xff]  ;;  %v916_v27 = vmul.f32 %v12420_v60, %v12667_v51  ;;  %v12039_v51 = vld [vmem:[%s16816_s2 + $0x40] sm:$0xff]  }
  0xf5   : > { %v12688_v43 = vpack.c.bf16 %v3624_v55, %v3622_v6  ;;  %v3602_v32 = vpack.c.bf16 %v3544_v7, %v3542_v56  ;;  %v1886_v6 = vmul.f32 %v12420_v60, %v12675_v2  ;;  %v1885_v55 = vmul.f32 %v12420_v60, %v12677_v3  ;;  %v9274_v56 = vld [vmem:[%s12229_s13 + $0x2d8] sm:$0xff] }
  0xf6   : > { %v12690_v49 = vpop.permute.xlu1 %1470  ;;  %v12692_v34 = vpop.permute.xlu0 %1465 }
  0xf7   : > { %2186 = vperm.xlu1 %11839, %v9398_v10   ;;  %10648 = vmatmul.mubr.bf16.vlgmr.msra.gmra.mxu0 %v12688_v43  ;;  %v1306_v10 = vmul.f32 %v12413_v57, %v12682_v8  ;;  %v1758_v23 = vmul.f32 %v12429_v63, %v12690_v49  ;;  %v1950_v7 = vmul.f32 %v12413_v57, %v12690_v49 }
  0xf8   : > { %2181 = vperm.xlu0 %11838, %v9397_v30   ;;  %10696 = vmatmul.mubr.bf16.vlgmr.msra.gmra.mxu1 %v3602_v32  ;;  %v1757_v2 = vmul.f32 %v12429_v63, %v12692_v34  ;;  %v1949_v3 = vmul.f32 %v12413_v57, %v12692_v34  ;;  %v9273_v30 = vld [vmem:[%s12229_s13 + $0x2d0] sm:$0xff]  ;;  %v1368_v32 = vadd.f32 %v1304_v29, %v914_v28 }
  0xf9   : > { %10776 = vmatpush3.bf16.msra.mxu1 %v12032_v38  ;;  %v1887_v38 = vmul.f32 %v12420_v60, %v12684_v9  ;;  %v12807_v9 = vmul.f32 %v12420_v60, %v12690_v49 }
  0xfa   : > { %v12697_v22 = vpop.permute.xlu1 %1480  ;;  %v12699_v46 = vpop.permute.xlu0 %1475  ;;  %10777 = vmatprep.subr.bf16.mxu1 %v12033_v0 }
  0xfb   : > { %2860 = vperm.xlu1 %11839, %v9456_v12   ;;  %v1367_v12 = vadd.f32 %v1303_v40, %v913_v4  ;;  %v12827_v49 = vmul.f32 %v12420_v60, %v12697_v22 }
  0xfc   : > { %2855 = vperm.xlu0 %11838, %v9455_v21   ;;  %v1888_v21 = vmul.f32 %v12420_v60, %v12682_v8  ;;  %v1369_v8 = vadd.f32 %v1305_v45, %v915_v17 }
  0xfd   : > { %10778 = vmatpush3.bf16.msra.mxu1 %v12033_v0 }
  0xfe   : > { %v12709_v11 = vpop.permute.xlu1 %646  ;;  %v12711_v42 = vpop.permute.xlu0 %641  ;;  %10779 = vmatprep.subr.bf16.mxu1 %v12034_v48 }
  0xff   : > { %2870 = vperm.xlu1 %11839, %v9458_v58   ;;  %v917_v4 = vmul.f32 %v12420_v60, %v12711_v42 }
 0x100   : > { %2865 = vperm.xlu0 %11838, %v9457_v1   ;;  %v1370_v1 = vadd.f32 %v1306_v10, %v916_v27  ;;  %v9338_v10 = vld [vmem:[%s12229_s13 + $0x4d8] sm:$0xff] }
 0x101   : > { %10780 = vmatpush3.bf16.msra.mxu1 %v12034_v48  ;;  %v1760_v48 = vmul.f32 %v12429_v63, %v12697_v22 }
 0x102   : > { %v12718_v13 = vpop.permute.xlu1 %656  ;;  %v12720_v39 = vpop.permute.xlu0 %651  ;;  %10781 = vmatprep.subr.bf16.mxu1 %v12035_v59 }
 0x103   : > { %2880 = vperm.xlu1 %11839, %v9460_v33   ;;  %v1952_v33 = vmul.f32 %v12413_v57, %v12697_v22 }
 0x104   : > { %2875 = vperm.xlu0 %11838, %v9459_v37   ;;  %v1759_v37 = vmul.f32 %v12429_v63, %v12699_v46 }
 0x105   : > { %10782 = vmatpush3.bf16.msra.mxu1 %v12035_v59  ;;  %v12811_v59 = vmul.f32 %v12420_v60, %v12692_v34  ;;  %v12831_v34 = vmul.f32 %v12420_v60, %v12699_v46  ;;  %v12843_v29 = vadd.f32 %v1952_v33, %v1888_v21 }
 0x106   : > { %v12727_v16 = vpop.permute.xlu1 %1036  ;;  %v12729_v31 = vpop.permute.xlu0 %1031  ;;  %10783 = vmatprep.subr.bf16.mxu1 %v12036_v18  ;;  %v12839_v28 = vadd.f32 %v1759_v37, %v1369_v8 }
 0x107   : > { %2890 = vperm.xlu1 %11839, %v9462_v52   ;;  %v1951_v52 = vmul.f32 %v12413_v57, %v12699_v46  ;;  %v918_v46 = vmul.f32 %v12420_v60, %v12709_v11  ;;  %v1890_v45 = vmul.f32 %v12420_v60, %v12727_v16  ;;  %v1889_v11 = vmul.f32 %v12420_v60, %v12729_v31 }
 0x108   : > { %2885 = vperm.xlu0 %11838, %v9461_v15   ;;  %v9336_v15 = vld [vmem:[%s12229_s13 + $0x4c8] sm:$0xff] }
 0x109   : > { %10784 = vmatpush3.bf16.msra.mxu1 %v12036_v18  ;;  %v12818_v18 = vadd.f32 %v1757_v2, %v1367_v12  ;;  %v2015_v17 = vadd.f32 %v1951_v52, %v1887_v38 }
 0x10a   : > { %v12736_v5 = vpop.permute.xlu1 %1046  ;;  %v12738_v26 = vpop.permute.xlu0 %1041  ;;  %10785 = vmatprep.subr.bf16.mxu1 %v12037_v50 }
 0x10b   : > { %706 = vperm.xlu1 %11839, %v275_v36   ;;  %v12816_v36 = vadd.f32 %v1758_v23, %v1368_v32  ;;  %v1310_v22 = vmul.f32 %v12413_v57, %v12736_v5  ;;  %v1309_v27 = vmul.f32 %v12413_v57, %v12738_v26 }
 0x10c   : > { %701 = vperm.xlu0 %11838, %v274_v19   ;;  %v12820_v19 = vadd.f32 %v1950_v7, %v1886_v6  ;;  %v920_v6 = vmul.f32 %v12420_v60, %v12718_v13 }
 0x10d   : > { %10786 = vmatpush3.bf16.msra.mxu1 %v12037_v50  ;;  %v9335_v50 = vld [vmem:[%s12229_s13 + $0x4c0] sm:$0xff] }
 0x10e   : > { %v12745_v61 = vpop.permute.xlu1 %1490  ;;  %v12747_v14 = vpop.permute.xlu0 %1485  ;;  %10787 = vmatprep.subr.bf16.mxu1 %v12038_v24  ;;  %v1374_v2 = vadd.f32 %v1310_v22, %v920_v6 }
 0x10f   : > { %716 = vperm.xlu1 %11839, %v277_v20   ;;  %v12822_v20 = vadd.f32 %v1949_v3, %v1885_v55  ;;  %v919_v55 = vmul.f32 %v12420_v60, %v12720_v39  ;;  %v1762_v23 = vmul.f32 %v12429_v63, %v12745_v61  ;;  %v1761_v7 = vmul.f32 %v12429_v63, %v12747_v14 }
 0x110   : > { %711 = vperm.xlu0 %11838, %v276_v53   ;;  %v1308_v53 = vmul.f32 %v12413_v57, %v12727_v16  ;;  %v1892_v39 = vmul.f32 %v12420_v60, %v12736_v5  ;;  %v1891_v16 = vmul.f32 %v12420_v60, %v12738_v26  ;;  %v12873_v32 = vmul.f32 %v12420_v60, %v12745_v61  ;;  %v279_v5 = vld [vmem:[%s12229_s13 + $0xe8] sm:$0xff] }
 0x111   : > { %10788 = vmatpush3.bf16.msra.mxu1 %v12038_v24  ;;  %v1953_v12 = vmul.f32 %v12413_v57, %v12747_v14  ;;  %v12879_v21 = vmul.f32 %v12420_v60, %v12747_v14 }
 0x112   : > { %v12760_v41 = vpop.permute.xlu1 %1500  ;;  %v12762_v54 = vpop.permute.xlu0 %1495  ;;  %10789 = vmatprep.subr.bf16.mxu1 %v12039_v51  ;;  %v1372_v42 = vadd.f32 %v1308_v53, %v918_v46 }
 0x113   : > { %1096 = vperm.xlu1 %11839, %v9272_v62   ;;  %v1307_v62 = vmul.f32 %v12413_v57, %v12729_v31  ;;  %v1954_v31 = vmul.f32 %v12413_v57, %v12745_v61  ;;  %v1764_v26 = vmul.f32 %v12429_v63, %v12760_v41  ;;  %v1763_v38 = vmul.f32 %v12429_v63, %v12762_v54 }
 0x114   : > { %1091 = vperm.xlu0 %11838, %v9271_v25   ;;  %v12837_v25 = vadd.f32 %v1760_v48, %v1370_v1  ;;  %v278_v48 = vld [vmem:[%s12229_s13 + $0xe0] sm:$0xff]  ;;  %v12891_v33 = vadd.f32 %v1762_v23, %v1372_v42  ;;  %v1956_v37 = vmul.f32 %v12413_v57, %v12760_v41  ;;  %v1955_v8 = vmul.f32 %v12413_v57, %v12762_v54 }
 0x115   : > { %10790 = vmatpush3.bf16.msra.mxu1 %v12039_v51  ;;  %v1371_v51 = vadd.f32 %v1307_v62, %v917_v4  ;;  %v2018_v62 = vadd.f32 %v1954_v31, %v1890_v45  ;;  %v12909_v46 = vmul.f32 %v12420_v60, %v12760_v41  ;;  %v12913_v4 = vmul.f32 %v12420_v60, %v12762_v54  ;;  %v280_v41 = vld [vmem:[%s12229_s13 + $0xf0] sm:$0xff] }
 0x116   : > { %v12795_v58 = vpop.permute.xlu1 %2116  ;;  %v12797_v0 = vpop.permute.xlu0 %2111  ;;  %v12918_v6 = vadd.f32 %v1764_v26, %v1374_v2  ;;  %v2020_v54 = vadd.f32 %v1956_v37, %v1892_v39 }
 0x117   : > { %1106 = vperm.xlu1 %11839, %v9274_v56   ;;  %v9337_v56 = vld [vmem:[%s12229_s13 + $0x4d0] sm:$0xff]  ;;  %v2398_v1 = vmul.f32 %v12429_v63, %v12795_v58  ;;  %v2397_v61 = vmul.f32 %v12429_v63, %v12797_v0  ;;  %v12893_v14 = vadd.f32 %v1761_v7, %v1371_v51  ;;  %v12927_v51 = vadd.f32 %v1955_v8, %v1891_v16  ;;  %v9276_v16 = vld [vmem:[%s12229_s13 + $0x2e8] sm:$0xff] }
 0x118   : > { %1101 = vperm.xlu0 %11838, %v9273_v30   ;;  %v1373_v30 = vadd.f32 %v1309_v27, %v919_v55  ;;  %v2017_v27 = vadd.f32 %v1953_v12, %v1889_v11 }
 0x119   : > { %v2462_v45 = vadd.f32 %v2398_v1, %v12820_v19 }
 0x11a   : > { %v2127_v24 = vpop.permute.xlu1 %2126  ;;  %v2122_v40 = vpop.permute.xlu0 %2121  ;;  %v12920_v55 = vadd.f32 %v1763_v38, %v1373_v30  ;;  %v9275_v30 = vld [vmem:[%s12229_s13 + $0x2e0] sm:$0xff] }
 0x11b   : > { %1550 = vperm.xlu1 %11839, %v9336_v15   ;;  %v2654_v15 = vmul.f32 %v12413_v57, %v12795_v58  ;;  %v2399_v53 = vmul.f32 %v12429_v63, %v2122_v40  ;;  %v2653_v58 = vmul.f32 %v12413_v57, %v12797_v0  ;;  %v2656_v42 = vmul.f32 %v12413_v57, %v2127_v24 }
 0x11c   : > { %1545 = vperm.xlu0 %11838, %v9335_v50   ;;  %v2400_v50 = vmul.f32 %v12429_v63, %v2127_v24  ;;  %v2655_v60 = vmul.f32 %v12413_v57, %v2122_v40 }
 0x11d   : > { %v2718_v11 = vadd.f32 %v2654_v15, %v12807_v9  ;;  %v2463_v7 = vadd.f32 %v2399_v53, %v2015_v17  ;;  %v2526_v9 = vmax.f32 %v12816_v36, %v2462_v45  ;;  %v2720_v12 = vadd.f32 %v2656_v42, %v12827_v49  ;;  %v9277_v15 = vld [vmem:[%s12229_s13 + $0x2f0] sm:$0xff] }
 0x11e   : > { %v2137_v13 = vpop.permute.xlu1 %2136  ;;  %v2132_v3 = vpop.permute.xlu0 %2131  ;;  %v2464_v23 = vadd.f32 %v2400_v50, %v12843_v29 }
 0x11f   : > { %1560 = vperm.xlu1 %11839, %v9338_v10   ;;  %v281_v10 = vld [vmem:[%s12229_s13 + $0xf8] sm:$0xff]  ;;  %v2402_v24 = vmul.f32 %v12429_v63, %v2137_v13  ;;  %v2658_v40 = vmul.f32 %v12413_v57, %v2137_v13  ;;  %v2401_v29 = vmul.f32 %v12429_v63, %v2132_v3  ;;  %v2527_v36 = vmax.f32 %v12839_v28, %v2463_v7 }
 0x120   : > { %1555 = vperm.xlu0 %11838, %v9337_v56   ;;  %v2461_v56 = vadd.f32 %v2397_v61, %v12822_v20  ;;  %v2717_v20 = vadd.f32 %v2653_v58, %v12811_v59  ;;  %v2719_v59 = vadd.f32 %v2655_v60, %v12831_v34  ;;  %v2528_v38 = vmax.f32 %v12837_v25, %v2464_v23 }
 0x121   : > { %v2722_v49 = vadd.f32 %v2658_v40, %v12873_v32 }
 0x122   : > { %v12899_v52 = vpop.permute.xlu1 %2146  ;;  %v12905_v22 = vpop.permute.xlu0 %2141  ;;  %v2525_v31 = vmax.f32 %v12818_v18, %v2461_v56 }
 0x123   : > { %726 = vperm.xlu1 %11839, %v279_v5   ;;  %v2657_v5 = vmul.f32 %v12413_v57, %v2132_v3  ;;  %v9278_v57 = vld [vmem:[%s12229_s13 + $0x2f8] sm:$0xff]  ;;  %v2465_v3 = vadd.f32 %v2401_v29, %v2017_v27  ;;  %v2404_v25 = vmul.f32 %v12429_v63, %v12899_v52  ;;  %v2403_v53 = vmul.f32 %v12429_v63, %v12905_v22  ;;  %v12961_v27 = vld [vmem:[%s16815_s1 + $0x1] ss:$0 sm:$0xff] }
 0x124   : > { %721 = vperm.xlu0 %11838, %v278_v48   ;;  %v2466_v48 = vadd.f32 %v2402_v24, %v2018_v62  ;;  %v2659_v42 = vmul.f32 %v12961_v27, %v12905_v22 }
 0x125   : > { %v2721_v50 = vadd.f32 %v2657_v5, %v12879_v21  ;;  %v2468_v7 = vadd.f32 %v2404_v25, %v2020_v54  ;;  %v2529_v24 = vmax.f32 %v12893_v14, %v2465_v3  ;;  %v2467_v40 = vadd.f32 %v2403_v53, %v12927_v51 }
 0x126   : > { %v2821_v0 = vpop.permute.xlu1 %2820  ;;  %v2816_v2 = vpop.permute.xlu0 %2815  ;;  %v2530_v23 = vmax.f32 %v12891_v33, %v2466_v48 }
 0x127   : > { %v3102_v19 = vmul.f32 %v12429_v63, %v2821_v0  ;;  %736 = vperm.xlu1 %11839, %v281_v10   ;;  %v3101_v39 = vmul.f32 %v12429_v63, %v2816_v2  ;;  %v2660_v10 = vmul.f32 %v12961_v27, %v12899_v52  ;;  %v9340_v52 = vld [vmem:[%s12229_s13 + $0x4e8] sm:$0xff] }
 0x128   : > { %731 = vperm.xlu0 %11838, %v280_v41  }
 0x129   : > { %v3166_v17 = vadd.f32 %v3102_v19, %v2718_v11  ;;  %v3165_v13 = vadd.f32 %v3101_v39, %v2717_v20  ;;  %v9339_v20 = vld [vmem:[%s12229_s13 + $0x4e0] sm:$0xff] }
 0x12a   : > { %v2831_v26 = vpop.permute.xlu1 %2830  ;;  %v2826_v61 = vpop.permute.xlu0 %2825 }
 0x12b   : > { %v3230_v1 = vmax.f32 %v2526_v9, %v3166_v17  ;;  %v3104_v18 = vmul.f32 %v12429_v63, %v2831_v26  ;;  %1116 = vperm.xlu1 %11839, %v9276_v16   ;;  %v3229_v37 = vmax.f32 %v2525_v31, %v3165_v13  ;;  %v3103_v34 = vmul.f32 %v12429_v63, %v2826_v61  ;;  %v12968_v63 = vld [vmem:[%s16815_s1 + $0x2] ss:$0 sm:$0xff]  ;;  %v9341_v13 = vld [vmem:[%s12229_s13 + $0x4f0] sm:$0xff] }
 0x12c   : > { %1111 = vperm.xlu0 %11838, %v9275_v30   ;;  %v2724_v9 = vadd.f32 %v2660_v10, %v12909_v46  ;;  %v2723_v17 = vadd.f32 %v2659_v42, %v12913_v4  ;;  %v2531_v26 = vmax.f32 %v12920_v55, %v2467_v40  ;;  %v9464_v40 = vld [vmem:[%s12229_s13 + $0x8c8] sm:$0xff] }
 0x12d   : > { %v3301_v8 = vadd.f32 %v12622_v44, %v3230_v1  ;;  %v3168_v28 = vadd.f32 %v3104_v18, %v2720_v12  ;;  %v3300_v32 = vadd.f32 %v12622_v44, %v3229_v37  ;;  %v3167_v62 = vadd.f32 %v3103_v34, %v2719_v59  ;;  %v9342_v12 = vld [vmem:[%s12229_s13 + $0x4f8] sm:$0xff]  ;;  %v9399_v37 = vld [vmem:[%s12229_s13 + $0x6c0] sm:$0xff] }
 0x12e   : > { %v2841_v58 = vpop.permute.xlu1 %2840  ;;  %v2836_v41 = vpop.permute.xlu0 %2835  ;;  %v2532_v59 = vmax.f32 %v12918_v6, %v2468_v7 }
 0x12f   : > { %v3365_v45 = vmax.f32 %v3301_v8, 0.0  ;;  %v3232_v56 = vmax.f32 %v2528_v38, %v3168_v28  ;;  %v3106_v21 = vmul.f32 %v12968_v63, %v2841_v58  ;;  %1126 = vperm.xlu1 %11839, %v9278_v57   ;;  %v3364_v60 = vmax.f32 %v3300_v32, 0.0  ;;  %v9402_v28 = vld [vmem:[%s12229_s13 + $0x6d8] sm:$0xff] }
 0x130   : > { %v3231_v0 = vmax.f32 %v2527_v36, %v3167_v62  ;;  %v3105_v11 = vmul.f32 %v12968_v63, %v2836_v41  ;;  %1121 = vperm.xlu0 %11838, %v9277_v15   ;;  %v9401_v15 = vld [vmem:[%s12229_s13 + $0x6d0] sm:$0xff] }
 0x131   : > { %3431 = vst [vmem:[#allocation2 + $0x49] sm:$0xff] %v3365_v45  ;;  %v3303_v19 = vadd.f32 %v12622_v44, %v3232_v56  ;;  %v3170_v2 = vadd.f32 %v3106_v21, %v2722_v49  ;;  %3430 = vst [vmem:[#allocation2 + $0x41] sm:$0xff] %v3364_v60  ;;  %v9400_v49 = vld [vmem:[%s12229_s13 + $0x6c8] sm:$0xff]  ;;  %v9403_v21 = vld [vmem:[%s12229_s13 + $0x6e0] sm:$0xff] }
 0x132   : > { %v3302_v22 = vadd.f32 %v12622_v44, %v3231_v0  ;;  %v3169_v39 = vadd.f32 %v3105_v11, %v2721_v50  ;;  %v2851_v16 = vpop.permute.xlu1 %2850  ;;  %v2846_v29 = vpop.permute.xlu0 %2845  ;;  %v9404_v56 = vld [vmem:[%s12229_s13 + $0x6e8] sm:$0xff]  ;;  %v9406_v60 = vld [vmem:[%s12229_s13 + $0x6f8] sm:$0xff]  ;;  %v9405_v0 = vld [vmem:[%s12229_s13 + $0x6f0] sm:$0xff] }
 0x133   : > { %v3367_v33 = vmax.f32 %v3303_v19, 0.0  ;;  %v3234_v54 = vmax.f32 %v2530_v23, %v3170_v2  ;;  %v3108_v31 = vmul.f32 %v12968_v63, %v2851_v16  ;;  %1570 = vperm.xlu1 %11839, %v9340_v52   ;;  %v3107_v51 = vmul.f32 %v12968_v63, %v2846_v29  ;;  %v9468_v29 = vld [vmem:[%s12229_s13 + $0x8e8] sm:$0xff] }
 0x134   : > { %v3366_v14 = vmax.f32 %v3302_v22, 0.0  ;;  %v3233_v30 = vmax.f32 %v2529_v24, %v3169_v39  ;;  %1565 = vperm.xlu0 %11838, %v9339_v20   ;;  %v9463_v22 = vld [vmem:[%s12229_s13 + $0x8c0] sm:$0xff] }
 0x135   : > { %3433 = vst [vmem:[#allocation2 + $0x59] sm:$0xff] %v3367_v33  ;;  %v3305_v46 = vadd.f32 %v12622_v44, %v3234_v54  ;;  %v3172_v5 = vadd.f32 %v3108_v31, %v2724_v9  ;;  %v3171_v38 = vadd.f32 %v3107_v51, %v2723_v17  ;;  %v9466_v9 = vld [vmem:[%s12229_s13 + $0x8d8] sm:$0xff]  ;;  %v9465_v33 = vld [vmem:[%s12229_s13 + $0x8d0] sm:$0xff]  ;;  %v9467_v17 = vld [vmem:[%s12229_s13 + $0x8e0] sm:$0xff] }
 0x136   : > { %3432 = vst [vmem:[#allocation2 + $0x51] sm:$0xff] %v3366_v14  ;;  %v3304_v4 = vadd.f32 %v12622_v44, %v3233_v30  ;;  %v12991_v36 = vpop.permute.xlu1 %666  ;;  %v12993_v61 = vpop.permute.xlu0 %661  ;;  %v9470_v51 = vld [vmem:[%s12229_s13 + $0x8f8] sm:$0xff] }
 0x137   : > { %v3369_v1 = vmax.f32 %v3305_v46, 0.0  ;;  %v3236_v18 = vmax.f32 %v2532_v59, %v3172_v5  ;;  %1580 = vperm.xlu1 %11839, %v9342_v12   ;;  %v3235_v48 = vmax.f32 %v2531_v26, %v3171_v38  ;;  %v9469_v12 = vld [vmem:[%s12229_s13 + $0x8f0] sm:$0xff]  ;;  %v283_v5 = vld [vmem:[%s12229_s13 + $0x108] sm:$0xff]  ;;  %v285_v38 = vld [vmem:[%s12229_s13 + $0x118] sm:$0xff] }
 0x138   : > { %v3368_v6 = vmax.f32 %v3304_v4, 0.0  ;;  %1575 = vperm.xlu0 %11838, %v9341_v13   ;;  %v3626_v50 = vld [vmem:[#allocation2 + $0x41] ss:$2 sm:$0xff]  ;;  %v3546_v32 = vld [vmem:[#allocation2 + $0x40] ss:$2 sm:$0xff] }
 0x139   : > { %3435 = vst [vmem:[#allocation2 + $0x69] sm:$0xff] %v3369_v1  ;;  %v3307_v55 = vadd.f32 %v12622_v44, %v3236_v18  ;;  %v3306_v34 = vadd.f32 %v12622_v44, %v3235_v48  ;;  %v282_v13 = vld [vmem:[%s12229_s13 + $0x100] sm:$0xff]  ;;  %v284_v1 = vld [vmem:[%s12229_s13 + $0x110] sm:$0xff]  ;;  %v9280_v48 = vld [vmem:[%s12229_s13 + $0x308] sm:$0xff] }
 0x13a   : > { %3434 = vst [vmem:[#allocation2 + $0x61] sm:$0xff] %v3368_v6  ;;  %v12999_v57 = vpop.permute.xlu1 %676  ;;  %v13001_v25 = vpop.permute.xlu0 %671 }
 0x13b   : > { %v3371_v3 = vmax.f32 %v3307_v55, 0.0  ;;  %2196 = vperm.xlu1 %11839, %v9400_v49   ;;  %v3370_v8 = vmax.f32 %v3306_v34, 0.0  ;;  %v9279_v49 = vld [vmem:[%s12229_s13 + $0x300] sm:$0xff] }
 0x13c   : > { %2191 = vperm.xlu0 %11838, %v9399_v37  }
 0x13d   : > { %3437 = vst [vmem:[#allocation2 + $0x79] sm:$0xff] %v3371_v3  ;;  %v3628_v53 = vld [vmem:[#allocation2 + $0x51] ss:$2 sm:$0xff]  ;;  %v3548_v62 = vld [vmem:[#allocation2 + $0x50] ss:$2 sm:$0xff]  ;;  %3436 = vst [vmem:[#allocation2 + $0x71] sm:$0xff] %v3370_v8 }
 0x13e   : > { %v13005_v44 = vpop.permute.xlu1 %1056  ;;  %v13007_v58 = vpack.c.bf16 %v3628_v53, %v3626_v50  ;;  %v3603_v10 = vpack.c.bf16 %v3548_v62, %v3546_v32  ;;  %v13009_v45 = vpop.permute.xlu0 %1051  ;;  %v13074_v3 = vld [vmem:[%s16815_s1] ss:$0 sm:$0xff] }
 0x13f   : > { %2206 = vperm.xlu1 %11839, %v9402_v28   ;;  %v1312_v55 = vmul.f32 %v12961_v27, %v13005_v44  ;;  %v1311_v37 = vmul.f32 %v12961_v27, %v13009_v45  ;;  %v922_v8 = vmul.f32 %v13074_v3, %v12991_v36  ;;  %v921_v28 = vmul.f32 %v13074_v3, %v12993_v61 }
 0x140   : > { %16890 = vst [vmem:[#allocation7_spill] sm:$0xff] %v13007_v58  ;;  %2201 = vperm.xlu0 %11838, %v9401_v15   ;;  %10651 = vmatprep.mubr.bf16.mxu0 %v13007_v58  ;;  %v924_v15 = vmul.f32 %v13074_v3, %v12999_v57  ;;  %v923_v32 = vmul.f32 %v13074_v3, %v13001_v25  ;;  %v9282_v57 = vld [vmem:[%s12229_s13 + $0x318] sm:$0xff] }
 0x141   : > { %10699 = vmatprep.mubr.bf16.mxu1 %v3603_v10  ;;  %v3630_v11 = vld [vmem:[#allocation2 + $0x61] ss:$2 sm:$0xff]  ;;  %v3550_v23 = vld [vmem:[#allocation2 + $0x60] ss:$2 sm:$0xff]  ;;  %v1894_v62 = vmul.f32 %v13074_v3, %v13005_v44  ;;  %v1893_v36 = vmul.f32 %v13074_v3, %v13009_v45  ;;  %v1375_v45 = vadd.f32 %v1311_v37, %v921_v28 }
 0x142   : > { %v13014_v41 = vpop.permute.xlu1 %1066  ;;  %v13016_v42 = vpop.permute.xlu0 %1061 }
 0x143   : > { %2216 = vperm.xlu1 %11839, %v9404_v56   ;;  %v1314_v50 = vmul.f32 %v12961_v27, %v13014_v41  ;;  %v1313_v61 = vmul.f32 %v12961_v27, %v13016_v42 }
 0x144   : > { %2211 = vperm.xlu0 %11838, %v9403_v21   ;;  %v3632_v52 = vld [vmem:[#allocation2 + $0x71] ss:$2 sm:$0xff]  ;;  %v3552_v7 = vld [vmem:[#allocation2 + $0x70] ss:$2 sm:$0xff] }
 0x145   : > { %v13022_v2 = vpack.c.bf16 %v3632_v52, %v3630_v11  ;;  %v3604_v20 = vpack.c.bf16 %v3552_v7, %v3550_v23  ;;  %v9281_v21 = vld [vmem:[%s12229_s13 + $0x310] sm:$0xff]  ;;  %v1895_v11 = vmul.f32 %v13074_v3, %v13016_v42  ;;  %v1378_v23 = vadd.f32 %v1314_v50, %v924_v15 }
 0x146   : > { %v13020_v19 = vpop.permute.xlu1 %1510  ;;  %v13024_v24 = vpop.permute.xlu0 %1505 }
 0x147   : > { %16891 = vst [vmem:[#allocation8_spill] sm:$0xff] %v13022_v2  ;;  %2226 = vperm.xlu1 %11839, %v9406_v60   ;;  %10652 = vmatmul.mubr.bf16.gmra.mxu0 %v13022_v2  ;;  %v1766_v10 = vmul.f32 %v12968_v63, %v13020_v19  ;;  %v1958_v56 = vmul.f32 %v12961_v27, %v13020_v19 }
 0x148   : > { %2221 = vperm.xlu0 %11838, %v9405_v0   ;;  %10700 = vmatmul.mubr.bf16.gmra.mxu1 %v3604_v20  ;;  %v1765_v25 = vmul.f32 %v12968_v63, %v13024_v24  ;;  %v1957_v44 = vmul.f32 %v12961_v27, %v13024_v24  ;;  %v1376_v60 = vadd.f32 %v1312_v55, %v922_v8 }
 0x149   : > { %v1896_v0 = vmul.f32 %v13074_v3, %v13014_v41  ;;  %v1377_v41 = vadd.f32 %v1313_v61, %v923_v32  ;;  %v13120_v42 = vmul.f32 %v13074_v3, %v13020_v19  ;;  %v9346_v32 = vld [vmem:[%s12229_s13 + $0x518] sm:$0xff] }
 0x14a   : > { %v13029_v39 = vpop.permute.xlu1 %1520  ;;  %v13031_v16 = vpop.permute.xlu0 %1515 }
 0x14b   : > { %2900 = vperm.xlu1 %11839, %v9464_v40   ;;  %v1768_v7 = vmul.f32 %v12968_v63, %v13029_v39  ;;  %v1960_v20 = vmul.f32 %v12961_v27, %v13029_v39  ;;  %v1767_v40 = vmul.f32 %v12968_v63, %v13031_v16  ;;  %v13140_v19 = vmul.f32 %v13074_v3, %v13029_v39 }
 0x14c   : > { %2895 = vperm.xlu0 %11838, %v9463_v22  }
 0x14d   : > { %v13154_v55 = vadd.f32 %v1767_v40, %v1377_v41  ;;  %v13158_v37 = vadd.f32 %v1960_v20, %v1896_v0  ;;  %v286_v20 = vld [vmem:[%s12229_s13 + $0x120] sm:$0xff] }
 0x14e   : > { %v13035_v54 = vpop.permute.xlu1 %686  ;;  %v13037_v31 = vpop.permute.xlu0 %681 }
 0x14f   : > { %2910 = vperm.xlu1 %11839, %v9466_v9   ;;  %v13124_v9 = vmul.f32 %v13074_v3, %v13024_v24  ;;  %v13144_v24 = vmul.f32 %v13074_v3, %v13031_v16  ;;  %v926_v8 = vmul.f32 %v13074_v3, %v13035_v54  ;;  %v925_v28 = vmul.f32 %v13074_v3, %v13037_v31 }
 0x150   : > { %2905 = vperm.xlu0 %11838, %v9465_v33   ;;  %v1959_v33 = vmul.f32 %v12961_v27, %v13031_v16 }
 0x152   : > { %v13041_v14 = vpop.permute.xlu1 %696  ;;  %v13043_v30 = vpop.permute.xlu0 %691  ;;  %v2023_v50 = vadd.f32 %v1959_v33, %v1895_v11 }
 0x153   : > { %2920 = vperm.xlu1 %11839, %v9468_v29   ;;  %v9344_v29 = vld [vmem:[%s12229_s13 + $0x508] sm:$0xff] }
 0x154   : > { %2915 = vperm.xlu0 %11838, %v9467_v17   ;;  %v13129_v17 = vadd.f32 %v1766_v10, %v1376_v60 }
 0x156   : > { %v13047_v59 = vpop.permute.xlu1 %1076 }
 0x157   : > { %v13049_v46 = vpop.permute.xlu0 %1071  ;;  %2930 = vperm.xlu1 %11839, %v9470_v51   ;;  %v13131_v51 = vadd.f32 %v1765_v25, %v1375_v45  ;;  %v1898_v61 = vmul.f32 %v13074_v3, %v13047_v59 }
 0x158   : > { %2925 = vperm.xlu0 %11838, %v9469_v12   ;;  %v13133_v12 = vadd.f32 %v1958_v56, %v1894_v62  ;;  %v928_v62 = vmul.f32 %v13074_v3, %v13041_v14  ;;  %v1897_v54 = vmul.f32 %v13074_v3, %v13049_v46 }
 0x15a   : > { %v13053_v26 = vpop.permute.xlu1 %1086 }
 0x15b   : > { %v13055_v4 = vpop.permute.xlu0 %1081  ;;  %746 = vperm.xlu1 %11839, %v283_v5   ;;  %v13135_v5 = vadd.f32 %v1957_v44, %v1893_v36  ;;  %v1318_v39 = vmul.f32 %v12961_v27, %v13053_v26  ;;  %v927_v36 = vmul.f32 %v13074_v3, %v13043_v30  ;;  %v1900_v30 = vmul.f32 %v13074_v3, %v13053_v26  ;;  %v287_v26 = vld [vmem:[%s12229_s13 + $0x128] sm:$0xff] }
 0x15c   : > { %741 = vperm.xlu0 %11838, %v282_v13   ;;  %v9343_v13 = vld [vmem:[%s12229_s13 + $0x500] sm:$0xff]  ;;  %v1317_v15 = vmul.f32 %v12961_v27, %v13055_v4 }
 0x15d   : > { %v1382_v44 = vadd.f32 %v1318_v39, %v928_v62  ;;  %v289_v62 = vld [vmem:[%s12229_s13 + $0x138] sm:$0xff] }
 0x15e   : > { %v13059_v18 = vpop.permute.xlu1 %1530  ;;  %v1381_v60 = vadd.f32 %v1317_v15, %v927_v36 }
 0x15f   : > { %v13061_v6 = vpop.permute.xlu0 %1525  ;;  %756 = vperm.xlu1 %11839, %v285_v38   ;;  %v1316_v38 = vmul.f32 %v12961_v27, %v13047_v59  ;;  %v1770_v56 = vmul.f32 %v12968_v63, %v13059_v18  ;;  %v1962_v25 = vmul.f32 %v12961_v27, %v13059_v18  ;;  %v1899_v59 = vmul.f32 %v13074_v3, %v13055_v4 }
 0x160   : > { %751 = vperm.xlu0 %11838, %v284_v1   ;;  %v1315_v1 = vmul.f32 %v12961_v27, %v13049_v46  ;;  %v1769_v46 = vmul.f32 %v12968_v63, %v13061_v6  ;;  %v13188_v45 = vmul.f32 %v13074_v3, %v13059_v18  ;;  %v1961_v0 = vmul.f32 %v12961_v27, %v13061_v6 }
 0x161   : > { %v1380_v31 = vadd.f32 %v1316_v38, %v926_v8  ;;  %v13194_v11 = vmul.f32 %v13074_v3, %v13061_v6  ;;  %v2026_v33 = vadd.f32 %v1962_v25, %v1898_v61 }
 0x162   : > { %v13069_v34 = vpop.permute.xlu1 %1540  ;;  %v1379_v10 = vadd.f32 %v1315_v1, %v925_v28 }
 0x163   : > { %v13084_v53 = vpop.permute.xlu0 %1535  ;;  %1136 = vperm.xlu1 %11839, %v9280_v48   ;;  %v1772_v4 = vmul.f32 %v12968_v63, %v13069_v34  ;;  %v13206_v40 = vadd.f32 %v1770_v56, %v1380_v31  ;;  %v13225_v28 = vmul.f32 %v13074_v3, %v13069_v34 }
 0x164   : > { %1131 = vperm.xlu0 %11838, %v9279_v49   ;;  %v13152_v49 = vadd.f32 %v1768_v7, %v1378_v23  ;;  %v1964_v23 = vmul.f32 %v12961_v27, %v13069_v34  ;;  %v1771_v6 = vmul.f32 %v12968_v63, %v13084_v53  ;;  %v1963_v41 = vmul.f32 %v12961_v27, %v13084_v53  ;;  %v288_v34 = vld [vmem:[%s12229_s13 + $0x130] sm:$0xff] }
 0x165   : > { %v13229_v15 = vmul.f32 %v13074_v3, %v13084_v53  ;;  %v13234_v36 = vadd.f32 %v1772_v4, %v1382_v44 }
 0x166   : > { %v13108_v52 = vpop.permute.xlu1 %2156  ;;  %v13238_v31 = vadd.f32 %v1964_v23, %v1900_v30 }
 0x167   : > { %v13116_v22 = vpop.permute.xlu0 %2151  ;;  %1146 = vperm.xlu1 %11839, %v9282_v57   ;;  %v9345_v57 = vld [vmem:[%s12229_s13 + $0x510] sm:$0xff]  ;;  %v2406_v7 = vmul.f32 %v12968_v63, %v13108_v52  ;;  %v2662_v38 = vmul.f32 %v12961_v27, %v13108_v52  ;;  %v2025_v52 = vadd.f32 %v1961_v0, %v1897_v54  ;;  %v13246_v54 = vadd.f32 %v1963_v41, %v1899_v59  ;;  %v9284_v59 = vld [vmem:[%s12229_s13 + $0x328] sm:$0xff] }
 0x168   : > { %1141 = vperm.xlu0 %11838, %v9281_v21   ;;  %v2405_v18 = vmul.f32 %v12968_v63, %v13116_v22 }
 0x169   : > { %v2470_v61 = vadd.f32 %v2406_v7, %v13133_v12  ;;  %v2726_v25 = vadd.f32 %v2662_v38, %v13120_v42 }
 0x16a   : > { %v13150_v48 = vpop.permute.xlu1 %2166 }
 0x16b   : > { %v2162_v16 = vpop.permute.xlu0 %2161  ;;  %1590 = vperm.xlu1 %11839, %v9344_v29   ;;  %v2408_v1 = vmul.f32 %v12968_v63, %v13150_v48  ;;  %v2664_v53 = vmul.f32 %v12961_v27, %v13150_v48  ;;  %v2534_v42 = vmax.f32 %v13129_v17, %v2470_v61 }
 0x16c   : > { %1585 = vperm.xlu0 %11838, %v9343_v13   ;;  %v13214_v13 = vadd.f32 %v1769_v46, %v1379_v10  ;;  %v2407_v39 = vmul.f32 %v12968_v63, %v2162_v16  ;;  %v13241_v10 = vadd.f32 %v1771_v6, %v1381_v60 }
 0x16d   : > { %v2472_v12 = vadd.f32 %v2408_v1, %v13158_v37  ;;  %v2728_v4 = vadd.f32 %v2664_v53, %v13140_v19 }
 0x16e   : > { %v2177_v14 = vpop.permute.xlu1 %2176 }
 0x16f   : > { %v2172_v21 = vpop.permute.xlu0 %2171  ;;  %1600 = vperm.xlu1 %11839, %v9346_v32   ;;  %v2661_v32 = vmul.f32 %v12961_v27, %v13116_v22  ;;  %v2663_v22 = vmul.f32 %v12961_v27, %v2162_v16  ;;  %v2410_v60 = vmul.f32 %v12968_v63, %v2177_v14  ;;  %v2666_v48 = vmul.f32 %v12961_v27, %v2177_v14 }
 0x170   : > { %1595 = vperm.xlu0 %11838, %v9345_v57   ;;  %v2469_v57 = vadd.f32 %v2405_v18, %v13135_v5  ;;  %v2471_v5 = vadd.f32 %v2407_v39, %v2023_v50  ;;  %v2409_v37 = vmul.f32 %v12968_v63, %v2172_v21  ;;  %v2665_v23 = vmul.f32 %v12961_v27, %v2172_v21  ;;  %v9286_v21 = vld [vmem:[%s12229_s13 + $0x338] sm:$0xff] }
 0x171   : > { %v2725_v46 = vadd.f32 %v2661_v32, %v13124_v9  ;;  %v2727_v9 = vadd.f32 %v2663_v22, %v13144_v24  ;;  %v2536_v18 = vmax.f32 %v13152_v49, %v2472_v12  ;;  %v2474_v41 = vadd.f32 %v2410_v60, %v2026_v33  ;;  %v9285_v33 = vld [vmem:[%s12229_s13 + $0x330] sm:$0xff] }
 0x172   : > { %v13212_v29 = vpop.permute.xlu1 %2186  ;;  %v2533_v0 = vmax.f32 %v13131_v51, %v2469_v57  ;;  %v2730_v19 = vadd.f32 %v2666_v48, %v13188_v45  ;;  %v2473_v1 = vadd.f32 %v2409_v37, %v2025_v52  ;;  %v2729_v45 = vadd.f32 %v2665_v23, %v13194_v11 }
 0x173   : > { %v13221_v8 = vpop.permute.xlu0 %2181  ;;  %766 = vperm.xlu1 %11839, %v287_v26   ;;  %v9283_v26 = vld [vmem:[%s12229_s13 + $0x320] sm:$0xff]  ;;  %v2412_v49 = vmul.f32 %v12968_v63, %v13212_v29 }
 0x174   : > { %761 = vperm.xlu0 %11838, %v286_v20   ;;  %v2535_v20 = vmax.f32 %v13154_v55, %v2471_v5  ;;  %v13274_v55 = vld [vmem:[%s16817_s3] ss:$0 sm:$0xff]  ;;  %v2667_v11 = vmul.f32 %v12961_v27, %v13221_v8 }
 0x176   : > { %v2861_v56 = vpop.permute.xlu1 %2860 }
 0x177   : > { %v3110_v44 = vmul.f32 %v12968_v63, %v2861_v56  ;;  %v2856_v30 = vpop.permute.xlu0 %2855  ;;  %776 = vperm.xlu1 %11839, %v289_v62   ;;  %v2411_v62 = vmul.f32 %v12968_v63, %v13221_v8 }
 0x178   : > { %v3109_v16 = vmul.f32 %v12968_v63, %v2856_v30  ;;  %771 = vperm.xlu0 %11838, %v288_v34   ;;  %v2668_v34 = vmul.f32 %v12961_v27, %v13212_v29  ;;  %v9348_v30 = vld [vmem:[%s12229_s13 + $0x528] sm:$0xff]  ;;  %v2476_v29 = vadd.f32 %v2412_v49, %v13238_v31 }
 0x179   : > { %v3174_v50 = vadd.f32 %v3110_v44, %v2726_v25 }
 0x17a   : > { %v3173_v14 = vadd.f32 %v3109_v16, %v2725_v46  ;;  %v2871_v7 = vpop.permute.xlu1 %2870  ;;  %v2538_v46 = vmax.f32 %v13206_v40, %v2474_v41  ;;  %v9347_v16 = vld [vmem:[%s12229_s13 + $0x520] sm:$0xff] }
 0x17b   : > { %v3238_v17 = vmax.f32 %v2534_v42, %v3174_v50  ;;  %v3112_v51 = vmul.f32 %v12968_v63, %v2871_v7  ;;  %v2866_v6 = vpop.permute.xlu0 %2865  ;;  %1156 = vperm.xlu1 %11839, %v9284_v59   ;;  %v2537_v59 = vmax.f32 %v13214_v13, %v2473_v1  ;;  %v2475_v42 = vadd.f32 %v2411_v62, %v13246_v54  ;;  %v9407_v1 = vld [vmem:[%s12229_s13 + $0x700] sm:$0xff] }
 0x17c   : > { %v3237_v38 = vmax.f32 %v2533_v0, %v3173_v14  ;;  %v3111_v24 = vmul.f32 %v12968_v63, %v2866_v6  ;;  %1151 = vperm.xlu0 %11838, %v9283_v26   ;;  %v2732_v50 = vadd.f32 %v2668_v34, %v13225_v28  ;;  %v9350_v14 = vld [vmem:[%s12229_s13 + $0x538] sm:$0xff]  ;;  %v2540_v7 = vmax.f32 %v13234_v36, %v2476_v29 }
 0x17d   : > { %v3309_v39 = vadd.f32 %v13274_v55, %v3238_v17  ;;  %v3176_v32 = vadd.f32 %v3112_v51, %v2728_v4  ;;  %v2539_v17 = vmax.f32 %v13241_v10, %v2475_v42  ;;  %v9414_v29 = vld [vmem:[%s12229_s13 + $0x738] sm:$0xff] }
 0x17e   : > { %v3308_v52 = vadd.f32 %v13274_v55, %v3237_v38  ;;  %v3175_v61 = vadd.f32 %v3111_v24, %v2727_v9  ;;  %v2881_v57 = vpop.permute.xlu1 %2880  ;;  %v2731_v9 = vadd.f32 %v2667_v11, %v13229_v15 }
 0x17f   : > { %v3373_v53 = vmax.f32 %v3309_v39, 0.0  ;;  %v3240_v22 = vmax.f32 %v2536_v18, %v3176_v32  ;;  %v3114_v56 = vmul.f32 %v12968_v63, %v2881_v57  ;;  %v2876_v25 = vpop.permute.xlu0 %2875  ;;  %1166 = vperm.xlu1 %11839, %v9286_v21   ;;  %v9408_v21 = vld [vmem:[%s12229_s13 + $0x708] sm:$0xff]  ;;  %v9409_v57 = vld [vmem:[%s12229_s13 + $0x710] sm:$0xff] }
 0x180   : > { %v3372_v12 = vmax.f32 %v3308_v52, 0.0  ;;  %v3239_v5 = vmax.f32 %v2535_v20, %v3175_v61  ;;  %v3113_v44 = vmul.f32 %v12968_v63, %v2876_v25  ;;  %1161 = vperm.xlu0 %11838, %v9285_v33   ;;  %v9349_v20 = vld [vmem:[%s12229_s13 + $0x530] sm:$0xff]  ;;  %v9410_v61 = vld [vmem:[%s12229_s13 + $0x718] sm:$0xff] }
 0x181   : > { %3439 = vst [vmem:[#allocation2 + $0x89] sm:$0xff] %v3373_v53  ;;  %v3311_v60 = vadd.f32 %v13274_v55, %v3240_v22  ;;  %v3178_v48 = vadd.f32 %v3114_v56, %v2730_v19 }
 0x182   : > { %3438 = vst [vmem:[#allocation2 + $0x81] sm:$0xff] %v3372_v12  ;;  %v3310_v8 = vadd.f32 %v13274_v55, %v3239_v5  ;;  %v3177_v0 = vadd.f32 %v3113_v44, %v2729_v45  ;;  %v2891_v37 = vpop.permute.xlu1 %2890  ;;  %v9412_v5 = vld [vmem:[%s12229_s13 + $0x728] sm:$0xff]  ;;  %v9411_v44 = vld [vmem:[%s12229_s13 + $0x720] sm:$0xff] }
 0x183   : > { %v3375_v40 = vmax.f32 %v3311_v60, 0.0  ;;  %v3242_v31 = vmax.f32 %v2538_v46, %v3178_v48  ;;  %v3116_v26 = vmul.f32 %v12968_v63, %v2891_v37  ;;  %v2886_v4 = vpop.permute.xlu0 %2885  ;;  %1610 = vperm.xlu1 %11839, %v9348_v30   ;;  %v9413_v60 = vld [vmem:[%s12229_s13 + $0x730] sm:$0xff] }
 0x184   : > { %v3374_v13 = vmax.f32 %v3310_v8, 0.0  ;;  %v3241_v23 = vmax.f32 %v2537_v59, %v3177_v0  ;;  %v3115_v54 = vmul.f32 %v12968_v63, %v2886_v4  ;;  %1605 = vperm.xlu0 %11838, %v9347_v16  }
 0x185   : > { %3441 = vst [vmem:[#allocation2 + $0x99] sm:$0xff] %v3375_v40  ;;  %v3313_v28 = vadd.f32 %v13274_v55, %v3242_v31  ;;  %v3180_v18 = vadd.f32 %v3116_v26, %v2732_v50  ;;  %v9472_v40 = vld [vmem:[%s12229_s13 + $0x908] sm:$0xff]  ;;  %v9471_v31 = vld [vmem:[%s12229_s13 + $0x900] sm:$0xff] }
 0x186   : > { %3440 = vst [vmem:[#allocation2 + $0x91] sm:$0xff] %v3374_v13  ;;  %v3312_v15 = vadd.f32 %v13274_v55, %v3241_v23  ;;  %v3179_v51 = vadd.f32 %v3115_v54, %v2731_v9  ;;  %v13306_v6 = vpop.permute.xlu1 %706  ;;  %v9474_v9 = vld [vmem:[%s12229_s13 + $0x918] sm:$0xff]  ;;  %v9473_v13 = vld [vmem:[%s12229_s13 + $0x910] sm:$0xff] }
 0x187   : > { %v3377_v41 = vmax.f32 %v3313_v28, 0.0  ;;  %v3244_v19 = vmax.f32 %v2540_v7, %v3180_v18  ;;  %v13308_v38 = vpop.permute.xlu0 %701  ;;  %1620 = vperm.xlu1 %11839, %v9350_v14   ;;  %v9476_v14 = vld [vmem:[%s12229_s13 + $0x928] sm:$0xff]  ;;  %v9475_v7 = vld [vmem:[%s12229_s13 + $0x920] sm:$0xff] }
 0x188   : > { %v3376_v36 = vmax.f32 %v3312_v15, 0.0  ;;  %v3243_v24 = vmax.f32 %v2539_v17, %v3179_v51  ;;  %1615 = vperm.xlu0 %11838, %v9349_v20   ;;  %v9478_v20 = vld [vmem:[%s12229_s13 + $0x938] sm:$0xff]  ;;  %v9477_v17 = vld [vmem:[%s12229_s13 + $0x930] sm:$0xff] }
 0x189   : > { %3443 = vst [vmem:[#allocation2 + $0xa9] sm:$0xff] %v3377_v41  ;;  %v3315_v10 = vadd.f32 %v13274_v55, %v3244_v19  ;;  %v3634_v32 = vld [vmem:[#allocation2 + $0x81] ss:$2 sm:$0xff]  ;;  %v3554_v53 = vld [vmem:[#allocation2 + $0x80] ss:$2 sm:$0xff] }
 0x18a   : > { %3442 = vst [vmem:[#allocation2 + $0xa1] sm:$0xff] %v3376_v36  ;;  %v3314_v49 = vadd.f32 %v13274_v55, %v3243_v24  ;;  %v13314_v39 = vpop.permute.xlu1 %716  ;;  %v13316_v33 = vld [vmem:[#allocation2 + $0x73] ss:$2 sm:$0xff]  ;;  %v291_v41 = vld [vmem:[%s12229_s13 + $0x148] sm:$0xff] }
 0x18b   : > { %16892 = vst [vmem:[#allocation9_spill] sm:$0xff] %v13316_v33  ;;  %v3379_v45 = vmax.f32 %v3315_v10, 0.0  ;;  %v13318_v62 = vpop.permute.xlu0 %711  ;;  %2236 = vperm.xlu1 %11839, %v9408_v21   ;;  %6192 = vst [vmem:[#allocation2 + $0x81] sm:$0x1] %v16821_v47  ;;  %v290_v19 = vld [vmem:[%s12229_s13 + $0x140] sm:$0xff]  ;;  %v293_v21 = vld [vmem:[%s12229_s13 + $0x158] sm:$0xff] }
 0x18c   : > { %v3378_v52 = vmax.f32 %v3314_v49, 0.0  ;;  %2231 = vperm.xlu0 %11838, %v9407_v1   ;;  %v292_v10 = vld [vmem:[%s12229_s13 + $0x150] sm:$0xff] }
 0x18d   : > { %3445 = vst [vmem:[#allocation2 + $0xb9] sm:$0xff] %v3379_v45  ;;  %v3636_v34 = vld [vmem:[#allocation2 + $0x91] ss:$2 sm:$0xff]  ;;  %v3556_v22 = vld [vmem:[#allocation2 + $0x90] ss:$2 sm:$0xff] }
 0x18e   : > { %3444 = vst [vmem:[#allocation2 + $0xb1] sm:$0xff] %v3378_v52  ;;  %v13323_v56 = vpop.permute.xlu1 %1096  ;;  %v13325_v25 = vpack.c.bf16 %v3636_v34, %v3634_v32  ;;  %v3605_v11 = vpack.c.bf16 %v3556_v22, %v3554_v53  ;;  %v9288_v32 = vld [vmem:[%s12229_s13 + $0x348] sm:$0xff]  ;;  %v929_v34 = vmul.f32 %v13074_v3, %v13308_v38 }
 0x18f   : > { %v13327_v12 = vpop.permute.xlu0 %1091  ;;  %2246 = vperm.xlu1 %11839, %v9410_v61   ;;  %v1320_v45 = vmul.f32 %v12961_v27, %v13323_v56  ;;  %v9287_v61 = vld [vmem:[%s12229_s13 + $0x340] sm:$0xff] }
 0x190   : > { %16893 = vst [vmem:[#allocation10_spill] sm:$0xff] %v13325_v25  ;;  %2241 = vperm.xlu0 %11838, %v9409_v57   ;;  %10655 = vmatprep.mubr.bf16.mxu0 %v13325_v25  ;;  %v1319_v52 = vmul.f32 %v12961_v27, %v13327_v12  ;;  %v930_v57 = vmul.f32 %v13074_v3, %v13306_v6 }
 0x191   : > { %10703 = vmatprep.mubr.bf16.mxu1 %v3605_v11  ;;  %v3638_v48 = vld [vmem:[#allocation2 + $0xa1] ss:$2 sm:$0xff]  ;;  %v3558_v59 = vld [vmem:[#allocation2 + $0xa0] ss:$2 sm:$0xff]  ;;  %v932_v11 = vmul.f32 %v13074_v3, %v13314_v39  ;;  %v1901_v38 = vmul.f32 %v13074_v3, %v13327_v12  ;;  %v9289_v12 = vld [vmem:[%s12229_s13 + $0x350] sm:$0xff] }
 0x192   : > { %v13332_v30 = vpop.permute.xlu1 %1106 }
 0x193   : > { %v13334_v46 = vpop.permute.xlu0 %1101  ;;  %2256 = vperm.xlu1 %11839, %v9412_v5   ;;  %v1322_v53 = vmul.f32 %v12961_v27, %v13332_v30  ;;  %v931_v5 = vmul.f32 %v13074_v3, %v13318_v62 }
 0x194   : > { %2251 = vperm.xlu0 %11838, %v9411_v44   ;;  %v1902_v44 = vmul.f32 %v13074_v3, %v13323_v56  ;;  %v1321_v6 = vmul.f32 %v12961_v27, %v13334_v46  ;;  %v9290_v56 = vld [vmem:[%s12229_s13 + $0x358] sm:$0xff] }
 0x195   : > { %v3640_v16 = vld [vmem:[#allocation2 + $0xb1] ss:$2 sm:$0xff]  ;;  %v3560_v42 = vld [vmem:[#allocation2 + $0xb0] ss:$2 sm:$0xff] }
 0x196   : > { %v13338_v8 = vpop.permute.xlu1 %1550  ;;  %v13340_v0 = vpack.c.bf16 %v3640_v16, %v3638_v48  ;;  %v3606_v37 = vpack.c.bf16 %v3560_v42, %v3558_v59  ;;  %v1384_v48 = vadd.f32 %v1320_v45, %v930_v57  ;;  %v1383_v16 = vadd.f32 %v1319_v52, %v929_v34  ;;  %v9351_v57 = vld [vmem:[%s12229_s13 + $0x540] sm:$0xff] }
 0x197   : > { %v13342_v50 = vpop.permute.xlu0 %1545  ;;  %2266 = vperm.xlu1 %11839, %v9414_v29   ;;  %v1966_v39 = vmul.f32 %v12961_v27, %v13338_v8  ;;  %v1904_v59 = vmul.f32 %v13074_v3, %v13332_v30  ;;  %v13429_v30 = vmul.f32 %v13074_v3, %v13338_v8 }
 0x198   : > { %16894 = vst [vmem:[#allocation11_spill] sm:$0xff] %v13340_v0  ;;  %2261 = vperm.xlu0 %11838, %v9413_v60   ;;  %10656 = vmatmul.mubr.bf16.gmra.mxu0 %v13340_v0  ;;  %v1774_v60 = vmul.f32 %v12968_v63, %v13338_v8  ;;  %v1773_v62 = vmul.f32 %v12968_v63, %v13342_v50 }
 0x199   : > { %10704 = vmatmul.mubr.bf16.gmra.mxu1 %v3606_v37  ;;  %v1965_v42 = vmul.f32 %v12961_v27, %v13342_v50  ;;  %v1386_v37 = vadd.f32 %v1322_v53, %v932_v11  ;;  %v13445_v8 = vadd.f32 %v1966_v39, %v1902_v44 }
 0x19a   : > { %v13347_v26 = vpop.permute.xlu1 %1560 }
 0x19b   : > { %v13349_v4 = vpop.permute.xlu0 %1555  ;;  %2940 = vperm.xlu1 %11839, %v9472_v40   ;;  %v1903_v40 = vmul.f32 %v13074_v3, %v13334_v46 }
 0x19c   : > { %2935 = vperm.xlu0 %11838, %v9471_v31   ;;  %v1776_v31 = vmul.f32 %v12968_v63, %v13347_v26  ;;  %v1967_v46 = vmul.f32 %v12961_v27, %v13349_v4  ;;  %v13454_v45 = vmul.f32 %v13074_v3, %v13349_v4 }
 0x19e   : > { %v13353_v23 = vpop.permute.xlu1 %726  ;;  %v13461_v34 = vadd.f32 %v1776_v31, %v1386_v37  ;;  %v13477_v39 = vadd.f32 %v1967_v46, %v1903_v40 }
 0x19f   : > { %v13355_v54 = vpop.permute.xlu0 %721  ;;  %2950 = vperm.xlu1 %11839, %v9474_v9   ;;  %v1968_v9 = vmul.f32 %v12961_v27, %v13347_v26 }
 0x1a0   : > { %2945 = vperm.xlu0 %11838, %v9473_v13  }
 0x1a2   : > { %v13359_v28 = vpop.permute.xlu1 %736 }
 0x1a3   : > { %v13361_v18 = vpop.permute.xlu0 %731  ;;  %2960 = vperm.xlu1 %11839, %v9476_v14   ;;  %v1385_v14 = vadd.f32 %v1321_v6, %v931_v5  ;;  %v13467_v5 = vadd.f32 %v1968_v9, %v1904_v59  ;;  %v934_v6 = vmul.f32 %v13074_v3, %v13353_v23 }
 0x1a4   : > { %2955 = vperm.xlu0 %11838, %v9475_v7   ;;  %v1775_v7 = vmul.f32 %v12968_v63, %v13349_v4 }
 0x1a6   : > { %v13365_v15 = vpop.permute.xlu1 %1116  ;;  %v13471_v44 = vadd.f32 %v1775_v7, %v1385_v14  ;;  %v13502_v14 = vld [vmem:[%s16815_s1 + $0x1] ss:$0 sm:$0xff] }
 0x1a7   : > { %v13367_v51 = vpop.permute.xlu0 %1111  ;;  %2970 = vperm.xlu1 %11839, %v9478_v20   ;;  %v1324_v52 = vmul.f32 %v12961_v27, %v13365_v15  ;;  %v1906_v40 = vmul.f32 %v13074_v3, %v13365_v15 }
 0x1a8   : > { %2965 = vperm.xlu0 %11838, %v9477_v17   ;;  %v13437_v17 = vadd.f32 %v1774_v60, %v1384_v48  ;;  %v1323_v53 = vmul.f32 %v12961_v27, %v13367_v51  ;;  %v936_v48 = vmul.f32 %v13074_v3, %v13359_v28  ;;  %v9353_v28 = vld [vmem:[%s12229_s13 + $0x550] sm:$0xff] }
 0x1a9   : > { %v1388_v37 = vadd.f32 %v1324_v52, %v934_v6 }
 0x1aa   : > { %v13371_v36 = vpop.permute.xlu1 %1126 }
 0x1ab   : > { %v13373_v24 = vpop.permute.xlu0 %1121  ;;  %786 = vperm.xlu1 %11839, %v291_v41   ;;  %v13439_v41 = vadd.f32 %v1773_v62, %v1383_v16 }
 0x1ac   : > { %781 = vperm.xlu0 %11838, %v290_v19   ;;  %v13443_v19 = vmul.f32 %v13074_v3, %v13342_v50  ;;  %v1325_v16 = vmul.f32 %v12961_v27, %v13373_v24 }
 0x1ae   : > { %v13377_v1 = vpop.permute.xlu1 %1570 }
 0x1af   : > { %v13379_v49 = vpop.permute.xlu0 %1565  ;;  %796 = vperm.xlu1 %11839, %v293_v21  }
 0x1b0   : > { %791 = vperm.xlu0 %11838, %v292_v10   ;;  %v9352_v10 = vld [vmem:[%s12229_s13 + $0x548] sm:$0xff] }
 0x1b2   : > { %v13393_v22 = vpop.permute.xlu1 %1580 }
 0x1b3   : > { %v13403_v29 = vpop.permute.xlu0 %1575  ;;  %1176 = vperm.xlu1 %11839, %v9288_v32   ;;  %v13450_v32 = vmul.f32 %v13074_v3, %v13347_v26  ;;  %v1972_v6 = vmul.f32 %v13502_v14, %v13393_v22 }
 0x1b4   : > { %1171 = vperm.xlu0 %11838, %v9287_v61   ;;  %v13458_v61 = vadd.f32 %v1965_v42, %v1901_v38  ;;  %v1326_v38 = vmul.f32 %v12961_v27, %v13371_v36  ;;  %v9354_v42 = vld [vmem:[%s12229_s13 + $0x558] sm:$0xff]  ;;  %v1778_v27 = vmul.f32 %v12968_v63, %v13377_v1  ;;  %v1907_v63 = vmul.f32 %v13074_v3, %v13373_v24 }
 0x1b5   : > { %v13527_v24 = vmul.f32 %v13074_v3, %v13379_v49 }
 0x1b6   : > { %v13425_v13 = vpop.permute.xlu1 %2196  ;;  %v1390_v46 = vadd.f32 %v1326_v38, %v936_v48  ;;  %v1971_v48 = vmul.f32 %v13502_v14, %v13403_v29 }
 0x1b7   : > { %v13435_v20 = vpop.permute.xlu0 %2191  ;;  %1186 = vperm.xlu1 %11839, %v9290_v56   ;;  %v10649_v21 = vpop.f32.mrf.mxu0  ;;  %v933_v56 = vmul.f32 %v13074_v3, %v13355_v54  ;;  %v1905_v54 = vmul.f32 %v13074_v3, %v13367_v51  ;;  %v1908_v51 = vmul.f32 %v13074_v3, %v13371_v36  ;;  %v1969_v36 = vmul.f32 %v13502_v14, %v13379_v49 }
 0x1b8   : > { %1181 = vperm.xlu0 %11838, %v9289_v12   ;;  %v10697_v50 = vpop.f32.mrf.mxu1  ;;  %v935_v12 = vmul.f32 %v13074_v3, %v13361_v18  ;;  %v1970_v18 = vmul.f32 %v13502_v14, %v13377_v1 }
 0x1b9   : > { %v13465_v11 = vadd.f32 %v10697_v50, %v10649_v21  ;;  %v3939_v26 = vpop.f32.mrf.mxu0  ;;  %v1387_v9 = vadd.f32 %v1323_v53, %v933_v56  ;;  %v13515_v21 = vld [vmem:[%s16815_s1 + $0x2] ss:$0 sm:$0xff]  ;;  %v295_v53 = vld [vmem:[%s12229_s13 + $0x168] sm:$0xff]  ;;  %v13539_v56 = vadd.f32 %v1778_v27, %v1388_v37  ;;  %v2033_v27 = vadd.f32 %v1969_v36, %v1905_v54 }
 0x1ba   : > { %v13469_v4 = vpop.permute.xlu1 %2206  ;;  %v4148_v60 = vpop.f32.mrf.mxu1  ;;  %v1389_v50 = vadd.f32 %v1325_v16, %v935_v12  ;;  %v2414_v38 = vmul.f32 %v13515_v21, %v13425_v13  ;;  %v2034_v16 = vadd.f32 %v1970_v18, %v1906_v40  ;;  %v2670_v12 = vmul.f32 %v13502_v14, %v13425_v13  ;;  %v297_v18 = vld [vmem:[%s12229_s13 + $0x178] sm:$0xff] }
 0x1bb   : > { %16895 = vst [vmem:[#allocation12_spill] sm:$0xff] %v13465_v11  ;;  %v13479_v62 = vpop.permute.xlu0 %2201  ;;  %1630 = vperm.xlu1 %11839, %v9352_v10   ;;  %v13487_v23 = vadd.f32 %v4148_v60, %v3939_v26  ;;  %v10650_v59 = vpop.f32.mrf.mxu0  ;;  %v1777_v10 = vmul.f32 %v13515_v21, %v13379_v49  ;;  %v1780_v26 = vmul.f32 %v13515_v21, %v13393_v22  ;;  %v294_v60 = vld [vmem:[%s12229_s13 + $0x160] sm:$0xff] }
 0x1bc   : > { %1625 = vperm.xlu0 %11838, %v9351_v57   ;;  %v10698_v31 = vpop.f32.mrf.mxu1  ;;  %v13521_v57 = vmul.f32 %v13074_v3, %v13377_v1  ;;  %v2413_v1 = vmul.f32 %v13515_v21, %v13435_v20  ;;  %v1779_v49 = vmul.f32 %v13515_v21, %v13403_v29  ;;  %v2416_v37 = vmul.f32 %v13515_v21, %v13469_v4 }
 0x1bd   : > { %16896 = vst [vmem:[#allocation13_spill] sm:$0xff] %v13487_v23  ;;  %v13506_v7 = vadd.f32 %v10698_v31, %v10650_v59  ;;  %v2415_v31 = vmul.f32 %v13515_v21, %v13479_v62  ;;  %v13559_v40 = vmul.f32 %v13074_v3, %v13393_v22  ;;  %v2669_v13 = vmul.f32 %v13502_v14, %v13435_v20  ;;  %v296_v22 = vld [vmem:[%s12229_s13 + $0x170] sm:$0xff] }
 0x1be   : > { %v2217_v15 = vpop.permute.xlu1 %2216  ;;  %v2478_v47 = vadd.f32 %v2414_v38, %v13445_v8  ;;  %v13575_v23 = vadd.f32 %v1779_v49, %v1389_v50  ;;  %v13581_v20 = vadd.f32 %v1971_v48, %v1907_v63  ;;  %v2480_v8 = vadd.f32 %v2416_v37, %v13467_v5  ;;  %v9291_v38 = vld [vmem:[%s12229_s13 + $0x360] sm:$0xff] }
 0x1bf   : > { %16897 = vst [vmem:[#allocation14_spill] sm:$0xff] %v13506_v7  ;;  %v2212_v52 = vpop.permute.xlu0 %2211  ;;  %1640 = vperm.xlu1 %11839, %v9354_v42   ;;  %v13547_v42 = vadd.f32 %v1777_v10, %v1387_v9  ;;  %v13563_v9 = vmul.f32 %v13074_v3, %v13403_v29  ;;  %v13568_v10 = vadd.f32 %v1780_v26, %v1390_v46  ;;  %v9292_v26 = vld [vmem:[%s12229_s13 + $0x368] sm:$0xff] }
 0x1c0   : > { %1635 = vperm.xlu0 %11838, %v9353_v28   ;;  %v13572_v7 = vadd.f32 %v1972_v6, %v1908_v51  ;;  %v2672_v3 = vmul.f32 %v13502_v14, %v13469_v4  ;;  %v2671_v29 = vmul.f32 %v13502_v14, %v13479_v62  ;;  %v2734_v46 = vadd.f32 %v2670_v12, %v13429_v30 }
 0x1c1   : > { %v2733_v36 = vadd.f32 %v2669_v13, %v13443_v19  ;;  %v2418_v4 = vmul.f32 %v13515_v21, %v2217_v15  ;;  %v2674_v62 = vmul.f32 %v13502_v14, %v2217_v15  ;;  %v2542_v30 = vmax.f32 %v13437_v17, %v2478_v47 }
 0x1c2   : > { %v13545_v59 = vpop.permute.xlu1 %2226  ;;  %v2735_v19 = vadd.f32 %v2671_v29, %v13454_v45  ;;  %v2544_v48 = vmax.f32 %v13461_v34, %v2480_v8 }
 0x1c3   : > { %v13555_v28 = vpop.permute.xlu0 %2221  ;;  %806 = vperm.xlu1 %11839, %v295_v53   ;;  %v2477_v53 = vadd.f32 %v2413_v1, %v13458_v61  ;;  %v2479_v61 = vadd.f32 %v2415_v31, %v13477_v39  ;;  %v2417_v39 = vmul.f32 %v13515_v21, %v2212_v52  ;;  %v2736_v1 = vadd.f32 %v2672_v3, %v13450_v32 }
 0x1c4   : > { %801 = vperm.xlu0 %11838, %v294_v60   ;;  %v2673_v60 = vmul.f32 %v13502_v14, %v2212_v52  ;;  %v2482_v37 = vadd.f32 %v2418_v4, %v2034_v16  ;;  %v2738_v32 = vadd.f32 %v2674_v62, %v13521_v57  ;;  %v9294_v52 = vld [vmem:[%s12229_s13 + $0x378] sm:$0xff]  ;;  %v2420_v34 = vmul.f32 %v13515_v21, %v13545_v59  ;;  %v9356_v4 = vld [vmem:[%s12229_s13 + $0x568] sm:$0xff] }
 0x1c5   : > { %v2541_v5 = vmax.f32 %v13439_v41, %v2477_v53  ;;  %v2543_v47 = vmax.f32 %v13471_v44, %v2479_v61  ;;  %v2481_v13 = vadd.f32 %v2417_v39, %v2033_v27  ;;  %v9293_v53 = vld [vmem:[%s12229_s13 + $0x370] sm:$0xff]  ;;  %v2419_v16 = vmul.f32 %v13515_v21, %v13555_v28 }
 0x1c6   : > { %v2901_v54 = vpop.permute.xlu1 %2900  ;;  %v2676_v27 = vmul.f32 %v13502_v14, %v13545_v59  ;;  %v2546_v62 = vmax.f32 %v13539_v56, %v2482_v37  ;;  %v2484_v59 = vadd.f32 %v2420_v34, %v13572_v7  ;;  %v9416_v34 = vld [vmem:[%s12229_s13 + $0x748] sm:$0xff] }
 0x1c7   : > { %v3118_v51 = vmul.f32 %v13515_v21, %v2901_v54  ;;  %v2896_v50 = vpop.permute.xlu0 %2895  ;;  %816 = vperm.xlu1 %11839, %v297_v18   ;;  %v2483_v39 = vadd.f32 %v2419_v16, %v13581_v20 }
 0x1c8   : > { %v3117_v63 = vmul.f32 %v13515_v21, %v2896_v50  ;;  %811 = vperm.xlu0 %11838, %v296_v22   ;;  %v2737_v22 = vadd.f32 %v2673_v60, %v13527_v24  ;;  %v2675_v24 = vmul.f32 %v13502_v14, %v13555_v28 }
 0x1c9   : > { %v3182_v6 = vadd.f32 %v3118_v51, %v2734_v46 }
 0x1ca   : > { %v3181_v15 = vadd.f32 %v3117_v63, %v2733_v36  ;;  %v2911_v49 = vpop.permute.xlu1 %2910 }
 0x1cb   : > { %v3246_v17 = vmax.f32 %v2542_v30, %v3182_v6  ;;  %v3120_v41 = vmul.f32 %v13515_v21, %v2911_v49  ;;  %v2906_v12 = vpop.permute.xlu0 %2905  ;;  %1196 = vperm.xlu1 %11839, %v9292_v26   ;;  %v9355_v30 = vld [vmem:[%s12229_s13 + $0x560] sm:$0xff] }
 0x1cc   : > { %v3245_v31 = vmax.f32 %v2541_v5, %v3181_v15  ;;  %v3119_v45 = vmul.f32 %v13515_v21, %v2906_v12  ;;  %1191 = vperm.xlu0 %11838, %v9291_v38   ;;  %v2545_v5 = vmax.f32 %v13547_v42, %v2481_v13  ;;  %v2739_v15 = vadd.f32 %v2675_v24, %v13563_v9 }
 0x1cd   : > { %v3317_v18 = vadd.f32 %v13274_v55, %v3246_v17  ;;  %v3184_v44 = vadd.f32 %v3120_v41, %v2736_v1  ;;  %v2740_v1 = vadd.f32 %v2676_v27, %v13559_v40  ;;  %v9357_v41 = vld [vmem:[%s12229_s13 + $0x570] sm:$0xff]  ;;  %v2547_v12 = vmax.f32 %v13575_v23, %v2483_v39 }
 0x1ce   : > { %v3316_v57 = vadd.f32 %v13274_v55, %v3245_v31  ;;  %v3183_v3 = vadd.f32 %v3119_v45, %v2735_v19  ;;  %v2921_v29 = vpop.permute.xlu1 %2920 }
 0x1cf   : > { %v3381_v54 = vmax.f32 %v3317_v18, 0.0  ;;  %v3248_v46 = vmax.f32 %v2544_v48, %v3184_v44  ;;  %v3122_v8 = vmul.f32 %v13515_v21, %v2921_v29  ;;  %v2916_v61 = vpop.permute.xlu0 %2915  ;;  %1206 = vperm.xlu1 %11839, %v9294_v52   ;;  %v9358_v48 = vld [vmem:[%s12229_s13 + $0x578] sm:$0xff]  ;;  %v9415_v18 = vld [vmem:[%s12229_s13 + $0x740] sm:$0xff]  ;;  %v9417_v29 = vld [vmem:[%s12229_s13 + $0x750] sm:$0xff] }
 0x1d0   : > { %v3380_v51 = vmax.f32 %v3316_v57, 0.0  ;;  %v3247_v50 = vmax.f32 %v2543_v47, %v3183_v3  ;;  %v3121_v36 = vmul.f32 %v13515_v21, %v2916_v61  ;;  %1201 = vperm.xlu0 %11838, %v9293_v53   ;;  %v2548_v47 = vmax.f32 %v13568_v10, %v2484_v59  ;;  %v9418_v3 = vld [vmem:[%s12229_s13 + $0x758] sm:$0xff] }
 0x1d1   : > { %3447 = vst [vmem:[#allocation2 + $0xc9] sm:$0xff] %v3381_v54  ;;  %v3319_v63 = vadd.f32 %v13274_v55, %v3248_v46  ;;  %v3186_v26 = vadd.f32 %v3122_v8, %v2738_v32  ;;  %v9422_v59 = vld [vmem:[%s12229_s13 + $0x778] sm:$0xff] }
 0x1d2   : > { %3446 = vst [vmem:[#allocation2 + $0xc1] sm:$0xff] %v3380_v51  ;;  %v3318_v28 = vadd.f32 %v13274_v55, %v3247_v50  ;;  %v3185_v6 = vadd.f32 %v3121_v36, %v2737_v22  ;;  %v2931_v38 = vpop.permute.xlu1 %2930  ;;  %v9420_v50 = vld [vmem:[%s12229_s13 + $0x768] sm:$0xff]  ;;  %v9419_v36 = vld [vmem:[%s12229_s13 + $0x760] sm:$0xff] }
 0x1d3   : > { %v3383_v56 = vmax.f32 %v3319_v63, 0.0  ;;  %v3250_v7 = vmax.f32 %v2546_v62, %v3186_v26  ;;  %v3124_v19 = vmul.f32 %v13515_v21, %v2931_v38  ;;  %v2926_v60 = vpop.permute.xlu0 %2925  ;;  %1650 = vperm.xlu1 %11839, %v9356_v4   ;;  %v9421_v63 = vld [vmem:[%s12229_s13 + $0x770] sm:$0xff] }
 0x1d4   : > { %v3382_v42 = vmax.f32 %v3318_v28, 0.0  ;;  %v3249_v49 = vmax.f32 %v2545_v5, %v3185_v6  ;;  %v3123_v20 = vmul.f32 %v13515_v21, %v2926_v60  ;;  %1645 = vperm.xlu0 %11838, %v9355_v30  }
 0x1d5   : > { %3449 = vst [vmem:[#allocation2 + $0xd9] sm:$0xff] %v3383_v56  ;;  %v3321_v40 = vadd.f32 %v13274_v55, %v3250_v7  ;;  %v3188_v17 = vadd.f32 %v3124_v19, %v2740_v1  ;;  %v9480_v56 = vld [vmem:[%s12229_s13 + $0x948] sm:$0xff]  ;;  %v9479_v7 = vld [vmem:[%s12229_s13 + $0x940] sm:$0xff] }
 0x1d6   : > { %3448 = vst [vmem:[#allocation2 + $0xd1] sm:$0xff] %v3382_v42  ;;  %v3320_v9 = vadd.f32 %v13274_v55, %v3249_v49  ;;  %v3187_v37 = vadd.f32 %v3123_v20, %v2739_v15  ;;  %v13637_v32 = vpop.permute.xlu1 %746  ;;  %v9482_v15 = vld [vmem:[%s12229_s13 + $0x958] sm:$0xff]  ;;  %v9481_v42 = vld [vmem:[%s12229_s13 + $0x950] sm:$0xff] }
 0x1d7   : > { %v3385_v31 = vmax.f32 %v3321_v40, 0.0  ;;  %v3252_v45 = vmax.f32 %v2548_v47, %v3188_v17  ;;  %v13639_v52 = vpop.permute.xlu0 %741  ;;  %1660 = vperm.xlu1 %11839, %v9358_v48   ;;  %v9484_v48 = vld [vmem:[%s12229_s13 + $0x968] sm:$0xff]  ;;  %v9483_v47 = vld [vmem:[%s12229_s13 + $0x960] sm:$0xff] }
 0x1d8   : > { %v3384_v10 = vmax.f32 %v3320_v9, 0.0  ;;  %v3251_v13 = vmax.f32 %v2547_v12, %v3187_v37  ;;  %1655 = vperm.xlu0 %11838, %v9357_v41   ;;  %v9486_v41 = vld [vmem:[%s12229_s13 + $0x978] sm:$0xff]  ;;  %v9485_v12 = vld [vmem:[%s12229_s13 + $0x970] sm:$0xff] }
 0x1d9   : > { %3451 = vst [vmem:[#allocation2 + $0xe9] sm:$0xff] %v3385_v31  ;;  %v3323_v23 = vadd.f32 %v13274_v55, %v3252_v45  ;;  %v3642_v27 = vld [vmem:[#allocation2 + $0xc1] ss:$2 sm:$0xff]  ;;  %v3562_v46 = vld [vmem:[#allocation2 + $0xc0] ss:$2 sm:$0xff] }
 0x1da   : > { %3450 = vst [vmem:[#allocation2 + $0xe1] sm:$0xff] %v3384_v10  ;;  %v3322_v44 = vadd.f32 %v13274_v55, %v3251_v13  ;;  %v13645_v53 = vpop.permute.xlu1 %756  ;;  %v299_v31 = vld [vmem:[%s12229_s13 + $0x188] sm:$0xff]  ;;  %v298_v45 = vld [vmem:[%s12229_s13 + $0x180] sm:$0xff] }
 0x1db   : > { %v3387_v22 = vmax.f32 %v3323_v23, 0.0  ;;  %v13647_v16 = vpop.permute.xlu0 %751  ;;  %2276 = vperm.xlu1 %11839, %v9416_v34   ;;  %v301_v34 = vld [vmem:[%s12229_s13 + $0x198] sm:$0xff]  ;;  %v300_v23 = vld [vmem:[%s12229_s13 + $0x190] sm:$0xff] }
 0x1dc   : > { %v3386_v57 = vmax.f32 %v3322_v44, 0.0  ;;  %2271 = vperm.xlu0 %11838, %v9415_v18  }
 0x1dd   : > { %3453 = vst [vmem:[#allocation2 + $0xf9] sm:$0xff] %v3387_v22  ;;  %v3644_v54 = vld [vmem:[#allocation2 + $0xd1] ss:$2 sm:$0xff]  ;;  %v3564_v8 = vld [vmem:[#allocation2 + $0xd0] ss:$2 sm:$0xff]  ;;  %v9296_v22 = vld [vmem:[%s12229_s13 + $0x388] sm:$0xff] }
 0x1de   : > { %3452 = vst [vmem:[#allocation2 + $0xf1] sm:$0xff] %v3386_v57  ;;  %v13651_v55 = vpop.permute.xlu1 %1136  ;;  %v13653_v61 = vpack.c.bf16 %v3644_v54, %v3642_v27  ;;  %v3607_v24 = vpack.c.bf16 %v3564_v8, %v3562_v46  ;;  %v13718_v27 = vld [vmem:[%s16815_s1] ss:$0 sm:$0xff] }
 0x1df   : > { %v13655_v51 = vpop.permute.xlu0 %1131  ;;  %2286 = vperm.xlu1 %11839, %v9418_v3   ;;  %v1328_v57 = vmul.f32 %v13502_v14, %v13651_v55  ;;  %v938_v54 = vmul.f32 %v13718_v27, %v13637_v32  ;;  %v937_v46 = vmul.f32 %v13718_v27, %v13639_v52 }
 0x1e0   : > { %16898 = vst [vmem:[#allocation15_spill] sm:$0xff] %v13653_v61  ;;  %2281 = vperm.xlu0 %11838, %v9417_v29   ;;  %10659 = vmatprep.mubr.bf16.mxu0 %v13653_v61  ;;  %v1327_v3 = vmul.f32 %v13502_v14, %v13655_v51  ;;  %v9295_v29 = vld [vmem:[%s12229_s13 + $0x380] sm:$0xff]  ;;  %v1909_v52 = vmul.f32 %v13718_v27, %v13655_v51  ;;  %v9297_v51 = vld [vmem:[%s12229_s13 + $0x390] sm:$0xff] }
 0x1e1   : > { %10707 = vmatprep.mubr.bf16.mxu1 %v3607_v24  ;;  %v3646_v26 = vld [vmem:[#allocation2 + $0xe1] ss:$2 sm:$0xff]  ;;  %v3566_v5 = vld [vmem:[#allocation2 + $0xe0] ss:$2 sm:$0xff] }
 0x1e2   : > { %v13660_v4 = vpop.permute.xlu1 %1146 }
 0x1e3   : > { %v13662_v62 = vpop.permute.xlu0 %1141  ;;  %2296 = vperm.xlu1 %11839, %v9420_v50   ;;  %v1330_v8 = vmul.f32 %v13502_v14, %v13660_v4  ;;  %v940_v50 = vmul.f32 %v13718_v27, %v13645_v53 }
 0x1e4   : > { %2291 = vperm.xlu0 %11838, %v9419_v36   ;;  %v939_v36 = vmul.f32 %v13718_v27, %v13647_v16  ;;  %v1329_v32 = vmul.f32 %v13502_v14, %v13662_v62 }
 0x1e5   : > { %v3648_v30 = vld [vmem:[#allocation2 + $0xf1] ss:$2 sm:$0xff]  ;;  %v3568_v39 = vld [vmem:[#allocation2 + $0xf0] ss:$2 sm:$0xff] }
 0x1e6   : > { %v13666_v28 = vpop.permute.xlu1 %1590  ;;  %v13668_v6 = vpack.c.bf16 %v3648_v30, %v3646_v26  ;;  %v3608_v38 = vpack.c.bf16 %v3568_v39, %v3566_v5  ;;  %v1392_v30 = vadd.f32 %v1328_v57, %v938_v54  ;;  %v1391_v5 = vadd.f32 %v1327_v3, %v937_v46  ;;  %v9360_v3 = vld [vmem:[%s12229_s13 + $0x588] sm:$0xff] }
 0x1e7   : > { %v13670_v1 = vpop.permute.xlu0 %1585  ;;  %2306 = vperm.xlu1 %11839, %v9422_v59   ;;  %v1910_v59 = vmul.f32 %v13718_v27, %v13651_v55  ;;  %v1782_v26 = vmul.f32 %v13515_v21, %v13666_v28  ;;  %v1974_v53 = vmul.f32 %v13502_v14, %v13666_v28  ;;  %v9298_v55 = vld [vmem:[%s12229_s13 + $0x398] sm:$0xff]  ;;  %v1912_v39 = vmul.f32 %v13718_v27, %v13660_v4  ;;  %v13762_v4 = vpop.f32.mrf.mxu1 }
 0x1e8   : > { %16899 = vst [vmem:[#allocation16_spill] sm:$0xff] %v13668_v6  ;;  %2301 = vperm.xlu0 %11838, %v9421_v63   ;;  %10660 = vmatmul.mubr.bf16.gmra.mxu0 %v13668_v6  ;;  %v1781_v16 = vmul.f32 %v13515_v21, %v13670_v1  ;;  %16901 = vst [vmem:[#allocation18_spill] sm:$0xff] %v13762_v4 }
 0x1e9   : > { %10708 = vmatmul.mubr.bf16.gmra.mxu1 %v3608_v38  ;;  %v1973_v38 = vmul.f32 %v13502_v14, %v13670_v1 }
 0x1ea   : > { %v13675_v19 = vpop.permute.xlu1 %1600 }
 0x1eb   : > { %v13677_v60 = vpop.permute.xlu0 %1595  ;;  %2980 = vperm.xlu1 %11839, %v9480_v56   ;;  %v13752_v56 = vpop.f32.mrf.mxu0 }
 0x1ec   : > { %2975 = vperm.xlu0 %11838, %v9479_v7   ;;  %16900 = vst [vmem:[#allocation17_spill] sm:$0xff] %v13752_v56  ;;  %v1394_v7 = vadd.f32 %v1330_v8, %v940_v50  ;;  %v13791_v54 = vmul.f32 %v13718_v27, %v13677_v60  ;;  %v13795_v8 = vadd.f32 %v1973_v38, %v1909_v52  ;;  %v9359_v50 = vld [vmem:[%s12229_s13 + $0x580] sm:$0xff] }
 0x1ee   : > { %v13681_v49 = vpop.permute.xlu1 %766 }
 0x1ef   : > { %v13683_v20 = vpop.permute.xlu0 %761  ;;  %2990 = vperm.xlu1 %11839, %v9482_v15   ;;  %v1911_v15 = vmul.f32 %v13718_v27, %v13662_v62  ;;  %v1975_v62 = vmul.f32 %v13502_v14, %v13677_v60  ;;  %v942_v52 = vmul.f32 %v13718_v27, %v13681_v49 }
 0x1f0   : > { %2985 = vperm.xlu0 %11838, %v9481_v42   ;;  %v1784_v42 = vmul.f32 %v13515_v21, %v13675_v19 }
 0x1f2   : > { %v13687_v40 = vpop.permute.xlu1 %776 }
 0x1f3   : > { %v13689_v17 = vpop.permute.xlu0 %771  ;;  %3000 = vperm.xlu1 %11839, %v9484_v48   ;;  %v1976_v48 = vmul.f32 %v13502_v14, %v13675_v19  ;;  %v944_v38 = vmul.f32 %v13718_v27, %v13687_v40  ;;  %v9361_v40 = vld [vmem:[%s12229_s13 + $0x590] sm:$0xff] }
 0x1f4   : > { %2995 = vperm.xlu0 %11838, %v9483_v47  }
 0x1f6   : > { %v13693_v9 = vpop.permute.xlu1 %1156 }
 0x1f7   : > { %v13695_v37 = vpop.permute.xlu0 %1151  ;;  %3010 = vperm.xlu1 %11839, %v9486_v41   ;;  %v1393_v41 = vadd.f32 %v1329_v32, %v939_v36  ;;  %v1332_v46 = vmul.f32 %v13502_v14, %v13693_v9  ;;  %v13798_v36 = vadd.f32 %v1784_v42, %v1394_v7  ;;  %v9362_v42 = vld [vmem:[%s12229_s13 + $0x598] sm:$0xff] }
 0x1f8   : > { %3005 = vperm.xlu0 %11838, %v9485_v12   ;;  %v13766_v12 = vmul.f32 %v13718_v27, %v13666_v28  ;;  %v13782_v28 = vadd.f32 %v1974_v53, %v1910_v59  ;;  %v1331_v59 = vmul.f32 %v13502_v14, %v13695_v37 }
 0x1fa   : > { %v13699_v10 = vpop.permute.xlu1 %1166 }
 0x1fb   : > { %v13701_v13 = vpop.permute.xlu0 %1161  ;;  %826 = vperm.xlu1 %11839, %v299_v31   ;;  %v1783_v31 = vmul.f32 %v13515_v21, %v13677_v60 }
 0x1fc   : > { %821 = vperm.xlu0 %11838, %v298_v45  }
 0x1fd   : > { %v13808_v53 = vadd.f32 %v1783_v31, %v1393_v41  ;;  %v1914_v41 = vmul.f32 %v13718_v27, %v13693_v9  ;;  %v1916_v9 = vmul.f32 %v13718_v27, %v13699_v10 }
 0x1fe   : > { %v13705_v18 = vpop.permute.xlu1 %1610 }
 0x1ff   : > { %v13707_v44 = vpop.permute.xlu0 %1605  ;;  %836 = vperm.xlu1 %11839, %v301_v34   ;;  %v13774_v34 = vadd.f32 %v1782_v26, %v1392_v30  ;;  %v13804_v26 = vadd.f32 %v1976_v48, %v1912_v39  ;;  %v13814_v30 = vadd.f32 %v1975_v62, %v1911_v15  ;;  %v941_v39 = vmul.f32 %v13718_v27, %v13683_v20 }
 0x200   : > { %831 = vperm.xlu0 %11838, %v300_v23   ;;  %v13776_v23 = vadd.f32 %v1781_v16, %v1391_v5  ;;  %v1334_v16 = vmul.f32 %v13502_v14, %v13699_v10  ;;  %v943_v15 = vmul.f32 %v13718_v27, %v13689_v17  ;;  %v1396_v48 = vadd.f32 %v1332_v46, %v942_v52  ;;  %v303_v10 = vld [vmem:[%s12229_s13 + $0x1a8] sm:$0xff] }
 0x201   : > { %v1913_v20 = vmul.f32 %v13718_v27, %v13695_v37  ;;  %v1395_v62 = vadd.f32 %v1331_v59, %v941_v39  ;;  %v1915_v37 = vmul.f32 %v13718_v27, %v13701_v13  ;;  %v13846_v52 = vmul.f32 %v13718_v27, %v13705_v18 }
 0x202   : > { %v13726_v24 = vpop.permute.xlu1 %1620  ;;  %v1398_v46 = vadd.f32 %v1334_v16, %v944_v38  ;;  %v1977_v16 = vmul.f32 %v13502_v14, %v13707_v44 }
 0x203   : > { %v13736_v63 = vpop.permute.xlu0 %1615  ;;  %1216 = vperm.xlu1 %11839, %v9296_v22   ;;  %v13780_v22 = vmul.f32 %v13718_v27, %v13670_v1  ;;  %v1980_v39 = vmul.f32 %v13502_v14, %v13726_v24 }
 0x204   : > { %1211 = vperm.xlu0 %11838, %v9295_v29   ;;  %v13787_v29 = vmul.f32 %v13718_v27, %v13675_v19 }
 0x206   : > { %v13760_v47 = vpop.permute.xlu1 %2236 }
 0x207   : > { %v13772_v45 = vpop.permute.xlu0 %2231  ;;  %1226 = vperm.xlu1 %11839, %v9298_v55   ;;  %v10653_v57 = vpop.f32.mrf.mxu0  ;;  %v2422_v38 = vmul.f32 %v13515_v21, %v13760_v47  ;;  %v2678_v4 = vmul.f32 %v13502_v14, %v13760_v47  ;;  %v2041_v47 = vadd.f32 %v1977_v16, %v1913_v20 }
 0x208   : > { %1221 = vperm.xlu0 %11838, %v9297_v51   ;;  %v10701_v1 = vpop.f32.mrf.mxu1  ;;  %v1333_v51 = vmul.f32 %v13502_v14, %v13701_v13  ;;  %v1788_v13 = vmul.f32 %v13515_v21, %v13726_v24 }
 0x209   : > { %v13802_v32 = vadd.f32 %v10701_v1, %v10653_v57  ;;  %v3955_v19 = vpop.f32.mrf.mxu0  ;;  %v1786_v57 = vmul.f32 %v13515_v21, %v13705_v18 }
 0x20a   : > { %v13806_v60 = vpop.permute.xlu1 %2246  ;;  %v4164_v55 = vpop.f32.mrf.mxu1 }
 0x20b   : > { %16902 = vst [vmem:[#allocation19_spill] sm:$0xff] %v13802_v32  ;;  %v2242_v5 = vpop.permute.xlu0 %2241  ;;  %1670 = vperm.xlu1 %11839, %v9360_v3   ;;  %v13822_v7 = vadd.f32 %v4164_v55, %v3955_v19  ;;  %v10654_v49 = vpop.f32.mrf.mxu0  ;;  %v1978_v3 = vmul.f32 %v13502_v14, %v13705_v18  ;;  %v1397_v19 = vadd.f32 %v1333_v51, %v943_v15  ;;  %v302_v51 = vld [vmem:[%s12229_s13 + $0x1a0] sm:$0xff] }
 0x20c   : > { %1665 = vperm.xlu0 %11838, %v9359_v50   ;;  %v10702_v31 = vpop.f32.mrf.mxu1  ;;  %v1785_v50 = vmul.f32 %v13515_v21, %v13707_v44  ;;  %v13852_v55 = vmul.f32 %v13718_v27, %v13707_v44  ;;  %v2421_v18 = vmul.f32 %v13515_v21, %v13772_v45  ;;  %v1787_v44 = vmul.f32 %v13515_v21, %v13736_v63 }
 0x20d   : > { %16903 = vst [vmem:[#allocation20_spill] sm:$0xff] %v13822_v7  ;;  %v13836_v1 = vadd.f32 %v10702_v31, %v10654_v49  ;;  %v13864_v49 = vadd.f32 %v1786_v57, %v1396_v48  ;;  %v2042_v15 = vadd.f32 %v1978_v3, %v1914_v41  ;;  %v2424_v48 = vmul.f32 %v13515_v21, %v13806_v60  ;;  %v305_v3 = vld [vmem:[%s12229_s13 + $0x1b8] sm:$0xff] }
 0x20e   : > { %v2257_v17 = vpop.permute.xlu1 %2256  ;;  %v2423_v57 = vmul.f32 %v13515_v21, %v2242_v5  ;;  %v13887_v41 = vmul.f32 %v13718_v27, %v13736_v63  ;;  %v2486_v7 = vadd.f32 %v2422_v38, %v13782_v28  ;;  %v13896_v32 = vadd.f32 %v1980_v39, %v1916_v9  ;;  %v9300_v39 = vld [vmem:[%s12229_s13 + $0x3a8] sm:$0xff]  ;;  %v9299_v38 = vld [vmem:[%s12229_s13 + $0x3a0] sm:$0xff] }
 0x20f   : > { %16904 = vst [vmem:[#allocation21_spill] sm:$0xff] %v13836_v1  ;;  %v2252_v59 = vpop.permute.xlu0 %2251  ;;  %1680 = vperm.xlu1 %11839, %v9362_v42   ;;  %v1979_v42 = vmul.f32 %v13502_v14, %v13736_v63  ;;  %v13883_v1 = vmul.f32 %v13718_v27, %v13726_v24  ;;  %v304_v24 = vld [vmem:[%s12229_s13 + $0x1b0] sm:$0xff]  ;;  %v13899_v11 = vadd.f32 %v1787_v44, %v1397_v19 }
 0x210   : > { %1675 = vperm.xlu0 %11838, %v9361_v40   ;;  %v13872_v40 = vadd.f32 %v1785_v50, %v1395_v62  ;;  %v2677_v62 = vmul.f32 %v13502_v14, %v13772_v45  ;;  %v13892_v50 = vadd.f32 %v1788_v13, %v1398_v46  ;;  %v2680_v63 = vmul.f32 %v13502_v14, %v13806_v60 }
 0x211   : > { %v2679_v45 = vmul.f32 %v13502_v14, %v2242_v5  ;;  %v13904_v20 = vadd.f32 %v1979_v42, %v1915_v37  ;;  %v2742_v46 = vadd.f32 %v2678_v4, %v13766_v12  ;;  %v2488_v28 = vadd.f32 %v2424_v48, %v13804_v26 }
 0x212   : > { %v13870_v31 = vpop.permute.xlu1 %2266  ;;  %v2741_v13 = vadd.f32 %v2677_v62, %v13780_v22  ;;  %v2426_v60 = vmul.f32 %v13515_v21, %v2257_v17  ;;  %v2682_v5 = vmul.f32 %v13502_v14, %v2257_v17  ;;  %v2550_v4 = vmax.f32 %v13774_v34, %v2486_v7 }
 0x213   : > { %v13879_v56 = vpop.permute.xlu0 %2261  ;;  %846 = vperm.xlu1 %11839, %v303_v10   ;;  %v2485_v10 = vadd.f32 %v2421_v18, %v13795_v8  ;;  %v2487_v8 = vadd.f32 %v2423_v57, %v13814_v30  ;;  %v2425_v26 = vmul.f32 %v13515_v21, %v2252_v59  ;;  %v2744_v18 = vadd.f32 %v2680_v63, %v13787_v29 }
 0x214   : > { %841 = vperm.xlu0 %11838, %v302_v51   ;;  %v2743_v22 = vadd.f32 %v2679_v45, %v13791_v54  ;;  %v2681_v51 = vmul.f32 %v13502_v14, %v2252_v59  ;;  %v2552_v42 = vmax.f32 %v13798_v36, %v2488_v28  ;;  %v2490_v57 = vadd.f32 %v2426_v60, %v2042_v15  ;;  %v9302_v59 = vld [vmem:[%s12229_s13 + $0x3b8] sm:$0xff]  ;;  %v9301_v15 = vld [vmem:[%s12229_s13 + $0x3b0] sm:$0xff] }
 0x215   : > { %v2549_v12 = vmax.f32 %v13776_v23, %v2485_v10  ;;  %v2551_v48 = vmax.f32 %v13808_v53, %v2487_v8  ;;  %v2746_v29 = vadd.f32 %v2682_v5, %v13846_v52  ;;  %v2428_v36 = vmul.f32 %v13515_v21, %v13870_v31  ;;  %v13933_v53 = vld [vmem:[%s16817_s3] ss:$0 sm:$0xff] }
 0x216   : > { %v2941_v16 = vpop.permute.xlu1 %2940  ;;  %v2745_v52 = vadd.f32 %v2681_v51, %v13852_v55  ;;  %v2427_v63 = vmul.f32 %v13515_v21, %v13879_v56  ;;  %v2683_v55 = vmul.f32 %v13502_v14, %v13879_v56 }
 0x217   : > { %v3126_v9 = vmul.f32 %v13515_v21, %v2941_v16  ;;  %v2936_v19 = vpop.permute.xlu0 %2935  ;;  %856 = vperm.xlu1 %11839, %v305_v3   ;;  %v2489_v3 = vadd.f32 %v2425_v26, %v2041_v47  ;;  %v9363_v26 = vld [vmem:[%s12229_s13 + $0x5a0] sm:$0xff] }
 0x218   : > { %v3125_v37 = vmul.f32 %v13515_v21, %v2936_v19  ;;  %851 = vperm.xlu0 %11838, %v304_v24  }
 0x219   : > { %v3190_v30 = vadd.f32 %v3126_v9, %v2742_v46  ;;  %v2684_v46 = vmul.f32 %v13502_v14, %v13870_v31  ;;  %v2492_v31 = vadd.f32 %v2428_v36, %v13896_v32  ;;  %v9424_v36 = vld [vmem:[%s12229_s13 + $0x788] sm:$0xff] }
 0x21a   : > { %v3189_v17 = vadd.f32 %v3125_v37, %v2741_v13  ;;  %v2951_v44 = vpop.permute.xlu1 %2950  ;;  %v9364_v37 = vld [vmem:[%s12229_s13 + $0x5a8] sm:$0xff] }
 0x21b   : > { %v3254_v34 = vmax.f32 %v2550_v4, %v3190_v30  ;;  %v3128_v23 = vmul.f32 %v13515_v21, %v2951_v44  ;;  %v2946_v7 = vpop.permute.xlu0 %2945  ;;  %1236 = vperm.xlu1 %11839, %v9300_v39   ;;  %v2554_v39 = vmax.f32 %v13864_v49, %v2490_v57  ;;  %v2553_v30 = vmax.f32 %v13872_v40, %v2489_v3 }
 0x21c   : > { %v3253_v62 = vmax.f32 %v2549_v12, %v3189_v17  ;;  %v3127_v54 = vmul.f32 %v13515_v21, %v2946_v7  ;;  %1231 = vperm.xlu0 %11838, %v9299_v38   ;;  %v2491_v38 = vadd.f32 %v2427_v63, %v13904_v20  ;;  %v2747_v44 = vadd.f32 %v2683_v55, %v13887_v41  ;;  %v9365_v7 = vld [vmem:[%s12229_s13 + $0x5b0] sm:$0xff] }
 0x21d   : > { %v3325_v10 = vadd.f32 %v13933_v53, %v3254_v34  ;;  %v3192_v24 = vadd.f32 %v3128_v23, %v2744_v18  ;;  %v2556_v34 = vmax.f32 %v13892_v50, %v2492_v31 }
 0x21e   : > { %v3324_v47 = vadd.f32 %v13933_v53, %v3253_v62  ;;  %v3191_v45 = vadd.f32 %v3127_v54, %v2743_v22  ;;  %v2961_v16 = vpop.permute.xlu1 %2960  ;;  %v2748_v22 = vadd.f32 %v2684_v46, %v13883_v1  ;;  %v2555_v57 = vmax.f32 %v13899_v11, %v2491_v38 }
 0x21f   : > { %v3389_v28 = vmax.f32 %v3325_v10, 0.0  ;;  %v3256_v8 = vmax.f32 %v2552_v42, %v3192_v24  ;;  %v3130_v9 = vmul.f32 %v13515_v21, %v2961_v16  ;;  %v2956_v19 = vpop.permute.xlu0 %2955  ;;  %1246 = vperm.xlu1 %11839, %v9302_v59   ;;  %v9423_v10 = vld [vmem:[%s12229_s13 + $0x780] sm:$0xff]  ;;  %v9425_v16 = vld [vmem:[%s12229_s13 + $0x790] sm:$0xff] }
 0x220   : > { %v3388_v13 = vmax.f32 %v3324_v47, 0.0  ;;  %v3255_v60 = vmax.f32 %v2551_v48, %v3191_v45  ;;  %v3129_v5 = vmul.f32 %v13515_v21, %v2956_v19  ;;  %1241 = vperm.xlu0 %11838, %v9301_v15   ;;  %v9366_v48 = vld [vmem:[%s12229_s13 + $0x5b8] sm:$0xff] }
 0x221   : > { %3455 = vst [vmem:[#allocation2 + $0x109] sm:$0xff] %v3389_v28  ;;  %v3327_v4 = vadd.f32 %v13933_v53, %v3256_v8  ;;  %v3194_v12 = vadd.f32 %v3130_v9, %v2746_v29  ;;  %v9426_v45 = vld [vmem:[%s12229_s13 + $0x798] sm:$0xff] }
 0x222   : > { %3454 = vst [vmem:[#allocation2 + $0x101] sm:$0xff] %v3388_v13  ;;  %v3326_v14 = vadd.f32 %v13933_v53, %v3255_v60  ;;  %v3193_v56 = vadd.f32 %v3129_v5, %v2745_v52  ;;  %v2971_v18 = vpop.permute.xlu1 %2970  ;;  %v9428_v5 = vld [vmem:[%s12229_s13 + $0x7a8] sm:$0xff] }
 0x223   : > { %v3391_v49 = vmax.f32 %v3327_v4, 0.0  ;;  %v3258_v32 = vmax.f32 %v2554_v39, %v3194_v12  ;;  %v3132_v51 = vmul.f32 %v13515_v21, %v2971_v18  ;;  %v2966_v17 = vpop.permute.xlu0 %2965  ;;  %1690 = vperm.xlu1 %11839, %v9364_v37   ;;  %v9427_v37 = vld [vmem:[%s12229_s13 + $0x7a0] sm:$0xff]  ;;  %v9430_v4 = vld [vmem:[%s12229_s13 + $0x7b8] sm:$0xff]  ;;  %v9429_v12 = vld [vmem:[%s12229_s13 + $0x7b0] sm:$0xff] }
 0x224   : > { %v3390_v40 = vmax.f32 %v3326_v14, 0.0  ;;  %v3257_v42 = vmax.f32 %v2553_v30, %v3193_v56  ;;  %v3131_v20 = vmul.f32 %v13515_v21, %v2966_v17  ;;  %1685 = vperm.xlu0 %11838, %v9363_v26  }
 0x225   : > { %3457 = vst [vmem:[#allocation2 + $0x119] sm:$0xff] %v3391_v49  ;;  %v3329_v1 = vadd.f32 %v13933_v53, %v3258_v32  ;;  %v3196_v23 = vadd.f32 %v3132_v51, %v2748_v22  ;;  %v9488_v32 = vld [vmem:[%s12229_s13 + $0x988] sm:$0xff]  ;;  %v9487_v51 = vld [vmem:[%s12229_s13 + $0x980] sm:$0xff] }
 0x226   : > { %3456 = vst [vmem:[#allocation2 + $0x111] sm:$0xff] %v3390_v40  ;;  %v3328_v41 = vadd.f32 %v13933_v53, %v3257_v42  ;;  %v3195_v29 = vadd.f32 %v3131_v20, %v2747_v44  ;;  %v13965_v62 = vpop.permute.xlu1 %786  ;;  %v9490_v40 = vld [vmem:[%s12229_s13 + $0x998] sm:$0xff]  ;;  %v9489_v42 = vld [vmem:[%s12229_s13 + $0x990] sm:$0xff] }
 0x227   : > { %v3393_v21 = vmax.f32 %v3329_v1, 0.0  ;;  %v3260_v54 = vmax.f32 %v2556_v34, %v3196_v23  ;;  %v13967_v59 = vpop.permute.xlu0 %781  ;;  %1700 = vperm.xlu1 %11839, %v9366_v48   ;;  %v9492_v34 = vld [vmem:[%s12229_s13 + $0x9a8] sm:$0xff]  ;;  %v9491_v1 = vld [vmem:[%s12229_s13 + $0x9a0] sm:$0xff] }
 0x228   : > { %v3392_v50 = vmax.f32 %v3328_v41, 0.0  ;;  %v3259_v3 = vmax.f32 %v2555_v57, %v3195_v29  ;;  %1695 = vperm.xlu0 %11838, %v9365_v7   ;;  %v9494_v57 = vld [vmem:[%s12229_s13 + $0x9b8] sm:$0xff]  ;;  %v9493_v41 = vld [vmem:[%s12229_s13 + $0x9b0] sm:$0xff] }
 0x229   : > { %3459 = vst [vmem:[#allocation2 + $0x129] sm:$0xff] %v3393_v21  ;;  %v3331_v11 = vadd.f32 %v13933_v53, %v3260_v54  ;;  %v3650_v46 = vld [vmem:[#allocation2 + $0x101] ss:$2 sm:$0xff]  ;;  %v3570_v8 = vld [vmem:[#allocation2 + $0x100] ss:$2 sm:$0xff] }
 0x22a   : > { %3458 = vst [vmem:[#allocation2 + $0x121] sm:$0xff] %v3392_v50  ;;  %v3330_v24 = vadd.f32 %v13933_v53, %v3259_v3  ;;  %v13973_v15 = vpop.permute.xlu1 %796  ;;  %v307_v54 = vld [vmem:[%s12229_s13 + $0x1c8] sm:$0xff]  ;;  %v306_v50 = vld [vmem:[%s12229_s13 + $0x1c0] sm:$0xff] }
 0x22b   : > { %v3395_v52 = vmax.f32 %v3331_v11, 0.0  ;;  %v13975_v63 = vpop.permute.xlu0 %791  ;;  %2316 = vperm.xlu1 %11839, %v9424_v36   ;;  %v309_v11 = vld [vmem:[%s12229_s13 + $0x1d8] sm:$0xff] }
 0x22c   : > { %v3394_v47 = vmax.f32 %v3330_v24, 0.0  ;;  %2311 = vperm.xlu0 %11838, %v9423_v10   ;;  %v308_v10 = vld [vmem:[%s12229_s13 + $0x1d0] sm:$0xff] }
 0x22d   : > { %3461 = vst [vmem:[#allocation2 + $0x139] sm:$0xff] %v3395_v52  ;;  %v3652_v28 = vld [vmem:[#allocation2 + $0x111] ss:$2 sm:$0xff]  ;;  %v3572_v9 = vld [vmem:[#allocation2 + $0x110] ss:$2 sm:$0xff] }
 0x22e   : > { %3460 = vst [vmem:[#allocation2 + $0x131] sm:$0xff] %v3394_v47  ;;  %v13979_v19 = vpop.permute.xlu1 %1176  ;;  %v13981_v55 = vpack.c.bf16 %v3652_v28, %v3650_v46  ;;  %v3609_v13 = vpack.c.bf16 %v3572_v9, %v3570_v8  ;;  %v9304_v47 = vld [vmem:[%s12229_s13 + $0x3c8] sm:$0xff]  ;;  %v9303_v28 = vld [vmem:[%s12229_s13 + $0x3c0] sm:$0xff]  ;;  %v946_v8 = vmul.f32 %v13718_v27, %v13965_v62  ;;  %v945_v9 = vmul.f32 %v13718_v27, %v13967_v59 }
 0x22f   : > { %v13983_v60 = vpop.permute.xlu0 %1171  ;;  %2326 = vperm.xlu1 %11839, %v9426_v45   ;;  %v14041_v45 = vld [vmem:[%s16815_s1 + $0x1] ss:$0 sm:$0xff] }
 0x230   : > { %16905 = vst [vmem:[#allocation22_spill] sm:$0xff] %v13981_v55  ;;  %2321 = vperm.xlu0 %11838, %v9425_v16   ;;  %10663 = vmatprep.mubr.bf16.mxu0 %v13981_v55  ;;  %v1336_v16 = vmul.f32 %v14041_v45, %v13979_v19  ;;  %v1335_v46 = vmul.f32 %v14041_v45, %v13983_v60 }
 0x231   : > { %10711 = vmatprep.mubr.bf16.mxu1 %v3609_v13  ;;  %v3654_v26 = vld [vmem:[#allocation2 + $0x121] ss:$2 sm:$0xff]  ;;  %v3574_v38 = vld [vmem:[#allocation2 + $0x120] ss:$2 sm:$0xff]  ;;  %v948_v13 = vmul.f32 %v13718_v27, %v13973_v15  ;;  %v1917_v62 = vmul.f32 %v13718_v27, %v13983_v60 }
 0x232   : > { %v13988_v39 = vpop.permute.xlu1 %1186  ;;  %v14071_v15 = vld [vmem:[%s16815_s1 + $0x2] ss:$0 sm:$0xff] }
 0x233   : > { %v13990_v31 = vpop.permute.xlu0 %1181  ;;  %2336 = vperm.xlu1 %11839, %v9428_v5   ;;  %v1338_v5 = vmul.f32 %v14041_v45, %v13988_v39 }
 0x234   : > { %2331 = vperm.xlu0 %11838, %v9427_v37   ;;  %v1337_v59 = vmul.f32 %v14041_v45, %v13990_v31 }
 0x235   : > { %v3656_v30 = vld [vmem:[#allocation2 + $0x131] ss:$2 sm:$0xff]  ;;  %v3576_v14 = vld [vmem:[#allocation2 + $0x130] ss:$2 sm:$0xff] }
 0x236   : > { %v13994_v56 = vpop.permute.xlu1 %1630  ;;  %v13996_v18 = vpack.c.bf16 %v3656_v30, %v3654_v26  ;;  %v3610_v22 = vpack.c.bf16 %v3576_v14, %v3574_v38  ;;  %v9306_v38 = vld [vmem:[%s12229_s13 + $0x3d8] sm:$0xff]  ;;  %v1400_v14 = vadd.f32 %v1336_v16, %v946_v8 }
 0x237   : > { %v13998_v49 = vpop.permute.xlu0 %1625  ;;  %2346 = vperm.xlu1 %11839, %v9430_v4   ;;  %v947_v4 = vmul.f32 %v13718_v27, %v13975_v63  ;;  %v1790_v63 = vmul.f32 %v14071_v15, %v13994_v56 }
 0x238   : > { %16906 = vst [vmem:[#allocation23_spill] sm:$0xff] %v13996_v18  ;;  %2341 = vperm.xlu0 %11838, %v9429_v12   ;;  %10664 = vmatmul.mubr.bf16.gmra.mxu0 %v13996_v18  ;;  %v1918_v12 = vmul.f32 %v13718_v27, %v13979_v19  ;;  %v1982_v19 = vmul.f32 %v14041_v45, %v13994_v56 }
 0x239   : > { %10712 = vmatmul.mubr.bf16.gmra.mxu1 %v3610_v22  ;;  %v1789_v60 = vmul.f32 %v14071_v15, %v13998_v49  ;;  %v1981_v30 = vmul.f32 %v14041_v45, %v13998_v49  ;;  %v1399_v22 = vadd.f32 %v1335_v46, %v945_v9  ;;  %v14111_v16 = vadd.f32 %v1790_v63, %v1400_v14 }
 0x23a   : > { %v14003_v17 = vpop.permute.xlu1 %1640  ;;  %v14113_v46 = vadd.f32 %v1982_v19, %v1918_v12 }
 0x23b   : > { %v14005_v44 = vpop.permute.xlu0 %1635  ;;  %3020 = vperm.xlu1 %11839, %v9488_v32   ;;  %v1920_v32 = vmul.f32 %v13718_v27, %v13988_v39  ;;  %v14097_v39 = vpop.f32.mrf.mxu1  ;;  %v14117_v8 = vadd.f32 %v1981_v30, %v1917_v62  ;;  %v9367_v62 = vld [vmem:[%s12229_s13 + $0x5c0] sm:$0xff] }
 0x23c   : > { %3015 = vperm.xlu0 %11838, %v9487_v51   ;;  %v1919_v51 = vmul.f32 %v13718_v27, %v13990_v31  ;;  %16908 = vst [vmem:[#allocation25_spill] sm:$0xff] %v14097_v39  ;;  %v1983_v31 = vmul.f32 %v14041_v45, %v14005_v44  ;;  %v14130_v12 = vmul.f32 %v13718_v27, %v14005_v44 }
 0x23e   : > { %v14009_v20 = vpop.permute.xlu1 %806 }
 0x23f   : > { %v14011_v48 = vpop.permute.xlu0 %801  ;;  %3030 = vperm.xlu1 %11839, %v9490_v40   ;;  %v9305_v40 = vld [vmem:[%s12229_s13 + $0x3d0] sm:$0xff] }
 0x240   : > { %3025 = vperm.xlu0 %11838, %v9489_v42   ;;  %v14087_v42 = vpop.f32.mrf.mxu0 }
 0x241   : > { %16907 = vst [vmem:[#allocation24_spill] sm:$0xff] %v14087_v42 }
 0x242   : > { %v14015_v23 = vpop.permute.xlu1 %816 }
 0x243   : > { %v14017_v7 = vpop.permute.xlu0 %811  ;;  %3040 = vperm.xlu1 %11839, %v9492_v34   ;;  %v1402_v34 = vadd.f32 %v1338_v5, %v948_v13 }
 0x244   : > { %3035 = vperm.xlu0 %11838, %v9491_v1   ;;  %v1792_v1 = vmul.f32 %v14071_v15, %v14003_v17 }
 0x246   : > { %v14021_v29 = vpop.permute.xlu1 %1196  ;;  %v14135_v19 = vadd.f32 %v1792_v1, %v1402_v34  ;;  %v952_v34 = vmul.f32 %v13718_v27, %v14015_v23  ;;  %v951_v1 = vmul.f32 %v13718_v27, %v14017_v7 }
 0x247   : > { %v14023_v21 = vpop.permute.xlu0 %1191  ;;  %3050 = vperm.xlu1 %11839, %v9494_v57   ;;  %v1984_v57 = vmul.f32 %v14041_v45, %v14003_v17  ;;  %v1340_v13 = vmul.f32 %v14041_v45, %v14021_v29 }
 0x248   : > { %3045 = vperm.xlu0 %11838, %v9493_v41   ;;  %v1791_v41 = vmul.f32 %v14071_v15, %v14005_v44  ;;  %v949_v44 = vmul.f32 %v13718_v27, %v14011_v48 }
 0x24a   : > { %v14027_v3 = vpop.permute.xlu1 %1206 }
 0x24b   : > { %v14029_v36 = vpop.permute.xlu0 %1201  ;;  %866 = vperm.xlu1 %11839, %v307_v54   ;;  %v1342_v14 = vmul.f32 %v14041_v45, %v14027_v3 }
 0x24c   : > { %861 = vperm.xlu0 %11838, %v306_v50   ;;  %v1401_v50 = vadd.f32 %v1337_v59, %v947_v4  ;;  %v14126_v4 = vmul.f32 %v13718_v27, %v14003_v17  ;;  %v950_v17 = vmul.f32 %v13718_v27, %v14009_v20  ;;  %v1341_v20 = vmul.f32 %v14041_v45, %v14029_v36 }
 0x24e   : > { %v14033_v24 = vpop.permute.xlu1 %1650 }
 0x24f   : > { %v14035_v52 = vpop.permute.xlu0 %1645  ;;  %876 = vperm.xlu1 %11839, %v309_v11   ;;  %v14103_v11 = vmul.f32 %v13718_v27, %v13994_v56  ;;  %v9368_v56 = vld [vmem:[%s12229_s13 + $0x5c8] sm:$0xff]  ;;  %v1794_v7 = vmul.f32 %v14071_v15, %v14033_v24 }
 0x250   : > { %871 = vperm.xlu0 %11838, %v308_v10   ;;  %v14107_v10 = vmul.f32 %v13718_v27, %v13998_v49  ;;  %v1339_v49 = vmul.f32 %v14041_v45, %v14023_v21 }
 0x252   : > { %v14056_v37 = vpop.permute.xlu1 %1660 }
 0x253   : > { %v14066_v26 = vpop.permute.xlu0 %1655  ;;  %1256 = vperm.xlu1 %11839, %v9304_v47   ;;  %v1796_v39 = vmul.f32 %v14071_v15, %v14056_v37 }
 0x254   : > { %1251 = vperm.xlu0 %11838, %v9303_v28   ;;  %v14115_v28 = vadd.f32 %v1789_v60, %v1399_v22  ;;  %v14137_v60 = vadd.f32 %v1984_v57, %v1920_v32 }
 0x256   : > { %v14095_v54 = vpop.permute.xlu1 %2276 }
 0x257   : > { %v14109_v47 = vpop.permute.xlu0 %2271  ;;  %1266 = vperm.xlu1 %11839, %v9306_v38   ;;  %v14141_v38 = vadd.f32 %v1791_v41, %v1401_v50  ;;  %v9370_v41 = vld [vmem:[%s12229_s13 + $0x5d8] sm:$0xff]  ;;  %v1404_v50 = vadd.f32 %v1340_v13, %v950_v17  ;;  %v1985_v17 = vmul.f32 %v14041_v45, %v14035_v52 }
 0x258   : > { %v10657_v9 = vpop.f32.mrf.mxu0  ;;  %1261 = vperm.xlu0 %11838, %v9305_v40   ;;  %v14149_v40 = vadd.f32 %v1983_v31, %v1919_v51  ;;  %v1922_v51 = vmul.f32 %v13718_v27, %v14021_v29  ;;  %v1403_v31 = vadd.f32 %v1339_v49, %v949_v44  ;;  %v1406_v29 = vadd.f32 %v1342_v14, %v952_v34 }
 0x259   : > { %v10705_v5 = vpop.f32.mrf.mxu1  ;;  %v1923_v49 = vmul.f32 %v13718_v27, %v14029_v36  ;;  %v14187_v14 = vmul.f32 %v13718_v27, %v14035_v52  ;;  %v1988_v36 = vmul.f32 %v14041_v45, %v14056_v37  ;;  %v1795_v34 = vmul.f32 %v14071_v15, %v14066_v26 }
 0x25a   : > { %v14133_v59 = vadd.f32 %v10705_v5, %v10657_v9  ;;  %v3971_v63 = vpop.f32.mrf.mxu0  ;;  %v14139_v30 = vpop.permute.xlu1 %2286  ;;  %v1921_v9 = vmul.f32 %v13718_v27, %v14023_v21  ;;  %v1986_v5 = vmul.f32 %v14041_v45, %v14033_v24  ;;  %v1924_v21 = vmul.f32 %v13718_v27, %v14027_v3  ;;  %v311_v3 = vld [vmem:[%s12229_s13 + $0x1e8] sm:$0xff] }
 0x25b   : > { %v4180_v22 = vpop.f32.mrf.mxu1  ;;  %v2282_v32 = vpop.permute.xlu0 %2281  ;;  %1710 = vperm.xlu1 %11839, %v9368_v56   ;;  %v9369_v56 = vld [vmem:[%s12229_s13 + $0x5d0] sm:$0xff] }
 0x25c   : > { %16909 = vst [vmem:[#allocation26_spill] sm:$0xff] %v14133_v59  ;;  %v14157_v57 = vadd.f32 %v4180_v22, %v3971_v63  ;;  %v10658_v48 = vpop.f32.mrf.mxu0  ;;  %1705 = vperm.xlu0 %11838, %v9367_v62   ;;  %v1793_v62 = vmul.f32 %v14071_v15, %v14035_v52  ;;  %v1405_v22 = vadd.f32 %v1341_v20, %v951_v1 }
 0x25d   : > { %v10706_v23 = vpop.f32.mrf.mxu1  ;;  %v2430_v1 = vmul.f32 %v14071_v15, %v14095_v54  ;;  %v2429_v20 = vmul.f32 %v14071_v15, %v14109_v47  ;;  %v14201_v52 = vadd.f32 %v1794_v7, %v1404_v50  ;;  %v2431_v59 = vmul.f32 %v14071_v15, %v2282_v32  ;;  %v313_v7 = vld [vmem:[%s12229_s13 + $0x1f8] sm:$0xff] }
 0x25e   : > { %16910 = vst [vmem:[#allocation27_spill] sm:$0xff] %v14157_v57  ;;  %v14171_v13 = vadd.f32 %v10706_v23, %v10658_v48  ;;  %v2297_v63 = vpop.permute.xlu1 %2296  ;;  %v14183_v48 = vmul.f32 %v13718_v27, %v14033_v24  ;;  %v310_v24 = vld [vmem:[%s12229_s13 + $0x1e0] sm:$0xff]  ;;  %v2050_v23 = vadd.f32 %v1986_v5, %v1922_v51  ;;  %v2432_v57 = vmul.f32 %v14071_v15, %v14139_v30 }
 0x25f   : > { %v2292_v44 = vpop.permute.xlu0 %2291  ;;  %1720 = vperm.xlu1 %11839, %v9370_v41   ;;  %v1987_v41 = vmul.f32 %v14041_v45, %v14066_v26  ;;  %v2049_v18 = vadd.f32 %v1985_v17, %v1921_v9  ;;  %v14214_v50 = vadd.f32 %v1796_v39, %v1406_v29  ;;  %v14218_v51 = vmul.f32 %v13718_v27, %v14056_v37  ;;  %v312_v29 = vld [vmem:[%s12229_s13 + $0x1f0] sm:$0xff] }
 0x260   : > { %16911 = vst [vmem:[#allocation28_spill] sm:$0xff] %v14171_v13  ;;  %1715 = vperm.xlu0 %11838, %v9369_v56   ;;  %v14203_v56 = vadd.f32 %v1793_v62, %v1403_v31  ;;  %v2686_v13 = vmul.f32 %v14041_v45, %v14095_v54  ;;  %v14222_v31 = vmul.f32 %v13718_v27, %v14066_v26 }
 0x261   : > { %v2685_v54 = vmul.f32 %v14041_v45, %v14109_v47  ;;  %v14227_v5 = vadd.f32 %v1988_v36, %v1924_v21  ;;  %v14229_v9 = vadd.f32 %v1795_v34, %v1405_v22  ;;  %v2494_v39 = vadd.f32 %v2430_v1, %v14113_v46  ;;  %v9308_v34 = vld [vmem:[%s12229_s13 + $0x3e8] sm:$0xff] }
 0x262   : > { %v14205_v42 = vpop.permute.xlu1 %2306  ;;  %v2493_v62 = vadd.f32 %v2429_v20, %v14117_v8  ;;  %v14234_v37 = vadd.f32 %v1987_v41, %v1923_v49  ;;  %v2688_v27 = vmul.f32 %v14041_v45, %v14139_v30  ;;  %v2687_v26 = vmul.f32 %v14041_v45, %v2282_v32 }
 0x263   : > { %v14212_v55 = vpop.permute.xlu0 %2301  ;;  %886 = vperm.xlu1 %11839, %v311_v3   ;;  %v2434_v47 = vmul.f32 %v14071_v15, %v2297_v63  ;;  %v2750_v21 = vadd.f32 %v2686_v13, %v14103_v11  ;;  %v2496_v22 = vadd.f32 %v2432_v57, %v14137_v60  ;;  %v2495_v46 = vadd.f32 %v2431_v59, %v14149_v40  ;;  %v9307_v57 = vld [vmem:[%s12229_s13 + $0x3e0] sm:$0xff] }
 0x264   : > { %881 = vperm.xlu0 %11838, %v310_v24   ;;  %v2749_v3 = vadd.f32 %v2685_v54, %v14107_v10  ;;  %v2690_v30 = vmul.f32 %v14041_v45, %v2297_v63  ;;  %v2433_v32 = vmul.f32 %v14071_v15, %v2292_v44  ;;  %v2558_v11 = vmax.f32 %v14111_v16, %v2494_v39 }
 0x265   : > { %v2557_v60 = vmax.f32 %v14115_v28, %v2493_v62  ;;  %v2689_v59 = vmul.f32 %v14041_v45, %v2292_v44  ;;  %v2752_v13 = vadd.f32 %v2688_v27, %v14126_v4  ;;  %v2751_v10 = vadd.f32 %v2687_v26, %v14130_v12  ;;  %v9310_v12 = vld [vmem:[%s12229_s13 + $0x3f8] sm:$0xff] }
 0x266   : > { %v2981_v17 = vpop.permute.xlu1 %2980  ;;  %v2498_v63 = vadd.f32 %v2434_v47, %v2050_v23  ;;  %v2560_v24 = vmax.f32 %v14135_v19, %v2496_v22  ;;  %v2559_v41 = vmax.f32 %v14141_v38, %v2495_v46  ;;  %v2754_v44 = vadd.f32 %v2690_v30, %v14183_v48 }
 0x267   : > { %v3134_v8 = vmul.f32 %v14071_v15, %v2981_v17  ;;  %v2976_v49 = vpop.permute.xlu0 %2975  ;;  %896 = vperm.xlu1 %11839, %v313_v7   ;;  %v2497_v7 = vadd.f32 %v2433_v32, %v2049_v18  ;;  %v2753_v23 = vadd.f32 %v2689_v59, %v14187_v14  ;;  %v2436_v19 = vmul.f32 %v14071_v15, %v14205_v42  ;;  %v11856_v14 = vld [vmem:[%s16816_s2 + $0xb8] sm:$0xff]   ;;  %v9372_v32 = vld [vmem:[%s12229_s13 + $0x5e8] sm:$0xff] }
 0x268   : > { %v3133_v36 = vmul.f32 %v14071_v15, %v2976_v49  ;;  %891 = vperm.xlu0 %11838, %v312_v29   ;;  %v9309_v29 = vld [vmem:[%s12229_s13 + $0x3f0] sm:$0xff]  ;;  %v2562_v27 = vmax.f32 %v14201_v52, %v2498_v63  ;;  %v2435_v48 = vmul.f32 %v14071_v15, %v14212_v55  ;;  %v2692_v17 = vmul.f32 %v14041_v45, %v14205_v42 }
 0x269   : > { %v3198_v40 = vadd.f32 %v3134_v8, %v2750_v21  ;;  %v2691_v8 = vmul.f32 %v14041_v45, %v14212_v55  ;;  %10727 = vmatprep.subr.bf16.mxu0 %v11856_v14  ;;  %10871 = vmatprep.subr.bf16.mxu1 %v11856_v14 }
 0x26a   : > { %v3197_v1 = vadd.f32 %v3133_v36, %v2749_v3  ;;  %v2991_v20 = vpop.permute.xlu1 %2990  ;;  %v2500_v36 = vadd.f32 %v2436_v19, %v14227_v5  ;;  %10728 = vmatpush3.bf16.msra.mxu0 %v11856_v14  ;;  %v2499_v55 = vadd.f32 %v2435_v48, %v14234_v37  ;;  %v9434_v14 = vld [vmem:[%s12229_s13 + $0x7d8] sm:$0xff] }
 0x26b   : > { %v3262_v16 = vmax.f32 %v2558_v11, %v3198_v40  ;;  %v3136_v28 = vmul.f32 %v14071_v15, %v2991_v20  ;;  %v2986_v54 = vpop.permute.xlu0 %2985  ;;  %1276 = vperm.xlu1 %11839, %v9308_v34   ;;  %v9371_v11 = vld [vmem:[%s12229_s13 + $0x5e0] sm:$0xff]  ;;  %v2755_v20 = vadd.f32 %v2691_v8, %v14222_v31 }
 0x26c   : > { %v3261_v4 = vmax.f32 %v2557_v60, %v3197_v1  ;;  %v3135_v39 = vmul.f32 %v14071_v15, %v2986_v54  ;;  %1271 = vperm.xlu0 %11838, %v9307_v57   ;;  %v2561_v60 = vmax.f32 %v14203_v56, %v2497_v7  ;;  %v9373_v54 = vld [vmem:[%s12229_s13 + $0x5f0] sm:$0xff] }
 0x26d   : > { %v3333_v38 = vadd.f32 %v13933_v53, %v3262_v16  ;;  %v3200_v62 = vadd.f32 %v3136_v28, %v2752_v13  ;;  %v2756_v13 = vadd.f32 %v2692_v17, %v14218_v51  ;;  %v2564_v16 = vmax.f32 %v14214_v50, %v2500_v36  ;;  %v9433_v17 = vld [vmem:[%s12229_s13 + $0x7d0] sm:$0xff] }
 0x26e   : > { %v3332_v18 = vadd.f32 %v13933_v53, %v3261_v4  ;;  %v3199_v26 = vadd.f32 %v3135_v39, %v2751_v10  ;;  %v3001_v47 = vpop.permute.xlu1 %3000 }
 0x26f   : > { %v3397_v21 = vmax.f32 %v3333_v38, 0.0  ;;  %v3264_v22 = vmax.f32 %v2560_v24, %v3200_v62  ;;  %v3138_v52 = vmul.f32 %v14071_v15, %v3001_v47  ;;  %v2996_v46 = vpop.permute.xlu0 %2995  ;;  %1286 = vperm.xlu1 %11839, %v9310_v12   ;;  %v9432_v38 = vld [vmem:[%s12229_s13 + $0x7c8] sm:$0xff]  ;;  %v9431_v62 = vld [vmem:[%s12229_s13 + $0x7c0] sm:$0xff] }
 0x270   : > { %v3396_v49 = vmax.f32 %v3332_v18, 0.0  ;;  %v3263_v3 = vmax.f32 %v2559_v41, %v3199_v26  ;;  %v3137_v30 = vmul.f32 %v14071_v15, %v2996_v46  ;;  %1281 = vperm.xlu0 %11838, %v9309_v29   ;;  %v9374_v41 = vld [vmem:[%s12229_s13 + $0x5f8] sm:$0xff]  ;;  %v11857_v26 = vld [vmem:[%s16816_s2 + $0xb0] sm:$0xff]  }
 0x271   : > { %3463 = vst [vmem:[#allocation2 + $0x149] sm:$0xff] %v3397_v21  ;;  %v3335_v42 = vadd.f32 %v13933_v53, %v3264_v22  ;;  %v3202_v34 = vadd.f32 %v3138_v52, %v2754_v44  ;;  %v2563_v44 = vmax.f32 %v14229_v9, %v2499_v55  ;;  %10729 = vmatprep.subr.bf16.mxu0 %v11857_v26 }
 0x272   : > { %3462 = vst [vmem:[#allocation2 + $0x141] sm:$0xff] %v3396_v49  ;;  %v3334_v59 = vadd.f32 %v13933_v53, %v3263_v3  ;;  %v3201_v40 = vadd.f32 %v3137_v30, %v2753_v23  ;;  %v3011_v57 = vpop.permute.xlu1 %3010  ;;  %10730 = vmatpush3.bf16.msra.mxu0 %v11857_v26  ;;  %v9436_v30 = vld [vmem:[%s12229_s13 + $0x7e8] sm:$0xff] }
 0x273   : > { %v3399_v5 = vmax.f32 %v3335_v42, 0.0  ;;  %v3266_v10 = vmax.f32 %v2562_v27, %v3202_v34  ;;  %v3140_v63 = vmul.f32 %v14071_v15, %v3011_v57  ;;  %v3006_v1 = vpop.permute.xlu0 %3005  ;;  %1730 = vperm.xlu1 %11839, %v9372_v32   ;;  %v9435_v32 = vld [vmem:[%s12229_s13 + $0x7e0] sm:$0xff]  ;;  %v11858_v34 = vld [vmem:[%s16816_s2 + $0xa8] sm:$0xff]  }
 0x274   : > { %v3398_v56 = vmax.f32 %v3334_v59, 0.0  ;;  %v3265_v24 = vmax.f32 %v2561_v60, %v3201_v40  ;;  %v3139_v37 = vmul.f32 %v14071_v15, %v3006_v1  ;;  %1725 = vperm.xlu0 %11838, %v9371_v11   ;;  %v9438_v11 = vld [vmem:[%s12229_s13 + $0x7f8] sm:$0xff]  ;;  %v9437_v60 = vld [vmem:[%s12229_s13 + $0x7f0] sm:$0xff]  ;;  %10731 = vmatprep.subr.bf16.mxu0 %v11858_v34  ;;  %v9496_v1 = vld [vmem:[%s12229_s13 + $0x9c8] sm:$0xff] }
 0x275   : > { %3465 = vst [vmem:[#allocation2 + $0x159] sm:$0xff] %v3399_v5  ;;  %v3337_v51 = vadd.f32 %v13933_v53, %v3266_v10  ;;  %v3204_v28 = vadd.f32 %v3140_v63, %v2756_v13  ;;  %v14390_v26 = vld [vmem:[%s16816_s2 + $0x88] sm:$0xff]  }
 0x276   : > { %3464 = vst [vmem:[#allocation2 + $0x151] sm:$0xff] %v3398_v56  ;;  %v3336_v31 = vadd.f32 %v13933_v53, %v3265_v24  ;;  %v3203_v7 = vadd.f32 %v3139_v37, %v2755_v20  ;;  %v14296_v4 = vpop.permute.xlu1 %826  ;;  %10732 = vmatpush3.bf16.msra.mxu0 %v11858_v34  ;;  %v9495_v20 = vld [vmem:[%s12229_s13 + $0x9c0] sm:$0xff]  ;;  %v9498_v37 = vld [vmem:[%s12229_s13 + $0x9d8] sm:$0xff] }
 0x277   : > { %v3401_v39 = vmax.f32 %v3337_v51, 0.0  ;;  %v3268_v12 = vmax.f32 %v2564_v16, %v3204_v28  ;;  %v14298_v23 = vpop.permute.xlu0 %821  ;;  %1740 = vperm.xlu1 %11839, %v9374_v41   ;;  %v9497_v41 = vld [vmem:[%s12229_s13 + $0x9d0] sm:$0xff]  ;;  %v9500_v28 = vld [vmem:[%s12229_s13 + $0x9e8] sm:$0xff] }
 0x278   : > { %v3400_v50 = vmax.f32 %v3336_v31, 0.0  ;;  %v3267_v19 = vmax.f32 %v2563_v44, %v3203_v7  ;;  %1735 = vperm.xlu0 %11838, %v9373_v54   ;;  %v9499_v54 = vld [vmem:[%s12229_s13 + $0x9e0] sm:$0xff] }
 0x279   : > { %3467 = vst [vmem:[#allocation2 + $0x169] sm:$0xff] %v3401_v39  ;;  %v3339_v9 = vadd.f32 %v13933_v53, %v3268_v12  ;;  %v3658_v21 = vld [vmem:[#allocation2 + $0x141] ss:$2 sm:$0xff]  ;;  %v9502_v39 = vld [vmem:[%s12229_s13 + $0x9f8] sm:$0xff]  ;;  %v9501_v12 = vld [vmem:[%s12229_s13 + $0x9f0] sm:$0xff] }
 0x27a   : > { %3466 = vst [vmem:[#allocation2 + $0x161] sm:$0xff] %v3400_v50  ;;  %v3338_v29 = vadd.f32 %v13933_v53, %v3267_v19  ;;  %v14304_v27 = vpop.permute.xlu1 %836  ;;  %v3578_v53 = vld [vmem:[#allocation2 + $0x140] ss:$2 sm:$0xff] }
 0x27b   : > { %v3403_v48 = vmax.f32 %v3339_v9, 0.0  ;;  %v14306_v18 = vpop.permute.xlu0 %831  ;;  %2356 = vperm.xlu1 %11839, %v9432_v38   ;;  %v14355_v44 = vld [vmem:[%s16816_s2 + $0xa0] sm:$0xff]   ;;  %v14372_v38 = vld [vmem:[%s16816_s2 + $0x98] sm:$0xff]  }
 0x27c   : > { %v3402_v47 = vmax.f32 %v3338_v29, 0.0  ;;  %2351 = vperm.xlu0 %11838, %v9431_v62   ;;  %10733 = vmatprep.subr.bf16.mxu0 %v14355_v44 }
 0x27d   : > { %3469 = vst [vmem:[#allocation2 + $0x179] sm:$0xff] %v3403_v48  ;;  %v3660_v22 = vld [vmem:[#allocation2 + $0x151] ss:$2 sm:$0xff]  ;;  %v3580_v52 = vld [vmem:[#allocation2 + $0x150] ss:$2 sm:$0xff]  ;;  %10734 = vmatpush3.bf16.msra.mxu0 %v14355_v44 }
 0x27e   : > { %3468 = vst [vmem:[#allocation2 + $0x171] sm:$0xff] %v3402_v47  ;;  %v14313_v46 = vpop.permute.xlu1 %1216  ;;  %v14315_v8 = vpack.c.bf16 %v3660_v22, %v3658_v21  ;;  %v3611_v49 = vpack.c.bf16 %v3580_v52, %v3578_v53  ;;  %10735 = vmatprep.subr.bf16.mxu0 %v14372_v38  ;;  %v14385_v48 = vld [vmem:[%s16816_s2 + $0x90] sm:$0xff]   ;;  %v14403_v21 = vld [vmem:[%s16815_s1] ss:$0 sm:$0xff] }
 0x27f   : > { %v14317_v3 = vpop.permute.xlu0 %1211  ;;  %2366 = vperm.xlu1 %11839, %v9434_v14   ;;  %v1344_v14 = vmul.f32 %v14041_v45, %v14313_v46  ;;  %v954_v22 = vmul.f32 %v14403_v21, %v14296_v4  ;;  %v953_v53 = vmul.f32 %v14403_v21, %v14298_v23  ;;  %v955_v4 = vmul.f32 %v14403_v21, %v14306_v18 }
 0x280   : > { %16912 = vst [vmem:[#allocation29_spill] sm:$0xff] %v14315_v8  ;;  %2361 = vperm.xlu0 %11838, %v9433_v17   ;;  %10667 = vmatprep.mubr.bf16.mxu0 %v14315_v8  ;;  %v1343_v17 = vmul.f32 %v14041_v45, %v14317_v3  ;;  %v1926_v23 = vmul.f32 %v14403_v21, %v14313_v46 }
 0x281   : > { %10715 = vmatprep.mubr.bf16.mxu1 %v3611_v49  ;;  %v3662_v55 = vld [vmem:[#allocation2 + $0x161] ss:$2 sm:$0xff]  ;;  %v3582_v40 = vld [vmem:[#allocation2 + $0x160] ss:$2 sm:$0xff]  ;;  %10736 = vmatpush3.bf16.msra.mxu0 %v14372_v38 }
 0x282   : > { %v14322_v36 = vpop.permute.xlu1 %1226  ;;  %10737 = vmatprep.subr.bf16.mxu0 %v14385_v48 }
 0x283   : > { %v14324_v42 = vpop.permute.xlu0 %1221  ;;  %2376 = vperm.xlu1 %11839, %v9436_v30   ;;  %v1346_v52 = vmul.f32 %v14041_v45, %v14322_v36  ;;  %v14417_v30 = vld [vmem:[%s16816_s2 + $0x80] sm:$0xff]   ;;  %v1928_v46 = vmul.f32 %v14403_v21, %v14322_v36  ;;  %v14453_v36 = vpop.f32.mrf.mxu1 }
 0x284   : > { %2371 = vperm.xlu0 %11838, %v9435_v32   ;;  %v956_v32 = vmul.f32 %v14403_v21, %v14304_v27  ;;  %v1345_v34 = vmul.f32 %v14041_v45, %v14324_v42  ;;  %16915 = vst [vmem:[#allocation32_spill] sm:$0xff] %v14453_v36 }
 0x285   : > { %v3664_v59 = vld [vmem:[#allocation2 + $0x171] ss:$2 sm:$0xff]  ;;  %v3584_v57 = vld [vmem:[#allocation2 + $0x170] ss:$2 sm:$0xff]  ;;  %10738 = vmatpush3.bf16.msra.mxu0 %v14385_v48 }
 0x286   : > { %v14331_v13 = vpop.permute.xlu1 %1670  ;;  %v14333_v5 = vpack.c.bf16 %v3664_v59, %v3662_v55  ;;  %v3612_v10 = vpack.c.bf16 %v3584_v57, %v3582_v40  ;;  %10739 = vmatprep.subr.bf16.mxu0 %v14390_v26  ;;  %v1408_v59 = vadd.f32 %v1344_v14, %v954_v22  ;;  %v1407_v40 = vadd.f32 %v1343_v17, %v953_v53 }
 0x287   : > { %v14335_v63 = vpop.permute.xlu0 %1665  ;;  %2386 = vperm.xlu1 %11839, %v9438_v11   ;;  %v1798_v55 = vmul.f32 %v14071_v15, %v14331_v13  ;;  %v1990_v27 = vmul.f32 %v14041_v45, %v14331_v13 }
 0x288   : > { %16913 = vst [vmem:[#allocation30_spill] sm:$0xff] %v14333_v5  ;;  %2381 = vperm.xlu0 %11838, %v9437_v60   ;;  %10668 = vmatmul.mubr.bf16.gmra.mxu0 %v14333_v5  ;;  %v1925_v60 = vmul.f32 %v14403_v21, %v14317_v3  ;;  %v1797_v18 = vmul.f32 %v14071_v15, %v14335_v63  ;;  %v14442_v3 = vpop.f32.mrf.mxu0 }
 0x289   : > { %10716 = vmatmul.mubr.bf16.gmra.mxu1 %v3612_v10  ;;  %v1989_v57 = vmul.f32 %v14041_v45, %v14335_v63  ;;  %10740 = vmatpush3.bf16.msra.mxu0 %v14390_v26  ;;  %16914 = vst [vmem:[#allocation31_spill] sm:$0xff] %v14442_v3  ;;  %v1410_v10 = vadd.f32 %v1346_v52, %v956_v32 }
 0x28a   : > { %v14340_v56 = vpop.permute.xlu1 %1680  ;;  %10741 = vmatprep.subr.bf16.mxu0 %v14417_v30  ;;  %v14465_v14 = vadd.f32 %v1798_v55, %v1408_v59  ;;  %v14467_v17 = vadd.f32 %v1990_v27, %v1926_v23  ;;  %v14469_v22 = vadd.f32 %v1797_v18, %v1407_v40  ;;  %v14473_v53 = vmul.f32 %v14403_v21, %v14335_v63 }
 0x28b   : > { %v14342_v24 = vpop.permute.xlu0 %1675  ;;  %3060 = vperm.xlu1 %11839, %v9496_v1   ;;  %v1927_v1 = vmul.f32 %v14403_v21, %v14324_v42  ;;  %v14475_v52 = vadd.f32 %v1989_v57, %v1925_v60  ;;  %v14479_v32 = vmul.f32 %v14403_v21, %v14340_v56 }
 0x28c   : > { %3055 = vperm.xlu0 %11838, %v9495_v20   ;;  %v1800_v20 = vmul.f32 %v14071_v15, %v14340_v56  ;;  %v1799_v42 = vmul.f32 %v14071_v15, %v14342_v24 }
 0x28d   : > { %10742 = vmatpush3.bf16.msra.mxu0 %v14417_v30 }
 0x28e   : > { %v14346_v16 = vpop.permute.xlu1 %846  ;;  %v14488_v55 = vadd.f32 %v1800_v20, %v1410_v10 }
 0x28f   : > { %v14348_v51 = vpop.permute.xlu0 %841  ;;  %3070 = vperm.xlu1 %11839, %v9498_v37   ;;  %v1992_v37 = vmul.f32 %v14041_v45, %v14340_v56 }
 0x290   : > { %3065 = vperm.xlu0 %11838, %v9497_v41  }
 0x291   : > { %v14490_v63 = vadd.f32 %v1992_v37, %v1928_v46  ;;  %v958_v46 = vmul.f32 %v14403_v21, %v14346_v16  ;;  %v957_v37 = vmul.f32 %v14403_v21, %v14348_v51 }
 0x292   : > { %v14357_v31 = vpop.permute.xlu1 %856 }
 0x293   : > { %v14359_v7 = vpop.permute.xlu0 %851  ;;  %3080 = vperm.xlu1 %11839, %v9500_v28   ;;  %v1409_v28 = vadd.f32 %v1345_v34, %v955_v4  ;;  %v14483_v4 = vmul.f32 %v14403_v21, %v14342_v24 }
 0x294   : > { %3075 = vperm.xlu0 %11838, %v9499_v54   ;;  %v14457_v54 = vmul.f32 %v14403_v21, %v14331_v13  ;;  %v959_v16 = vmul.f32 %v14403_v21, %v14359_v7 }
 0x295   : > { %v14502_v59 = vadd.f32 %v1799_v42, %v1409_v28 }
 0x296   : > { %v14365_v50 = vpop.permute.xlu1 %1236 }
 0x297   : > { %v14367_v19 = vpop.permute.xlu0 %1231  ;;  %3090 = vperm.xlu1 %11839, %v9502_v39   ;;  %v1991_v39 = vmul.f32 %v14041_v45, %v14342_v24  ;;  %v1348_v23 = vmul.f32 %v14041_v45, %v14365_v50  ;;  %v14499_v24 = vld [vmem:[%s16816_s2 + $0x38] sm:$0xff]  }
 0x298   : > { %3085 = vperm.xlu0 %11838, %v9501_v12   ;;  %v1347_v60 = vmul.f32 %v14041_v45, %v14367_v19  ;;  %10823 = vmatprep.subr.bf16.mxu0 %v14499_v24  ;;  %v1929_v36 = vmul.f32 %v14403_v21, %v14367_v19 }
 0x299   : > { %v2055_v40 = vadd.f32 %v1991_v39, %v1927_v1  ;;  %v1412_v42 = vadd.f32 %v1348_v23, %v958_v46  ;;  %v1930_v39 = vmul.f32 %v14403_v21, %v14365_v50 }
 0x29a   : > { %v14374_v9 = vpop.permute.xlu1 %1246  ;;  %v1411_v3 = vadd.f32 %v1347_v60, %v957_v37 }
 0x29b   : > { %v14376_v62 = vpop.permute.xlu0 %1241  ;;  %v1350_v57 = vmul.f32 %v14041_v45, %v14374_v9  ;;  %v1932_v7 = vmul.f32 %v14403_v21, %v14374_v9 }
 0x29c   : > { %v1931_v50 = vmul.f32 %v14403_v21, %v14376_v62 }
 0x29e   : > { %v14380_v29 = vpop.permute.xlu1 %1690 }
 0x29f   : > { %v14392_v47 = vpop.permute.xlu0 %1685  ;;  %v2634_v46 = vmul.f32 %v14403_v21, %v14380_v29 }
 0x2a0   : > { %v1801_v19 = vmul.f32 %v14071_v15, %v14392_v47  ;;  %v1993_v37 = vmul.f32 %v14041_v45, %v14392_v47 }
 0x2a2   : > { %v14411_v49 = vpop.permute.xlu1 %1700 }
 0x2a3   : > { %v14427_v11 = vpop.permute.xlu0 %1695  ;;  %v1804_v9 = vmul.f32 %v14071_v15, %v14411_v49 }
 0x2a6   : > { %v14450_v41 = vpop.permute.xlu1 %2316 }
 0x2a7   : > { %v14463_v12 = vpop.permute.xlu0 %2311  ;;  %v2694_v5 = vmul.f32 %v14041_v45, %v14450_v41 }
 0x2a8   : > { %v10661_v13 = vpop.f32.mrf.mxu0 }
 0x2a9   : > { %v10709_v34 = vpop.f32.mrf.mxu1 }
 0x2aa   : > { %v14494_v27 = vadd.f32 %v10709_v34, %v10661_v13  ;;  %v3987_v56 = vpop.f32.mrf.mxu0  ;;  %v2327_v18 = vpop.permute.xlu1 %2326  ;;  %v960_v13 = vmul.f32 %v14403_v21, %v14357_v31  ;;  %v1349_v34 = vmul.f32 %v14041_v45, %v14376_v62  ;;  %v1802_v31 = vmul.f32 %v14071_v15, %v14380_v29 }
 0x2ab   : > { %v4196_v10 = vpop.f32.mrf.mxu1  ;;  %v2322_v20 = vpop.permute.xlu0 %2321  ;;  %v1996_v62 = vmul.f32 %v14041_v45, %v14411_v49  ;;  %v2440_v8 = vmul.f32 %v14071_v15, %v2327_v18 }
 0x2ac   : > { %16916 = vst [vmem:[#allocation33_spill] sm:$0xff] %v14494_v27  ;;  %v14514_v28 = vadd.f32 %v4196_v10, %v3987_v56  ;;  %v10662_v1 = vpop.f32.mrf.mxu0  ;;  %v1994_v56 = vmul.f32 %v14041_v45, %v14380_v29  ;;  %v1414_v27 = vadd.f32 %v1350_v57, %v960_v13  ;;  %v1413_v60 = vadd.f32 %v1349_v34, %v959_v16 }
 0x2ad   : > { %v10710_v51 = vpop.f32.mrf.mxu1  ;;  %v2633_v57 = vmul.f32 %v14403_v21, %v14392_v47  ;;  %v2438_v13 = vmul.f32 %v14071_v15, %v14450_v41  ;;  %v2437_v34 = vmul.f32 %v14071_v15, %v14463_v12  ;;  %v1803_v16 = vmul.f32 %v14071_v15, %v14427_v11 }
 0x2ae   : > { %16917 = vst [vmem:[#allocation34_spill] sm:$0xff] %v14514_v28  ;;  %v14526_v10 = vadd.f32 %v10710_v51, %v10662_v1  ;;  %v2337_v28 = vpop.permute.xlu1 %2336  ;;  %v14548_v1 = vadd.f32 %v1802_v31, %v1412_v42  ;;  %v2058_v29 = vadd.f32 %v1994_v56, %v1930_v39  ;;  %v1995_v47 = vmul.f32 %v14041_v45, %v14427_v11 }
 0x2af   : > { %v2332_v23 = vpop.permute.xlu0 %2331  ;;  %v2439_v6 = vmul.f32 %v14071_v15, %v2322_v20  ;;  %v2057_v42 = vadd.f32 %v1993_v37, %v1929_v36  ;;  %v14562_v39 = vmul.f32 %v14403_v21, %v14411_v49  ;;  %v14566_v31 = vmul.f32 %v14403_v21, %v14427_v11 }
 0x2b0   : > { %16918 = vst [vmem:[#allocation35_spill] sm:$0xff] %v14526_v10  ;;  %v14554_v10 = vadd.f32 %v1801_v19, %v1411_v3  ;;  %v2693_v3 = vmul.f32 %v14041_v45, %v14463_v12  ;;  %v14570_v56 = vadd.f32 %v1804_v9, %v1414_v27  ;;  %v2060_v41 = vadd.f32 %v1996_v62, %v1932_v7 }
 0x2b1   : > { %v2502_v19 = vadd.f32 %v2438_v13, %v14467_v17  ;;  %v2501_v0 = vadd.f32 %v2437_v34, %v14475_v52  ;;  %v14574_v25 = vadd.f32 %v1803_v16, %v1413_v60  ;;  %v2059_v36 = vadd.f32 %v1995_v47, %v1931_v50 }
 0x2b2   : > { %v2347_v51 = vpop.permute.xlu1 %2346  ;;  %v2696_v49 = vmul.f32 %v14041_v45, %v2327_v18  ;;  %v2695_v37 = vmul.f32 %v14041_v45, %v2322_v20  ;;  %v2758_v11 = vadd.f32 %v2694_v5, %v14457_v54  ;;  %v2504_v33 = vadd.f32 %v2440_v8, %v14490_v63 }
 0x2b3   : > { %v2342_v61 = vpop.permute.xlu0 %2341  ;;  %v2503_v12 = vadd.f32 %v2439_v6, %v2055_v40  ;;  %v2757_v17 = vadd.f32 %v2693_v3, %v14473_v53  ;;  %v2442_v52 = vmul.f32 %v14071_v15, %v2337_v28  ;;  %v2698_v60 = vmul.f32 %v14041_v45, %v2337_v28 }
 0x2b4   : > { %v2566_v18 = vmax.f32 %v14465_v14, %v2502_v19  ;;  %v2565_v20 = vmax.f32 %v14469_v22, %v2501_v0  ;;  %v2441_v5 = vmul.f32 %v14071_v15, %v2332_v23  ;;  %v2760_v6 = vadd.f32 %v2696_v49, %v14479_v32 }
 0x2b5   : > { %v2697_v8 = vmul.f32 %v14041_v45, %v2332_v23  ;;  %v2568_v40 = vmax.f32 %v14488_v55, %v2504_v33  ;;  %v2567_v28 = vmax.f32 %v14502_v59, %v2503_v12  ;;  %v2506_v0 = vadd.f32 %v2442_v52, %v2058_v29  ;;  %v14599_v23 = vld [vmem:[%s16817_s3] ss:$0 sm:$0xff] }
 0x2b6   : > { %v3021_v2 = vpop.permute.xlu1 %3020  ;;  %v2762_v22 = vadd.f32 %v2698_v60, %v2634_v46  ;;  %v2505_v32 = vadd.f32 %v2441_v5, %v2057_v42  ;;  %v2443_v16 = vmul.f32 %v14071_v15, %v2342_v61  ;;  %v2700_v3 = vmul.f32 %v14041_v45, %v2347_v51 }
 0x2b7   : > { %v3142_v27 = vmul.f32 %v14071_v15, %v3021_v2  ;;  %v3016_v7 = vpop.permute.xlu0 %3015  ;;  %v2759_v2 = vadd.f32 %v2695_v37, %v14483_v4  ;;  %v2444_v4 = vmul.f32 %v14071_v15, %v2347_v51  ;;  %v2761_v59 = vadd.f32 %v2697_v8, %v2633_v57 }
 0x2b8   : > { %v3141_v50 = vmul.f32 %v14071_v15, %v3016_v7  ;;  %v2570_v57 = vmax.f32 %v14548_v1, %v2506_v0  ;;  %v2569_v51 = vmax.f32 %v14554_v10, %v2505_v32 }
 0x2b9   : > { %v3206_v54 = vadd.f32 %v3142_v27, %v2758_v11  ;;  %v2699_v11 = vmul.f32 %v14041_v45, %v2342_v61  ;;  %v2764_v61 = vadd.f32 %v2700_v3, %v14562_v39 }
 0x2ba   : > { %v3205_v53 = vadd.f32 %v3141_v50, %v2757_v17  ;;  %v3031_v63 = vpop.permute.xlu1 %3030  ;;  %v2508_v17 = vadd.f32 %v2444_v4, %v2060_v41  ;;  %v2507_v50 = vadd.f32 %v2443_v16, %v2059_v36 }
 0x2bb   : > { %v3270_v9 = vmax.f32 %v2566_v18, %v3206_v54  ;;  %v3144_v14 = vmul.f32 %v14071_v15, %v3031_v63  ;;  %v3026_v62 = vpop.permute.xlu0 %3025  ;;  %v2763_v41 = vadd.f32 %v2699_v11, %v14566_v31 }
 0x2bc   : > { %v3269_v13 = vmax.f32 %v2565_v20, %v3205_v53  ;;  %v3143_v34 = vmul.f32 %v14071_v15, %v3026_v62  ;;  %v2572_v10 = vmax.f32 %v14570_v56, %v2508_v17 }
 0x2bd   : > { %v3341_v33 = vadd.f32 %v14599_v23, %v3270_v9  ;;  %v3208_v55 = vadd.f32 %v3144_v14, %v2760_v6 }
 0x2be   : > { %v3340_v29 = vadd.f32 %v14599_v23, %v3269_v13  ;;  %v3207_v46 = vadd.f32 %v3143_v34, %v2759_v2  ;;  %v3041_v47 = vpop.permute.xlu1 %3040 }
 0x2bf   : > { %v3405_v42 = vmax.f32 %v3341_v33, 0.0  ;;  %v3272_v19 = vmax.f32 %v2568_v40, %v3208_v55  ;;  %v3146_v49 = vmul.f32 %v14071_v15, %v3041_v47  ;;  %v3036_v37 = vpop.permute.xlu0 %3035  ;;  %v2571_v40 = vmax.f32 %v14574_v25, %v2507_v50 }
 0x2c0   : > { %v3404_v12 = vmax.f32 %v3340_v29, 0.0  ;;  %v3271_v27 = vmax.f32 %v2567_v28, %v3207_v46  ;;  %v3145_v7 = vmul.f32 %v14071_v15, %v3036_v37 }
 0x2c1   : > { %3471 = vst [vmem:[#allocation2 + $0x189] sm:$0xff] %v3405_v42  ;;  %v3343_v52 = vadd.f32 %v14599_v23, %v3272_v19  ;;  %v3210_v60 = vadd.f32 %v3146_v49, %v2762_v22 }
 0x2c2   : > { %3470 = vst [vmem:[#allocation2 + $0x181] sm:$0xff] %v3404_v12  ;;  %v3342_v18 = vadd.f32 %v14599_v23, %v3271_v27  ;;  %v3209_v20 = vadd.f32 %v3145_v7, %v2761_v59  ;;  %v3051_v5 = vpop.permute.xlu1 %3050 }
 0x2c3   : > { %v3407_v45 = vmax.f32 %v3343_v52, 0.0  ;;  %v3274_v54 = vmax.f32 %v2570_v57, %v3210_v60  ;;  %v3148_v6 = vmul.f32 %v14071_v15, %v3051_v5  ;;  %v3046_v1 = vpop.permute.xlu0 %3045 }
 0x2c4   : > { %v3406_v2 = vmax.f32 %v3342_v18, 0.0  ;;  %v3273_v8 = vmax.f32 %v2569_v51, %v3209_v20  ;;  %v3147_v53 = vmul.f32 %v14071_v15, %v3046_v1  ;;  %v14649_v1 = vld [vmem:[%s16815_s1 + $0x1] ss:$0 sm:$0xff] }
 0x2c5   : > { %3473 = vst [vmem:[#allocation2 + $0x199] sm:$0xff] %v3407_v45  ;;  %v3345_v36 = vadd.f32 %v14599_v23, %v3274_v54  ;;  %v3212_v63 = vadd.f32 %v3148_v6, %v2764_v61 }
 0x2c6   : > { %3472 = vst [vmem:[#allocation2 + $0x191] sm:$0xff] %v3406_v2  ;;  %v3344_v39 = vadd.f32 %v14599_v23, %v3273_v8  ;;  %v3211_v28 = vadd.f32 %v3147_v53, %v2763_v41  ;;  %v867_v9 = vpop.permute.xlu1 %866 }
 0x2c7   : > { %v3409_v14 = vmax.f32 %v3345_v36, 0.0  ;;  %v3276_v62 = vmax.f32 %v2572_v10, %v3212_v63  ;;  %v862_v31 = vpop.permute.xlu0 %861  ;;  %v962_v8 = vmul.f32 %v14403_v21, %v867_v9  ;;  %v14668_v9 = vld [vmem:[%s16815_s1 + $0x2] ss:$0 sm:$0xff] }
 0x2c8   : > { %v3408_v0 = vmax.f32 %v3344_v39, 0.0  ;;  %v3275_v22 = vmax.f32 %v2571_v40, %v3211_v28  ;;  %v961_v53 = vmul.f32 %v14403_v21, %v862_v31 }
 0x2c9   : > { %3475 = vst [vmem:[#allocation2 + $0x1a9] sm:$0xff] %v3409_v14  ;;  %v3347_v15 = vadd.f32 %v14599_v23, %v3276_v62  ;;  %v3666_v4 = vld [vmem:[#allocation2 + $0x181] ss:$2 sm:$0xff]  ;;  %v3586_v55 = vld [vmem:[#allocation2 + $0x180] ss:$2 sm:$0xff] }
 0x2ca   : > { %3474 = vst [vmem:[#allocation2 + $0x1a1] sm:$0xff] %v3408_v0  ;;  %v3346_v56 = vadd.f32 %v14599_v23, %v3275_v22  ;;  %v877_v13 = vpop.permute.xlu1 %876 }
 0x2cb   : > { %v3411_v34 = vmax.f32 %v3347_v15, 0.0  ;;  %v872_v32 = vpop.permute.xlu0 %871  ;;  %v964_v63 = vmul.f32 %v14403_v21, %v877_v13 }
 0x2cc   : > { %v3410_v25 = vmax.f32 %v3346_v56, 0.0  ;;  %v963_v40 = vmul.f32 %v14403_v21, %v872_v32  ;;  %v14675_v32 = vpop.f32.mrf.mxu0 }
 0x2cd   : > { %3477 = vst [vmem:[#allocation2 + $0x1b9] sm:$0xff] %v3411_v34  ;;  %v3668_v33 = vld [vmem:[#allocation2 + $0x191] ss:$2 sm:$0xff]  ;;  %v3588_v59 = vld [vmem:[#allocation2 + $0x190] ss:$2 sm:$0xff]  ;;  %16921 = vst [vmem:[#allocation38_spill] sm:$0xff] %v14675_v32 }
 0x2ce   : > { %3476 = vst [vmem:[#allocation2 + $0x1b1] sm:$0xff] %v3410_v25  ;;  %v1257_v16 = vpop.permute.xlu1 %1256  ;;  %v14622_v29 = vpack.c.bf16 %v3668_v33, %v3666_v4  ;;  %v3613_v46 = vpack.c.bf16 %v3588_v59, %v3586_v55 }
 0x2cf   : > { %v1252_v47 = vpop.permute.xlu0 %1251  ;;  %v1352_v41 = vmul.f32 %v14649_v1, %v1257_v16  ;;  %v1934_v39 = vmul.f32 %v14403_v21, %v1257_v16  ;;  %v14682_v16 = vpop.f32.mrf.mxu1 }
 0x2d0   : > { %16919 = vst [vmem:[#allocation36_spill] sm:$0xff] %v14622_v29  ;;  %10671 = vmatprep.mubr.bf16.mxu0 %v14622_v29  ;;  %10719 = vmatprep.mubr.bf16.mxu1 %v3613_v46  ;;  %v1351_v2 = vmul.f32 %v14649_v1, %v1252_v47  ;;  %v1933_v62 = vmul.f32 %v14403_v21, %v1252_v47  ;;  %16922 = vst [vmem:[#allocation39_spill] sm:$0xff] %v14682_v16 }
 0x2d1   : > { %v3670_v19 = vld [vmem:[#allocation2 + $0x1a1] ss:$2 sm:$0xff]  ;;  %v3590_v37 = vld [vmem:[#allocation2 + $0x1a0] ss:$2 sm:$0xff]  ;;  %v1416_v15 = vadd.f32 %v1352_v41, %v962_v8 }
 0x2d2   : > { %v1267_v3 = vpop.permute.xlu1 %1266  ;;  %v1415_v56 = vadd.f32 %v1351_v2, %v961_v53 }
 0x2d3   : > { %v1262_v42 = vpop.permute.xlu0 %1261  ;;  %v1354_v10 = vmul.f32 %v14649_v1, %v1267_v3  ;;  %v1936_v13 = vmul.f32 %v14403_v21, %v1267_v3 }
 0x2d4   : > { %v1353_v28 = vmul.f32 %v14649_v1, %v1262_v42  ;;  %v1935_v4 = vmul.f32 %v14403_v21, %v1262_v42 }
 0x2d5   : > { %v3672_v49 = vld [vmem:[#allocation2 + $0x1b1] ss:$2 sm:$0xff]  ;;  %v3592_v11 = vld [vmem:[#allocation2 + $0x1b0] ss:$2 sm:$0xff]  ;;  %v1418_v25 = vadd.f32 %v1354_v10, %v964_v63 }
 0x2d6   : > { %v1711_v12 = vpop.permute.xlu1 %1710  ;;  %v14625_v27 = vpack.c.bf16 %v3672_v49, %v3670_v19  ;;  %v3614_v7 = vpack.c.bf16 %v3592_v11, %v3590_v37  ;;  %v1417_v46 = vadd.f32 %v1353_v28, %v963_v40 }
 0x2d7   : > { %v1706_v57 = vpop.permute.xlu0 %1705  ;;  %v1806_v31 = vmul.f32 %v14668_v9, %v1711_v12  ;;  %v1998_v0 = vmul.f32 %v14649_v1, %v1711_v12  ;;  %v14685_v47 = vmul.f32 %v14403_v21, %v1711_v12 }
 0x2d8   : > { %16920 = vst [vmem:[#allocation37_spill] sm:$0xff] %v14625_v27  ;;  %10672 = vmatmul.mubr.bf16.gmra.mxu0 %v14625_v27  ;;  %10720 = vmatmul.mubr.bf16.gmra.mxu1 %v3614_v7  ;;  %v1805_v22 = vmul.f32 %v14668_v9, %v1706_v57  ;;  %v1997_v34 = vmul.f32 %v14649_v1, %v1706_v57 }
 0x2d9   : > { %v14691_v37 = vadd.f32 %v1806_v31, %v1416_v15  ;;  %v14693_v42 = vadd.f32 %v1998_v0, %v1934_v39  ;;  %v14698_v7 = vmul.f32 %v14403_v21, %v1706_v57 }
 0x2da   : > { %v1721_v17 = vpop.permute.xlu1 %1720  ;;  %v14695_v11 = vadd.f32 %v1805_v22, %v1415_v56  ;;  %v2061_v2 = vadd.f32 %v1997_v34, %v1933_v62 }
 0x2db   : > { %v1716_v52 = vpop.permute.xlu0 %1715  ;;  %v1808_v33 = vmul.f32 %v14668_v9, %v1721_v17  ;;  %v2000_v55 = vmul.f32 %v14649_v1, %v1721_v17  ;;  %v14701_v12 = vmul.f32 %v14403_v21, %v1721_v17 }
 0x2dc   : > { %v1807_v3 = vmul.f32 %v14668_v9, %v1716_v52  ;;  %v1999_v19 = vmul.f32 %v14649_v1, %v1716_v52  ;;  %v14704_v8 = vmul.f32 %v14403_v21, %v1716_v52 }
 0x2dd   : > { %v14708_v63 = vadd.f32 %v1808_v33, %v1418_v25  ;;  %v14710_v40 = vadd.f32 %v2000_v55, %v1936_v13 }
 0x2de   : > { %v887_v60 = vpop.permute.xlu1 %886  ;;  %v14716_v17 = vadd.f32 %v1807_v3, %v1417_v46  ;;  %v2063_v31 = vadd.f32 %v1999_v19, %v1935_v4 }
 0x2df   : > { %v14628_v51 = vpop.permute.xlu0 %881  ;;  %v966_v52 = vmul.f32 %v14403_v21, %v887_v60 }
 0x2e0   : > { %v965_v56 = vmul.f32 %v14403_v21, %v14628_v51 }
 0x2e2   : > { %v14630_v50 = vpop.permute.xlu1 %896 }
 0x2e3   : > { %v14632_v18 = vpop.permute.xlu0 %891  ;;  %v968_v13 = vmul.f32 %v14403_v21, %v14630_v50 }
 0x2e4   : > { %v967_v60 = vmul.f32 %v14403_v21, %v14632_v18 }
 0x2e6   : > { %v14634_v20 = vpop.permute.xlu1 %1276 }
 0x2e7   : > { %v14636_v5 = vpop.permute.xlu0 %1271  ;;  %v1356_v53 = vmul.f32 %v14649_v1, %v14634_v20  ;;  %v1938_v55 = vmul.f32 %v14403_v21, %v14634_v20 }
 0x2e8   : > { %v1355_v57 = vmul.f32 %v14649_v1, %v14636_v5  ;;  %v1937_v46 = vmul.f32 %v14403_v21, %v14636_v5 }
 0x2e9   : > { %v1420_v4 = vadd.f32 %v1356_v53, %v966_v52 }
 0x2ea   : > { %v14638_v61 = vpop.permute.xlu1 %1286  ;;  %v1419_v3 = vadd.f32 %v1355_v57, %v965_v56 }
 0x2eb   : > { %v14640_v45 = vpop.permute.xlu0 %1281  ;;  %v1358_v0 = vmul.f32 %v14649_v1, %v14638_v61  ;;  %v1940_v18 = vmul.f32 %v14403_v21, %v14638_v61 }
 0x2ec   : > { %v1357_v34 = vmul.f32 %v14649_v1, %v14640_v45  ;;  %v1939_v20 = vmul.f32 %v14403_v21, %v14640_v45 }
 0x2ee   : > { %v14642_v54 = vpop.permute.xlu1 %1730  ;;  %v1421_v57 = vadd.f32 %v1357_v34, %v967_v60 }
 0x2ef   : > { %v14644_v6 = vpop.permute.xlu0 %1725  ;;  %v1810_v50 = vmul.f32 %v14668_v9, %v14642_v54  ;;  %v2002_v19 = vmul.f32 %v14649_v1, %v14642_v54  ;;  %v2642_v52 = vmul.f32 %v14403_v21, %v14642_v54 }
 0x2f0   : > { %v1809_v5 = vmul.f32 %v14668_v9, %v14644_v6 }
 0x2f1   : > { %v14761_v34 = vadd.f32 %v1810_v50, %v1420_v4  ;;  %v2066_v54 = vadd.f32 %v2002_v19, %v1938_v55 }
 0x2f2   : > { %v14656_v36 = vpop.permute.xlu1 %1740 }
 0x2f3   : > { %v14662_v14 = vpop.permute.xlu0 %1735  ;;  %v1812_v61 = vmul.f32 %v14668_v9, %v14656_v36  ;;  %v2004_v45 = vmul.f32 %v14649_v1, %v14656_v36  ;;  %v14775_v55 = vmul.f32 %v14403_v21, %v14656_v36 }
 0x2f4   : > { %v14779_v50 = vmul.f32 %v14403_v21, %v14662_v14 }
 0x2f6   : > { %v14680_v59 = vpop.permute.xlu1 %2356 }
 0x2f7   : > { %v14689_v49 = vpop.permute.xlu0 %2351  ;;  %v2446_v56 = vmul.f32 %v14668_v9, %v14680_v59  ;;  %v2702_v16 = vmul.f32 %v14649_v1, %v14680_v59  ;;  %v2068_v59 = vadd.f32 %v2004_v45, %v1940_v18 }
 0x2f8   : > { %v10665_v41 = vpop.f32.mrf.mxu0 }
 0x2f9   : > { %v10713_v10 = vpop.f32.mrf.mxu1 }
 0x2fa   : > { %v14714_v39 = vadd.f32 %v10713_v10, %v10665_v41  ;;  %v4003_v28 = vpop.f32.mrf.mxu0  ;;  %v2367_v62 = vpop.permute.xlu1 %2366 }
 0x2fb   : > { %v4212_v22 = vpop.f32.mrf.mxu1  ;;  %v2362_v15 = vpop.permute.xlu0 %2361  ;;  %v2448_v32 = vmul.f32 %v14668_v9, %v2367_v62 }
 0x2fc   : > { %16923 = vst [vmem:[#allocation40_spill] sm:$0xff] %v14714_v39  ;;  %v14727_v25 = vadd.f32 %v4212_v22, %v4003_v28  ;;  %v10666_v33 = vpop.f32.mrf.mxu0  ;;  %v1422_v28 = vadd.f32 %v1358_v0, %v968_v13  ;;  %v2001_v22 = vmul.f32 %v14649_v1, %v14644_v6  ;;  %v2641_v0 = vmul.f32 %v14403_v21, %v14644_v6 }
 0x2fd   : > { %v10714_v51 = vpop.f32.mrf.mxu1  ;;  %v2445_v13 = vmul.f32 %v14668_v9, %v14689_v49  ;;  %v2003_v6 = vmul.f32 %v14649_v1, %v14662_v14  ;;  %v2703_v36 = vmul.f32 %v14649_v1, %v2362_v15  ;;  %v2766_v21 = vadd.f32 %v2702_v16, %v14685_v47 }
 0x2fe   : > { %16924 = vst [vmem:[#allocation41_spill] sm:$0xff] %v14727_v25  ;;  %v14739_v41 = vadd.f32 %v10714_v51, %v10666_v33  ;;  %v2377_v10 = vpop.permute.xlu1 %2376  ;;  %v1811_v33 = vmul.f32 %v14668_v9, %v14662_v14  ;;  %v14767_v51 = vadd.f32 %v1809_v5, %v1419_v3  ;;  %v2065_v4 = vadd.f32 %v2001_v22, %v1937_v46 }
 0x2ff   : > { %v2372_v53 = vpop.permute.xlu0 %2371  ;;  %v2701_v3 = vmul.f32 %v14649_v1, %v14689_v49  ;;  %v14783_v19 = vadd.f32 %v1812_v61, %v1422_v28  ;;  %v2510_v5 = vadd.f32 %v2446_v56, %v14693_v42  ;;  %v2509_v39 = vadd.f32 %v2445_v13, %v2061_v2 }
 0x300   : > { %16925 = vst [vmem:[#allocation42_spill] sm:$0xff] %v14739_v41  ;;  %v2447_v41 = vmul.f32 %v14668_v9, %v2362_v15  ;;  %v14786_v27 = vadd.f32 %v1811_v33, %v1421_v57  ;;  %v2067_v46 = vadd.f32 %v2003_v6, %v1939_v20  ;;  %v2704_v22 = vmul.f32 %v14649_v1, %v2367_v62 }
 0x301   : > { %v2512_v14 = vadd.f32 %v2448_v32, %v14710_v40  ;;  %v2765_v18 = vadd.f32 %v2701_v3, %v14698_v7  ;;  %v2450_v42 = vmul.f32 %v14668_v9, %v2377_v10  ;;  %v2706_v2 = vmul.f32 %v14649_v1, %v2377_v10 }
 0x302   : > { %v2387_v60 = vpop.permute.xlu1 %2386  ;;  %v2511_v58 = vadd.f32 %v2447_v41, %v2063_v31  ;;  %v2574_v62 = vmax.f32 %v14691_v37, %v2510_v5  ;;  %v2573_v15 = vmax.f32 %v14695_v11, %v2509_v39  ;;  %v2449_v16 = vmul.f32 %v14668_v9, %v2372_v53 }
 0x303   : > { %v2382_v25 = vpop.permute.xlu0 %2381  ;;  %v2768_v32 = vadd.f32 %v2704_v22, %v14701_v12  ;;  %v2705_v40 = vmul.f32 %v14649_v1, %v2372_v53  ;;  %v2576_v41 = vmax.f32 %v14708_v63, %v2512_v14  ;;  %v2514_v11 = vadd.f32 %v2450_v42, %v2066_v54 }
 0x304   : > { %v2575_v10 = vmax.f32 %v14716_v17, %v2511_v58  ;;  %v2770_v39 = vadd.f32 %v2706_v2, %v2642_v52  ;;  %v2513_v12 = vadd.f32 %v2449_v16, %v2065_v4  ;;  %v2451_v63 = vmul.f32 %v14668_v9, %v2382_v25 }
 0x305   : > { %v2769_v33 = vadd.f32 %v2705_v40, %v2641_v0  ;;  %v2708_v3 = vmul.f32 %v14649_v1, %v2387_v60  ;;  %v2707_v4 = vmul.f32 %v14649_v1, %v2382_v25  ;;  %v2578_v0 = vmax.f32 %v14761_v34, %v2514_v11 }
 0x306   : > { %v3061_v29 = vpop.permute.xlu1 %3060  ;;  %v2515_v42 = vadd.f32 %v2451_v63, %v2067_v46 }
 0x307   : > { %v3150_v49 = vmul.f32 %v14668_v9, %v3061_v29  ;;  %v3056_v28 = vpop.permute.xlu0 %3055  ;;  %v2767_v29 = vadd.f32 %v2703_v36, %v14704_v8  ;;  %v2452_v8 = vmul.f32 %v14668_v9, %v2387_v60  ;;  %v2577_v60 = vmax.f32 %v14767_v51, %v2513_v12 }
 0x308   : > { %v3149_v20 = vmul.f32 %v14668_v9, %v3056_v28  ;;  %v2772_v1 = vadd.f32 %v2708_v3, %v14775_v55  ;;  %v3704_v3 = vld [vmem:[#allocation2 + $0x32] ss:$2 sm:$0xff] }
 0x309   : > { %v3214_v47 = vadd.f32 %v3150_v49, %v2766_v21  ;;  %v2516_v49 = vadd.f32 %v2452_v8, %v2068_v59  ;;  %v2771_v59 = vadd.f32 %v2707_v4, %v14779_v50 }
 0x30a   : > { %v3213_v7 = vadd.f32 %v3149_v20, %v2765_v18  ;;  %v3071_v31 = vpop.permute.xlu1 %3070 }
 0x30b   : > { %v3278_v57 = vmax.f32 %v2574_v62, %v3214_v47  ;;  %v3152_v37 = vmul.f32 %v14668_v9, %v3071_v31  ;;  %v3066_v61 = vpop.permute.xlu0 %3065  ;;  %v2580_v51 = vmax.f32 %v14783_v19, %v2516_v49  ;;  %v3716_v49 = vld [vmem:[#allocation2 + $0x92] ss:$2 sm:$0xff] }
 0x30c   : > { %v3277_v45 = vmax.f32 %v2573_v15, %v3213_v7  ;;  %v3151_v56 = vmul.f32 %v14668_v9, %v3066_v61  ;;  %v2579_v7 = vmax.f32 %v14786_v27, %v2515_v42 }
 0x30d   : > { %v3349_v53 = vadd.f32 %v14599_v23, %v3278_v57  ;;  %v3216_v13 = vadd.f32 %v3152_v37, %v2768_v32 }
 0x30e   : > { %v3348_v58 = vadd.f32 %v14599_v23, %v3277_v45  ;;  %v3215_v17 = vadd.f32 %v3151_v56, %v2767_v29  ;;  %v3081_v6 = vpop.permute.xlu1 %3080 }
 0x30f   : > { %v3413_v54 = vmax.f32 %v3349_v53, 0.0  ;;  %v3280_v52 = vmax.f32 %v2576_v41, %v3216_v13  ;;  %v3154_v5 = vmul.f32 %v14668_v9, %v3081_v6  ;;  %v3076_v22 = vpop.permute.xlu0 %3075  ;;  %v3700_v53 = vld [vmem:[#allocation2 + $0x12] ss:$2 sm:$0xff] }
 0x310   : > { %v3412_v36 = vmax.f32 %v3348_v58, 0.0  ;;  %v3279_v21 = vmax.f32 %v2575_v10, %v3215_v17  ;;  %v3153_v14 = vmul.f32 %v14668_v9, %v3076_v22  ;;  %v3698_v17 = vld [vmem:[#allocation2 + $0x2] ss:$2 sm:$0xff] }
 0x311   : > { %3479 = vst [vmem:[#allocation2 + $0x1c9] sm:$0xff] %v3413_v54  ;;  %v3351_v28 = vadd.f32 %v14599_v23, %v3280_v52  ;;  %v3218_v18 = vadd.f32 %v3154_v5, %v2770_v39  ;;  %v3761_v6 = vpack.c.bf16 %v3700_v53, %v3698_v17  ;;  %v3708_v54 = vld [vmem:[#allocation2 + $0x52] ss:$2 sm:$0xff]  ;;  %v3702_v52 = vld [vmem:[#allocation2 + $0x22] ss:$2 sm:$0xff] }
 0x312   : > { %3478 = vst [vmem:[#allocation2 + $0x1c1] sm:$0xff] %v3412_v36  ;;  %v3350_v2 = vadd.f32 %v14599_v23, %v3279_v21  ;;  %v3217_v20 = vadd.f32 %v3153_v14, %v2769_v33  ;;  %v3091_v62 = vpop.permute.xlu1 %3090  ;;  %v3762_v5 = vpack.c.bf16 %v3704_v3, %v3702_v52  ;;  %v3706_v22 = vld [vmem:[#allocation2 + $0x42] ss:$2 sm:$0xff]  ;;  %v12055_v36 = vld [vmem:[%s16816_s2 + $0xb8] sm:$0xff]  }
 0x313   : > { %v3415_v25 = vmax.f32 %v3351_v28, 0.0  ;;  %v3282_v15 = vmax.f32 %v2578_v0, %v3218_v18  ;;  %v3156_v16 = vmul.f32 %v14668_v9, %v3091_v62  ;;  %v3086_v34 = vpop.permute.xlu0 %3085  ;;  %v3763_v4 = vpack.c.bf16 %v3708_v54, %v3706_v22  ;;  %v12056_v21 = vld [vmem:[%s16816_s2 + $0x30] sm:$0xff]   ;;  %v12060_v62 = vld [vmem:[%s16816_s2 + $0x20] sm:$0xff]  }
 0x314   : > { %v3414_v47 = vmax.f32 %v3350_v2, 0.0  ;;  %v3281_v32 = vmax.f32 %v2577_v60, %v3217_v20  ;;  %v3155_v29 = vmul.f32 %v14668_v9, %v3086_v34  ;;  %v3712_v14 = vld [vmem:[#allocation2 + $0x72] ss:$2 sm:$0xff]  ;;  %v3714_v18 = vld [vmem:[#allocation2 + $0x82] ss:$2 sm:$0xff] }
 0x315   : > { %3481 = vst [vmem:[#allocation2 + $0x1d9] sm:$0xff] %v3415_v25  ;;  %v3353_v46 = vadd.f32 %v14599_v23, %v3282_v15  ;;  %v3220_v40 = vadd.f32 %v3156_v16, %v2772_v1  ;;  %v12057_v0 = vld [vmem:[%s16816_s2 + $0xb0] sm:$0xff]   ;;  %v12058_v60 = vld [vmem:[%s16816_s2 + $0x28] sm:$0xff]   ;;  %v3765_v42 = vpack.c.bf16 %v3716_v49, %v3714_v18 }
 0x316   : > { %3480 = vst [vmem:[#allocation2 + $0x1d1] sm:$0xff] %v3414_v47  ;;  %v3352_v55 = vadd.f32 %v14599_v23, %v3281_v32  ;;  %v3219_v31 = vadd.f32 %v3155_v29, %v2771_v59  ;;  %v12059_v2 = vld [vmem:[%s16816_s2 + $0xa8] sm:$0xff]   ;;  %v3720_v20 = vld [vmem:[#allocation2 + $0xb2] ss:$2 sm:$0xff] }
 0x317   : > { %v3417_v41 = vmax.f32 %v3353_v46, 0.0  ;;  %v3284_v10 = vmax.f32 %v2580_v51, %v3220_v40  ;;  %v3724_v1 = vld [vmem:[#allocation2 + $0xd2] ss:$2 sm:$0xff]  ;;  %v3718_v25 = vld [vmem:[#allocation2 + $0xa2] ss:$2 sm:$0xff]  ;;  %v14865_v51 = vpop.f32.mrf.mxu0 }
 0x318   : > { %v3416_v57 = vmax.f32 %v3352_v55, 0.0  ;;  %v3283_v50 = vmax.f32 %v2579_v7, %v3219_v31  ;;  %v3766_v15 = vpack.c.bf16 %v3720_v20, %v3718_v25  ;;  %v3722_v16 = vld [vmem:[#allocation2 + $0xc2] ss:$2 sm:$0xff]  ;;  %v12061_v59 = vld [vmem:[%s16816_s2 + $0x18] sm:$0xff]   ;;  %v14868_v7 = vpop.f32.mrf.mxu1  ;;  %v3782_v18 = vld [vmem:[#allocation2 + $0x23] ss:$2 sm:$0xff] }
 0x319   : > { %3483 = vst [vmem:[#allocation2 + $0x1e9] sm:$0xff] %v3417_v41  ;;  %v3355_v37 = vadd.f32 %v14599_v23, %v3284_v10  ;;  %v3674_v11 = vld [vmem:[#allocation2 + $0x1c1] ss:$2 sm:$0xff]  ;;  %v3594_v27 = vld [vmem:[#allocation2 + $0x1c0] ss:$2 sm:$0xff]  ;;  %v3767_v34 = vpack.c.bf16 %v3724_v1, %v3722_v16  ;;  %v16926_v20 = vld [vmem:[#allocation7_spill] sm:$0xff] }
 0x31a   : > { %3482 = vst [vmem:[#allocation2 + $0x1e1] sm:$0xff] %v3416_v57  ;;  %v3354_v9 = vadd.f32 %v14599_v23, %v3283_v50  ;;  %v3728_v47 = vld [vmem:[#allocation2 + $0xf2] ss:$2 sm:$0xff]  ;;  %v3726_v29 = vld [vmem:[#allocation2 + $0xe2] ss:$2 sm:$0xff] }
 0x31b   : > { %v3419_v19 = vmax.f32 %v3355_v37, 0.0  ;;  %v3732_v32 = vld [vmem:[#allocation2 + $0x112] ss:$2 sm:$0xff]  ;;  %v3768_v46 = vpack.c.bf16 %v3728_v47, %v3726_v29  ;;  %v3730_v40 = vld [vmem:[#allocation2 + $0x102] ss:$2 sm:$0xff] }
 0x31c   : > { %v3418_v61 = vmax.f32 %v3354_v9, 0.0  ;;  %v12063_v55 = vld [vmem:[%s16816_s2 + $0x8] sm:$0xff]   ;;  %v3736_v37 = vld [vmem:[#allocation2 + $0x132] ss:$2 sm:$0xff]  ;;  %v3800_v47 = vld [vmem:[#allocation2 + $0xb3] ss:$2 sm:$0xff] }
 0x31d   : > { %3485 = vst [vmem:[#allocation2 + $0x1f9] sm:$0xff] %v3419_v19  ;;  %v3676_v39 = vld [vmem:[#allocation2 + $0x1d1] ss:$2 sm:$0xff]  ;;  %v3596_v45 = vld [vmem:[#allocation2 + $0x1d0] ss:$2 sm:$0xff]  ;;  %v16927_v25 = vld [vmem:[#allocation9_spill] sm:$0xff] }
 0x31e   : > { %3484 = vst [vmem:[#allocation2 + $0x1f1] sm:$0xff] %v3418_v61  ;;  %v14829_v56 = vpack.c.bf16 %v3676_v39, %v3674_v11  ;;  %v3615_v12 = vpack.c.bf16 %v3596_v45, %v3594_v27  ;;  %v3740_v61 = vld [vmem:[#allocation2 + $0x152] ss:$2 sm:$0xff]  ;;  %v3734_v39 = vld [vmem:[#allocation2 + $0x122] ss:$2 sm:$0xff] }
 0x31f   : > { %v3770_v45 = vpack.c.bf16 %v3736_v37, %v3734_v39  ;;  %v3756_v3 = vld [vmem:[#allocation2 + $0x1d2] ss:$2 sm:$0xff]  ;;  %v3750_v54 = vld [vmem:[#allocation2 + $0x1a2] ss:$2 sm:$0xff]  ;;  %v3790_v1 = vld [vmem:[#allocation2 + $0x63] ss:$2 sm:$0xff] }
 0x320   : > { %10675 = vmatprep.mubr.bf16.mxu0 %v14829_v56  ;;  %10723 = vmatprep.mubr.bf16.mxu1 %v3615_v12  ;;  %v3738_v12 = vld [vmem:[#allocation2 + $0x142] ss:$2 sm:$0xff]  ;;  %v3794_v16 = vld [vmem:[#allocation2 + $0x83] ss:$2 sm:$0xff]  ;;  %v16932_v37 = vld [vmem:[#allocation16_spill] sm:$0xff] }
 0x321   : > { %v3678_v8 = vld [vmem:[#allocation2 + $0x1e1] ss:$2 sm:$0xff]  ;;  %v3598_v33 = vld [vmem:[#allocation2 + $0x1e0] ss:$2 sm:$0xff]  ;;  %v3771_v53 = vpack.c.bf16 %v3740_v61, %v3738_v12 }
 0x322   : > { %v3802_v29 = vld [vmem:[#allocation2 + $0xc3] ss:$2 sm:$0xff]  ;;  %v3820_v61 = vld [vmem:[#allocation2 + $0x153] ss:$2 sm:$0xff] }
 0x325   : > { %v3680_v13 = vld [vmem:[#allocation2 + $0x1f1] ss:$2 sm:$0xff]  ;;  %v3600_v63 = vld [vmem:[#allocation2 + $0x1f0] ss:$2 sm:$0xff] }
 0x326   : > { %v14832_v23 = vpack.c.bf16 %v3680_v13, %v3678_v8  ;;  %v3616_v58 = vpack.c.bf16 %v3600_v63, %v3598_v33  ;;  %v12066_v8 = vld [vmem:[%s16816_s2 + $0x80] sm:$0xff]  }
 0x327   : > { %v3748_v13 = vld [vmem:[#allocation2 + $0x192] ss:$2 sm:$0xff]  ;;  %v3742_v33 = vld [vmem:[#allocation2 + $0x162] ss:$2 sm:$0xff] }
 0x328   : > { %10676 = vmatmul.mubr.bf16.gmra.mxu0 %v14832_v23  ;;  %10724 = vmatmul.mubr.bf16.gmra.mxu1 %v3616_v58  ;;  %v3746_v58 = vld [vmem:[#allocation2 + $0x182] ss:$2 sm:$0xff] }
 0x329   : > { %10743 = vmatprep.mubr.bf16.mxu0 %v3761_v6  ;;  %10791 = vmatprep.mubr.bf16.mxu1 %v3761_v6  ;;  %v3773_v17 = vpack.c.bf16 %v3748_v13, %v3746_v58  ;;  %v3752_v6 = vld [vmem:[#allocation2 + $0x1b2] ss:$2 sm:$0xff]  ;;  %v3828_v13 = vld [vmem:[#allocation2 + $0x193] ss:$2 sm:$0xff] }
 0x32a   : > { %v3774_v52 = vpack.c.bf16 %v3752_v6, %v3750_v54  ;;  %v3826_v6 = vld [vmem:[#allocation2 + $0x183] ss:$2 sm:$0xff] }
 0x330   : > { %10744 = vmatmul.mubr.bf16.vlgmr.msra.gmra.mxu0 %v3762_v5  ;;  %10792 = vmatmul.mubr.bf16.vlgmr.msra.gmra.mxu1 %v3762_v5  ;;  %v3754_v5 = vld [vmem:[#allocation2 + $0x1c2] ss:$2 sm:$0xff] }
 0x331   : > { %10824 = vmatpush3.bf16.msra.mxu0 %v14499_v24  ;;  %10747 = vmatprep.mubr.bf16.mxu0 %v3763_v4  ;;  %v3710_v24 = vld [vmem:[#allocation2 + $0x62] ss:$2 sm:$0xff]  ;;  %v3775_v22 = vpack.c.bf16 %v3756_v3, %v3754_v5  ;;  %v3853_v3 = vpack.c.bf16 %v3828_v13, %v3826_v6 }
 0x332   : > { %10795 = vmatprep.mubr.bf16.mxu1 %v3763_v4  ;;  %10872 = vmatpush3.bf16.msra.mxu1 %v12055_v36  ;;  %v3764_v28 = vpack.c.bf16 %v3712_v14, %v3710_v24  ;;  %v3760_v4 = vld [vmem:[#allocation2 + $0x1f2] ss:$2 sm:$0xff]  ;;  %v3780_v36 = vld [vmem:[#allocation2 + $0x13] ss:$2 sm:$0xff]  ;;  %v16938_v5 = vld [vmem:[#allocation30_spill] sm:$0xff] }
 0x333   : > { %10825 = vmatprep.subr.bf16.mxu0 %v12056_v21  ;;  %10873 = vmatprep.subr.bf16.mxu1 %v12057_v0  ;;  %v3784_v24 = vld [vmem:[#allocation2 + $0x33] ss:$2 sm:$0xff] }
 0x335   : > { %10826 = vmatpush3.bf16.msra.mxu0 %v12056_v21  ;;  %v3758_v21 = vld [vmem:[#allocation2 + $0x1e2] ss:$2 sm:$0xff] }
 0x336   : > { %10874 = vmatpush3.bf16.msra.mxu1 %v12057_v0  ;;  %10827 = vmatprep.subr.bf16.mxu0 %v12058_v60  ;;  %v3776_v14 = vpack.c.bf16 %v3760_v4, %v3758_v21  ;;  %v3778_v0 = vld [vmem:[#allocation2 + $0x3] ss:$2 sm:$0xff]  ;;  %v16939_v4 = vld [vmem:[#allocation36_spill] sm:$0xff] }
 0x337   : > { %10875 = vmatprep.subr.bf16.mxu1 %v12059_v2  ;;  %v3841_v49 = vpack.c.bf16 %v3780_v36, %v3778_v0  ;;  %v3832_v0 = vld [vmem:[#allocation2 + $0x1b3] ss:$2 sm:$0xff] }
 0x338   : > { %10748 = vmatmul.mubr.bf16.gmra.mxu0 %v3764_v28  ;;  %10796 = vmatmul.mubr.bf16.gmra.mxu1 %v3764_v28  ;;  %v3788_v28 = vld [vmem:[#allocation2 + $0x53] ss:$2 sm:$0xff] }
 0x339   : > { %10751 = vmatprep.mubr.bf16.mxu0 %v3765_v42  ;;  %10799 = vmatprep.mubr.bf16.mxu1 %v3765_v42  ;;  %v3786_v42 = vld [vmem:[#allocation2 + $0x43] ss:$2 sm:$0xff] }
 0x33a   : > { %10828 = vmatpush3.bf16.msra.mxu0 %v12058_v60  ;;  %10876 = vmatpush3.bf16.msra.mxu1 %v12059_v2  ;;  %v3842_v60 = vpack.c.bf16 %v3784_v24, %v3782_v18  ;;  %v3843_v2 = vpack.c.bf16 %v3788_v28, %v3786_v42  ;;  %v3836_v28 = vld [vmem:[#allocation2 + $0x1d3] ss:$2 sm:$0xff] }
 0x33b   : > { %10829 = vmatprep.subr.bf16.mxu0 %v12060_v62  ;;  %10877 = vmatprep.subr.bf16.mxu1 %v14355_v44 }
 0x33e   : > { %10830 = vmatpush3.bf16.msra.mxu0 %v12060_v62  ;;  %10878 = vmatpush3.bf16.msra.mxu1 %v14355_v44  ;;  %v12062_v44 = vld [vmem:[%s16816_s2 + $0x10] sm:$0xff]  }
 0x33f   : > { %10831 = vmatprep.subr.bf16.mxu0 %v12061_v59  ;;  %10879 = vmatprep.subr.bf16.mxu1 %v14372_v38  ;;  %v3796_v62 = vld [vmem:[#allocation2 + $0x93] ss:$2 sm:$0xff] }
 0x340   : > { %10752 = vmatmul.mubr.bf16.gmra.mxu0 %v3766_v15  ;;  %10800 = vmatmul.mubr.bf16.gmra.mxu1 %v3766_v15  ;;  %v3844_v15 = vpack.c.bf16 %v16927_v25, %v3790_v1  ;;  %v3838_v1 = vld [vmem:[#allocation2 + $0x1e3] ss:$2 sm:$0xff]  ;;  %v3840_v25 = vld [vmem:[#allocation2 + $0x1f3] ss:$2 sm:$0xff] }
 0x341   : > { %10755 = vmatprep.mubr.bf16.mxu0 %v3767_v34  ;;  %10803 = vmatprep.mubr.bf16.mxu1 %v3767_v34  ;;  %v3845_v34 = vpack.c.bf16 %v3796_v62, %v3794_v16  ;;  %v16940_v62 = vld [vmem:[#allocation37_spill] sm:$0xff]  ;;  %v14920_v16 = vld [vmem:[%s16816_s2 + $0x138] sm:$0xff]  }
 0x342   : > { %10832 = vmatpush3.bf16.msra.mxu0 %v12061_v59  ;;  %10880 = vmatpush3.bf16.msra.mxu1 %v14372_v38  ;;  %v3769_v38 = vpack.c.bf16 %v3732_v32, %v3730_v40  ;;  %v16929_v59 = vld [vmem:[#allocation10_spill] sm:$0xff]  ;;  %v16930_v40 = vld [vmem:[#allocation11_spill] sm:$0xff] }
 0x343   : > { %10833 = vmatprep.subr.bf16.mxu0 %v12062_v44  ;;  %10881 = vmatprep.subr.bf16.mxu1 %v14385_v48  ;;  %v3798_v32 = vld [vmem:[#allocation2 + $0xa3] ss:$2 sm:$0xff] }
 0x346   : > { %10834 = vmatpush3.bf16.msra.mxu0 %v12062_v44  ;;  %10882 = vmatpush3.bf16.msra.mxu1 %v14385_v48  ;;  %v12064_v48 = vld [vmem:[%s16816_s2 + $0x88] sm:$0xff]   ;;  %v3804_v44 = vld [vmem:[#allocation2 + $0xd3] ss:$2 sm:$0xff] }
 0x347   : > { %10835 = vmatprep.subr.bf16.mxu0 %v12063_v55  ;;  %10883 = vmatprep.subr.bf16.mxu1 %v14390_v26  ;;  %v12065_v26 = vld [vmem:[%s16816_s2] sm:$0xff]  }
 0x348   : > { %v10669_v31 = vpop.f32.mrf.mxu0  ;;  %10756 = vmatmul.mubr.bf16.gmra.mxu0 %v3768_v46  ;;  %10804 = vmatmul.mubr.bf16.gmra.mxu1 %v3768_v46  ;;  %v3847_v46 = vpack.c.bf16 %v3804_v44, %v3802_v29  ;;  %v11871_v44 = vld [vmem:[%s16816_s2 + $0xe0] sm:$0xff]   ;;  %v14974_v29 = vld [vmem:[%s16816_s2 + $0x110] sm:$0xff]  }
 0x349   : > { %v10717_v41 = vpop.f32.mrf.mxu1  ;;  %10759 = vmatprep.mubr.bf16.mxu0 %v3769_v38  ;;  %10807 = vmatprep.mubr.bf16.mxu1 %v3769_v38  ;;  %v16931_v38 = vld [vmem:[#allocation15_spill] sm:$0xff]  ;;  %16945 = vst [vmem:[#allocation16_spill] sm:$0xff] %v14974_v29 }
 0x34a   : > { %v14874_v10 = vadd.f32 %v10717_v41, %v10669_v31  ;;  %v4019_v57 = vpop.f32.mrf.mxu0  ;;  %10836 = vmatpush3.bf16.msra.mxu0 %v12063_v55  ;;  %10884 = vmatpush3.bf16.msra.mxu1 %v12064_v48  ;;  %v3808_v55 = vld [vmem:[#allocation2 + $0xf3] ss:$2 sm:$0xff]  ;;  %v3806_v41 = vld [vmem:[#allocation2 + $0xe3] ss:$2 sm:$0xff] }
 0x34b   : > { %v4228_v50 = vpop.f32.mrf.mxu1  ;;  %10837 = vmatprep.subr.bf16.mxu0 %v12065_v26  ;;  %10885 = vmatprep.subr.bf16.mxu1 %v14417_v30  ;;  %v3744_v30 = vld [vmem:[#allocation2 + $0x172] ss:$2 sm:$0xff]  ;;  %v3812_v31 = vld [vmem:[#allocation2 + $0x113] ss:$2 sm:$0xff]  ;;  %v3810_v48 = vld [vmem:[#allocation2 + $0x103] ss:$2 sm:$0xff] }
 0x34c   : > { %v14883_v9 = vadd.f32 %v4228_v50, %v4019_v57  ;;  %v10670_v19 = vpop.f32.mrf.mxu0  ;;  %v3772_v63 = vpack.c.bf16 %v3744_v30, %v3742_v33  ;;  %v3848_v57 = vpack.c.bf16 %v3808_v55, %v3806_v41  ;;  %v3849_v50 = vpack.c.bf16 %v3812_v31, %v3810_v48  ;;  %v3824_v30 = vld [vmem:[#allocation2 + $0x173] ss:$2 sm:$0xff]  ;;  %v3822_v33 = vld [vmem:[#allocation2 + $0x163] ss:$2 sm:$0xff] }
 0x34d   : > { %v10718_v11 = vpop.f32.mrf.mxu1  ;;  %v14994_v55 = vld [vmem:[%s16816_s2 + $0x100] sm:$0xff]  }
 0x34e   : > { %v14885_v27 = vadd.f32 %v10718_v11, %v10670_v19  ;;  %10838 = vmatpush3.bf16.msra.mxu0 %v12065_v26  ;;  %10886 = vmatpush3.bf16.msra.mxu1 %v12066_v8  ;;  %v16933_v26 = vld [vmem:[#allocation22_spill] sm:$0xff]  ;;  %v3816_v19 = vld [vmem:[#allocation2 + $0x133] ss:$2 sm:$0xff] }
 0x34f   : > { %v3814_v11 = vld [vmem:[#allocation2 + $0x123] ss:$2 sm:$0xff]  ;;  %v16934_v8 = vld [vmem:[#allocation23_spill] sm:$0xff]  ;;  %v14904_v58 = vpop.f32.mrf.mxu1  ;;  %10919 = vmatprep.subr.bf16.mxu0 %v14920_v16 }
 0x350   : > { %10760 = vmatmul.mubr.bf16.gmra.mxu0 %v3770_v45  ;;  %10808 = vmatmul.mubr.bf16.gmra.mxu1 %v3770_v45  ;;  %v3850_v39 = vpack.c.bf16 %v3816_v19, %v3814_v11  ;;  %v3818_v45 = vld [vmem:[#allocation2 + $0x143] ss:$2 sm:$0xff]  ;;  %16937 = vst [vmem:[#allocation9_spill] sm:$0xff] %v14904_v58  ;;  %16947 = vst [vmem:[#allocation23_spill] sm:$0xff] %v14994_v55  ;;  %v15013_v11 = vld [vmem:[%s16816_s2 + $0x178] sm:$0xff]  }
 0x351   : > { %10763 = vmatprep.mubr.bf16.mxu0 %v3771_v53  ;;  %10811 = vmatprep.mubr.bf16.mxu1 %v3771_v53  ;;  %v3851_v12 = vpack.c.bf16 %v3820_v61, %v3818_v45  ;;  %v16935_v53 = vld [vmem:[#allocation29_spill] sm:$0xff] }
 0x352   : > { %v11879_v31 = vld [vmem:[%s16816_s2 + $0xc0] sm:$0xff]  }
 0x358   : > { %10764 = vmatmul.mubr.bf16.gmra.mxu0 %v3772_v63  ;;  %10812 = vmatmul.mubr.bf16.gmra.mxu1 %v3772_v63  ;;  %v14902_v63 = vpop.f32.mrf.mxu0 }
 0x359   : > { %10767 = vmatprep.mubr.bf16.mxu0 %v3773_v17  ;;  %10815 = vmatprep.mubr.bf16.mxu1 %v3773_v17  ;;  %16936 = vst [vmem:[#allocation7_spill] sm:$0xff] %v14902_v63  ;;  %v3852_v17 = vpack.c.bf16 %v3824_v30, %v3822_v33  ;;  %v16952_v33 = vld [vmem:[#allocation12_spill] sm:$0xff] }
 0x360   : > { %10768 = vmatmul.mubr.bf16.gmra.mxu0 %v3774_v52  ;;  %10816 = vmatmul.mubr.bf16.gmra.mxu1 %v3774_v52 }
 0x361   : > { %10771 = vmatprep.mubr.bf16.mxu0 %v3775_v22  ;;  %10819 = vmatprep.mubr.bf16.mxu1 %v3775_v22 }
 0x368   : > { %10772 = vmatmul.mubr.bf16.gmra.mxu0 %v3776_v14  ;;  %10820 = vmatmul.mubr.bf16.gmra.mxu1 %v3776_v14 }
 0x369   : > { %10839 = vmatprep.mubr.bf16.mxu0 %v12673_v35  ;;  %10887 = vmatprep.mubr.bf16.mxu1 %v3841_v49  ;;  %v16928_v35 = vld [vmem:[#allocation8_spill] sm:$0xff] }
 0x370   : > { %10840 = vmatmul.mubr.bf16.vlgmr.msra.gmra.mxu0 %v12688_v43  ;;  %10888 = vmatmul.mubr.bf16.vlgmr.msra.gmra.mxu1 %v3842_v60  ;;  %v3846_v43 = vpack.c.bf16 %v3800_v47, %v3798_v32  ;;  %v3830_v60 = vld [vmem:[#allocation2 + $0x1a3] ss:$2 sm:$0xff]  ;;  %v14964_v32 = vld [vmem:[%s16816_s2 + $0x118] sm:$0xff]  }
 0x371   : > { %10843 = vmatprep.mubr.bf16.mxu0 %v16926_v20  ;;  %10891 = vmatprep.mubr.bf16.mxu1 %v3843_v2  ;;  %v3854_v42 = vpack.c.bf16 %v3832_v0, %v3830_v60  ;;  %v3834_v2 = vld [vmem:[#allocation2 + $0x1c3] ss:$2 sm:$0xff]  ;;  %16944 = vst [vmem:[#allocation15_spill] sm:$0xff] %v14964_v32  ;;  %v16955_v60 = vld [vmem:[#allocation19_spill] sm:$0xff] }
 0x372   : > { %v3855_v20 = vpack.c.bf16 %v3836_v28, %v3834_v2  ;;  %10920 = vmatpush3.bf16.msra.mxu0 %v14920_v16  ;;  %v14954_v47 = vld [vmem:[%s16816_s2 + $0x120] sm:$0xff]  }
 0x373   : > { %16943 = vst [vmem:[#allocation11_spill] sm:$0xff] %v14954_v47 }
 0x378   : > { %10844 = vmatmul.mubr.bf16.gmra.mxu0 %v16928_v35  ;;  %10892 = vmatmul.mubr.bf16.gmra.mxu1 %v3844_v15  ;;  %v3856_v15 = vpack.c.bf16 %v3840_v25, %v3838_v1  ;;  %v14944_v35 = vld [vmem:[%s16816_s2 + $0x128] sm:$0xff]  }
 0x379   : > { %10847 = vmatprep.mubr.bf16.mxu0 %v16929_v59  ;;  %10895 = vmatprep.mubr.bf16.mxu1 %v3845_v34  ;;  %v14926_v34 = vld [vmem:[%s16816_s2 + $0xf8] sm:$0xff]   ;;  %16942 = vst [vmem:[#allocation10_spill] sm:$0xff] %v14944_v35  ;;  %v11869_v59 = vld [vmem:[%s16816_s2 + $0xe8] sm:$0xff]  }
 0x37a   : > { %16941 = vst [vmem:[#allocation8_spill] sm:$0xff] %v14926_v34  ;;  %10951 = vmatprep.subr.bf16.mxu1 %v14926_v34 }
 0x37b   : > { %10952 = vmatpush3.bf16.msra.mxu1 %v14926_v34 }
 0x380   : > { %10848 = vmatmul.mubr.bf16.gmra.mxu0 %v16930_v40  ;;  %10896 = vmatmul.mubr.bf16.gmra.mxu1 %v3846_v43  ;;  %v11873_v43 = vld [vmem:[%s16816_s2 + $0xd8] sm:$0xff]   ;;  %v14984_v40 = vld [vmem:[%s16816_s2 + $0x108] sm:$0xff]  }
 0x381   : > { %10851 = vmatprep.mubr.bf16.mxu0 %v16931_v38  ;;  %10899 = vmatprep.mubr.bf16.mxu1 %v3847_v46  ;;  %v11875_v46 = vld [vmem:[%s16816_s2 + $0xd0] sm:$0xff]   ;;  %16946 = vst [vmem:[#allocation22_spill] sm:$0xff] %v14984_v40  ;;  %v11877_v38 = vld [vmem:[%s16816_s2 + $0xc8] sm:$0xff]  }
 0x388   : > { %10852 = vmatmul.mubr.bf16.gmra.mxu0 %v16932_v37  ;;  %10900 = vmatmul.mubr.bf16.gmra.mxu1 %v3848_v57 }
 0x389   : > { %10855 = vmatprep.mubr.bf16.mxu0 %v16933_v26  ;;  %10903 = vmatprep.mubr.bf16.mxu1 %v3849_v50 }
 0x390   : > { %10856 = vmatmul.mubr.bf16.gmra.mxu0 %v16934_v8  ;;  %10904 = vmatmul.mubr.bf16.gmra.mxu1 %v3850_v39 }
 0x391   : > { %10859 = vmatprep.mubr.bf16.mxu0 %v16935_v53  ;;  %10907 = vmatprep.mubr.bf16.mxu1 %v3851_v12 }
 0x398   : > { %v10673_v54 = vpop.f32.mrf.mxu0  ;;  %v10721_v52 = vpop.f32.mrf.mxu1  ;;  %10860 = vmatmul.mubr.bf16.gmra.mxu0 %v16938_v5  ;;  %10908 = vmatmul.mubr.bf16.gmra.mxu1 %v3852_v17 }
 0x399   : > { %v14907_v22 = vadd.f32 %v10721_v52, %v10673_v54  ;;  %10863 = vmatprep.mubr.bf16.mxu0 %v16939_v4  ;;  %10911 = vmatprep.mubr.bf16.mxu1 %v3853_v3  ;;  %v16953_v54 = vld [vmem:[#allocation13_spill] sm:$0xff] }
 0x39a   : > { %v4035_v36 = vpop.f32.mrf.mxu0  ;;  %v4244_v21 = vpop.f32.mrf.mxu1 }
 0x39b   : > { %v14910_v14 = vadd.f32 %v4244_v21, %v4035_v36  ;;  %v16954_v36 = vld [vmem:[#allocation14_spill] sm:$0xff] }
 0x39c   : > { %v10674_v49 = vpop.f32.mrf.mxu0  ;;  %v10722_v24 = vpop.f32.mrf.mxu1 }
 0x39d   : > { %v14912_v18 = vadd.f32 %v10722_v24, %v10674_v49 }
 0x39e   : > { %v15002_v41 = vpop.f32.mrf.mxu0  ;;  %v15004_v57 = vpop.f32.mrf.mxu1 }
 0x39f   : > { %16948 = vst [vmem:[#allocation29_spill] sm:$0xff] %v15002_v41  ;;  %16949 = vst [vmem:[#allocation30_spill] sm:$0xff] %v15004_v57 }
 0x3a0   : > { %10864 = vmatmul.mubr.bf16.gmra.mxu0 %v16940_v62  ;;  %10912 = vmatmul.mubr.bf16.gmra.mxu1 %v3854_v42  ;;  %v16956_v62 = vld [vmem:[#allocation20_spill] sm:$0xff] }
 0x3a1   : > { %10867 = vmatprep.mubr.bf16.mxu0 %v14829_v56  ;;  %10915 = vmatprep.mubr.bf16.mxu1 %v3855_v20  ;;  %v14934_v56 = vld [vmem:[%s16816_s2 + $0x130] sm:$0xff]  }
 0x3a2   : > { %10921 = vmatprep.subr.bf16.mxu0 %v14934_v56 }
 0x3a3   : > { %10922 = vmatpush3.bf16.msra.mxu0 %v14934_v56 }
 0x3a4   : > { %10923 = vmatprep.subr.bf16.mxu0 %v14944_v35 }
 0x3a7   : > { %10924 = vmatpush3.bf16.msra.mxu0 %v14944_v35 }
 0x3a8   : > { %10868 = vmatmul.mubr.bf16.gmra.mxu0 %v14832_v23  ;;  %10916 = vmatmul.mubr.bf16.gmra.mxu1 %v3856_v15  ;;  %v11867_v23 = vld [vmem:[%s16816_s2 + $0xf0] sm:$0xff]  }
 0x3a9   : > { %10953 = vmatprep.subr.bf16.mxu1 %v11867_v23  ;;  %10925 = vmatprep.subr.bf16.mxu0 %v14954_v47 }
 0x3aa   : > { %10954 = vmatpush3.bf16.msra.mxu1 %v11867_v23  ;;  %v16957_v23 = vld [vmem:[#allocation21_spill] sm:$0xff] }
 0x3ab   : > { %10955 = vmatprep.subr.bf16.mxu1 %v11869_v59  ;;  %10926 = vmatpush3.bf16.msra.mxu0 %v14954_v47 }
 0x3ac   : > { %10927 = vmatprep.subr.bf16.mxu0 %v14964_v32 }
 0x3ae   : > { %10956 = vmatpush3.bf16.msra.mxu1 %v11869_v59 }
 0x3af   : > { %10957 = vmatprep.subr.bf16.mxu1 %v11871_v44  ;;  %10928 = vmatpush3.bf16.msra.mxu0 %v14964_v32 }
 0x3b0   : > { %10929 = vmatprep.subr.bf16.mxu0 %v14974_v29 }
 0x3b2   : > { %10958 = vmatpush3.bf16.msra.mxu1 %v11871_v44 }
 0x3b3   : > { %10959 = vmatprep.subr.bf16.mxu1 %v11873_v43  ;;  %10930 = vmatpush3.bf16.msra.mxu0 %v14974_v29 }
 0x3b4   : > { %10931 = vmatprep.subr.bf16.mxu0 %v14984_v40 }
 0x3b6   : > { %10960 = vmatpush3.bf16.msra.mxu1 %v11873_v43 }
 0x3b7   : > { %10961 = vmatprep.subr.bf16.mxu1 %v11875_v46  ;;  %10932 = vmatpush3.bf16.msra.mxu0 %v14984_v40 }
 0x3b8   : > { %10933 = vmatprep.subr.bf16.mxu0 %v14994_v55 }
 0x3ba   : > { %10962 = vmatpush3.bf16.msra.mxu1 %v11875_v46 }
 0x3bb   : > { %10963 = vmatprep.subr.bf16.mxu1 %v11877_v38  ;;  %10934 = vmatpush3.bf16.msra.mxu0 %v14994_v55 }
 0x3bc   : > { %10983 = vmatprep.subr.bf16.mxu0 %v15013_v11 }
 0x3be   : > { %10964 = vmatpush3.bf16.msra.mxu1 %v11877_v38 }
 0x3bf   : > { %10965 = vmatprep.subr.bf16.mxu1 %v11879_v31 }
 0x3c2   : > { %10966 = vmatpush3.bf16.msra.mxu1 %v11879_v31  ;;  %v16958_v31 = vld [vmem:[#allocation26_spill] sm:$0xff] }
 0x3c3   : > { %11015 = vmatprep.subr.bf16.mxu1 %v14920_v16 }
 0x3e8   : > { %v10677_v48 = vpop.f32.mrf.mxu0  ;;  %v10725_v50 = vpop.f32.mrf.mxu1 }
 0x3e9   : > { %v15006_v37 = vadd.f32 %v10725_v50, %v10677_v48 }
 0x3ea   : > { %v4051_v26 = vpop.f32.mrf.mxu0  ;;  %v4260_v19 = vpop.f32.mrf.mxu1 }
 0x3eb   : > { %v15008_v61 = vadd.f32 %v4260_v19, %v4051_v26  ;;  %v16959_v19 = vld [vmem:[#allocation27_spill] sm:$0xff] }
 0x3ec   : > { %v10678_v39 = vpop.f32.mrf.mxu0  ;;  %v10726_v45 = vpop.f32.mrf.mxu1 }
 0x3ed   : > { %v15015_v12 = vadd.f32 %v10726_v45, %v10678_v39 }
 0x3ee   : > { %v15018_v8 = vpop.f32.mrf.mxu0  ;;  %v15020_v53 = vpop.f32.mrf.mxu1 }
 0x3ef   : > { %16950 = vst [vmem:[#allocation36_spill] sm:$0xff] %v15018_v8  ;;  %16951 = vst [vmem:[#allocation37_spill] sm:$0xff] %v15020_v53 }
 0x3f0   : > { %v10745_v30 = vpop.f32.mrf.mxu0  ;;  %v15022_v13 = vpop.f32.mrf.mxu1 }
 0x3f1   : > { %v15025_v17 = vadd.f32 %v10745_v30, %v16952_v33  ;;  %v16960_v33 = vld [vmem:[#allocation28_spill] sm:$0xff] }
 0x3f2   : > { %v4357_v6 = vpop.f32.mrf.mxu0  ;;  %v15027_v3 = vpop.f32.mrf.mxu1 }
 0x3f3   : > { %v15030_v52 = vadd.f32 %v4357_v6, %v16953_v54 }
 0x3f4   : > { %v10746_v5 = vpop.f32.mrf.mxu0  ;;  %v15032_v4 = vpop.f32.mrf.mxu1 }
 0x3f5   : > { %v15035_v21 = vadd.f32 %v10746_v5, %v16954_v36 }
 0x3f6   : > { %v15037_v0 = vpop.f32.mrf.mxu0  ;;  %v15039_v49 = vpop.f32.mrf.mxu1 }
 0x3f8   : > { %v10749_v24 = vpop.f32.mrf.mxu0  ;;  %v15041_v28 = vpop.f32.mrf.mxu1 }
 0x3f9   : > { %v15044_v42 = vadd.f32 %v10749_v24, %v16955_v60  ;;  %v16961_v60 = vld [vmem:[#allocation33_spill] sm:$0xff] }
 0x3fa   : > { %v4373_v2 = vpop.f32.mrf.mxu0  ;;  %v15046_v20 = vpop.f32.mrf.mxu1 }
 0x3fb   : > { %v15049_v1 = vadd.f32 %v4373_v2, %v16956_v62 }
 0x3fc   : > { %v10750_v25 = vpop.f32.mrf.mxu0  ;;  %v15051_v15 = vpop.f32.mrf.mxu1 }
 0x3fd   : > { %v15054_v59 = vadd.f32 %v10750_v25, %v16957_v23  ;;  %v16962_v23 = vld [vmem:[#allocation34_spill] sm:$0xff] }
 0x3fe   : > { %v15056_v44 = vpop.f32.mrf.mxu0  ;;  %v15058_v43 = vpop.f32.mrf.mxu1 }
 0x400   : > { %v10753_v46 = vpop.f32.mrf.mxu0  ;;  %v15060_v38 = vpop.f32.mrf.mxu1 }
 0x401   : > { %v15063_v48 = vadd.f32 %v10753_v46, %v16958_v31 }
 0x402   : > { %v4389_v50 = vpop.f32.mrf.mxu0  ;;  %v15065_v26 = vpop.f32.mrf.mxu1 }
 0x403   : > { %v15068_v39 = vadd.f32 %v4389_v50, %v16959_v19  ;;  %v16963_v19 = vld [vmem:[#allocation35_spill] sm:$0xff] }
 0x404   : > { %v10754_v45 = vpop.f32.mrf.mxu0  ;;  %v15070_v30 = vpop.f32.mrf.mxu1 }
 0x405   : > { %v15073_v6 = vadd.f32 %v10754_v45, %v16960_v33 }
 0x406   : > { %v15075_v54 = vpop.f32.mrf.mxu0  ;;  %v15077_v5 = vpop.f32.mrf.mxu1 }
 0x408   : > { %v10757_v36 = vpop.f32.mrf.mxu0  ;;  %v15079_v24 = vpop.f32.mrf.mxu1 }
 0x409   : > { %v15082_v2 = vadd.f32 %v10757_v36, %v16961_v60  ;;  %v16964_v36 = vld [vmem:[#allocation40_spill] sm:$0xff] }
 0x40a   : > { %v4405_v62 = vpop.f32.mrf.mxu0  ;;  %v15084_v25 = vpop.f32.mrf.mxu1 }
 0x40b   : > { %v15087_v46 = vadd.f32 %v4405_v62, %v16962_v23  ;;  %v16965_v62 = vld [vmem:[#allocation41_spill] sm:$0xff] }
 0x40c   : > { %v10758_v31 = vpop.f32.mrf.mxu0  ;;  %v15089_v50 = vpop.f32.mrf.mxu1 }
 0x40d   : > { %v15092_v45 = vadd.f32 %v10758_v31, %v16963_v19  ;;  %v16966_v31 = vld [vmem:[#allocation42_spill] sm:$0xff] }
 0x40e   : > { %v15094_v33 = vpop.f32.mrf.mxu0  ;;  %v15096_v34 = vpop.f32.mrf.mxu1 }
 0x410   : > { %v10761_v55 = vpop.f32.mrf.mxu0  ;;  %v15098_v53 = vpop.f32.mrf.mxu1 }
 0x411   : > { %v15101_v60 = vadd.f32 %v10761_v55, %v16964_v36 }
 0x412   : > { %v4421_v8 = vpop.f32.mrf.mxu0  ;;  %v15103_v40 = vpop.f32.mrf.mxu1 }
 0x413   : > { %v15106_v23 = vadd.f32 %v4421_v8, %v16965_v62 }
 0x414   : > { %v10762_v29 = vpop.f32.mrf.mxu0  ;;  %v15108_v57 = vpop.f32.mrf.mxu1 }
 0x415   : > { %v15111_v19 = vadd.f32 %v10762_v29, %v16966_v31 }
 0x416   : > { %v15113_v41 = vpop.f32.mrf.mxu0  ;;  %v15115_v32 = vpop.f32.mrf.mxu1 }
 0x417   : > { %16967 = vst [vmem:[#allocation12_spill] sm:$0xff] %v15111_v19  ;;  %16968 = vst [vmem:[#allocation13_spill] sm:$0xff] %v15115_v32 }
 0x418   : > { %v10765_v47 = vpop.f32.mrf.mxu0  ;;  %v15117_v58 = vpop.f32.mrf.mxu1 }
 0x419   : > { %16969 = vst [vmem:[#allocation14_spill] sm:$0xff] %v15117_v58  ;;  %v15120_v55 = vadd.f32 %v10765_v47, %v14874_v10 }
 0x41a   : > { %v4437_v36 = vpop.f32.mrf.mxu0  ;;  %v15122_v63 = vpop.f32.mrf.mxu1 }
 0x41b   : > { %16970 = vst [vmem:[#allocation19_spill] sm:$0xff] %v15120_v55  ;;  %v15125_v8 = vadd.f32 %v4437_v36, %v14883_v9 }
 0x41c   : > { %v10766_v62 = vpop.f32.mrf.mxu0  ;;  %v15127_v35 = vpop.f32.mrf.mxu1 }
 0x41d   : > { %16971 = vst [vmem:[#allocation20_spill] sm:$0xff] %v15125_v8  ;;  %v15130_v29 = vadd.f32 %v10766_v62, %v14885_v27 }
 0x41e   : > { %v15132_v31 = vpop.f32.mrf.mxu0  ;;  %v15134_v19 = vpop.f32.mrf.mxu1 }
 0x41f   : > { %16972 = vst [vmem:[#allocation21_spill] sm:$0xff] %v15130_v29  ;;  %16973 = vst [vmem:[#allocation26_spill] sm:$0xff] %v15132_v31 }
 0x420   : > { %16974 = vst [vmem:[#allocation27_spill] sm:$0xff] %v15134_v19  ;;  %v10769_v58 = vpop.f32.mrf.mxu0  ;;  %v15136_v32 = vpop.f32.mrf.mxu1 }
 0x421   : > { %16975 = vst [vmem:[#allocation28_spill] sm:$0xff] %v15136_v32  ;;  %v15139_v10 = vadd.f32 %v10769_v58, %v14907_v22 }
 0x422   : > { %v4453_v47 = vpop.f32.mrf.mxu0  ;;  %v15141_v55 = vpop.f32.mrf.mxu1 }
 0x423   : > { %16976 = vst [vmem:[#allocation33_spill] sm:$0xff] %v15139_v10  ;;  %16977 = vst [vmem:[#allocation34_spill] sm:$0xff] %v15141_v55  ;;  %v15144_v9 = vadd.f32 %v4453_v47, %v14910_v14 }
 0x424   : > { %v10770_v36 = vpop.f32.mrf.mxu0  ;;  %v15146_v8 = vpop.f32.mrf.mxu1 }
 0x425   : > { %16978 = vst [vmem:[#allocation35_spill] sm:$0xff] %v15144_v9  ;;  %16979 = vst [vmem:[#allocation40_spill] sm:$0xff] %v15146_v8  ;;  %v15149_v27 = vadd.f32 %v10770_v36, %v14912_v18 }
 0x426   : > { %v15151_v62 = vpop.f32.mrf.mxu0  ;;  %v15153_v29 = vpop.f32.mrf.mxu1 }
 0x427   : > { %16980 = vst [vmem:[#allocation41_spill] sm:$0xff] %v15149_v27  ;;  %16981 = vst [vmem:[#allocation42_spill] sm:$0xff] %v15151_v62 }
 0x428   : > { %16982 = vst [vmem:[#allocation43_spill] sm:$0xff] %v15153_v29  ;;  %v10773_v32 = vpop.f32.mrf.mxu0  ;;  %v15155_v31 = vpop.f32.mrf.mxu1 }
 0x429   : > { %16983 = vst [vmem:[#allocation44_spill] sm:$0xff] %v15155_v31  ;;  %v15158_v58 = vadd.f32 %v10773_v32, %v15006_v37 }
 0x42a   : > { %v4469_v22 = vpop.f32.mrf.mxu0  ;;  %v15160_v10 = vpop.f32.mrf.mxu1 }
 0x42b   : > { %16984 = vst [vmem:[#allocation45_spill] sm:$0xff] %v15158_v58  ;;  %16985 = vst [vmem:[#allocation46_spill] sm:$0xff] %v15160_v10  ;;  %v15163_v14 = vadd.f32 %v4469_v22, %v15008_v61  ;;  %v15179_v22 = vld [vmem:[%s16817_s3 + $0x1] ss:$0 sm:$0xff] }
 0x42c   : > { %v10774_v47 = vpop.f32.mrf.mxu0  ;;  %v15165_v9 = vpop.f32.mrf.mxu1 }
 0x42d   : > { %16986 = vst [vmem:[#allocation47_spill] sm:$0xff] %v15163_v14  ;;  %16987 = vst [vmem:[#allocation48_spill] sm:$0xff] %v15165_v9  ;;  %v15168_v18 = vadd.f32 %v10774_v47, %v15015_v12  ;;  %v16992_v9 = vld [vmem:[#allocation18_spill] sm:$0xff] }
 0x42e   : > { %v15170_v36 = vpop.f32.mrf.mxu0  ;;  %v15172_v27 = vpop.f32.mrf.mxu1 }
 0x42f   : > { %16988 = vst [vmem:[#allocation49_spill] sm:$0xff] %v15168_v18  ;;  %16989 = vst [vmem:[#allocation50_spill] sm:$0xff] %v15170_v36 }
 0x430   : > { %16990 = vst [vmem:[#allocation51_spill] sm:$0xff] %v15172_v27  ;;  %v10841_v31 = vpop.f32.mrf.mxu0  ;;  %v10889_v62 = vpop.f32.mrf.mxu1  ;;  %v16991_v27 = vld [vmem:[#allocation17_spill] sm:$0xff] }
 0x431   : > { %v4720_v32 = vadd.f32 %v10841_v31, %v15022_v13  ;;  %v4152_v13 = vadd.f32 %v16992_v9, %v16991_v27 }
 0x432   : > { %v4711_v37 = vpop.f32.mrf.mxu0  ;;  %v4872_v58 = vpop.f32.mrf.mxu1 }
 0x433   : > { %v5001_v10 = vadd.f32 %v10889_v62, %v4720_v32  ;;  %v4712_v61 = vadd.f32 %v4711_v37, %v15027_v3  ;;  %v4485_v8 = vadd.f32 %v15037_v0, %v4152_v13 }
 0x434   : > { %v10842_v12 = vpop.f32.mrf.mxu0  ;;  %v10890_v47 = vpop.f32.mrf.mxu1 }
 0x435   : > { %v5033_v18 = vmax.f32 %v15025_v17, %v5001_v10  ;;  %v4999_v14 = vadd.f32 %v4872_v58, %v4712_v61  ;;  %v4723_v36 = vadd.f32 %v10842_v12, %v15032_v4 }
 0x436   : > { %v4714_v31 = vpop.f32.mrf.mxu0  ;;  %v4875_v29 = vpop.f32.mrf.mxu1 }
 0x437   : > { %v5071_v62 = vadd.f32 %v15179_v22, %v5033_v18  ;;  %v5031_v3 = vmax.f32 %v15030_v52, %v4999_v14  ;;  %v5002_v32 = vadd.f32 %v10890_v47, %v4723_v36  ;;  %v4715_v37 = vadd.f32 %v4714_v31, %v15039_v49 }
 0x438   : > { %v10845_v55 = vpop.f32.mrf.mxu0  ;;  %v10893_v19 = vpop.f32.mrf.mxu1 }
 0x439   : > { %v5103_v17 = vmax.f32 %v5071_v62, 0.0  ;;  %v5069_v10 = vadd.f32 %v15179_v22, %v5031_v3  ;;  %v5034_v4 = vmax.f32 %v15035_v21, %v5002_v32  ;;  %v5000_v58 = vadd.f32 %v4875_v29, %v4715_v37 }
 0x43a   : > { %v4736_v9 = vadd.f32 %v10845_v55, %v15041_v28  ;;  %v4727_v27 = vpop.f32.mrf.mxu0  ;;  %v4888_v61 = vpop.f32.mrf.mxu1  ;;  %v16993_v28 = vld [vmem:[#allocation24_spill] sm:$0xff]  ;;  %v16994_v55 = vld [vmem:[#allocation25_spill] sm:$0xff] }
 0x43b   : > { %5137 = vst [vmem:[#allocation3 + $0x11] sm:$0xff] %v5103_v17  ;;  %v5101_v18 = vmax.f32 %v5069_v10, 0.0  ;;  %v5072_v52 = vadd.f32 %v15179_v22, %v5034_v4  ;;  %v5032_v14 = vmax.f32 %v4485_v8, %v5000_v58  ;;  %v4728_v49 = vadd.f32 %v4727_v27, %v15046_v20 }
 0x43c   : > { %v5005_v0 = vadd.f32 %v10893_v19, %v4736_v9  ;;  %v10846_v36 = vpop.f32.mrf.mxu0  ;;  %v10894_v12 = vpop.f32.mrf.mxu1  ;;  %v4168_v31 = vadd.f32 %v16994_v55, %v16993_v28 }
 0x43d   : > { %5135 = vst [vmem:[#allocation3 + $0x1] sm:$0xff] %v5101_v18  ;;  %v5104_v47 = vmax.f32 %v5072_v52, 0.0  ;;  %v5070_v13 = vadd.f32 %v15179_v22, %v5032_v14  ;;  %v5003_v21 = vadd.f32 %v4888_v61, %v4728_v49  ;;  %v4739_v29 = vadd.f32 %v10846_v36, %v15051_v15 }
 0x43e   : > { %v5037_v62 = vmax.f32 %v15044_v42, %v5005_v0  ;;  %v4730_v3 = vpop.f32.mrf.mxu0  ;;  %v4891_v32 = vpop.f32.mrf.mxu1  ;;  %v4489_v17 = vadd.f32 %v15056_v44, %v4168_v31 }
 0x43f   : > { %5138 = vst [vmem:[#allocation3 + $0x19] sm:$0xff] %v5104_v47  ;;  %v5102_v8 = vmax.f32 %v5070_v13, 0.0  ;;  %v5035_v20 = vmax.f32 %v15049_v1, %v5003_v21  ;;  %v5006_v19 = vadd.f32 %v10894_v12, %v4739_v29  ;;  %v4731_v37 = vadd.f32 %v4730_v3, %v15058_v43  ;;  %v16995_v13 = vld [vmem:[#allocation31_spill] sm:$0xff]  ;;  %v16996_v21 = vld [vmem:[#allocation32_spill] sm:$0xff] }
 0x440   : > { %v5075_v10 = vadd.f32 %v15179_v22, %v5037_v62  ;;  %v10849_v4 = vpop.f32.mrf.mxu0  ;;  %v10897_v15 = vpop.f32.mrf.mxu1  ;;  %v4184_v29 = vadd.f32 %v16996_v21, %v16995_v13 }
 0x441   : > { %5136 = vst [vmem:[#allocation3 + $0x9] sm:$0xff] %v5102_v8  ;;  %v5073_v58 = vadd.f32 %v15179_v22, %v5035_v20  ;;  %v5038_v42 = vmax.f32 %v15054_v59, %v5006_v19  ;;  %v5004_v9 = vadd.f32 %v4891_v32, %v4731_v37  ;;  %v4752_v27 = vadd.f32 %v10849_v4, %v15060_v38 }
 0x442   : > { %v5107_v61 = vmax.f32 %v5075_v10, 0.0  ;;  %v4743_v18 = vpop.f32.mrf.mxu0  ;;  %v4904_v1 = vpop.f32.mrf.mxu1  ;;  %v4493_v8 = vadd.f32 %v15075_v54, %v4184_v29 }
 0x443   : > { %v5105_v52 = vmax.f32 %v5073_v58, 0.0  ;;  %v5076_v43 = vadd.f32 %v15179_v22, %v5038_v42  ;;  %v5036_v14 = vmax.f32 %v4489_v17, %v5004_v9  ;;  %v5009_v44 = vadd.f32 %v10897_v15, %v4752_v27 }
 0x444   : > { %5141 = vst [vmem:[#allocation3 + $0x31] sm:$0xff] %v5107_v61  ;;  %v4744_v49 = vadd.f32 %v4743_v18, %v15065_v26  ;;  %v10850_v0 = vpop.f32.mrf.mxu0  ;;  %v10898_v36 = vpop.f32.mrf.mxu1  ;;  %v16997_v9 = vmov 0.0  }
 0x445   : > { %5139 = vst [vmem:[#allocation3 + $0x21] sm:$0xff] %v5105_v52  ;;  %v5108_v12 = vmax.f32 %v5076_v43, 0.0  ;;  %v5074_v59 = vadd.f32 %v15179_v22, %v5036_v14  ;;  %v5041_v47 = vmax.f32 %v15063_v48, %v5009_v44  ;;  %v4755_v38 = vadd.f32 %v10850_v0, %v15070_v30 }
 0x446   : > { %v5007_v28 = vadd.f32 %v4904_v1, %v4744_v49  ;;  %v4746_v55 = vpop.f32.mrf.mxu0  ;;  %v4907_v31 = vpop.f32.mrf.mxu1  ;;  %v5262_v42 = vld [vmem:[#allocation3 + $0x11] ss:$2 sm:$0xff] }
 0x447   : > { %5142 = vst [vmem:[#allocation3 + $0x39] sm:$0xff] %v5108_v12  ;;  %v5106_v62 = vmax.f32 %v5074_v59, 0.0  ;;  %v5079_v26 = vadd.f32 %v15179_v22, %v5041_v47  ;;  %v5010_v3 = vadd.f32 %v10898_v36, %v4755_v38  ;;  %v4747_v32 = vadd.f32 %v4746_v55, %v15077_v5  ;;  %v16998_v12 = vld [vmem:[#allocation38_spill] sm:$0xff]  ;;  %v16999_v59 = vld [vmem:[#allocation39_spill] sm:$0xff] }
 0x448   : > { %v5039_v20 = vmax.f32 %v15068_v39, %v5007_v28  ;;  %v10853_v48 = vpop.f32.mrf.mxu0  ;;  %v10901_v19 = vpop.f32.mrf.mxu1  ;;  %v5260_v30 = vld [vmem:[#allocation3 + $0x1] ss:$2 sm:$0xff]  ;;  %v5220_v37 = vld [vmem:[#allocation3] ss:$2 sm:$0xff]  ;;  %v5222_v17 = vld [vmem:[#allocation3 + $0x10] ss:$2 sm:$0xff]  ;;  %v4200_v47 = vadd.f32 %v16999_v59, %v16998_v12 }
 0x449   : > { %5140 = vst [vmem:[#allocation3 + $0x29] sm:$0xff] %v5106_v62  ;;  %v5111_v10 = vmax.f32 %v5079_v26, 0.0  ;;  %v5042_v4 = vmax.f32 %v15073_v6, %v5010_v3  ;;  %v5008_v15 = vadd.f32 %v4907_v31, %v4747_v32  ;;  %v4768_v58 = vadd.f32 %v10853_v48, %v15079_v24  ;;  %6898 = vst [vmem:[#allocation3] sm:$0x1] %v16997_v9 }
 0x44a   : > { %v5077_v5 = vadd.f32 %v15179_v22, %v5039_v20  ;;  %v4759_v54 = vpop.f32.mrf.mxu0  ;;  %v4920_v27 = vpop.f32.mrf.mxu1  ;;  %v15221_v39 = vpack.c.bf16 %v5262_v42, %v5260_v30  ;;  %v5251_v61 = vpack.c.bf16 %v5222_v17, %v5220_v37  ;;  %v4497_v31 = vadd.f32 %v15094_v33, %v4200_v47 }
 0x44b   : > { %5145 = vst [vmem:[#allocation3 + $0x51] sm:$0xff] %v5111_v10  ;;  %v5080_v18 = vadd.f32 %v15179_v22, %v5042_v4  ;;  %v5040_v1 = vmax.f32 %v4493_v8, %v5008_v15  ;;  %v5013_v52 = vadd.f32 %v10901_v19, %v4768_v58  ;;  %v4760_v6 = vadd.f32 %v4759_v54, %v15084_v25  ;;  %v15243_v10 = vld [vmem:[%s16816_s2 + $0x170] sm:$0xff]  }
 0x44c   : > { %v5109_v43 = vmax.f32 %v5077_v5, 0.0  ;;  %10935 = vmatprep.mubr.bf16.mxu0 %v15221_v39  ;;  %10967 = vmatprep.mubr.bf16.mxu1 %v5251_v61  ;;  %v10854_v24 = vpop.f32.mrf.mxu0  ;;  %v10902_v14 = vpop.f32.mrf.mxu1 }
 0x44d   : > { %v5112_v44 = vmax.f32 %v5080_v18, 0.0  ;;  %v5078_v49 = vadd.f32 %v15179_v22, %v5040_v1  ;;  %v5045_v0 = vmax.f32 %v15082_v2, %v5013_v52  ;;  %v5011_v36 = vadd.f32 %v4920_v27, %v4760_v6 }
 0x44e   : > { %5143 = vst [vmem:[#allocation3 + $0x41] sm:$0xff] %v5109_v43  ;;  %v4771_v38 = vadd.f32 %v10854_v24, %v15089_v50  ;;  %v4762_v13 = vpop.f32.mrf.mxu0  ;;  %v4923_v25 = vpop.f32.mrf.mxu1  ;;  %v5266_v30 = vld [vmem:[#allocation3 + $0x31] ss:$2 sm:$0xff]  ;;  %v15259_v43 = vld [vmem:[%s16816_s2 + $0x168] sm:$0xff]  }
 0x44f   : > { %5146 = vst [vmem:[#allocation3 + $0x59] sm:$0xff] %v5112_v44  ;;  %v5110_v21 = vmax.f32 %v5078_v49, 0.0  ;;  %v5083_v29 = vadd.f32 %v15179_v22, %v5045_v0  ;;  %v5043_v28 = vmax.f32 %v15087_v46, %v5011_v36  ;;  %v4763_v55 = vadd.f32 %v4762_v13, %v15096_v34 }
 0x450   : > { %v5014_v2 = vadd.f32 %v10902_v14, %v4771_v38  ;;  %v10857_v62 = vpop.f32.mrf.mxu0  ;;  %v10905_v26 = vpop.f32.mrf.mxu1  ;;  %v5264_v3 = vld [vmem:[#allocation3 + $0x21] ss:$2 sm:$0xff]  ;;  %v5224_v32 = vld [vmem:[#allocation3 + $0x20] ss:$2 sm:$0xff]  ;;  %v5226_v8 = vld [vmem:[#allocation3 + $0x30] ss:$2 sm:$0xff] }
 0x451   : > { %5144 = vst [vmem:[#allocation3 + $0x49] sm:$0xff] %v5110_v21  ;;  %v5115_v50 = vmax.f32 %v5083_v29, 0.0  ;;  %v5081_v20 = vadd.f32 %v15179_v22, %v5043_v28  ;;  %v5012_v48 = vadd.f32 %v4923_v25, %v4763_v55  ;;  %v4784_v19 = vadd.f32 %v10857_v62, %v15098_v53  ;;  %v17002_v25 = vld [vmem:[#allocation14_spill] sm:$0xff]  ;;  %v15280_v62 = vld [vmem:[%s16816_s2 + $0x160] sm:$0xff]  }
 0x452   : > { %v5046_v46 = vmax.f32 %v15092_v45, %v5014_v2  ;;  %v4775_v37 = vpop.f32.mrf.mxu0  ;;  %v4936_v34 = vpop.f32.mrf.mxu1  ;;  %v15238_v17 = vpack.c.bf16 %v5266_v30, %v5264_v3  ;;  %v5252_v33 = vpack.c.bf16 %v5226_v8, %v5224_v32  ;;  %v17004_v30 = vld [vmem:[#allocation19_spill] sm:$0xff] }
 0x453   : > { %5149 = vst [vmem:[#allocation3 + $0x71] sm:$0xff] %v5115_v50  ;;  %v5113_v4 = vmax.f32 %v5081_v20, 0.0  ;;  %v5044_v15 = vmax.f32 %v4497_v31, %v5012_v48  ;;  %v5017_v58 = vadd.f32 %v10905_v26, %v4784_v19  ;;  %v4776_v42 = vadd.f32 %v4775_v37, %v15103_v40  ;;  %v17003_v50 = vld [vmem:[#allocation10_spill] sm:$0xff] }
 0x454   : > { %v5084_v53 = vadd.f32 %v15179_v22, %v5046_v46  ;;  %10936 = vmatmul.mubr.bf16.vlgmr.msra.gmra.mxu0 %v15238_v17  ;;  %10968 = vmatmul.mubr.bf16.vlgmr.msra.gmra.mxu1 %v5252_v33  ;;  %v10858_v45 = vpop.f32.mrf.mxu0  ;;  %v10906_v5 = vpop.f32.mrf.mxu1  ;;  %v4216_v40 = vadd.f32 %v14868_v7, %v14865_v51  ;;  %v17000_v7 = vld [vmem:[#allocation13_spill] sm:$0xff]  ;;  %v17005_v33 = vld [vmem:[#allocation7_spill] sm:$0xff] }
 0x455   : > { %5147 = vst [vmem:[#allocation3 + $0x61] sm:$0xff] %v5113_v4  ;;  %v5082_v54 = vadd.f32 %v15179_v22, %v5044_v15  ;;  %v5049_v27 = vmax.f32 %v15101_v60, %v5017_v58  ;;  %v5015_v61 = vadd.f32 %v4936_v34, %v4776_v42  ;;  %v4787_v18 = vadd.f32 %v10858_v45, %v15108_v57  ;;  %v15263_v44 = vld [vmem:[#allocation3 + $0x33] ss:$2 sm:$0xff] }
 0x456   : > { %10984 = vmatpush3.bf16.msra.mxu0 %v15013_v11  ;;  %v5116_v1 = vmax.f32 %v5084_v53, 0.0  ;;  %v4778_v52 = vpop.f32.mrf.mxu0  ;;  %v4939_v6 = vpop.f32.mrf.mxu1  ;;  %11016 = vmatpush3.bf16.msra.mxu1 %v14920_v16  ;;  %v4501_v51 = vadd.f32 %v15113_v41, %v4216_v40  ;;  %v5270_v29 = vld [vmem:[#allocation3 + $0x51] ss:$2 sm:$0xff]  ;;  %v17010_v40 = vld [vmem:[#allocation26_spill] sm:$0xff] }
 0x457   : > { %10985 = vmatprep.subr.bf16.mxu0 %v15243_v10  ;;  %v5114_v60 = vmax.f32 %v5082_v54, 0.0  ;;  %v5087_v57 = vadd.f32 %v15179_v22, %v5049_v27  ;;  %v5047_v24 = vmax.f32 %v15106_v23, %v5015_v61  ;;  %v5018_v14 = vadd.f32 %v10906_v5, %v4787_v18  ;;  %11017 = vmatprep.subr.bf16.mxu1 %v14934_v56  ;;  %v17001_v23 = vld [vmem:[#allocation12_spill] sm:$0xff]  ;;  %v17006_v4 = vld [vmem:[#allocation9_spill] sm:$0xff]  ;;  %v17008_v27 = vld [vmem:[#allocation27_spill] sm:$0xff] }
 0x458   : > { %5150 = vst [vmem:[#allocation3 + $0x79] sm:$0xff] %v5116_v1  ;;  %v4779_v16 = vadd.f32 %v4778_v52, %v17000_v7  ;;  %v10861_v49 = vpop.f32.mrf.mxu0  ;;  %v10909_v0 = vpop.f32.mrf.mxu1  ;;  %v5268_v36 = vld [vmem:[#allocation3 + $0x41] ss:$2 sm:$0xff]  ;;  %v5228_v12 = vld [vmem:[#allocation3 + $0x40] ss:$2 sm:$0xff]  ;;  %v15297_v53 = vld [vmem:[%s16816_s2 + $0x158] sm:$0xff]  }
 0x459   : > { %v5230_v59 = vld [vmem:[#allocation3 + $0x50] ss:$2 sm:$0xff]  ;;  %5148 = vst [vmem:[#allocation3 + $0x69] sm:$0xff] %v5114_v60  ;;  %v5119_v47 = vmax.f32 %v5087_v57, 0.0  ;;  %v5085_v38 = vadd.f32 %v15179_v22, %v5047_v24  ;;  %v5050_v13 = vmax.f32 %v17001_v23, %v5018_v14  ;;  %v4800_v21 = vadd.f32 %v10861_v49, %v17002_v25  ;;  %6899 = vst [vmem:[#allocation3 + $0x41] sm:$0x1] %v16997_v9 }
 0x45a   : > { %10986 = vmatpush3.bf16.msra.mxu0 %v15243_v10  ;;  %v5016_v41 = vadd.f32 %v4939_v6, %v4779_v16  ;;  %v4791_v28 = vpop.f32.mrf.mxu0  ;;  %v4952_v55 = vpop.f32.mrf.mxu1  ;;  %v15273_v31 = vpack.c.bf16 %v5270_v29, %v5268_v36  ;;  %v5253_v2 = vpack.c.bf16 %v5230_v59, %v5228_v12  ;;  %11018 = vmatpush3.bf16.msra.mxu1 %v14934_v56  ;;  %v17007_v45 = vld [vmem:[#allocation20_spill] sm:$0xff]  ;;  %v17009_v18 = vld [vmem:[#allocation11_spill] sm:$0xff]  ;;  %v17011_v7 = vld [vmem:[#allocation21_spill] sm:$0xff] }
 0x45b   : > { %10987 = vmatprep.subr.bf16.mxu0 %v15259_v43  ;;  %5153 = vst [vmem:[#allocation3 + $0x91] sm:$0xff] %v5119_v47  ;;  %v5117_v26 = vmax.f32 %v5085_v38, 0.0  ;;  %v5088_v3 = vadd.f32 %v15179_v22, %v5050_v13  ;;  %v5021_v32 = vadd.f32 %v10909_v0, %v4800_v21  ;;  %v4792_v8 = vadd.f32 %v4791_v28, %v15122_v63  ;;  %v17012_v12 = vld [vmem:[#allocation28_spill] sm:$0xff]  ;;  %v15315_v25 = vld [vmem:[%s16816_s2 + $0x150] sm:$0xff]  }
 0x45c   : > { %11019 = vmatprep.subr.bf16.mxu1 %v17003_v50  ;;  %v5048_v20 = vmax.f32 %v4501_v51, %v5016_v41  ;;  %10939 = vmatprep.mubr.bf16.mxu0 %v15273_v31  ;;  %v10862_v56 = vpop.f32.mrf.mxu0  ;;  %v10910_v48 = vpop.f32.mrf.mxu1  ;;  %v4232_v63 = vadd.f32 %v17006_v4, %v17005_v33  ;;  %v17013_v28 = vld [vmem:[#allocation34_spill] sm:$0xff] }
 0x45d   : > { %10971 = vmatprep.mubr.bf16.mxu1 %v5253_v2  ;;  %5151 = vst [vmem:[#allocation3 + $0x81] sm:$0xff] %v5117_v26  ;;  %v5120_v19 = vmax.f32 %v5088_v3, 0.0  ;;  %v5053_v46 = vmax.f32 %v17004_v30, %v5021_v32  ;;  %v5019_v37 = vadd.f32 %v4952_v55, %v4792_v8  ;;  %v4803_v34 = vadd.f32 %v10862_v56, %v15127_v35  ;;  %v17014_v2 = vld [vmem:[#allocation15_spill] sm:$0xff]  ;;  %v17015_v56 = vld [vmem:[#allocation40_spill] sm:$0xff]  ;;  %v17017_v30 = vld [vmem:[#allocation30_spill] sm:$0xff] }
 0x45e   : > { %10988 = vmatpush3.bf16.msra.mxu0 %v15259_v43  ;;  %v5086_v15 = vadd.f32 %v15179_v22, %v5048_v20  ;;  %v4794_v58 = vpop.f32.mrf.mxu0  ;;  %v4955_v42 = vpop.f32.mrf.mxu1  ;;  %11020 = vmatpush3.bf16.msra.mxu1 %v17003_v50  ;;  %v4505_v1 = vadd.f32 %v17010_v40, %v4232_v63  ;;  %v15332_v63 = vld [vmem:[%s16816_s2 + $0x148] sm:$0xff]  }
 0x45f   : > { %10989 = vmatprep.subr.bf16.mxu0 %v15280_v62  ;;  %5154 = vst [vmem:[#allocation3 + $0x99] sm:$0xff] %v5120_v19  ;;  %v5091_v35 = vadd.f32 %v15179_v22, %v5053_v46  ;;  %v5051_v5 = vmax.f32 %v17007_v45, %v5019_v37  ;;  %v5022_v54 = vadd.f32 %v10910_v48, %v4803_v34  ;;  %v5274_v0 = vld [vmem:[#allocation3 + $0x71] ss:$2 sm:$0xff] }
 0x460   : > { %v4795_v61 = vadd.f32 %v4794_v58, %v17008_v27  ;;  %11021 = vmatprep.subr.bf16.mxu1 %v17009_v18  ;;  %v5118_v52 = vmax.f32 %v5086_v15, 0.0  ;;  %v10865_v6 = vpop.f32.mrf.mxu0  ;;  %v10913_v60 = vpop.f32.mrf.mxu1  ;;  %v5272_v57 = vld [vmem:[#allocation3 + $0x61] ss:$2 sm:$0xff]  ;;  %v5232_v24 = vld [vmem:[#allocation3 + $0x60] ss:$2 sm:$0xff] }
 0x461   : > { %v5123_v14 = vmax.f32 %v5091_v35, 0.0  ;;  %v5089_v51 = vadd.f32 %v15179_v22, %v5051_v5  ;;  %v5054_v16 = vmax.f32 %v17011_v7, %v5022_v54  ;;  %v5234_v36 = vld [vmem:[#allocation3 + $0x70] ss:$2 sm:$0xff]  ;;  %v4816_v59 = vadd.f32 %v10865_v6, %v17012_v12  ;;  %v17022_v27 = vld [vmem:[#allocation42_spill] sm:$0xff] }
 0x462   : > { %v5020_v49 = vadd.f32 %v4955_v42, %v4795_v61  ;;  %10990 = vmatpush3.bf16.msra.mxu0 %v15280_v62  ;;  %5152 = vst [vmem:[#allocation3 + $0x89] sm:$0xff] %v5118_v52  ;;  %v4807_v47 = vpop.f32.mrf.mxu0  ;;  %v4968_v38 = vpop.f32.mrf.mxu1  ;;  %v15308_v23 = vpack.c.bf16 %v5274_v0, %v5272_v57  ;;  %v5254_v13 = vpack.c.bf16 %v5234_v36, %v5232_v24  ;;  %v17016_v19 = vld [vmem:[#allocation29_spill] sm:$0xff]  ;;  %v17019_v58 = vld [vmem:[#allocation35_spill] sm:$0xff]  ;;  %v17021_v54 = vld [vmem:[#allocation16_spill] sm:$0xff] }
 0x463   : > { %11022 = vmatpush3.bf16.msra.mxu1 %v17009_v18  ;;  %10991 = vmatprep.subr.bf16.mxu0 %v15297_v53  ;;  %5157 = vst [vmem:[#allocation3 + $0xb1] sm:$0xff] %v5123_v14  ;;  %v5121_v21 = vmax.f32 %v5089_v51, 0.0  ;;  %v5092_v29 = vadd.f32 %v15179_v22, %v5054_v16  ;;  %v4808_v55 = vadd.f32 %v4807_v47, %v17013_v28  ;;  %v17018_v37 = vld [vmem:[#allocation33_spill] sm:$0xff]  ;;  %v17020_v45 = vld [vmem:[#allocation43_spill] sm:$0xff]  ;;  %v17024_v14 = vld [vmem:[#allocation44_spill] sm:$0xff] }
 0x464   : > { %v5052_v41 = vmax.f32 %v4505_v1, %v5020_v49  ;;  %11023 = vmatprep.subr.bf16.mxu1 %v17014_v2  ;;  %v5025_v26 = vadd.f32 %v10913_v60, %v4816_v59  ;;  %10940 = vmatmul.mubr.bf16.gmra.mxu0 %v15308_v23  ;;  %v10866_v3 = vpop.f32.mrf.mxu0  ;;  %v10914_v32 = vpop.f32.mrf.mxu1  ;;  %v4248_v46 = vadd.f32 %v17017_v30, %v17016_v19  ;;  %v17023_v60 = vld [vmem:[#allocation41_spill] sm:$0xff]  ;;  %v17025_v28 = vld [vmem:[#allocation22_spill] sm:$0xff]  ;;  %v17029_v19 = vld [vmem:[#allocation36_spill] sm:$0xff] }
 0x465   : > { %10972 = vmatmul.mubr.bf16.gmra.mxu1 %v5254_v13  ;;  %5155 = vst [vmem:[#allocation3 + $0xa1] sm:$0xff] %v5121_v21  ;;  %v5124_v8 = vmax.f32 %v5092_v29, 0.0  ;;  %v5023_v20 = vadd.f32 %v4968_v38, %v4808_v55  ;;  %v4819_v48 = vadd.f32 %v10866_v3, %v17015_v56  ;;  %v15350_v38 = vld [vmem:[%s16816_s2 + $0x140] sm:$0xff]   ;;  %v17026_v55 = vld [vmem:[#allocation46_spill] sm:$0xff] }
 0x466   : > { %v5090_v50 = vadd.f32 %v15179_v22, %v5052_v41  ;;  %10992 = vmatpush3.bf16.msra.mxu0 %v15297_v53  ;;  %v5057_v34 = vmax.f32 %v17018_v37, %v5025_v26  ;;  %v4810_v33 = vpop.f32.mrf.mxu0  ;;  %v4971_v4 = vpop.f32.mrf.mxu1  ;;  %v4509_v61 = vadd.f32 %v17022_v27, %v4248_v46  ;;  %v5278_v52 = vld [vmem:[#allocation3 + $0x91] ss:$2 sm:$0xff] }
 0x467   : > { %11024 = vmatpush3.bf16.msra.mxu1 %v17014_v2  ;;  %10993 = vmatprep.subr.bf16.mxu0 %v15315_v25  ;;  %5158 = vst [vmem:[#allocation3 + $0xb9] sm:$0xff] %v5124_v8  ;;  %v5055_v42 = vmax.f32 %v17019_v58, %v5023_v20  ;;  %v5026_v35 = vadd.f32 %v10914_v32, %v4819_v48  ;;  %v17028_v56 = vld [vmem:[#allocation48_spill] sm:$0xff]  ;;  %v17030_v30 = vld [vmem:[#allocation37_spill] sm:$0xff]  ;;  %v17031_v58 = vld [vmem:[#allocation51_spill] sm:$0xff] }
 0x468   : > { %v5122_v15 = vmax.f32 %v5090_v50, 0.0  ;;  %v4811_v5 = vadd.f32 %v4810_v33, %v17020_v45  ;;  %11025 = vmatprep.subr.bf16.mxu1 %v17021_v54  ;;  %v5095_v18 = vadd.f32 %v15179_v22, %v5057_v34  ;;  %v10869_v40 = vpop.f32.mrf.mxu0  ;;  %v10917_v1 = vpop.f32.mrf.mxu1  ;;  %v17027_v50 = vld [vmem:[#allocation45_spill] sm:$0xff]  ;;  %v4264_v46 = vadd.f32 %v17030_v30, %v17029_v19  ;;  %v17032_v45 = vld [vmem:[#allocation23_spill] sm:$0xff] }
 0x469   : > { %v5093_v6 = vadd.f32 %v15179_v22, %v5055_v42  ;;  %v5058_v57 = vmax.f32 %v17023_v60, %v5026_v35  ;;  %v4832_v51 = vadd.f32 %v10869_v40, %v17024_v14  ;;  %v5276_v7 = vld [vmem:[#allocation3 + $0x81] ss:$2 sm:$0xff]  ;;  %v5236_v16 = vld [vmem:[#allocation3 + $0x80] ss:$2 sm:$0xff]  ;;  %v5238_v49 = vld [vmem:[#allocation3 + $0x90] ss:$2 sm:$0xff] }
 0x46a   : > { %5156 = vst [vmem:[#allocation3 + $0xa9] sm:$0xff] %v5122_v15  ;;  %v5024_v24 = vadd.f32 %v4971_v4, %v4811_v5  ;;  %10994 = vmatpush3.bf16.msra.mxu0 %v15315_v25  ;;  %v5127_v0 = vmax.f32 %v5095_v18, 0.0  ;;  %v4823_v36 = vpop.f32.mrf.mxu0  ;;  %v4984_v12 = vpop.f32.mrf.mxu1  ;;  %v15343_v59 = vpack.c.bf16 %v5278_v52, %v5276_v7  ;;  %v5255_v47 = vpack.c.bf16 %v5238_v49, %v5236_v16  ;;  %v17033_v5 = vld [vmem:[#allocation50_spill] sm:$0xff]  ;;  %v17034_v27 = vld [vmem:[#allocation47_spill] sm:$0xff]  ;;  %v17035_v60 = vld [vmem:[#allocation49_spill] sm:$0xff] }
 0x46b   : > { %11026 = vmatpush3.bf16.msra.mxu1 %v17021_v54  ;;  %10995 = vmatprep.subr.bf16.mxu0 %v15332_v63  ;;  %v5125_v13 = vmax.f32 %v5093_v6, 0.0  ;;  %v5096_v21 = vadd.f32 %v15179_v22, %v5058_v57  ;;  %v5029_v41 = vadd.f32 %v10917_v1, %v4832_v51  ;;  %v4824_v2 = vadd.f32 %v4823_v36, %v17026_v55  ;;  %v17036_v16 = vld [vmem:[#allocation8_spill] sm:$0xff]  ;;  %v5304_v19 = vld [vmem:[#allocation3 + $0x22] ss:$2 sm:$0xff] }
 0x46c   : > { %v5056_v29 = vmax.f32 %v4509_v61, %v5024_v24  ;;  %11027 = vmatprep.subr.bf16.mxu1 %v17025_v28  ;;  %5161 = vst [vmem:[#allocation3 + $0xd1] sm:$0xff] %v5127_v0  ;;  %10943 = vmatprep.mubr.bf16.mxu0 %v15343_v59  ;;  %v10870_v26 = vpop.f32.mrf.mxu0  ;;  %v10918_v3 = vpop.f32.mrf.mxu1  ;;  %v4513_v54 = vadd.f32 %v17033_v5, %v4264_v46  ;;  %v5308_v30 = vld [vmem:[#allocation3 + $0x42] ss:$2 sm:$0xff]  ;;  %v5306_v46 = vld [vmem:[#allocation3 + $0x32] ss:$2 sm:$0xff] }
 0x46d   : > { %10975 = vmatprep.mubr.bf16.mxu1 %v5255_v47  ;;  %5159 = vst [vmem:[#allocation3 + $0xc1] sm:$0xff] %v5125_v13  ;;  %v5128_v32 = vmax.f32 %v5096_v21, 0.0  ;;  %v5061_v20 = vmax.f32 %v17027_v50, %v5029_v41  ;;  %v4835_v48 = vadd.f32 %v10870_v26, %v17028_v56  ;;  %v5027_v37 = vadd.f32 %v4984_v12, %v4824_v2  ;;  %v5302_v56 = vld [vmem:[#allocation3 + $0x12] ss:$2 sm:$0xff] }
 0x46e   : > { %v5094_v8 = vadd.f32 %v15179_v22, %v5056_v29  ;;  %10996 = vmatpush3.bf16.msra.mxu0 %v15332_v63  ;;  %v4826_v34 = vpop.f32.mrf.mxu0  ;;  %v5282_v35 = vld [vmem:[#allocation3 + $0xb1] ss:$2 sm:$0xff]  ;;  %v4987_v18 = vpop.f32.mrf.mxu1 }
 0x46f   : > { %11028 = vmatpush3.bf16.msra.mxu1 %v17025_v28  ;;  %10997 = vmatprep.subr.bf16.mxu0 %v15350_v38  ;;  %5162 = vst [vmem:[#allocation3 + $0xd9] sm:$0xff] %v5128_v32  ;;  %v5099_v4 = vadd.f32 %v15179_v22, %v5061_v20  ;;  %v5030_v15 = vadd.f32 %v10918_v3, %v4835_v48  ;;  %v5300_v3 = vld [vmem:[#allocation3 + $0x2] ss:$2 sm:$0xff] }
 0x470   : > { %v5126_v33 = vmax.f32 %v5094_v8, 0.0  ;;  %v4827_v42 = vadd.f32 %v4826_v34, %v17031_v58  ;;  %11029 = vmatprep.subr.bf16.mxu1 %v17032_v45  ;;  %v5059_v61 = vmax.f32 %v17034_v27, %v5027_v37  ;;  %v5331_v48 = vpack.c.bf16 %v5302_v56, %v5300_v3  ;;  %v5310_v34 = vld [vmem:[#allocation3 + $0x52] ss:$2 sm:$0xff]  ;;  %v5312_v58 = vld [vmem:[#allocation3 + $0x62] ss:$2 sm:$0xff] }
 0x471   : > { %v5280_v40 = vld [vmem:[#allocation3 + $0xa1] ss:$2 sm:$0xff]  ;;  %v5240_v1 = vld [vmem:[#allocation3 + $0xa0] ss:$2 sm:$0xff]  ;;  %v5242_v52 = vld [vmem:[#allocation3 + $0xb0] ss:$2 sm:$0xff]  ;;  %v5062_v57 = vmax.f32 %v17035_v60, %v5030_v15  ;;  %v5332_v37 = vpack.c.bf16 %v5306_v46, %v5304_v19 }
 0x472   : > { %5160 = vst [vmem:[#allocation3 + $0xc9] sm:$0xff] %v5126_v33  ;;  %v5131_v6 = vmax.f32 %v5099_v4, 0.0  ;;  %v5028_v24 = vadd.f32 %v4987_v18, %v4827_v42  ;;  %v15370_v14 = vpack.c.bf16 %v5282_v35, %v5280_v40  ;;  %10998 = vmatpush3.bf16.msra.mxu0 %v15350_v38  ;;  %v5097_v51 = vadd.f32 %v15179_v22, %v5059_v61  ;;  %v12067_v4 = vld [vmem:[%s16816_s2 + $0xf8] sm:$0xff]   ;;  %v12068_v15 = vld [vmem:[%s16816_s2 + $0xf0] sm:$0xff]   ;;  %v15526_v46 = vld [vmem:[%s16816_s2 + $0x188] sm:$0xff]  }
 0x473   : > { %v5256_v7 = vpack.c.bf16 %v5242_v52, %v5240_v1  ;;  %11030 = vmatpush3.bf16.msra.mxu1 %v17032_v45  ;;  %11047 = vmatprep.subr.bf16.mxu0 %v17036_v16  ;;  %v5100_v49 = vadd.f32 %v15179_v22, %v5062_v57  ;;  %v5333_v33 = vpack.c.bf16 %v5310_v34, %v5308_v30  ;;  %v5316_v42 = vld [vmem:[#allocation3 + $0x82] ss:$2 sm:$0xff]  ;;  %v5314_v35 = vld [vmem:[#allocation3 + $0x72] ss:$2 sm:$0xff]  ;;  %v5342_v57 = vld [vmem:[#allocation3 + $0x13] ss:$2 sm:$0xff] }
 0x474   : > { %5165 = vst [vmem:[#allocation3 + $0xf1] sm:$0xff] %v5131_v6  ;;  %v5060_v0 = vmax.f32 %v4513_v54, %v5028_v24  ;;  %10944 = vmatmul.mubr.bf16.gmra.mxu0 %v15370_v14  ;;  %11079 = vmatprep.subr.bf16.mxu1 %v15013_v11  ;;  %v5129_v36 = vmax.f32 %v5097_v51, 0.0  ;;  %v12069_v45 = vld [vmem:[%s16816_s2 + $0xe8] sm:$0xff]   ;;  %v5334_v5 = vpack.c.bf16 %v5314_v35, %v5312_v58  ;;  %v12071_v40 = vld [vmem:[%s16816_s2 + $0xd8] sm:$0xff]   ;;  %v15456_v3 = vld [vmem:[%s16816_s2 + $0x1b0] sm:$0xff]  }
 0x475   : > { %10976 = vmatmul.mubr.bf16.gmra.mxu1 %v5256_v7  ;;  %v5132_v12 = vmax.f32 %v5100_v49, 0.0  ;;  %v5320_v27 = vld [vmem:[#allocation3 + $0xa2] ss:$2 sm:$0xff]  ;;  %v5322_v18 = vld [vmem:[#allocation3 + $0xb2] ss:$2 sm:$0xff]  ;;  %17040 = vst [vmem:[#allocation25_spill] sm:$0xff] %v15456_v3 }
 0x476   : > { %v5098_v47 = vadd.f32 %v15179_v22, %v5060_v0  ;;  %5163 = vst [vmem:[#allocation3 + $0xe1] sm:$0xff] %v5129_v36  ;;  %v5286_v21 = vld [vmem:[#allocation3 + $0xd1] ss:$2 sm:$0xff]  ;;  %v5336_v1 = vpack.c.bf16 %v5322_v18, %v5320_v27  ;;  %v12073_v24 = vld [vmem:[%s16816_s2 + $0xc8] sm:$0xff]   ;;  %v15512_v19 = vld [vmem:[%s16816_s2 + $0x190] sm:$0xff]  }
 0x477   : > { %5166 = vst [vmem:[#allocation3 + $0xf9] sm:$0xff] %v5132_v12  ;;  %v5350_v16 = vld [vmem:[#allocation3 + $0x53] ss:$2 sm:$0xff]  ;;  %v5344_v49 = vld [vmem:[#allocation3 + $0x23] ss:$2 sm:$0xff]  ;;  %17048 = vst [vmem:[#allocation10_spill] sm:$0xff] %v15512_v19 }
 0x478   : > { %v5130_v13 = vmax.f32 %v5098_v47, 0.0  ;;  %v5372_v0 = vpack.c.bf16 %v15263_v44, %v5344_v49  ;;  %v5348_v36 = vld [vmem:[#allocation3 + $0x43] ss:$2 sm:$0xff]  ;;  %v5358_v12 = vld [vmem:[#allocation3 + $0x93] ss:$2 sm:$0xff]  ;;  %17050 = vst [vmem:[#allocation7_spill] sm:$0xff] %v15526_v46 }
 0x479   : > { %v5284_v29 = vld [vmem:[#allocation3 + $0xc1] ss:$2 sm:$0xff]  ;;  %v5244_v41 = vld [vmem:[#allocation3 + $0xc0] ss:$2 sm:$0xff]  ;;  %v5246_v28 = vld [vmem:[#allocation3 + $0xd0] ss:$2 sm:$0xff] }
 0x47a   : > { %5164 = vst [vmem:[#allocation3 + $0xe9] sm:$0xff] %v5130_v13  ;;  %v15380_v55 = vpack.c.bf16 %v5286_v21, %v5284_v29  ;;  %v5257_v2 = vpack.c.bf16 %v5246_v28, %v5244_v41  ;;  %v5324_v61 = vld [vmem:[#allocation3 + $0xc2] ss:$2 sm:$0xff]  ;;  %v5352_v47 = vld [vmem:[#allocation3 + $0x63] ss:$2 sm:$0xff]  ;;  %v15540_v34 = vld [vmem:[%s16816_s2 + $0x180] sm:$0xff]  }
 0x47b   : > { %v5356_v21 = vld [vmem:[#allocation3 + $0x83] ss:$2 sm:$0xff]  ;;  %v5362_v44 = vld [vmem:[#allocation3 + $0xb3] ss:$2 sm:$0xff]  ;;  %17052 = vst [vmem:[#allocation20_spill] sm:$0xff] %v15540_v34 }
 0x47c   : > { %10947 = vmatprep.mubr.bf16.mxu0 %v15380_v55  ;;  %10979 = vmatprep.mubr.bf16.mxu1 %v5257_v2  ;;  %v5375_v29 = vpack.c.bf16 %v5358_v12, %v5356_v21  ;;  %v5364_v28 = vld [vmem:[#allocation3 + $0xc3] ss:$2 sm:$0xff] }
 0x47d   : > { %v15498_v56 = vld [vmem:[%s16816_s2 + $0x198] sm:$0xff]   ;;  %v15521_v30 = vld [vmem:[%s16816_s2 + $0x1c8] sm:$0xff]  }
 0x47e   : > { %v5290_v26 = vld [vmem:[#allocation3 + $0xf1] ss:$2 sm:$0xff]  ;;  %v5330_v60 = vld [vmem:[#allocation3 + $0xf2] ss:$2 sm:$0xff]  ;;  %17046 = vst [vmem:[#allocation12_spill] sm:$0xff] %v15498_v56  ;;  %17049 = vst [vmem:[#allocation19_spill] sm:$0xff] %v15521_v30 }
 0x481   : > { %v5288_v32 = vld [vmem:[#allocation3 + $0xe1] ss:$2 sm:$0xff]  ;;  %v5248_v8 = vld [vmem:[#allocation3 + $0xe0] ss:$2 sm:$0xff]  ;;  %v5250_v50 = vld [vmem:[#allocation3 + $0xf0] ss:$2 sm:$0xff] }
 0x482   : > { %v15383_v22 = vpack.c.bf16 %v5290_v26, %v5288_v32  ;;  %v5258_v20 = vpack.c.bf16 %v5250_v50, %v5248_v8  ;;  %v5328_v6 = vld [vmem:[#allocation3 + $0xe2] ss:$2 sm:$0xff]  ;;  %v5368_v2 = vld [vmem:[#allocation3 + $0xe3] ss:$2 sm:$0xff]  ;;  %v5370_v26 = vld [vmem:[#allocation3 + $0xf3] ss:$2 sm:$0xff] }
 0x483   : > { %v5338_v51 = vpack.c.bf16 %v5330_v60, %v5328_v6  ;;  %v15465_v32 = vld [vmem:[%s16816_s2 + $0x1e8] sm:$0xff]   ;;  %v15479_v50 = vld [vmem:[%s16816_s2 + $0x1e0] sm:$0xff]  }
 0x484   : > { %10948 = vmatmul.mubr.bf16.gmra.mxu0 %v15383_v22  ;;  %10980 = vmatmul.mubr.bf16.gmra.mxu1 %v5258_v20  ;;  %17041 = vst [vmem:[#allocation31_spill] sm:$0xff] %v15465_v32  ;;  %v15470_v8 = vld [vmem:[%s16816_s2 + $0x1a8] sm:$0xff]   ;;  %17043 = vst [vmem:[#allocation38_spill] sm:$0xff] %v15479_v50  ;;  %v15493_v20 = vld [vmem:[%s16816_s2 + $0x1d8] sm:$0xff]  }
 0x485   : > { %10999 = vmatprep.mubr.bf16.mxu0 %v5331_v48  ;;  %11031 = vmatprep.mubr.bf16.mxu1 %v5331_v48  ;;  %17042 = vst [vmem:[#allocation32_spill] sm:$0xff] %v15470_v8  ;;  %17045 = vst [vmem:[#allocation13_spill] sm:$0xff] %v15493_v20  ;;  %v15507_v48 = vld [vmem:[%s16816_s2 + $0x1d0] sm:$0xff]  }
 0x486   : > { %17047 = vst [vmem:[#allocation14_spill] sm:$0xff] %v15507_v48 }
 0x48c   : > { %11000 = vmatmul.mubr.bf16.vlgmr.msra.gmra.mxu0 %v5332_v37  ;;  %11032 = vmatmul.mubr.bf16.vlgmr.msra.gmra.mxu1 %v5332_v37  ;;  %v15535_v37 = vld [vmem:[%s16816_s2 + $0x1c0] sm:$0xff]  }
 0x48d   : > { %11048 = vmatpush3.bf16.msra.mxu0 %v12067_v4  ;;  %11003 = vmatprep.mubr.bf16.mxu0 %v5333_v33  ;;  %17051 = vst [vmem:[#allocation9_spill] sm:$0xff] %v15535_v37 }
 0x48e   : > { %11035 = vmatprep.mubr.bf16.mxu1 %v5333_v33  ;;  %11080 = vmatpush3.bf16.msra.mxu1 %v15013_v11  ;;  %v5318_v11 = vld [vmem:[#allocation3 + $0x92] ss:$2 sm:$0xff] }
 0x48f   : > { %11049 = vmatprep.subr.bf16.mxu0 %v12068_v15  ;;  %11081 = vmatprep.subr.bf16.mxu1 %v15243_v10  ;;  %v5335_v54 = vpack.c.bf16 %v5318_v11, %v5316_v42  ;;  %v15549_v33 = vld [vmem:[%s16816_s2 + $0x238] sm:$0xff]  }
 0x490   : > { %17053 = vst [vmem:[#allocation27_spill] sm:$0xff] %v15549_v33 }
 0x491   : > { %11050 = vmatpush3.bf16.msra.mxu0 %v12068_v15 }
 0x492   : > { %11082 = vmatpush3.bf16.msra.mxu1 %v15243_v10  ;;  %11051 = vmatprep.subr.bf16.mxu0 %v12069_v45  ;;  %v12070_v10 = vld [vmem:[%s16816_s2 + $0xe0] sm:$0xff]  }
 0x493   : > { %11083 = vmatprep.subr.bf16.mxu1 %v15259_v43 }
 0x494   : > { %11004 = vmatmul.mubr.bf16.gmra.mxu0 %v5334_v5  ;;  %11036 = vmatmul.mubr.bf16.gmra.mxu1 %v5334_v5 }
 0x495   : > { %11052 = vmatpush3.bf16.msra.mxu0 %v12069_v45  ;;  %11007 = vmatprep.mubr.bf16.mxu0 %v5335_v54 }
 0x496   : > { %11039 = vmatprep.mubr.bf16.mxu1 %v5335_v54  ;;  %11084 = vmatpush3.bf16.msra.mxu1 %v15259_v43  ;;  %v5326_v43 = vld [vmem:[#allocation3 + $0xd2] ss:$2 sm:$0xff] }
 0x497   : > { %11053 = vmatprep.subr.bf16.mxu0 %v12070_v10  ;;  %11085 = vmatprep.subr.bf16.mxu1 %v15280_v62  ;;  %v5337_v52 = vpack.c.bf16 %v5326_v43, %v5324_v61 }
 0x499   : > { %11054 = vmatpush3.bf16.msra.mxu0 %v12070_v10 }
 0x49a   : > { %11086 = vmatpush3.bf16.msra.mxu1 %v15280_v62  ;;  %11055 = vmatprep.subr.bf16.mxu0 %v12071_v40  ;;  %v12072_v62 = vld [vmem:[%s16816_s2 + $0xd0] sm:$0xff]  }
 0x49b   : > { %11087 = vmatprep.subr.bf16.mxu1 %v15297_v53 }
 0x49c   : > { %11008 = vmatmul.mubr.bf16.gmra.mxu0 %v5336_v1  ;;  %11040 = vmatmul.mubr.bf16.gmra.mxu1 %v5336_v1 }
 0x49d   : > { %11056 = vmatpush3.bf16.msra.mxu0 %v12071_v40  ;;  %11011 = vmatprep.mubr.bf16.mxu0 %v5337_v52 }
 0x49e   : > { %11043 = vmatprep.mubr.bf16.mxu1 %v5337_v52  ;;  %11088 = vmatpush3.bf16.msra.mxu1 %v15297_v53  ;;  %v5340_v53 = vld [vmem:[#allocation3 + $0x3] ss:$2 sm:$0xff] }
 0x49f   : > { %11057 = vmatprep.subr.bf16.mxu0 %v12072_v62  ;;  %11089 = vmatprep.subr.bf16.mxu1 %v15315_v25  ;;  %v5371_v7 = vpack.c.bf16 %v5342_v57, %v5340_v53 }
 0x4a1   : > { %11058 = vmatpush3.bf16.msra.mxu0 %v12072_v62 }
 0x4a2   : > { %11090 = vmatpush3.bf16.msra.mxu1 %v15315_v25  ;;  %11059 = vmatprep.subr.bf16.mxu0 %v12073_v24  ;;  %v12074_v25 = vld [vmem:[%s16816_s2 + $0xc0] sm:$0xff]  }
 0x4a3   : > { %11091 = vmatprep.subr.bf16.mxu1 %v15332_v63 }
 0x4a4   : > { %11012 = vmatmul.mubr.bf16.gmra.mxu0 %v5338_v51  ;;  %11044 = vmatmul.mubr.bf16.gmra.mxu1 %v5338_v51 }
 0x4a5   : > { %11060 = vmatpush3.bf16.msra.mxu0 %v12073_v24  ;;  %11063 = vmatprep.mubr.bf16.mxu0 %v15221_v39  ;;  %v5373_v39 = vpack.c.bf16 %v5350_v16, %v5348_v36 }
 0x4a6   : > { %11092 = vmatpush3.bf16.msra.mxu1 %v15332_v63  ;;  %11095 = vmatprep.mubr.bf16.mxu1 %v5371_v7  ;;  %v5354_v63 = vld [vmem:[#allocation3 + $0x73] ss:$2 sm:$0xff] }
 0x4a7   : > { %11061 = vmatprep.subr.bf16.mxu0 %v12074_v25  ;;  %11093 = vmatprep.subr.bf16.mxu1 %v15350_v38  ;;  %v5374_v13 = vpack.c.bf16 %v5354_v63, %v5352_v47 }
 0x4a9   : > { %11062 = vmatpush3.bf16.msra.mxu0 %v12074_v25 }
 0x4aa   : > { %11094 = vmatpush3.bf16.msra.mxu1 %v15350_v38  ;;  %v5366_v38 = vld [vmem:[#allocation3 + $0xd3] ss:$2 sm:$0xff] }
 0x4ac   : > { %11064 = vmatmul.mubr.bf16.vlgmr.msra.gmra.mxu0 %v15238_v17  ;;  %v5360_v17 = vld [vmem:[#allocation3 + $0xa3] ss:$2 sm:$0xff] }
 0x4ad   : > { %11096 = vmatmul.mubr.bf16.vlgmr.msra.gmra.mxu1 %v5372_v0  ;;  %11067 = vmatprep.mubr.bf16.mxu0 %v15273_v31  ;;  %v5376_v41 = vpack.c.bf16 %v5362_v44, %v5360_v17  ;;  %v5377_v31 = vpack.c.bf16 %v5366_v38, %v5364_v28 }
 0x4ae   : > { %11099 = vmatprep.mubr.bf16.mxu1 %v5373_v39 }
 0x4b4   : > { %11068 = vmatmul.mubr.bf16.gmra.mxu0 %v15308_v23  ;;  %v5378_v23 = vpack.c.bf16 %v5370_v26, %v5368_v2 }
 0x4b5   : > { %11100 = vmatmul.mubr.bf16.gmra.mxu1 %v5374_v13  ;;  %11071 = vmatprep.mubr.bf16.mxu0 %v15343_v59  ;;  %v15437_v59 = vld [vmem:[%s16816_s2 + $0x1f8] sm:$0xff]  }
 0x4b6   : > { %11103 = vmatprep.mubr.bf16.mxu1 %v5375_v29  ;;  %17037 = vst [vmem:[#allocation17_spill] sm:$0xff] %v15437_v59  ;;  %11111 = vmatprep.subr.bf16.mxu0 %v15437_v59 }
 0x4b7   : > { %11112 = vmatpush3.bf16.msra.mxu0 %v15437_v59 }
 0x4bc   : > { %11072 = vmatmul.mubr.bf16.gmra.mxu0 %v15370_v14  ;;  %v15442_v14 = vld [vmem:[%s16816_s2 + $0x1b8] sm:$0xff]  }
 0x4bd   : > { %11104 = vmatmul.mubr.bf16.gmra.mxu1 %v5376_v41  ;;  %11075 = vmatprep.mubr.bf16.mxu0 %v15380_v55  ;;  %17038 = vst [vmem:[#allocation18_spill] sm:$0xff] %v15442_v14  ;;  %v15451_v55 = vld [vmem:[%s16816_s2 + $0x1f0] sm:$0xff]  }
 0x4be   : > { %11107 = vmatprep.mubr.bf16.mxu1 %v5377_v31  ;;  %11135 = vmatprep.subr.bf16.mxu1 %v15442_v14  ;;  %17039 = vst [vmem:[#allocation24_spill] sm:$0xff] %v15451_v55 }
 0x4bf   : > { %11136 = vmatpush3.bf16.msra.mxu1 %v15442_v14  ;;  %11113 = vmatprep.subr.bf16.mxu0 %v15451_v55 }
 0x4c0   : > { %11137 = vmatprep.subr.bf16.mxu1 %v15456_v3  ;;  %11114 = vmatpush3.bf16.msra.mxu0 %v15451_v55 }
 0x4c1   : > { %11115 = vmatprep.subr.bf16.mxu0 %v15465_v32 }
 0x4c3   : > { %11138 = vmatpush3.bf16.msra.mxu1 %v15456_v3 }
 0x4c4   : > { %11076 = vmatmul.mubr.bf16.gmra.mxu0 %v15383_v22  ;;  %11139 = vmatprep.subr.bf16.mxu1 %v15470_v8  ;;  %v15484_v22 = vld [vmem:[%s16816_s2 + $0x1a0] sm:$0xff]  }
 0x4c5   : > { %11108 = vmatmul.mubr.bf16.gmra.mxu1 %v5378_v23  ;;  %11116 = vmatpush3.bf16.msra.mxu0 %v15465_v32  ;;  %17044 = vst [vmem:[#allocation39_spill] sm:$0xff] %v15484_v22 }
 0x4c6   : > { %11117 = vmatprep.subr.bf16.mxu0 %v15479_v50 }
 0x4c7   : > { %11140 = vmatpush3.bf16.msra.mxu1 %v15470_v8 }
 0x4c8   : > { %11141 = vmatprep.subr.bf16.mxu1 %v15484_v22 }
 0x4c9   : > { %11118 = vmatpush3.bf16.msra.mxu0 %v15479_v50 }
 0x4ca   : > { %11119 = vmatprep.subr.bf16.mxu0 %v15493_v20 }
 0x4cb   : > { %11142 = vmatpush3.bf16.msra.mxu1 %v15484_v22 }
 0x4cc   : > { %11143 = vmatprep.subr.bf16.mxu1 %v15498_v56 }
 0x4cd   : > { %11120 = vmatpush3.bf16.msra.mxu0 %v15493_v20 }
 0x4ce   : > { %11121 = vmatprep.subr.bf16.mxu0 %v15507_v48 }
 0x4cf   : > { %11144 = vmatpush3.bf16.msra.mxu1 %v15498_v56 }
 0x4d0   : > { %11145 = vmatprep.subr.bf16.mxu1 %v15512_v19 }
 0x4d1   : > { %11122 = vmatpush3.bf16.msra.mxu0 %v15507_v48 }
 0x4d2   : > { %11123 = vmatprep.subr.bf16.mxu0 %v15521_v30 }
 0x4d3   : > { %11146 = vmatpush3.bf16.msra.mxu1 %v15512_v19 }
 0x4d4   : > { %11147 = vmatprep.subr.bf16.mxu1 %v15526_v46 }
 0x4d5   : > { %11124 = vmatpush3.bf16.msra.mxu0 %v15521_v30 }
 0x4d6   : > { %11125 = vmatprep.subr.bf16.mxu0 %v15535_v37 }
 0x4d7   : > { %11148 = vmatpush3.bf16.msra.mxu1 %v15526_v46 }
 0x4d8   : > { %11149 = vmatprep.subr.bf16.mxu1 %v15540_v34 }
 0x4d9   : > { %11126 = vmatpush3.bf16.msra.mxu0 %v15535_v37 }
 0x4da   : > { %11159 = vmatprep.subr.bf16.mxu0 %v15549_v33 }
 0x4db   : > { %11150 = vmatpush3.bf16.msra.mxu1 %v15540_v34 }
 0x4dc   : > { %11183 = vmatprep.subr.bf16.mxu1 %v15437_v59 }
 0x514   : > { %v15553_v4 = vpop.f32.mrf.mxu0  ;;  %v15555_v15 = vpop.f32.mrf.mxu1 }
 0x516   : > { %v15557_v58 = vpop.f32.mrf.mxu0  ;;  %v15559_v42 = vpop.f32.mrf.mxu1 }
 0x518   : > { %v15561_v35 = vpop.f32.mrf.mxu0  ;;  %v15563_v45 = vpop.f32.mrf.mxu1 }
 0x51a   : > { %v15565_v5 = vpop.f32.mrf.mxu0  ;;  %v15567_v11 = vpop.f32.mrf.mxu1 }
 0x524   : > { %v15569_v54 = vpop.f32.mrf.mxu0 }
 0x525   : > { %v15571_v10 = vpop.f32.mrf.mxu1 }
 0x526   : > { %v15573_v27 = vpop.f32.mrf.mxu0 }
 0x527   : > { %v15575_v61 = vpop.f32.mrf.mxu1 }
 0x528   : > { %v15577_v18 = vpop.f32.mrf.mxu0 }
 0x529   : > { %v15579_v40 = vpop.f32.mrf.mxu1 }
 0x52a   : > { %v15581_v1 = vpop.f32.mrf.mxu0 }
 0x52b   : > { %v15583_v43 = vpop.f32.mrf.mxu1 }
 0x534   : > { %v15585_v52 = vpop.f32.mrf.mxu0 }
 0x535   : > { %v15587_v62 = vpop.f32.mrf.mxu1 }
 0x536   : > { %v15589_v6 = vpop.f32.mrf.mxu0 }
 0x537   : > { %v15591_v60 = vpop.f32.mrf.mxu1 }
 0x538   : > { %v15593_v57 = vpop.f32.mrf.mxu0 }
 0x539   : > { %v15595_v24 = vpop.f32.mrf.mxu1 }
 0x53a   : > { %v15597_v51 = vpop.f32.mrf.mxu0 }
 0x53b   : > { %v15599_v53 = vpop.f32.mrf.mxu1 }
 0x544   : > { %v15601_v7 = vpop.f32.mrf.mxu0  ;;  %v15603_v25 = vpop.f32.mrf.mxu1 }
 0x546   : > { %v15605_v16 = vpop.f32.mrf.mxu0  ;;  %v15607_v49 = vpop.f32.mrf.mxu1 }
 0x547   : > { %17054 = vst [vmem:[#allocation11_spill] sm:$0xff] %v15605_v16  ;;  %17055 = vst [vmem:[#allocation26_spill] sm:$0xff] %v15607_v49 }
 0x548   : > { %v15609_v0 = vpop.f32.mrf.mxu0  ;;  %v15611_v36 = vpop.f32.mrf.mxu1 }
 0x549   : > { %17056 = vst [vmem:[#allocation21_spill] sm:$0xff] %v15609_v0  ;;  %17057 = vst [vmem:[#allocation28_spill] sm:$0xff] %v15611_v36  ;;  %v5615_v36 = vadd.f32 %v15555_v15, %v15553_v4 }
 0x54a   : > { %v15613_v39 = vpop.f32.mrf.mxu0  ;;  %v15615_v63 = vpop.f32.mrf.mxu1 }
 0x54b   : > { %17058 = vst [vmem:[#allocation34_spill] sm:$0xff] %v15613_v39  ;;  %17059 = vst [vmem:[#allocation15_spill] sm:$0xff] %v15615_v63 }
 0x54c   : > { %v11001_v12 = vpop.f32.mrf.mxu0  ;;  %v11033_v47 = vpop.f32.mrf.mxu1 }
 0x54e   : > { %v5751_v13 = vpop.f32.mrf.mxu0  ;;  %v5864_v21 = vpop.f32.mrf.mxu1 }
 0x550   : > { %v11002_v29 = vpop.f32.mrf.mxu0  ;;  %v11034_v44 = vpop.f32.mrf.mxu1 }
 0x552   : > { %v5754_v38 = vpop.f32.mrf.mxu0  ;;  %v5867_v17 = vpop.f32.mrf.mxu1 }
 0x554   : > { %v15617_v41 = vpop.f32.mrf.mxu0  ;;  %v11037_v28 = vpop.f32.mrf.mxu1 }
 0x556   : > { %v15619_v31 = vpop.f32.mrf.mxu0  ;;  %v5880_v2 = vpop.f32.mrf.mxu1 }
 0x558   : > { %v15621_v26 = vpop.f32.mrf.mxu0  ;;  %v15623_v23 = vpop.f32.mrf.mxu1 }
 0x55a   : > { %v15625_v34 = vpop.f32.mrf.mxu0  ;;  %v15627_v46 = vpop.f32.mrf.mxu1 }
 0x55c   : > { %v15629_v19 = vpop.f32.mrf.mxu0  ;;  %v15631_v56 = vpop.f32.mrf.mxu1 }
 0x55e   : > { %v15633_v22 = vpop.f32.mrf.mxu0  ;;  %v15635_v8 = vpop.f32.mrf.mxu1 }
 0x560   : > { %v15637_v3 = vpop.f32.mrf.mxu0  ;;  %v15639_v14 = vpop.f32.mrf.mxu1 }
 0x562   : > { %v15641_v37 = vpop.f32.mrf.mxu0  ;;  %v15643_v30 = vpop.f32.mrf.mxu1 }
 0x563   : > { %17060 = vst [vmem:[#allocation40_spill] sm:$0xff] %v15641_v37 }
 0x564   : > { %v15645_v48 = vpop.f32.mrf.mxu0  ;;  %v15647_v20 = vpop.f32.mrf.mxu1 }
 0x565   : > { %17061 = vst [vmem:[#allocation29_spill] sm:$0xff] %v15645_v48  ;;  %17062 = vst [vmem:[#allocation30_spill] sm:$0xff] %v15647_v20  ;;  %v5816_v20 = vadd.f32 %v11001_v12, %v5615_v36 }
 0x566   : > { %v15649_v50 = vpop.f32.mrf.mxu0  ;;  %v15651_v32 = vpop.f32.mrf.mxu1 }
 0x567   : > { %17063 = vst [vmem:[#allocation33_spill] sm:$0xff] %v15649_v50  ;;  %17064 = vst [vmem:[#allocation35_spill] sm:$0xff] %v15651_v32  ;;  %v5607_v50 = vadd.f32 %v15559_v42, %v15557_v58  ;;  %v5610_v58 = vadd.f32 %v15567_v11, %v15565_v5 }
 0x568   : > { %v15653_v55 = vpop.f32.mrf.mxu0  ;;  %v15655_v59 = vpop.f32.mrf.mxu1 }
 0x569   : > { %17065 = vst [vmem:[#allocation43_spill] sm:$0xff] %v15653_v55  ;;  %17066 = vst [vmem:[#allocation16_spill] sm:$0xff] %v15655_v59  ;;  %v5618_v59 = vadd.f32 %v15563_v45, %v15561_v35  ;;  %v5814_v4 = vadd.f32 %v5751_v13, %v5607_v50  ;;  %v5815_v12 = vadd.f32 %v5754_v38, %v5610_v58 }
 0x56a   : > { %v15657_v33 = vpop.f32.mrf.mxu0  ;;  %v15659_v63 = vpop.f32.mrf.mxu1  ;;  %v5634_v38 = vadd.f32 %v15579_v40, %v15577_v18 }
 0x56b   : > { %17067 = vst [vmem:[#allocation42_spill] sm:$0xff] %v15657_v33  ;;  %17068 = vst [vmem:[#allocation41_spill] sm:$0xff] %v15659_v63  ;;  %v15670_v33 = vld [vmem:[%s16817_s3 + $0x2] ss:$0 sm:$0xff] }
 0x56c   : > { %v11065_v39 = vpop.f32.mrf.mxu0 }
 0x56d   : > { %v5970_v0 = vadd.f32 %v11065_v39, %v11033_v47  ;;  %v11097_v48 = vpop.f32.mrf.mxu1 }
 0x56e   : > { %v5961_v9 = vpop.f32.mrf.mxu0 }
 0x56f   : > { %v6123_v32 = vadd.f32 %v11097_v48, %v5970_v0  ;;  %v5962_v37 = vadd.f32 %v5961_v9, %v5864_v21  ;;  %v6058_v55 = vpop.f32.mrf.mxu1  ;;  %v5817_v48 = vadd.f32 %v11002_v29, %v5618_v59  ;;  %v5623_v59 = vadd.f32 %v15575_v61, %v15573_v27 }
 0x570   : > { %v11066_v63 = vpop.f32.mrf.mxu0 }
 0x571   : > { %v6139_v15 = vmax.f32 %v5816_v20, %v6123_v32  ;;  %v6121_v39 = vadd.f32 %v6058_v55, %v5962_v37  ;;  %v5973_v47 = vadd.f32 %v11066_v63, %v11034_v44  ;;  %v11098_v49 = vpop.f32.mrf.mxu1  ;;  %v5631_v37 = vadd.f32 %v15571_v10, %v15569_v54 }
 0x572   : > { %v5964_v9 = vpop.f32.mrf.mxu0 }
 0x573   : > { %v6161_v42 = vadd.f32 %v15670_v33, %v6139_v15  ;;  %v6137_v0 = vmax.f32 %v5814_v4, %v6121_v39  ;;  %v6124_v35 = vadd.f32 %v11098_v49, %v5973_v47  ;;  %v5965_v45 = vadd.f32 %v5964_v9, %v5867_v17  ;;  %v6061_v36 = vpop.f32.mrf.mxu1 }
 0x574   : > { %v11069_v21 = vpop.f32.mrf.mxu0  ;;  %v5820_v17 = vadd.f32 %v15617_v41, %v5631_v37  ;;  %v5818_v4 = vadd.f32 %v15619_v31, %v5623_v59  ;;  %v5821_v39 = vadd.f32 %v15621_v26, %v5634_v38  ;;  %v5647_v9 = vadd.f32 %v15587_v62, %v15585_v52  ;;  %v17069_v38 = vld [vmem:[#allocation11_spill] sm:$0xff] }
 0x575   : > { %v6177_v16 = vmax.f32 %v6161_v42, 0.0  ;;  %v6159_v50 = vadd.f32 %v15670_v33, %v6137_v0  ;;  %v6140_v32 = vmax.f32 %v5817_v48, %v6124_v35  ;;  %v6122_v55 = vadd.f32 %v6061_v36, %v5965_v45  ;;  %v11101_v20 = vpop.f32.mrf.mxu1 }
 0x576   : > { %v5986_v5 = vadd.f32 %v11069_v21, %v11037_v28  ;;  %v5977_v11 = vpop.f32.mrf.mxu0  ;;  %v5824_v36 = vadd.f32 %v15629_v19, %v5647_v9 }
 0x577   : > { %6195 = vst [vmem:[#allocation2 + $0x11] sm:$0xff] %v6177_v16  ;;  %v6175_v49 = vmax.f32 %v6159_v50, 0.0  ;;  %v6162_v63 = vadd.f32 %v15670_v33, %v6140_v32  ;;  %v6138_v13 = vmax.f32 %v5815_v12, %v6122_v55  ;;  %v5978_v29 = vadd.f32 %v5977_v11, %v5880_v2  ;;  %v6074_v44 = vpop.f32.mrf.mxu1 }
 0x578   : > { %v6127_v54 = vadd.f32 %v11101_v20, %v5986_v5  ;;  %v11070_v10 = vpop.f32.mrf.mxu0  ;;  %v5626_v2 = vadd.f32 %v15583_v43, %v15581_v1  ;;  %v5639_v32 = vadd.f32 %v15591_v60, %v15589_v6  ;;  %v5650_v55 = vadd.f32 %v15595_v24, %v15593_v57 }
 0x579   : > { %6193 = vst [vmem:[#allocation2 + $0x1] sm:$0xff] %v6175_v49  ;;  %v6178_v27 = vmax.f32 %v6162_v63, 0.0  ;;  %v6160_v61 = vadd.f32 %v15670_v33, %v6138_v13  ;;  %v6125_v16 = vadd.f32 %v6074_v44, %v5978_v29  ;;  %v5989_v28 = vadd.f32 %v11070_v10, %v15623_v23  ;;  %v11102_v15 = vpop.f32.mrf.mxu1 }
 0x57a   : > { %v6143_v18 = vmax.f32 %v5820_v17, %v6127_v54  ;;  %v5980_v40 = vpop.f32.mrf.mxu0  ;;  %v5819_v23 = vadd.f32 %v15625_v34, %v5626_v2  ;;  %v5642_v49 = vadd.f32 %v15599_v53, %v15597_v51  ;;  %v5822_v6 = vadd.f32 %v15633_v22, %v5639_v32  ;;  %v17070_v17 = vld [vmem:[#allocation26_spill] sm:$0xff]  ;;  %v17071_v53 = vld [vmem:[#allocation40_spill] sm:$0xff]  ;;  %v17080_v32 = vld [vmem:[#allocation15_spill] sm:$0xff] }
 0x57b   : > { %6196 = vst [vmem:[#allocation2 + $0x19] sm:$0xff] %v6178_v27  ;;  %v6176_v41 = vmax.f32 %v6160_v61, 0.0  ;;  %v6141_v31 = vmax.f32 %v5818_v4, %v6125_v16  ;;  %v6128_v47 = vadd.f32 %v11102_v15, %v5989_v28  ;;  %v5981_v58 = vadd.f32 %v5980_v40, %v15627_v46  ;;  %v6077_v48 = vpop.f32.mrf.mxu1  ;;  %v17072_v15 = vld [vmem:[#allocation30_spill] sm:$0xff] }
 0x57c   : > { %v6165_v42 = vadd.f32 %v15670_v33, %v6143_v18  ;;  %v11073_v0 = vpop.f32.mrf.mxu0  ;;  %v5825_v60 = vadd.f32 %v15637_v3, %v5650_v55  ;;  %v5655_v51 = vadd.f32 %v17070_v17, %v17069_v38  ;;  %v5823_v22 = vadd.f32 %v17071_v53, %v5642_v49 }
 0x57d   : > { %6194 = vst [vmem:[#allocation2 + $0x9] sm:$0xff] %v6176_v41  ;;  %v6163_v1 = vadd.f32 %v15670_v33, %v6141_v31  ;;  %v6144_v43 = vmax.f32 %v5821_v39, %v6128_v47  ;;  %v6126_v26 = vadd.f32 %v6077_v48, %v5981_v58  ;;  %v6002_v35 = vadd.f32 %v11073_v0, %v15631_v56  ;;  %v11105_v45 = vpop.f32.mrf.mxu1 }
 0x57e   : > { %v6181_v46 = vmax.f32 %v6165_v42, 0.0  ;;  %v5993_v12 = vpop.f32.mrf.mxu0  ;;  %v17073_v18 = vmov 0.0  }
 0x57f   : > { %v6179_v21 = vmax.f32 %v6163_v1, 0.0  ;;  %v6166_v52 = vadd.f32 %v15670_v33, %v6144_v43  ;;  %v6142_v62 = vmax.f32 %v5819_v23, %v6126_v26  ;;  %v6131_v34 = vadd.f32 %v11105_v45, %v6002_v35  ;;  %v6090_v50 = vpop.f32.mrf.mxu1  ;;  %v17075_v23 = vld [vmem:[#allocation35_spill] sm:$0xff]  ;;  %v17076_v1 = vld [vmem:[#allocation33_spill] sm:$0xff] }
 0x580   : > { %6199 = vst [vmem:[#allocation2 + $0x31] sm:$0xff] %v6181_v46  ;;  %v5994_v56 = vadd.f32 %v5993_v12, %v15635_v8  ;;  %v11074_v20 = vpop.f32.mrf.mxu0  ;;  %v5826_v43 = vadd.f32 %v17076_v1, %v5655_v51 }
 0x581   : > { %6197 = vst [vmem:[#allocation2 + $0x21] sm:$0xff] %v6179_v21  ;;  %v6182_v19 = vmax.f32 %v6166_v52, 0.0  ;;  %v6164_v37 = vadd.f32 %v15670_v33, %v6142_v62  ;;  %v6147_v59 = vmax.f32 %v5824_v36, %v6131_v34  ;;  %v6005_v5 = vadd.f32 %v11074_v20, %v15639_v14  ;;  %v11106_v11 = vpop.f32.mrf.mxu1  ;;  %v17077_v52 = vld [vmem:[#allocation21_spill] sm:$0xff]  ;;  %v17078_v62 = vld [vmem:[#allocation28_spill] sm:$0xff] }
 0x582   : > { %v6129_v57 = vadd.f32 %v6090_v50, %v5994_v56  ;;  %v5996_v24 = vpop.f32.mrf.mxu0  ;;  %v5663_v14 = vadd.f32 %v15603_v25, %v15601_v7  ;;  %v6275_v39 = vld [vmem:[#allocation2 + $0x11] ss:$2 sm:$0xff]  ;;  %v17074_v7 = vld [vmem:[#allocation29_spill] sm:$0xff]  ;;  %v5666_v34 = vadd.f32 %v17078_v62, %v17077_v52 }
 0x583   : > { %6200 = vst [vmem:[#allocation2 + $0x39] sm:$0xff] %v6182_v19  ;;  %v6180_v8 = vmax.f32 %v6164_v37, 0.0  ;;  %v6169_v63 = vadd.f32 %v15670_v33, %v6147_v59  ;;  %v6132_v13 = vadd.f32 %v11106_v11, %v6005_v5  ;;  %v5997_v29 = vadd.f32 %v5996_v24, %v15643_v30  ;;  %v6093_v44 = vpop.f32.mrf.mxu1  ;;  %v17079_v50 = vld [vmem:[#allocation34_spill] sm:$0xff]  ;;  %v17081_v56 = vld [vmem:[#allocation16_spill] sm:$0xff]  ;;  %v17082_v11 = vld [vmem:[#allocation41_spill] sm:$0xff] }
 0x584   : > { %v6145_v4 = vmax.f32 %v5822_v6, %v6129_v57  ;;  %v11077_v3 = vpop.f32.mrf.mxu0  ;;  %v6274_v54 = vld [vmem:[#allocation2 + $0x1] ss:$2 sm:$0xff]  ;;  %v6262_v10 = vld [vmem:[#allocation2] ss:$2 sm:$0xff]  ;;  %v6263_v27 = vld [vmem:[#allocation2 + $0x10] ss:$2 sm:$0xff]  ;;  %v5828_v25 = vadd.f32 %v17074_v7, %v5663_v14  ;;  %v5658_v55 = vadd.f32 %v17080_v32, %v17079_v50 }
 0x585   : > { %6198 = vst [vmem:[#allocation2 + $0x29] sm:$0xff] %v6180_v8  ;;  %v6185_v61 = vmax.f32 %v6169_v63, 0.0  ;;  %v6148_v16 = vmax.f32 %v5825_v60, %v6132_v13  ;;  %v6130_v28 = vadd.f32 %v6093_v44, %v5997_v29  ;;  %v6018_v30 = vadd.f32 %v11077_v3, %v17072_v15  ;;  %v11109_v2 = vpop.f32.mrf.mxu1  ;;  %7453 = vst [vmem:[#allocation2] sm:$0x1] %v17073_v18  ;;  %v17083_v57 = vld [vmem:[#allocation43_spill] sm:$0xff]  ;;  %v17084_v8 = vld [vmem:[#allocation42_spill] sm:$0xff] }
 0x586   : > { %v6167_v40 = vadd.f32 %v15670_v33, %v6145_v4  ;;  %v6009_v41 = vpop.f32.mrf.mxu0  ;;  %v15721_v31 = vpack.c.bf16 %v6275_v39, %v6274_v54  ;;  %v6270_v47 = vpack.c.bf16 %v6263_v27, %v6262_v10  ;;  %v5829_v24 = vadd.f32 %v17083_v57, %v5666_v34  ;;  %v15745_v4 = vld [vmem:[%s16816_s2 + $0x230] sm:$0xff]   ;;  %v17086_v15 = vld [vmem:[#allocation17_spill] sm:$0xff]  ;;  %v17087_v39 = vld [vmem:[#allocation24_spill] sm:$0xff] }
 0x587   : > { %6203 = vst [vmem:[#allocation2 + $0x51] sm:$0xff] %v6185_v61  ;;  %v6170_v58 = vadd.f32 %v15670_v33, %v6148_v16  ;;  %v6146_v48 = vmax.f32 %v5823_v22, %v6130_v28  ;;  %v6135_v9 = vadd.f32 %v11109_v2, %v6018_v30  ;;  %v6010_v42 = vadd.f32 %v6009_v41, %v17075_v23  ;;  %v6106_v0 = vpop.f32.mrf.mxu1  ;;  %v17085_v16 = vld [vmem:[#allocation27_spill] sm:$0xff]  ;;  %v15757_v30 = vld [vmem:[%s16816_s2 + $0x228] sm:$0xff]   ;;  %v11911_v50 = vld [vmem:[%s16816_s2 + $0x200] sm:$0xff]  }
 0x588   : > { %v6183_v26 = vmax.f32 %v6167_v40, 0.0  ;;  %11127 = vmatprep.mubr.bf16.mxu0 %v15721_v31  ;;  %11151 = vmatprep.mubr.bf16.mxu1 %v6270_v47  ;;  %v11078_v35 = vpop.f32.mrf.mxu0  ;;  %v15735_v60 = vld [vmem:[#allocation2 + $0x13] ss:$2 sm:$0xff]  ;;  %v5827_v63 = vadd.f32 %v17084_v8, %v5658_v55  ;;  %v6287_v1 = vld [vmem:[#allocation2 + $0x2] ss:$2 sm:$0xff] }
 0x589   : > { %v6186_v45 = vmax.f32 %v6170_v58, 0.0  ;;  %v6168_v36 = vadd.f32 %v15670_v33, %v6146_v48  ;;  %v6151_v46 = vmax.f32 %v5828_v25, %v6135_v9  ;;  %v6133_v12 = vadd.f32 %v6106_v0, %v6010_v42  ;;  %v11110_v21 = vpop.f32.mrf.mxu1  ;;  %v15768_v48 = vld [vmem:[%s16816_s2 + $0x220] sm:$0xff]   ;;  %v17088_v9 = vld [vmem:[#allocation31_spill] sm:$0xff]  ;;  %v17089_v42 = vld [vmem:[#allocation38_spill] sm:$0xff] }
 0x58a   : > { %6201 = vst [vmem:[#allocation2 + $0x41] sm:$0xff] %v6183_v26  ;;  %v6021_v20 = vadd.f32 %v11078_v35, %v17081_v56  ;;  %v6012_v19 = vpop.f32.mrf.mxu0  ;;  %v6277_v6 = vld [vmem:[#allocation2 + $0x31] ss:$2 sm:$0xff]  ;;  %v11910_v62 = vld [vmem:[%s16816_s2 + $0x208] sm:$0xff]  }
 0x58b   : > { %6204 = vst [vmem:[#allocation2 + $0x59] sm:$0xff] %v6186_v45  ;;  %v6184_v37 = vmax.f32 %v6168_v36, 0.0  ;;  %v6173_v59 = vadd.f32 %v15670_v33, %v6151_v46  ;;  %v6149_v5 = vmax.f32 %v5826_v43, %v6133_v12  ;;  %v6013_v49 = vadd.f32 %v6012_v19, %v17082_v11  ;;  %v6109_v29 = vpop.f32.mrf.mxu1  ;;  %v15778_v23 = vld [vmem:[%s16816_s2 + $0x218] sm:$0xff]   ;;  %v17090_v12 = vld [vmem:[#allocation13_spill] sm:$0xff]  ;;  %v11909_v52 = vld [vmem:[%s16816_s2 + $0x210] sm:$0xff]  }
 0x58c   : > { %v6136_v13 = vadd.f32 %v11110_v21, %v6021_v20  ;;  %v6276_v44 = vld [vmem:[#allocation2 + $0x21] ss:$2 sm:$0xff]  ;;  %v6264_v14 = vld [vmem:[#allocation2 + $0x20] ss:$2 sm:$0xff]  ;;  %v6265_v38 = vld [vmem:[#allocation2 + $0x30] ss:$2 sm:$0xff] }
 0x58d   : > { %6202 = vst [vmem:[#allocation2 + $0x49] sm:$0xff] %v6184_v37  ;;  %v6189_v17 = vmax.f32 %v6173_v59, 0.0  ;;  %v6171_v51 = vadd.f32 %v15670_v33, %v6149_v5  ;;  %v6134_v53 = vadd.f32 %v6109_v29, %v6013_v49  ;;  %v15740_v22 = vpack.c.bf16 %v6277_v6, %v6276_v44  ;;  %7454 = vst [vmem:[#allocation2 + $0x21] sm:$0x1] %v17073_v18  ;;  %v6289_v46 = vld [vmem:[#allocation2 + $0x12] ss:$2 sm:$0xff] }
 0x58e   : > { %v6152_v3 = vmax.f32 %v5829_v24, %v6136_v13  ;;  %v6271_v54 = vpack.c.bf16 %v6265_v38, %v6264_v14  ;;  %v6302_v21 = vpack.c.bf16 %v6289_v46, %v6287_v1  ;;  %v17091_v34 = vld [vmem:[#allocation14_spill] sm:$0xff]  ;;  %v17092_v32 = vld [vmem:[#allocation19_spill] sm:$0xff]  ;;  %v17093_v55 = vld [vmem:[#allocation9_spill] sm:$0xff] }
 0x58f   : > { %6207 = vst [vmem:[#allocation2 + $0x71] sm:$0xff] %v6189_v17  ;;  %v6187_v10 = vmax.f32 %v6171_v51, 0.0  ;;  %v6150_v27 = vmax.f32 %v5827_v63, %v6134_v53  ;;  %11128 = vmatmul.mubr.bf16.vlgmr.msra.gmra.mxu0 %v15740_v22  ;;  %v6291_v56 = vld [vmem:[#allocation2 + $0x22] ss:$2 sm:$0xff]  ;;  %v6293_v19 = vld [vmem:[#allocation2 + $0x32] ss:$2 sm:$0xff] }
 0x590   : > { %v6174_v61 = vadd.f32 %v15670_v33, %v6152_v3  ;;  %11152 = vmatmul.mubr.bf16.vlgmr.msra.gmra.mxu1 %v6271_v54  ;;  %11160 = vmatpush3.bf16.msra.mxu0 %v17085_v16  ;;  %v6303_v37 = vpack.c.bf16 %v6293_v19, %v6291_v56  ;;  %v17094_v59 = vld [vmem:[#allocation18_spill] sm:$0xff]  ;;  %v17095_v49 = vld [vmem:[#allocation25_spill] sm:$0xff]  ;;  %v17096_v8 = vld [vmem:[#allocation32_spill] sm:$0xff] }
 0x591   : > { %6205 = vst [vmem:[#allocation2 + $0x61] sm:$0xff] %v6187_v10  ;;  %v6172_v28 = vadd.f32 %v15670_v33, %v6150_v27  ;;  %11184 = vmatpush3.bf16.msra.mxu1 %v17086_v15  ;;  %11161 = vmatprep.subr.bf16.mxu0 %v15745_v4  ;;  %v6306_v63 = vld [vmem:[#allocation2 + $0x3] ss:$2 sm:$0xff]  ;;  %v17097_v29 = vld [vmem:[#allocation39_spill] sm:$0xff]  ;;  %v17098_v44 = vld [vmem:[#allocation12_spill] sm:$0xff] }
 0x592   : > { %v6190_v2 = vmax.f32 %v6174_v61, 0.0  ;;  %11185 = vmatprep.subr.bf16.mxu1 %v17087_v39  ;;  %v6279_v25 = vld [vmem:[#allocation2 + $0x51] ss:$2 sm:$0xff]  ;;  %v6297_v5 = vld [vmem:[#allocation2 + $0x52] ss:$2 sm:$0xff]  ;;  %v6314_v13 = vpack.c.bf16 %v15735_v60, %v6306_v63  ;;  %v15867_v15 = vld [vmem:[%s16816_s2 + $0x2a8] sm:$0xff]  }
 0x593   : > { %v6188_v7 = vmax.f32 %v6172_v28, 0.0  ;;  %v17100_v60 = vld [vmem:[#allocation7_spill] sm:$0xff]  ;;  %v17101_v14 = vld [vmem:[#allocation20_spill] sm:$0xff]  ;;  %v6308_v51 = vld [vmem:[#allocation2 + $0x23] ss:$2 sm:$0xff] }
 0x594   : > { %6208 = vst [vmem:[#allocation2 + $0x79] sm:$0xff] %v6190_v2  ;;  %11162 = vmatpush3.bf16.msra.mxu0 %v15745_v4  ;;  %v6278_v40 = vld [vmem:[#allocation2 + $0x41] ss:$2 sm:$0xff]  ;;  %v6266_v41 = vld [vmem:[#allocation2 + $0x40] ss:$2 sm:$0xff]  ;;  %v15839_v61 = vld [vmem:[%s16816_s2 + $0x2b8] sm:$0xff]  }
 0x595   : > { %v6267_v33 = vld [vmem:[#allocation2 + $0x50] ss:$2 sm:$0xff]  ;;  %6206 = vst [vmem:[#allocation2 + $0x69] sm:$0xff] %v6188_v7  ;;  %11186 = vmatpush3.bf16.msra.mxu1 %v17087_v39  ;;  %11163 = vmatprep.subr.bf16.mxu0 %v15757_v30  ;;  %v15763_v47 = vpack.c.bf16 %v6279_v25, %v6278_v40  ;;  %v6309_v38 = vld [vmem:[#allocation2 + $0x33] ss:$2 sm:$0xff] }
 0x596   : > { %v6272_v58 = vpack.c.bf16 %v6267_v33, %v6266_v41  ;;  %11187 = vmatprep.subr.bf16.mxu1 %v17088_v9  ;;  %v6295_v20 = vld [vmem:[#allocation2 + $0x42] ss:$2 sm:$0xff]  ;;  %v6315_v53 = vpack.c.bf16 %v6309_v38, %v6308_v51  ;;  %v15895_v7 = vld [vmem:[%s16816_s2 + $0x298] sm:$0xff]  }
 0x597   : > { %11131 = vmatprep.mubr.bf16.mxu0 %v15763_v47  ;;  %v6304_v11 = vpack.c.bf16 %v6297_v5, %v6295_v20  ;;  %v15858_v28 = vld [vmem:[%s16816_s2 + $0x270] sm:$0xff]   ;;  %v15881_v2 = vld [vmem:[%s16816_s2 + $0x2a0] sm:$0xff]   ;;  %v15900_v25 = vld [vmem:[%s16816_s2 + $0x258] sm:$0xff]  }
 0x598   : > { %11155 = vmatprep.mubr.bf16.mxu1 %v6272_v58  ;;  %11164 = vmatpush3.bf16.msra.mxu0 %v15757_v30  ;;  %v6311_v17 = vld [vmem:[#allocation2 + $0x53] ss:$2 sm:$0xff]  ;;  %v15923_v33 = vld [vmem:[%s16816_s2 + $0x288] sm:$0xff]  }
 0x599   : > { %11188 = vmatpush3.bf16.msra.mxu1 %v17088_v9  ;;  %11165 = vmatprep.subr.bf16.mxu0 %v15768_v48  ;;  %v15886_v39 = vld [vmem:[%s16816_s2 + $0x260] sm:$0xff]   ;;  %v15909_v40 = vld [vmem:[%s16816_s2 + $0x290] sm:$0xff]   ;;  %v15949_v9 = vld [vmem:[%s16816_s2 + $0x2f8] sm:$0xff]  }
 0x59a   : > { %11189 = vmatprep.subr.bf16.mxu1 %v17089_v42  ;;  %v15914_v41 = vld [vmem:[%s16816_s2 + $0x250] sm:$0xff]   ;;  %v15935_v58 = vld [vmem:[%s16816_s2 + $0x280] sm:$0xff]  }
 0x59b   : > { %v6281_v0 = vld [vmem:[#allocation2 + $0x71] ss:$2 sm:$0xff]  ;;  %v6301_v57 = vld [vmem:[#allocation2 + $0x72] ss:$2 sm:$0xff]  ;;  %17102 = vst [vmem:[#allocation44_spill] sm:$0xff] %v15914_v41 }
 0x59c   : > { %11166 = vmatpush3.bf16.msra.mxu0 %v15768_v48  ;;  %v6280_v43 = vld [vmem:[#allocation2 + $0x61] ss:$2 sm:$0xff]  ;;  %v6268_v26 = vld [vmem:[#allocation2 + $0x60] ss:$2 sm:$0xff]  ;;  %v6269_v35 = vld [vmem:[#allocation2 + $0x70] ss:$2 sm:$0xff] }
 0x59d   : > { %11190 = vmatpush3.bf16.msra.mxu1 %v17089_v42  ;;  %11167 = vmatprep.subr.bf16.mxu0 %v15778_v23  ;;  %v15784_v45 = vpack.c.bf16 %v6281_v0, %v6280_v43  ;;  %v6273_v36 = vpack.c.bf16 %v6269_v35, %v6268_v26  ;;  %v6299_v6 = vld [vmem:[#allocation2 + $0x62] ss:$2 sm:$0xff]  ;;  %v6312_v54 = vld [vmem:[#allocation2 + $0x63] ss:$2 sm:$0xff]  ;;  %v6313_v10 = vld [vmem:[#allocation2 + $0x73] ss:$2 sm:$0xff] }
 0x59e   : > { %11191 = vmatprep.subr.bf16.mxu1 %v17090_v12  ;;  %v6305_v24 = vpack.c.bf16 %v6301_v57, %v6299_v6  ;;  %v6317_v27 = vpack.c.bf16 %v6313_v10, %v6312_v54  ;;  %v15968_v54 = vld [vmem:[%s16817_s3 + $0x3] ss:$0 sm:$0xff] }
 0x59f   : > { %11132 = vmatmul.mubr.bf16.gmra.mxu0 %v15784_v45  ;;  %11156 = vmatmul.mubr.bf16.gmra.mxu1 %v6273_v36 }
 0x5a0   : > { %11168 = vmatpush3.bf16.msra.mxu0 %v15778_v23  ;;  %11175 = vmatprep.mubr.bf16.mxu0 %v6302_v21 }
 0x5a1   : > { %11192 = vmatpush3.bf16.msra.mxu1 %v17090_v12  ;;  %11199 = vmatprep.mubr.bf16.mxu1 %v6302_v21 }
 0x5a2   : > { %11169 = vmatprep.subr.bf16.mxu0 %v11909_v52  ;;  %11193 = vmatprep.subr.bf16.mxu1 %v17091_v34 }
 0x5a4   : > { %11170 = vmatpush3.bf16.msra.mxu0 %v11909_v52 }
 0x5a5   : > { %11194 = vmatpush3.bf16.msra.mxu1 %v17091_v34  ;;  %11171 = vmatprep.subr.bf16.mxu0 %v11910_v62 }
 0x5a6   : > { %11195 = vmatprep.subr.bf16.mxu1 %v17092_v32 }
 0x5a8   : > { %11172 = vmatpush3.bf16.msra.mxu0 %v11910_v62 }
 0x5a9   : > { %11196 = vmatpush3.bf16.msra.mxu1 %v17092_v32  ;;  %11173 = vmatprep.subr.bf16.mxu0 %v11911_v50 }
 0x5aa   : > { %11197 = vmatprep.subr.bf16.mxu1 %v17093_v55 }
 0x5ac   : > { %11174 = vmatpush3.bf16.msra.mxu0 %v11911_v50 }
 0x5ad   : > { %11198 = vmatpush3.bf16.msra.mxu1 %v17093_v55  ;;  %11207 = vmatprep.subr.bf16.mxu0 %v17094_v59 }
 0x5ae   : > { %11231 = vmatprep.subr.bf16.mxu1 %v17085_v16 }
 0x5af   : > { %11176 = vmatmul.mubr.bf16.vlgmr.msra.gmra.mxu0 %v6303_v37 }
 0x5b0   : > { %11200 = vmatmul.mubr.bf16.vlgmr.msra.gmra.mxu1 %v6303_v37  ;;  %11179 = vmatprep.mubr.bf16.mxu0 %v6304_v11 }
 0x5b1   : > { %11203 = vmatprep.mubr.bf16.mxu1 %v6304_v11  ;;  %11208 = vmatpush3.bf16.msra.mxu0 %v17094_v59 }
 0x5b2   : > { %11232 = vmatpush3.bf16.msra.mxu1 %v17085_v16  ;;  %11209 = vmatprep.subr.bf16.mxu0 %v17095_v49  ;;  %v15853_v16 = vld [vmem:[%s16816_s2 + $0x2b0] sm:$0xff]  }
 0x5b3   : > { %11233 = vmatprep.subr.bf16.mxu1 %v15745_v4 }
 0x5b5   : > { %11210 = vmatpush3.bf16.msra.mxu0 %v17095_v49 }
 0x5b6   : > { %11234 = vmatpush3.bf16.msra.mxu1 %v15745_v4  ;;  %11211 = vmatprep.subr.bf16.mxu0 %v17096_v8  ;;  %v6310_v4 = vld [vmem:[#allocation2 + $0x43] ss:$2 sm:$0xff] }
 0x5b7   : > { %11180 = vmatmul.mubr.bf16.gmra.mxu0 %v6305_v24  ;;  %11235 = vmatprep.subr.bf16.mxu1 %v15757_v30  ;;  %v6316_v3 = vpack.c.bf16 %v6311_v17, %v6310_v4 }
 0x5b8   : > { %11204 = vmatmul.mubr.bf16.gmra.mxu1 %v6305_v24  ;;  %11223 = vmatprep.mubr.bf16.mxu0 %v15721_v31  ;;  %v17099_v31 = vld [vmem:[#allocation10_spill] sm:$0xff] }
 0x5b9   : > { %11212 = vmatpush3.bf16.msra.mxu0 %v17096_v8  ;;  %11247 = vmatprep.mubr.bf16.mxu1 %v6314_v13 }
 0x5ba   : > { %11236 = vmatpush3.bf16.msra.mxu1 %v15757_v30  ;;  %11213 = vmatprep.subr.bf16.mxu0 %v17097_v29  ;;  %v15872_v30 = vld [vmem:[%s16816_s2 + $0x268] sm:$0xff]  }
 0x5bb   : > { %11237 = vmatprep.subr.bf16.mxu1 %v15768_v48 }
 0x5bd   : > { %11214 = vmatpush3.bf16.msra.mxu0 %v17097_v29 }
 0x5be   : > { %11238 = vmatpush3.bf16.msra.mxu1 %v15768_v48  ;;  %11215 = vmatprep.subr.bf16.mxu0 %v17098_v44  ;;  %v15940_v48 = vld [vmem:[%s16816_s2 + $0x240] sm:$0xff]  }
 0x5bf   : > { %11239 = vmatprep.subr.bf16.mxu1 %v15778_v23  ;;  %17104 = vst [vmem:[#allocation46_spill] sm:$0xff] %v15940_v48 }
 0x5c1   : > { %11216 = vmatpush3.bf16.msra.mxu0 %v17098_v44 }
 0x5c2   : > { %11240 = vmatpush3.bf16.msra.mxu1 %v15778_v23  ;;  %11217 = vmatprep.subr.bf16.mxu0 %v17099_v31 }
 0x5c3   : > { %11241 = vmatprep.subr.bf16.mxu1 %v11909_v52 }
 0x5c5   : > { %11218 = vmatpush3.bf16.msra.mxu0 %v17099_v31 }
 0x5c6   : > { %11242 = vmatpush3.bf16.msra.mxu1 %v11909_v52  ;;  %11219 = vmatprep.subr.bf16.mxu0 %v17100_v60 }
 0x5c7   : > { %11243 = vmatprep.subr.bf16.mxu1 %v11910_v62 }
 0x5c9   : > { %11220 = vmatpush3.bf16.msra.mxu0 %v17100_v60 }
 0x5ca   : > { %11244 = vmatpush3.bf16.msra.mxu1 %v11910_v62  ;;  %11221 = vmatprep.subr.bf16.mxu0 %v17101_v14 }
 0x5cb   : > { %11245 = vmatprep.subr.bf16.mxu1 %v11911_v50 }
 0x5cd   : > { %11222 = vmatpush3.bf16.msra.mxu0 %v17101_v14 }
 0x5ce   : > { %11246 = vmatpush3.bf16.msra.mxu1 %v11911_v50  ;;  %11255 = vmatprep.subr.bf16.mxu0 %v15839_v61 }
 0x5d0   : > { %11224 = vmatmul.mubr.bf16.vlgmr.msra.gmra.mxu0 %v15740_v22  ;;  %v15844_v22 = vld [vmem:[%s16816_s2 + $0x278] sm:$0xff]  }
 0x5d1   : > { %11248 = vmatmul.mubr.bf16.vlgmr.msra.gmra.mxu1 %v6315_v53  ;;  %11227 = vmatprep.mubr.bf16.mxu0 %v15763_v47  ;;  %v15928_v47 = vld [vmem:[%s16816_s2 + $0x248] sm:$0xff]  }
 0x5d2   : > { %11251 = vmatprep.mubr.bf16.mxu1 %v6316_v3  ;;  %11275 = vmatprep.subr.bf16.mxu1 %v15844_v22  ;;  %17103 = vst [vmem:[#allocation22_spill] sm:$0xff] %v15928_v47 }
 0x5d3   : > { %11256 = vmatpush3.bf16.msra.mxu0 %v15839_v61  ;;  %11276 = vmatpush3.bf16.msra.mxu1 %v15844_v22 }
 0x5d4   : > { %11257 = vmatprep.subr.bf16.mxu0 %v15853_v16  ;;  %11277 = vmatprep.subr.bf16.mxu1 %v15858_v28 }
 0x5d7   : > { %11258 = vmatpush3.bf16.msra.mxu0 %v15853_v16  ;;  %11278 = vmatpush3.bf16.msra.mxu1 %v15858_v28 }
 0x5d8   : > { %11228 = vmatmul.mubr.bf16.gmra.mxu0 %v15784_v45  ;;  %11259 = vmatprep.subr.bf16.mxu0 %v15867_v15 }
 0x5d9   : > { %11252 = vmatmul.mubr.bf16.gmra.mxu1 %v6317_v27  ;;  %11279 = vmatprep.subr.bf16.mxu1 %v15872_v30 }
 0x5db   : > { %11260 = vmatpush3.bf16.msra.mxu0 %v15867_v15  ;;  %11280 = vmatpush3.bf16.msra.mxu1 %v15872_v30 }
 0x5dc   : > { %11261 = vmatprep.subr.bf16.mxu0 %v15881_v2  ;;  %11281 = vmatprep.subr.bf16.mxu1 %v15886_v39 }
 0x5df   : > { %11262 = vmatpush3.bf16.msra.mxu0 %v15881_v2  ;;  %11282 = vmatpush3.bf16.msra.mxu1 %v15886_v39 }
 0x5e0   : > { %11263 = vmatprep.subr.bf16.mxu0 %v15895_v7  ;;  %11283 = vmatprep.subr.bf16.mxu1 %v15900_v25 }
 0x5e3   : > { %11264 = vmatpush3.bf16.msra.mxu0 %v15895_v7  ;;  %11284 = vmatpush3.bf16.msra.mxu1 %v15900_v25 }
 0x5e4   : > { %11265 = vmatprep.subr.bf16.mxu0 %v15909_v40  ;;  %11285 = vmatprep.subr.bf16.mxu1 %v15914_v41 }
 0x5e7   : > { %11266 = vmatpush3.bf16.msra.mxu0 %v15909_v40  ;;  %11286 = vmatpush3.bf16.msra.mxu1 %v15914_v41 }
 0x5e8   : > { %11267 = vmatprep.subr.bf16.mxu0 %v15923_v33  ;;  %11287 = vmatprep.subr.bf16.mxu1 %v15928_v47 }
 0x5eb   : > { %11268 = vmatpush3.bf16.msra.mxu0 %v15923_v33  ;;  %11288 = vmatpush3.bf16.msra.mxu1 %v15928_v47 }
 0x5ec   : > { %11269 = vmatprep.subr.bf16.mxu0 %v15935_v58  ;;  %11289 = vmatprep.subr.bf16.mxu1 %v15940_v48 }
 0x5ef   : > { %11270 = vmatpush3.bf16.msra.mxu0 %v15935_v58  ;;  %11290 = vmatpush3.bf16.msra.mxu1 %v15940_v48 }
 0x5f0   : > { %11295 = vmatprep.subr.bf16.mxu0 %v15949_v9  ;;  %11315 = vmatprep.subr.bf16.mxu1 %v15839_v61 }
 0x64f   : > { %v11129_v23 = vpop.f32.mrf.mxu0 }
 0x650   : > { %v11153_v42 = vpop.f32.mrf.mxu1 }
 0x651   : > { %v6400_v0 = vpop.f32.mrf.mxu0  ;;  %v6522_v44 = vadd.f32 %v11153_v42, %v11129_v23 }
 0x652   : > { %v6513_v1 = vpop.f32.mrf.mxu1 }
 0x653   : > { %v11130_v43 = vpop.f32.mrf.mxu0  ;;  %v6514_v38 = vadd.f32 %v6513_v1, %v6400_v0 }
 0x654   : > { %v11154_v26 = vpop.f32.mrf.mxu1 }
 0x655   : > { %v6403_v35 = vpop.f32.mrf.mxu0  ;;  %v6525_v3 = vadd.f32 %v11154_v26, %v11130_v43 }
 0x656   : > { %v6516_v45 = vpop.f32.mrf.mxu1 }
 0x657   : > { %v6517_v42 = vadd.f32 %v6516_v45, %v6403_v35 }
 0x65f   : > { %v11133_v36 = vpop.f32.mrf.mxu0  ;;  %v11157_v46 = vpop.f32.mrf.mxu1 }
 0x661   : > { %v6416_v12 = vpop.f32.mrf.mxu0  ;;  %v6529_v21 = vpop.f32.mrf.mxu1 }
 0x663   : > { %v15955_v52 = vpop.f32.mrf.mxu0  ;;  %v11158_v62 = vpop.f32.mrf.mxu1 }
 0x665   : > { %v15957_v34 = vpop.f32.mrf.mxu0  ;;  %v15959_v50 = vpop.f32.mrf.mxu1 }
 0x66f   : > { %v11177_v32 = vpop.f32.mrf.mxu0 }
 0x670   : > { %v11201_v55 = vpop.f32.mrf.mxu1  ;;  %v6659_v17 = vadd.f32 %v11177_v32, %v6522_v44 }
 0x671   : > { %v6626_v56 = vpop.f32.mrf.mxu0 }
 0x672   : > { %v6699_v20 = vpop.f32.mrf.mxu1  ;;  %v6657_v27 = vadd.f32 %v6626_v56, %v6514_v38 }
 0x673   : > { %v11178_v19 = vpop.f32.mrf.mxu0 }
 0x674   : > { %v11202_v37 = vpop.f32.mrf.mxu1 }
 0x675   : > { %v6629_v59 = vpop.f32.mrf.mxu0 }
 0x676   : > { %v6702_v5 = vpop.f32.mrf.mxu1  ;;  %v6658_v26 = vadd.f32 %v6629_v59, %v6517_v42  ;;  %v6541_v59 = vadd.f32 %v11158_v62, %v15955_v52 }
 0x677   : > { %v11181_v11 = vpop.f32.mrf.mxu0 }
 0x678   : > { %v11205_v49 = vpop.f32.mrf.mxu1 }
 0x679   : > { %v6642_v6 = vpop.f32.mrf.mxu0 }
 0x67a   : > { %v6715_v57 = vpop.f32.mrf.mxu1 }
 0x67b   : > { %v11182_v24 = vpop.f32.mrf.mxu0 }
 0x67c   : > { %v11206_v8 = vpop.f32.mrf.mxu1 }
 0x67d   : > { %v15961_v63 = vpop.f32.mrf.mxu0 }
 0x67e   : > { %v15963_v13 = vpop.f32.mrf.mxu1 }
 0x690   : > { %v11225_v29 = vpop.f32.mrf.mxu0 }
 0x691   : > { %v6773_v31 = vadd.f32 %v11225_v29, %v11201_v55  ;;  %v11249_v60 = vpop.f32.mrf.mxu1  ;;  %v6660_v55 = vadd.f32 %v11178_v19, %v6525_v3 }
 0x692   : > { %v6764_v14 = vpop.f32.mrf.mxu0 }
 0x693   : > { %v6862_v51 = vadd.f32 %v11249_v60, %v6773_v31  ;;  %v6765_v53 = vadd.f32 %v6764_v14, %v6699_v20  ;;  %v6829_v4 = vpop.f32.mrf.mxu1 }
 0x694   : > { %v11226_v10 = vpop.f32.mrf.mxu0 }
 0x695   : > { %v6870_v48 = vmax.f32 %v6659_v17, %v6862_v51  ;;  %v6860_v47 = vadd.f32 %v6829_v4, %v6765_v53  ;;  %v6776_v41 = vadd.f32 %v11226_v10, %v11202_v37  ;;  %v11250_v23 = vpop.f32.mrf.mxu1  ;;  %v6538_v17 = vadd.f32 %v11157_v46, %v11133_v36 }
 0x696   : > { %v6767_v29 = vpop.f32.mrf.mxu0  ;;  %v6530_v37 = vadd.f32 %v6529_v21, %v6416_v12 }
 0x697   : > { %v6884_v0 = vadd.f32 %v15968_v54, %v6870_v48  ;;  %v6868_v1 = vmax.f32 %v6657_v27, %v6860_v47  ;;  %v6863_v32 = vadd.f32 %v11250_v23, %v6776_v41  ;;  %v6768_v20 = vadd.f32 %v6767_v29, %v6702_v5  ;;  %v6832_v43 = vpop.f32.mrf.mxu1 }
 0x698   : > { %v11229_v44 = vpop.f32.mrf.mxu0  ;;  %v6663_v5 = vadd.f32 %v11181_v11, %v6538_v17  ;;  %v6661_v53 = vadd.f32 %v6642_v6, %v6530_v37  ;;  %v6664_v27 = vadd.f32 %v11182_v24, %v6541_v59  ;;  %v11931_v59 = vld [vmem:[%s16816_s2 + $0x2e0] sm:$0xff]  }
 0x699   : > { %v6892_v31 = vmax.f32 %v6884_v0, 0.0  ;;  %v6882_v60 = vadd.f32 %v15968_v54, %v6868_v1  ;;  %v6871_v14 = vmax.f32 %v6660_v55, %v6863_v32  ;;  %v6861_v56 = vadd.f32 %v6832_v43, %v6768_v20  ;;  %v11253_v38 = vpop.f32.mrf.mxu1 }
 0x69a   : > { %v6789_v51 = vadd.f32 %v11229_v44, %v11205_v49  ;;  %v6780_v35 = vpop.f32.mrf.mxu0  ;;  %v6533_v49 = vadd.f32 %v15959_v50, %v15957_v34 }
 0x69b   : > { %6902 = vst [vmem:[#allocation3 + $0x11] sm:$0xff] %v6892_v31  ;;  %v6890_v45 = vmax.f32 %v6882_v60, 0.0  ;;  %v6885_v48 = vadd.f32 %v15968_v54, %v6871_v14  ;;  %v6869_v47 = vmax.f32 %v6658_v26, %v6861_v56  ;;  %v6781_v41 = vadd.f32 %v6780_v35, %v6715_v57  ;;  %v6845_v19 = vpop.f32.mrf.mxu1 }
 0x69c   : > { %v6866_v4 = vadd.f32 %v11253_v38, %v6789_v51  ;;  %v11230_v3 = vpop.f32.mrf.mxu0  ;;  %v6662_v29 = vadd.f32 %v15961_v63, %v6533_v49  ;;  %v16112_v49 = vld [vmem:[%s16816_s2 + $0x358] sm:$0xff]  }
 0x69d   : > { %6900 = vst [vmem:[#allocation3 + $0x1] sm:$0xff] %v6890_v45  ;;  %v6893_v10 = vmax.f32 %v6885_v48, 0.0  ;;  %v6883_v36 = vadd.f32 %v15968_v54, %v6869_v47  ;;  %v6864_v46 = vadd.f32 %v6845_v19, %v6781_v41  ;;  %v6792_v12 = vadd.f32 %v11230_v3, %v11206_v8  ;;  %v11254_v21 = vpop.f32.mrf.mxu1  ;;  %v11929_v47 = vld [vmem:[%s16816_s2 + $0x2f0] sm:$0xff]   ;;  %v11930_v19 = vld [vmem:[%s16816_s2 + $0x2e8] sm:$0xff]  }
 0x69e   : > { %v6874_v23 = vmax.f32 %v6663_v5, %v6866_v4  ;;  %v6783_v57 = vpop.f32.mrf.mxu0  ;;  %v16068_v3 = vld [vmem:[%s16816_s2 + $0x370] sm:$0xff]  }
 0x69f   : > { %6903 = vst [vmem:[#allocation3 + $0x19] sm:$0xff] %v6893_v10  ;;  %v6891_v42 = vmax.f32 %v6883_v36, 0.0  ;;  %v6872_v52 = vmax.f32 %v6661_v53, %v6864_v46  ;;  %v6867_v62 = vadd.f32 %v11254_v21, %v6792_v12  ;;  %v6784_v11 = vadd.f32 %v6783_v57, %v15963_v13  ;;  %v6848_v55 = vpop.f32.mrf.mxu1  ;;  %v16073_v10 = vld [vmem:[%s16816_s2 + $0x330] sm:$0xff]   ;;  %v16084_v36 = vld [vmem:[%s16816_s2 + $0x368] sm:$0xff]   ;;  %v16098_v12 = vld [vmem:[%s16816_s2 + $0x360] sm:$0xff]  }
 0x6a0   : > { %v6888_v6 = vadd.f32 %v15968_v54, %v6874_v23  ;;  %v16089_v46 = vld [vmem:[%s16816_s2 + $0x328] sm:$0xff]   ;;  %v16103_v21 = vld [vmem:[%s16816_s2 + $0x320] sm:$0xff]   ;;  %v16126_v23 = vld [vmem:[%s16816_s2 + $0x350] sm:$0xff]  }
 0x6a1   : > { %6901 = vst [vmem:[#allocation3 + $0x9] sm:$0xff] %v6891_v42  ;;  %v6886_v8 = vadd.f32 %v15968_v54, %v6872_v52  ;;  %v6875_v0 = vmax.f32 %v6664_v27, %v6867_v62  ;;  %v6865_v1 = vadd.f32 %v6848_v55, %v6784_v11  ;;  %v16117_v27 = vld [vmem:[%s16816_s2 + $0x318] sm:$0xff]   ;;  %v16131_v57 = vld [vmem:[%s16816_s2 + $0x310] sm:$0xff]   ;;  %v16140_v42 = vld [vmem:[%s16816_s2 + $0x348] sm:$0xff]  }
 0x6a2   : > { %v6896_v34 = vmax.f32 %v6888_v6, 0.0  ;;  %v16145_v52 = vld [vmem:[%s16816_s2 + $0x308] sm:$0xff]   ;;  %v16156_v62 = vld [vmem:[%s16816_s2 + $0x340] sm:$0xff]  }
 0x6a3   : > { %v6894_v50 = vmax.f32 %v6886_v8, 0.0  ;;  %v6889_v24 = vadd.f32 %v15968_v54, %v6875_v0  ;;  %v6873_v32 = vmax.f32 %v6662_v29, %v6865_v1  ;;  %v16161_v11 = vld [vmem:[%s16816_s2 + $0x300] sm:$0xff]  }
 0x6a4   : > { %6906 = vst [vmem:[#allocation3 + $0x31] sm:$0xff] %v6896_v34 }
 0x6a5   : > { %6904 = vst [vmem:[#allocation3 + $0x21] sm:$0xff] %v6894_v50  ;;  %v6897_v20 = vmax.f32 %v6889_v24, 0.0  ;;  %v6887_v13 = vadd.f32 %v15968_v54, %v6873_v32 }
 0x6a6   : > { %v6968_v26 = vld [vmem:[#allocation3 + $0x11] ss:$2 sm:$0xff]  ;;  %v6976_v48 = vld [vmem:[#allocation3 + $0x12] ss:$2 sm:$0xff] }
 0x6a7   : > { %6907 = vst [vmem:[#allocation3 + $0x39] sm:$0xff] %v6897_v20  ;;  %v6895_v43 = vmax.f32 %v6887_v13, 0.0 }
 0x6a8   : > { %v6967_v44 = vld [vmem:[#allocation3 + $0x1] ss:$2 sm:$0xff]  ;;  %v6961_v63 = vld [vmem:[#allocation3] ss:$2 sm:$0xff]  ;;  %v6962_v31 = vld [vmem:[#allocation3 + $0x10] ss:$2 sm:$0xff] }
 0x6a9   : > { %6905 = vst [vmem:[#allocation3 + $0x29] sm:$0xff] %v6895_v43  ;;  %v15983_v60 = vpack.c.bf16 %v6968_v26, %v6967_v44  ;;  %v6965_v14 = vpack.c.bf16 %v6962_v31, %v6961_v63  ;;  %7930 = vst [vmem:[#allocation3] sm:$0x1] %v17073_v18  ;;  %v15986_v56 = vld [vmem:[#allocation3 + $0x3] ss:$2 sm:$0xff] }
 0x6aa   : > { %7931 = vst [vmem:[#allocation3 + $0x11] sm:$0x1] %v17073_v18  ;;  %v6974_v38 = vld [vmem:[#allocation3 + $0x2] ss:$2 sm:$0xff] }
 0x6ab   : > { %11271 = vmatprep.mubr.bf16.mxu0 %v15983_v60  ;;  %11291 = vmatprep.mubr.bf16.mxu1 %v6965_v14  ;;  %v6981_v41 = vpack.c.bf16 %v6976_v48, %v6974_v38  ;;  %v9788_v48 = vld [vmem:[%s16817_s3 + $0x4] ss:$0 sm:$0xff] }
 0x6ac   : > { %v6984_v53 = vld [vmem:[#allocation3 + $0x13] ss:$2 sm:$0xff] }
 0x6ad   : > { %v6987_v4 = vpack.c.bf16 %v6984_v53, %v15986_v56 }
 0x6ae   : > { %v6970_v54 = vld [vmem:[#allocation3 + $0x31] ss:$2 sm:$0xff]  ;;  %v6980_v5 = vld [vmem:[#allocation3 + $0x32] ss:$2 sm:$0xff] }
 0x6b0   : > { %v6969_v17 = vld [vmem:[#allocation3 + $0x21] ss:$2 sm:$0xff]  ;;  %v6963_v37 = vld [vmem:[#allocation3 + $0x20] ss:$2 sm:$0xff]  ;;  %v6964_v51 = vld [vmem:[#allocation3 + $0x30] ss:$2 sm:$0xff] }
 0x6b1   : > { %v15990_v35 = vpack.c.bf16 %v6970_v54, %v6969_v17  ;;  %v6966_v45 = vpack.c.bf16 %v6964_v51, %v6963_v37 }
 0x6b3   : > { %11272 = vmatmul.mubr.bf16.vlgmr.msra.gmra.mxu0 %v15990_v35  ;;  %11292 = vmatmul.mubr.bf16.vlgmr.msra.gmra.mxu1 %v6966_v45 }
 0x6b4   : > { %11296 = vmatpush3.bf16.msra.mxu0 %v15949_v9  ;;  %11316 = vmatpush3.bf16.msra.mxu1 %v15839_v61  ;;  %v11932_v61 = vld [vmem:[%s16816_s2 + $0x2d8] sm:$0xff]  }
 0x6b5   : > { %11311 = vmatprep.mubr.bf16.mxu0 %v6981_v41  ;;  %11331 = vmatprep.mubr.bf16.mxu1 %v6981_v41 }
 0x6b6   : > { %11297 = vmatprep.subr.bf16.mxu0 %v11929_v47  ;;  %11317 = vmatprep.subr.bf16.mxu1 %v15853_v16 }
 0x6b8   : > { %11298 = vmatpush3.bf16.msra.mxu0 %v11929_v47  ;;  %11318 = vmatpush3.bf16.msra.mxu1 %v15853_v16  ;;  %v11933_v16 = vld [vmem:[%s16816_s2 + $0x2d0] sm:$0xff]  }
 0x6b9   : > { %11299 = vmatprep.subr.bf16.mxu0 %v11930_v19  ;;  %11319 = vmatprep.subr.bf16.mxu1 %v15867_v15 }
 0x6bc   : > { %11300 = vmatpush3.bf16.msra.mxu0 %v11930_v19  ;;  %11320 = vmatpush3.bf16.msra.mxu1 %v15867_v15  ;;  %v11934_v15 = vld [vmem:[%s16816_s2 + $0x2c8] sm:$0xff]  }
 0x6bd   : > { %11301 = vmatprep.subr.bf16.mxu0 %v11931_v59  ;;  %11321 = vmatprep.subr.bf16.mxu1 %v15881_v2 }
 0x6c0   : > { %11302 = vmatpush3.bf16.msra.mxu0 %v11931_v59  ;;  %11322 = vmatpush3.bf16.msra.mxu1 %v15881_v2  ;;  %v11935_v2 = vld [vmem:[%s16816_s2 + $0x2c0] sm:$0xff]  }
 0x6c1   : > { %11303 = vmatprep.subr.bf16.mxu0 %v11932_v61  ;;  %11323 = vmatprep.subr.bf16.mxu1 %v15895_v7 }
 0x6c4   : > { %11304 = vmatpush3.bf16.msra.mxu0 %v11932_v61  ;;  %11324 = vmatpush3.bf16.msra.mxu1 %v15895_v7  ;;  %v6978_v7 = vld [vmem:[#allocation3 + $0x22] ss:$2 sm:$0xff] }
 0x6c5   : > { %11305 = vmatprep.subr.bf16.mxu0 %v11933_v16  ;;  %11325 = vmatprep.subr.bf16.mxu1 %v15909_v40 }
 0x6c8   : > { %11306 = vmatpush3.bf16.msra.mxu0 %v11933_v16  ;;  %11326 = vmatpush3.bf16.msra.mxu1 %v15909_v40  ;;  %v6982_v40 = vpack.c.bf16 %v6980_v5, %v6978_v7 }
 0x6c9   : > { %11307 = vmatprep.subr.bf16.mxu0 %v11934_v15  ;;  %11327 = vmatprep.subr.bf16.mxu1 %v15923_v33 }
 0x6cc   : > { %11308 = vmatpush3.bf16.msra.mxu0 %v11934_v15  ;;  %11328 = vmatpush3.bf16.msra.mxu1 %v15923_v33 }
 0x6cd   : > { %11309 = vmatprep.subr.bf16.mxu0 %v11935_v2  ;;  %11329 = vmatprep.subr.bf16.mxu1 %v15935_v58 }
 0x6d0   : > { %11310 = vmatpush3.bf16.msra.mxu0 %v11935_v2  ;;  %11330 = vmatpush3.bf16.msra.mxu1 %v15935_v58  ;;  %v16056_v58 = vld [vmem:[%s16816_s2 + $0x378] sm:$0xff]  }
 0x6d1   : > { %11335 = vmatprep.subr.bf16.mxu0 %v15844_v22  ;;  %11355 = vmatprep.subr.bf16.mxu1 %v15949_v9 }
 0x6d3   : > { %11312 = vmatmul.mubr.bf16.vlgmr.msra.gmra.mxu0 %v6982_v40  ;;  %11332 = vmatmul.mubr.bf16.vlgmr.msra.gmra.mxu1 %v6982_v40 }
 0x6d4   : > { %11336 = vmatpush3.bf16.msra.mxu0 %v15844_v22  ;;  %11351 = vmatprep.mubr.bf16.mxu0 %v15983_v60  ;;  %v17105_v22 = vld [vmem:[#allocation44_spill] sm:$0xff] }
 0x6d5   : > { %11356 = vmatpush3.bf16.msra.mxu1 %v15949_v9  ;;  %11371 = vmatprep.mubr.bf16.mxu1 %v6987_v4  ;;  %v16061_v9 = vld [vmem:[%s16816_s2 + $0x338] sm:$0xff]  }
 0x6d6   : > { %11337 = vmatprep.subr.bf16.mxu0 %v15858_v28  ;;  %11357 = vmatprep.subr.bf16.mxu1 %v11929_v47 }
 0x6d8   : > { %11338 = vmatpush3.bf16.msra.mxu0 %v15858_v28  ;;  %v17106_v28 = vld [vmem:[#allocation22_spill] sm:$0xff] }
 0x6d9   : > { %11358 = vmatpush3.bf16.msra.mxu1 %v11929_v47  ;;  %11339 = vmatprep.subr.bf16.mxu0 %v15872_v30 }
 0x6da   : > { %11359 = vmatprep.subr.bf16.mxu1 %v11930_v19 }
 0x6dc   : > { %11340 = vmatpush3.bf16.msra.mxu0 %v15872_v30  ;;  %v17107_v30 = vld [vmem:[#allocation46_spill] sm:$0xff] }
 0x6dd   : > { %11360 = vmatpush3.bf16.msra.mxu1 %v11930_v19  ;;  %11341 = vmatprep.subr.bf16.mxu0 %v15886_v39 }
 0x6de   : > { %11361 = vmatprep.subr.bf16.mxu1 %v11931_v59 }
 0x6e0   : > { %11342 = vmatpush3.bf16.msra.mxu0 %v15886_v39  ;;  %v6985_v39 = vld [vmem:[#allocation3 + $0x23] ss:$2 sm:$0xff] }
 0x6e1   : > { %11362 = vmatpush3.bf16.msra.mxu1 %v11931_v59  ;;  %11343 = vmatprep.subr.bf16.mxu0 %v15900_v25 }
 0x6e2   : > { %11363 = vmatprep.subr.bf16.mxu1 %v11932_v61 }
 0x6e4   : > { %11344 = vmatpush3.bf16.msra.mxu0 %v15900_v25  ;;  %v6986_v25 = vld [vmem:[#allocation3 + $0x33] ss:$2 sm:$0xff] }
 0x6e5   : > { %11364 = vmatpush3.bf16.msra.mxu1 %v11932_v61  ;;  %11345 = vmatprep.subr.bf16.mxu0 %v17105_v22  ;;  %v6988_v33 = vpack.c.bf16 %v6986_v25, %v6985_v39 }
 0x6e6   : > { %11365 = vmatprep.subr.bf16.mxu1 %v11933_v16 }
 0x6e8   : > { %11346 = vmatpush3.bf16.msra.mxu0 %v17105_v22 }
 0x6e9   : > { %11366 = vmatpush3.bf16.msra.mxu1 %v11933_v16  ;;  %11347 = vmatprep.subr.bf16.mxu0 %v17106_v28 }
 0x6ea   : > { %11367 = vmatprep.subr.bf16.mxu1 %v11934_v15 }
 0x6ec   : > { %11348 = vmatpush3.bf16.msra.mxu0 %v17106_v28 }
 0x6ed   : > { %11368 = vmatpush3.bf16.msra.mxu1 %v11934_v15  ;;  %11349 = vmatprep.subr.bf16.mxu0 %v17107_v30 }
 0x6ee   : > { %11369 = vmatprep.subr.bf16.mxu1 %v11935_v2 }
 0x6f0   : > { %11350 = vmatpush3.bf16.msra.mxu0 %v17107_v30 }
 0x6f1   : > { %11370 = vmatpush3.bf16.msra.mxu1 %v11935_v2  ;;  %11375 = vmatprep.subr.bf16.mxu0 %v17073_v18 }
 0x6f2   : > { %11395 = vmatprep.subr.bf16.mxu1 %v17073_v18 }
 0x6f3   : > { %11352 = vmatmul.mubr.bf16.vlgmr.msra.gmra.mxu0 %v15990_v35 }
 0x6f4   : > { %11372 = vmatmul.mubr.bf16.vlgmr.msra.gmra.mxu1 %v6988_v33  ;;  %11376 = vmatpush3.bf16.msra.mxu0 %v16056_v58 }
 0x6f5   : > { %11396 = vmatpush3.bf16.msra.mxu1 %v16061_v9  ;;  %11377 = vmatprep.subr.bf16.mxu0 %v17073_v18 }
 0x6f6   : > { %11397 = vmatprep.subr.bf16.mxu1 %v17073_v18  ;;  %11391 = vmatprep.mubr.msk.bf16.mxu0 %vm12139_vm0, %v17073_v18 }
 0x6f7   : > { %11411 = vmatprep.mubr.msk.bf16.mxu1 %vm12139_vm0, %v17073_v18 }
 0x6f8   : > { %11378 = vmatpush3.bf16.msra.mxu0 %v16068_v3 }
 0x6f9   : > { %11398 = vmatpush3.bf16.msra.mxu1 %v16073_v10  ;;  %11379 = vmatprep.subr.bf16.mxu0 %v17073_v18 }
 0x6fa   : > { %11399 = vmatprep.subr.bf16.mxu1 %v17073_v18 }
 0x6fc   : > { %11380 = vmatpush3.bf16.msra.mxu0 %v16084_v36 }
 0x6fd   : > { %11400 = vmatpush3.bf16.msra.mxu1 %v16089_v46  ;;  %11381 = vmatprep.subr.bf16.mxu0 %v17073_v18 }
 0x6fe   : > { %11401 = vmatprep.subr.bf16.mxu1 %v17073_v18 }
 0x700   : > { %11382 = vmatpush3.bf16.msra.mxu0 %v16098_v12 }
 0x701   : > { %11402 = vmatpush3.bf16.msra.mxu1 %v16103_v21  ;;  %11383 = vmatprep.subr.bf16.mxu0 %v17073_v18 }
 0x702   : > { %11403 = vmatprep.subr.bf16.mxu1 %v17073_v18 }
 0x704   : > { %11384 = vmatpush3.bf16.msra.mxu0 %v16112_v49 }
 0x705   : > { %11404 = vmatpush3.bf16.msra.mxu1 %v16117_v27  ;;  %11385 = vmatprep.subr.bf16.mxu0 %v17073_v18 }
 0x706   : > { %11405 = vmatprep.subr.bf16.mxu1 %v17073_v18 }
 0x708   : > { %11386 = vmatpush3.bf16.msra.mxu0 %v16126_v23 }
 0x709   : > { %11406 = vmatpush3.bf16.msra.mxu1 %v16131_v57  ;;  %11387 = vmatprep.subr.bf16.mxu0 %v17073_v18 }
 0x70a   : > { %11407 = vmatprep.subr.bf16.mxu1 %v17073_v18 }
 0x70c   : > { %11388 = vmatpush3.bf16.msra.mxu0 %v16140_v42 }
 0x70d   : > { %11408 = vmatpush3.bf16.msra.mxu1 %v16145_v52  ;;  %11389 = vmatprep.subr.bf16.mxu0 %v17073_v18 }
 0x70e   : > { %11409 = vmatprep.subr.bf16.mxu1 %v17073_v18 }
 0x710   : > { %11390 = vmatpush3.bf16.msra.mxu0 %v16156_v62 }
 0x711   : > { %11410 = vmatpush3.bf16.msra.mxu1 %v16161_v11  ;;  %11415 = vmatprep.subr.bf16.mxu0 %v17073_v18 }
 0x712   : > { %11435 = vmatprep.subr.bf16.mxu1 %v17073_v18 }
 0x773   : > { %v11273_v6 = vpop.f32.mrf.mxu0  ;;  %v11293_v55 = vpop.f32.mrf.mxu1 }
 0x774   : > { %v7177_v60 = vadd.f32 %v11293_v55, %v11273_v6 }
 0x775   : > { %v7071_v29 = vpop.f32.mrf.mxu0  ;;  %v7168_v8 = vpop.f32.mrf.mxu1 }
 0x776   : > { %v7169_v38 = vadd.f32 %v7168_v8, %v7071_v29 }
 0x777   : > { %v11274_v0 = vpop.f32.mrf.mxu0  ;;  %v11294_v1 = vpop.f32.mrf.mxu1 }
 0x778   : > { %v7180_v45 = vadd.f32 %v11294_v1, %v11274_v0 }
 0x779   : > { %v7074_v34 = vpop.f32.mrf.mxu0  ;;  %v7171_v50 = vpop.f32.mrf.mxu1 }
 0x77a   : > { %v7172_v15 = vadd.f32 %v7171_v50, %v7074_v34  ;;  %v11952_v50 = vld [vmem:[%s16816_s2 + $0x3b8] sm:$0xff]  }
 0x793   : > { %v11313_v24 = vpop.f32.mrf.mxu0  ;;  %v11333_v32 = vpop.f32.mrf.mxu1 }
 0x794   : > { %v7282_v17 = vadd.f32 %v11313_v24, %v7177_v60  ;;  %v16310_v60 = vld [vmem:[%s16816_s2 + $0x3e0] sm:$0xff]  }
 0x795   : > { %v7265_v20 = vpop.f32.mrf.mxu0  ;;  %v7318_v13 = vpop.f32.mrf.mxu1 }
 0x796   : > { %v7280_v41 = vadd.f32 %v7265_v20, %v7169_v38  ;;  %v16338_v38 = vld [vmem:[%s16816_s2 + $0x3d0] sm:$0xff]  }
 0x797   : > { %v11314_v43 = vpop.f32.mrf.mxu0  ;;  %v11334_v26 = vpop.f32.mrf.mxu1 }
 0x798   : > { %v7283_v2 = vadd.f32 %v11314_v43, %v7180_v45 }
 0x799   : > { %v7268_v44 = vpop.f32.mrf.mxu0  ;;  %v7321_v63 = vpop.f32.mrf.mxu1 }
 0x79a   : > { %v7281_v22 = vadd.f32 %v7268_v44, %v7172_v15  ;;  %v11955_v44 = vld [vmem:[%s16816_s2 + $0x3a0] sm:$0xff]  }
 0x7b3   : > { %v11353_v31 = vpop.f32.mrf.mxu0 }
 0x7b4   : > { %v7376_v14 = vadd.f32 %v11353_v31, %v11333_v32  ;;  %v11373_v56 = vpop.f32.mrf.mxu1 }
 0x7b5   : > { %v7367_v54 = vpop.f32.mrf.mxu0 }
 0x7b6   : > { %v7433_v37 = vadd.f32 %v11373_v56, %v7376_v14  ;;  %v7368_v51 = vadd.f32 %v7367_v54, %v7318_v13  ;;  %v7416_v35 = vpop.f32.mrf.mxu1  ;;  %v16319_v14 = vld [vmem:[%s16816_s2 + $0x418] sm:$0xff]   ;;  %v16333_v54 = vld [vmem:[%s16816_s2 + $0x410] sm:$0xff]  }
 0x7b7   : > { %v11354_v47 = vpop.f32.mrf.mxu0  ;;  %v16324_v56 = vld [vmem:[%s16816_s2 + $0x3d8] sm:$0xff]  }
 0x7b8   : > { %v7437_v19 = vmax.f32 %v7282_v17, %v7433_v37  ;;  %v7431_v59 = vadd.f32 %v7416_v35, %v7368_v51  ;;  %v7379_v61 = vadd.f32 %v11354_v47, %v11334_v26  ;;  %v11374_v16 = vpop.f32.mrf.mxu1  ;;  %v11953_v26 = vld [vmem:[%s16816_s2 + $0x3b0] sm:$0xff]   ;;  %v16347_v17 = vld [vmem:[%s16816_s2 + $0x408] sm:$0xff]   ;;  %v16359_v51 = vld [vmem:[%s16816_s2 + $0x400] sm:$0xff]  }
 0x7b9   : > { %v7370_v7 = vpop.f32.mrf.mxu0  ;;  %v16352_v37 = vld [vmem:[%s16816_s2 + $0x3c8] sm:$0xff]   ;;  %v16364_v35 = vld [vmem:[%s16816_s2 + $0x3c0] sm:$0xff]  }
 0x7ba   : > { %v7447_v5 = vadd.f32 %v9788_v48, %v7437_v19  ;;  %v7435_v53 = vmax.f32 %v7280_v41, %v7431_v59  ;;  %v7434_v40 = vadd.f32 %v11374_v16, %v7379_v61  ;;  %v7371_v4 = vadd.f32 %v7370_v7, %v7321_v63  ;;  %v7419_v28 = vpop.f32.mrf.mxu1 }
 0x7bc   : > { %v7451_v30 = vmax.f32 %v7447_v5, 0.0  ;;  %v7445_v39 = vadd.f32 %v9788_v48, %v7435_v53  ;;  %v7438_v25 = vmax.f32 %v7283_v2, %v7434_v40  ;;  %v7432_v33 = vadd.f32 %v7419_v28, %v7371_v4 }
 0x7be   : > { %7457 = vst [vmem:[#allocation2 + $0x11] sm:$0xff] %v7451_v30  ;;  %v7449_v6 = vmax.f32 %v7445_v39, 0.0  ;;  %v7448_v55 = vadd.f32 %v9788_v48, %v7438_v25  ;;  %v7436_v29 = vmax.f32 %v7281_v22, %v7432_v33 }
 0x7c0   : > { %7455 = vst [vmem:[#allocation2 + $0x1] sm:$0xff] %v7449_v6  ;;  %v7452_v8 = vmax.f32 %v7448_v55, 0.0  ;;  %v7446_v0 = vadd.f32 %v9788_v48, %v7436_v29 }
 0x7c2   : > { %7458 = vst [vmem:[#allocation2 + $0x19] sm:$0xff] %v7452_v8  ;;  %v7450_v1 = vmax.f32 %v7446_v0, 0.0  ;;  %v9862_v0 = vld [vmem:[%s16817_s3 + $0x5] ss:$0 sm:$0xff] }
 0x7c4   : > { %7456 = vst [vmem:[#allocation2 + $0x9] sm:$0xff] %v7450_v1 }
 0x7c9   : > { %v7516_v34 = vld [vmem:[#allocation2 + $0x11] ss:$2 sm:$0xff]  ;;  %v7519_v63 = vld [vmem:[#allocation2 + $0x12] ss:$2 sm:$0xff] }
 0x7cb   : > { %v7515_v24 = vld [vmem:[#allocation2 + $0x1] ss:$2 sm:$0xff]  ;;  %v7512_v32 = vld [vmem:[#allocation2] ss:$2 sm:$0xff]  ;;  %v7513_v20 = vld [vmem:[#allocation2 + $0x10] ss:$2 sm:$0xff] }
 0x7cc   : > { %v16175_v13 = vpack.c.bf16 %v7516_v34, %v7515_v24  ;;  %v7514_v43 = vpack.c.bf16 %v7513_v20, %v7512_v32 }
 0x7ce   : > { %11392 = vmatmul.mubr.bf16.vlgmr.msra.gmra.mxu0 %v16175_v13  ;;  %11412 = vmatmul.mubr.bf16.vlgmr.msra.gmra.mxu1 %v7514_v43 }
 0x7cf   : > { %11416 = vmatpush3.bf16.msra.mxu0 %v11952_v50  ;;  %11436 = vmatpush3.bf16.msra.mxu1 %v16056_v58  ;;  %v11954_v58 = vld [vmem:[%s16816_s2 + $0x3a8] sm:$0xff]  }
 0x7d0   : > { %11417 = vmatprep.subr.bf16.mxu0 %v17073_v18  ;;  %11437 = vmatprep.subr.bf16.mxu1 %v17073_v18 }
 0x7d1   : > { %11431 = vmatprep.mubr.msk.bf16.mxu0 %vm12139_vm0, %v17073_v18  ;;  %11451 = vmatprep.mubr.msk.bf16.mxu1 %vm12139_vm0, %v17073_v18 }
 0x7d3   : > { %11418 = vmatpush3.bf16.msra.mxu0 %v11953_v26  ;;  %11438 = vmatpush3.bf16.msra.mxu1 %v16068_v3  ;;  %v11956_v3 = vld [vmem:[%s16816_s2 + $0x398] sm:$0xff]  }
 0x7d4   : > { %11419 = vmatprep.subr.bf16.mxu0 %v17073_v18  ;;  %11439 = vmatprep.subr.bf16.mxu1 %v17073_v18 }
 0x7d7   : > { %11420 = vmatpush3.bf16.msra.mxu0 %v11954_v58  ;;  %11440 = vmatpush3.bf16.msra.mxu1 %v16084_v36  ;;  %v11957_v36 = vld [vmem:[%s16816_s2 + $0x390] sm:$0xff]  }
 0x7d8   : > { %11421 = vmatprep.subr.bf16.mxu0 %v17073_v18  ;;  %11441 = vmatprep.subr.bf16.mxu1 %v17073_v18 }
 0x7db   : > { %11422 = vmatpush3.bf16.msra.mxu0 %v11955_v44  ;;  %11442 = vmatpush3.bf16.msra.mxu1 %v16098_v12  ;;  %v11958_v12 = vld [vmem:[%s16816_s2 + $0x388] sm:$0xff]  }
 0x7dc   : > { %11423 = vmatprep.subr.bf16.mxu0 %v17073_v18  ;;  %11443 = vmatprep.subr.bf16.mxu1 %v17073_v18 }
 0x7df   : > { %11424 = vmatpush3.bf16.msra.mxu0 %v11956_v3  ;;  %11444 = vmatpush3.bf16.msra.mxu1 %v16112_v49  ;;  %v11959_v49 = vld [vmem:[%s16816_s2 + $0x380] sm:$0xff]  }
 0x7e0   : > { %11425 = vmatprep.subr.bf16.mxu0 %v17073_v18  ;;  %11445 = vmatprep.subr.bf16.mxu1 %v17073_v18 }
 0x7e3   : > { %11426 = vmatpush3.bf16.msra.mxu0 %v11957_v36  ;;  %11446 = vmatpush3.bf16.msra.mxu1 %v16126_v23  ;;  %v7518_v23 = vld [vmem:[#allocation2 + $0x2] ss:$2 sm:$0xff] }
 0x7e4   : > { %11427 = vmatprep.subr.bf16.mxu0 %v17073_v18  ;;  %11447 = vmatprep.subr.bf16.mxu1 %v17073_v18  ;;  %v7520_v31 = vpack.c.bf16 %v7519_v63, %v7518_v23  ;;  %v11976_v23 = vld [vmem:[%s16816_s2 + $0x478] sm:$0xff]  }
 0x7e7   : > { %11428 = vmatpush3.bf16.msra.mxu0 %v11958_v12  ;;  %11448 = vmatpush3.bf16.msra.mxu1 %v16140_v42  ;;  %v16280_v42 = vld [vmem:[%s16816_s2 + $0x3f0] sm:$0xff]  }
 0x7e8   : > { %11429 = vmatprep.subr.bf16.mxu0 %v17073_v18  ;;  %11449 = vmatprep.subr.bf16.mxu1 %v17073_v18 }
 0x7eb   : > { %11430 = vmatpush3.bf16.msra.mxu0 %v11959_v49  ;;  %11450 = vmatpush3.bf16.msra.mxu1 %v16156_v62  ;;  %v16296_v62 = vld [vmem:[%s16816_s2 + $0x3e8] sm:$0xff]  }
 0x7ec   : > { %11455 = vmatprep.subr.bf16.mxu0 %v17073_v18  ;;  %11475 = vmatprep.subr.bf16.mxu1 %v17073_v18 }
 0x7ee   : > { %11432 = vmatmul.mubr.bf16.vlgmr.msra.gmra.mxu0 %v7520_v31  ;;  %11452 = vmatmul.mubr.bf16.vlgmr.msra.gmra.mxu1 %v7520_v31 }
 0x7ef   : > { %11456 = vmatpush3.bf16.msra.mxu0 %v16061_v9  ;;  %11476 = vmatpush3.bf16.msra.mxu1 %v11952_v50  ;;  %v7521_v9 = vld [vmem:[#allocation2 + $0x3] ss:$2 sm:$0xff] }
 0x7f0   : > { %11457 = vmatprep.subr.bf16.mxu0 %v17073_v18  ;;  %11477 = vmatprep.subr.bf16.mxu1 %v17073_v18 }
 0x7f1   : > { %11471 = vmatprep.mubr.msk.bf16.mxu0 %vm12139_vm0, %v17073_v18  ;;  %11491 = vmatprep.mubr.msk.bf16.mxu1 %vm12139_vm0, %v17073_v18 }
 0x7f3   : > { %11458 = vmatpush3.bf16.msra.mxu0 %v16073_v10  ;;  %11478 = vmatpush3.bf16.msra.mxu1 %v11953_v26  ;;  %v7522_v10 = vld [vmem:[#allocation2 + $0x13] ss:$2 sm:$0xff] }
 0x7f4   : > { %11459 = vmatprep.subr.bf16.mxu0 %v17073_v18  ;;  %11479 = vmatprep.subr.bf16.mxu1 %v17073_v18 }
 0x7f7   : > { %11460 = vmatpush3.bf16.msra.mxu0 %v16089_v46  ;;  %11480 = vmatpush3.bf16.msra.mxu1 %v11954_v58  ;;  %v7523_v46 = vpack.c.bf16 %v7522_v10, %v7521_v9  ;;  %v11977_v9 = vld [vmem:[%s16816_s2 + $0x470] sm:$0xff]   ;;  %v11978_v10 = vld [vmem:[%s16816_s2 + $0x468] sm:$0xff]  }
 0x7f8   : > { %11461 = vmatprep.subr.bf16.mxu0 %v17073_v18  ;;  %11481 = vmatprep.subr.bf16.mxu1 %v17073_v18 }
 0x7fb   : > { %11462 = vmatpush3.bf16.msra.mxu0 %v16103_v21  ;;  %11482 = vmatpush3.bf16.msra.mxu1 %v11955_v44  ;;  %v16263_v21 = vld [vmem:[%s16816_s2 + $0x438] sm:$0xff]  }
 0x7fc   : > { %11463 = vmatprep.subr.bf16.mxu0 %v17073_v18  ;;  %11483 = vmatprep.subr.bf16.mxu1 %v17073_v18 }
 0x7ff   : > { %11464 = vmatpush3.bf16.msra.mxu0 %v16117_v27  ;;  %11484 = vmatpush3.bf16.msra.mxu1 %v11956_v3  ;;  %v16268_v27 = vld [vmem:[%s16816_s2 + $0x3f8] sm:$0xff]  }
 0x800   : > { %11465 = vmatprep.subr.bf16.mxu0 %v17073_v18  ;;  %11485 = vmatprep.subr.bf16.mxu1 %v17073_v18 }
 0x803   : > { %11466 = vmatpush3.bf16.msra.mxu0 %v16131_v57  ;;  %11486 = vmatpush3.bf16.msra.mxu1 %v11957_v36  ;;  %v16275_v57 = vld [vmem:[%s16816_s2 + $0x430] sm:$0xff]  }
 0x804   : > { %11467 = vmatprep.subr.bf16.mxu0 %v17073_v18  ;;  %11487 = vmatprep.subr.bf16.mxu1 %v17073_v18 }
 0x807   : > { %11468 = vmatpush3.bf16.msra.mxu0 %v16145_v52  ;;  %11488 = vmatpush3.bf16.msra.mxu1 %v11958_v12  ;;  %v16291_v52 = vld [vmem:[%s16816_s2 + $0x428] sm:$0xff]  }
 0x808   : > { %11469 = vmatprep.subr.bf16.mxu0 %v17073_v18  ;;  %11489 = vmatprep.subr.bf16.mxu1 %v17073_v18 }
 0x80b   : > { %11470 = vmatpush3.bf16.msra.mxu0 %v16161_v11  ;;  %11490 = vmatpush3.bf16.msra.mxu1 %v11959_v49  ;;  %v16305_v11 = vld [vmem:[%s16816_s2 + $0x420] sm:$0xff]  }
 0x80c   : > { %11495 = vmatprep.subr.bf16.mxu0 %v17073_v18  ;;  %11515 = vmatprep.subr.bf16.mxu1 %v17073_v18 }
 0x80e   : > { %11472 = vmatmul.mubr.bf16.vlgmr.msra.gmra.mxu0 %v16175_v13  ;;  %11492 = vmatmul.mubr.bf16.vlgmr.msra.gmra.mxu1 %v7523_v46  ;;  %v11979_v46 = vld [vmem:[%s16816_s2 + $0x460] sm:$0xff]  }
 0x80f   : > { %11511 = vmatprep.mubr.msk.bf16.mxu0 %vm12139_vm0, %v17073_v18  ;;  %11531 = vmatprep.mubr.msk.bf16.mxu1 %vm12139_vm0, %v17073_v18 }
 0x810   : > { %11496 = vmatpush3.bf16.msra.mxu0 %v16263_v21  ;;  %11516 = vmatpush3.bf16.msra.mxu1 %v16268_v27 }
 0x811   : > { %11497 = vmatprep.subr.bf16.mxu0 %v17073_v18  ;;  %11517 = vmatprep.subr.bf16.mxu1 %v17073_v18 }
 0x814   : > { %11498 = vmatpush3.bf16.msra.mxu0 %v16275_v57  ;;  %11518 = vmatpush3.bf16.msra.mxu1 %v16280_v42 }
 0x815   : > { %11499 = vmatprep.subr.bf16.mxu0 %v17073_v18  ;;  %11519 = vmatprep.subr.bf16.mxu1 %v17073_v18 }
 0x818   : > { %11500 = vmatpush3.bf16.msra.mxu0 %v16291_v52  ;;  %11520 = vmatpush3.bf16.msra.mxu1 %v16296_v62 }
 0x819   : > { %11501 = vmatprep.subr.bf16.mxu0 %v17073_v18  ;;  %11521 = vmatprep.subr.bf16.mxu1 %v17073_v18 }
 0x81c   : > { %11502 = vmatpush3.bf16.msra.mxu0 %v16305_v11  ;;  %11522 = vmatpush3.bf16.msra.mxu1 %v16310_v60 }
 0x81d   : > { %11503 = vmatprep.subr.bf16.mxu0 %v17073_v18  ;;  %11523 = vmatprep.subr.bf16.mxu1 %v17073_v18 }
 0x820   : > { %11504 = vmatpush3.bf16.msra.mxu0 %v16319_v14  ;;  %11524 = vmatpush3.bf16.msra.mxu1 %v16324_v56 }
 0x821   : > { %11505 = vmatprep.subr.bf16.mxu0 %v17073_v18  ;;  %11525 = vmatprep.subr.bf16.mxu1 %v17073_v18 }
 0x824   : > { %11506 = vmatpush3.bf16.msra.mxu0 %v16333_v54  ;;  %11526 = vmatpush3.bf16.msra.mxu1 %v16338_v38 }
 0x825   : > { %11507 = vmatprep.subr.bf16.mxu0 %v17073_v18  ;;  %11527 = vmatprep.subr.bf16.mxu1 %v17073_v18 }
 0x828   : > { %11508 = vmatpush3.bf16.msra.mxu0 %v16347_v17  ;;  %11528 = vmatpush3.bf16.msra.mxu1 %v16352_v37 }
 0x829   : > { %11509 = vmatprep.subr.bf16.mxu0 %v17073_v18  ;;  %11529 = vmatprep.subr.bf16.mxu1 %v17073_v18 }
 0x82c   : > { %11510 = vmatpush3.bf16.msra.mxu0 %v16359_v51  ;;  %11530 = vmatpush3.bf16.msra.mxu1 %v16364_v35 }
 0x82d   : > { %11535 = vmatprep.subr.bf16.mxu0 %v17073_v18  ;;  %11555 = vmatprep.subr.bf16.mxu1 %v17073_v18 }
 0x88e   : > { %v7606_v45 = vpop.f32.mrf.mxu0  ;;  %v7695_v48 = vpop.f32.mrf.mxu1 }
 0x88f   : > { %v7696_v47 = vadd.f32 %v7695_v48, %v7606_v45  ;;  %v16522_v45 = vld [vmem:[%s16816_s2 + $0x4d8] sm:$0xff]  }
 0x890   : > { %v11393_v41 = vpop.f32.mrf.mxu0  ;;  %v11413_v19 = vpop.f32.mrf.mxu1  ;;  %v16527_v48 = vld [vmem:[%s16816_s2 + $0x498] sm:$0xff]  }
 0x891   : > { %v16541_v41 = vld [vmem:[%s16816_s2 + $0x490] sm:$0xff]   ;;  %v16550_v19 = vld [vmem:[%s16816_s2 + $0x4c8] sm:$0xff]  }
 0x892   : > { %v7609_v59 = vpop.f32.mrf.mxu0  ;;  %v7698_v61 = vpop.f32.mrf.mxu1 }
 0x893   : > { %v7699_v16 = vadd.f32 %v7698_v61, %v7609_v59  ;;  %v16555_v59 = vld [vmem:[%s16816_s2 + $0x488] sm:$0xff]   ;;  %v16562_v61 = vld [vmem:[%s16816_s2 + $0x4c0] sm:$0xff]  }
 0x894   : > { %v11394_v15 = vpop.f32.mrf.mxu0  ;;  %v11414_v2 = vpop.f32.mrf.mxu1 }
 0x8ae   : > { %v7784_v7 = vpop.f32.mrf.mxu0  ;;  %v7827_v5 = vpop.f32.mrf.mxu1 }
 0x8af   : > { %v7791_v29 = vadd.f32 %v7784_v7, %v7696_v47  ;;  %v16536_v47 = vld [vmem:[%s16816_s2 + $0x4d0] sm:$0xff]  }
 0x8b0   : > { %v11433_v53 = vpop.f32.mrf.mxu0  ;;  %v11453_v40 = vpop.f32.mrf.mxu1 }
 0x8b2   : > { %v7787_v4 = vpop.f32.mrf.mxu0  ;;  %v7830_v22 = vpop.f32.mrf.mxu1 }
 0x8b3   : > { %v7792_v13 = vadd.f32 %v7787_v4, %v7699_v16  ;;  %v16567_v16 = vld [vmem:[%s16816_s2 + $0x480] sm:$0xff]  }
 0x8b4   : > { %v11434_v28 = vpop.f32.mrf.mxu0  ;;  %v11454_v30 = vpop.f32.mrf.mxu1 }
 0x8ce   : > { %v7868_v39 = vpop.f32.mrf.mxu0  ;;  %v7909_v25 = vpop.f32.mrf.mxu1 }
 0x8cf   : > { %v7869_v33 = vadd.f32 %v7868_v39, %v7827_v5 }
 0x8d0   : > { %v11473_v6 = vpop.f32.mrf.mxu0  ;;  %v11493_v55 = vpop.f32.mrf.mxu1 }
 0x8d1   : > { %v7916_v8 = vadd.f32 %v7909_v25, %v7869_v33 }
 0x8d2   : > { %v7871_v1 = vpop.f32.mrf.mxu0  ;;  %v7912_v34 = vpop.f32.mrf.mxu1 }
 0x8d3   : > { %v7918_v50 = vmax.f32 %v7791_v29, %v7916_v8  ;;  %v7872_v24 = vadd.f32 %v7871_v1, %v7830_v22 }
 0x8d4   : > { %v11474_v32 = vpop.f32.mrf.mxu0  ;;  %v11494_v20 = vpop.f32.mrf.mxu1 }
 0x8d5   : > { %v7926_v43 = vadd.f32 %v9862_v0, %v7918_v50  ;;  %v7917_v26 = vadd.f32 %v7912_v34, %v7872_v24 }
 0x8d7   : > { %v7928_v58 = vmax.f32 %v7926_v43, 0.0  ;;  %v7919_v44 = vmax.f32 %v7792_v13, %v7917_v26  ;;  %v9936_v13 = vld [vmem:[%s16817_s3 + $0x6] ss:$0 sm:$0xff] }
 0x8d9   : > { %7932 = vst [vmem:[#allocation3 + $0x1] sm:$0xff] %v7928_v58  ;;  %v7927_v3 = vadd.f32 %v9862_v0, %v7919_v44 }
 0x8db   : > { %v7929_v36 = vmax.f32 %v7927_v3, 0.0 }
 0x8dd   : > { %7933 = vst [vmem:[#allocation3 + $0x9] sm:$0xff] %v7929_v36 }
 0x8e4   : > { %v7989_v12 = vld [vmem:[#allocation3 + $0x1] ss:$2 sm:$0xff]  ;;  %v7987_v49 = vld [vmem:[#allocation3] ss:$2 sm:$0xff] }
 0x8e5   : > { %v16378_v63 = vpack.c.bf16 %v7989_v12, %v7989_v12  ;;  %v7988_v31 = vpack.c.bf16 %v7987_v49, %v7987_v49  ;;  %v12000_v49 = vld [vmem:[%s16816_s2 + $0x538] sm:$0xff]  }
 0x8e7   : > { %11512 = vmatmul.mubr.bf16.vlgmr.msra.gmra.mxu0 %v16378_v63  ;;  %11532 = vmatmul.mubr.bf16.vlgmr.msra.gmra.mxu1 %v7988_v31 }
 0x8e8   : > { %11536 = vmatpush3.bf16.msra.mxu0 %v11976_v23  ;;  %11556 = vmatpush3.bf16.msra.mxu1 %v16263_v21  ;;  %v11980_v21 = vld [vmem:[%s16816_s2 + $0x458] sm:$0xff]  }
 0x8e9   : > { %11537 = vmatprep.subr.bf16.mxu0 %v17073_v18  ;;  %11557 = vmatprep.subr.bf16.mxu1 %v17073_v18 }
 0x8ea   : > { %11551 = vmatprep.mubr.msk.bf16.mxu0 %vm12139_vm0, %v17073_v18  ;;  %11571 = vmatprep.mubr.msk.bf16.mxu1 %vm12139_vm0, %v17073_v18 }
 0x8ec   : > { %11538 = vmatpush3.bf16.msra.mxu0 %v11977_v9  ;;  %11558 = vmatpush3.bf16.msra.mxu1 %v16275_v57  ;;  %v11981_v57 = vld [vmem:[%s16816_s2 + $0x450] sm:$0xff]  }
 0x8ed   : > { %11539 = vmatprep.subr.bf16.mxu0 %v17073_v18  ;;  %11559 = vmatprep.subr.bf16.mxu1 %v17073_v18 }
 0x8f0   : > { %11540 = vmatpush3.bf16.msra.mxu0 %v11978_v10  ;;  %11560 = vmatpush3.bf16.msra.mxu1 %v16291_v52  ;;  %v11982_v52 = vld [vmem:[%s16816_s2 + $0x448] sm:$0xff]  }
 0x8f1   : > { %11541 = vmatprep.subr.bf16.mxu0 %v17073_v18  ;;  %11561 = vmatprep.subr.bf16.mxu1 %v17073_v18 }
 0x8f4   : > { %11542 = vmatpush3.bf16.msra.mxu0 %v11979_v46  ;;  %11562 = vmatpush3.bf16.msra.mxu1 %v16305_v11  ;;  %v11983_v11 = vld [vmem:[%s16816_s2 + $0x440] sm:$0xff]  }
 0x8f5   : > { %11543 = vmatprep.subr.bf16.mxu0 %v17073_v18  ;;  %11563 = vmatprep.subr.bf16.mxu1 %v17073_v18 }
 0x8f8   : > { %11544 = vmatpush3.bf16.msra.mxu0 %v11980_v21  ;;  %11564 = vmatpush3.bf16.msra.mxu1 %v16319_v14  ;;  %v7991_v14 = vld [vmem:[#allocation3 + $0x2] ss:$2 sm:$0xff] }
 0x8f9   : > { %11545 = vmatprep.subr.bf16.mxu0 %v17073_v18  ;;  %11565 = vmatprep.subr.bf16.mxu1 %v17073_v18 }
 0x8fc   : > { %11546 = vmatpush3.bf16.msra.mxu0 %v11981_v57  ;;  %11566 = vmatpush3.bf16.msra.mxu1 %v16333_v54  ;;  %v7992_v54 = vpack.c.bf16 %v7991_v14, %v7991_v14  ;;  %v12007_v14 = vld [vmem:[%s16816_s2 + $0x500] sm:$0xff]  }
 0x8fd   : > { %11547 = vmatprep.subr.bf16.mxu0 %v17073_v18  ;;  %11567 = vmatprep.subr.bf16.mxu1 %v17073_v18 }
 0x900   : > { %11548 = vmatpush3.bf16.msra.mxu0 %v11982_v52  ;;  %11568 = vmatpush3.bf16.msra.mxu1 %v16347_v17  ;;  %v16492_v17 = vld [vmem:[%s16816_s2 + $0x4e8] sm:$0xff]  }
 0x901   : > { %11549 = vmatprep.subr.bf16.mxu0 %v17073_v18  ;;  %11569 = vmatprep.subr.bf16.mxu1 %v17073_v18 }
 0x904   : > { %11550 = vmatpush3.bf16.msra.mxu0 %v11983_v11  ;;  %11570 = vmatpush3.bf16.msra.mxu1 %v16359_v51  ;;  %v16508_v51 = vld [vmem:[%s16816_s2 + $0x4e0] sm:$0xff]  }
 0x905   : > { %11575 = vmatprep.subr.bf16.mxu0 %v17073_v18  ;;  %11595 = vmatprep.subr.bf16.mxu1 %v17073_v18 }
 0x907   : > { %11552 = vmatmul.mubr.bf16.vlgmr.msra.gmra.mxu0 %v7992_v54  ;;  %11572 = vmatmul.mubr.bf16.vlgmr.msra.gmra.mxu1 %v7992_v54 }
 0x908   : > { %11576 = vmatpush3.bf16.msra.mxu0 %v16268_v27  ;;  %11596 = vmatpush3.bf16.msra.mxu1 %v11976_v23  ;;  %v7993_v27 = vld [vmem:[#allocation3 + $0x3] ss:$2 sm:$0xff] }
 0x909   : > { %11577 = vmatprep.subr.bf16.mxu0 %v17073_v18  ;;  %11597 = vmatprep.subr.bf16.mxu1 %v17073_v18 }
 0x90a   : > { %11591 = vmatprep.mubr.msk.bf16.mxu0 %vm12139_vm0, %v17073_v18  ;;  %11611 = vmatprep.mubr.msk.bf16.mxu1 %vm12139_vm0, %v17073_v18 }
 0x90c   : > { %11578 = vmatpush3.bf16.msra.mxu0 %v16280_v42  ;;  %11598 = vmatpush3.bf16.msra.mxu1 %v11977_v9  ;;  %v7994_v42 = vpack.c.bf16 %v7993_v27, %v7993_v27 }
 0x90d   : > { %11579 = vmatprep.subr.bf16.mxu0 %v17073_v18  ;;  %11599 = vmatprep.subr.bf16.mxu1 %v17073_v18 }
 0x910   : > { %11580 = vmatpush3.bf16.msra.mxu0 %v16296_v62  ;;  %11600 = vmatpush3.bf16.msra.mxu1 %v11978_v10  ;;  %v16466_v62 = vld [vmem:[%s16816_s2 + $0x4f8] sm:$0xff]   ;;  %v12001_v10 = vld [vmem:[%s16816_s2 + $0x530] sm:$0xff]  }
 0x911   : > { %11581 = vmatprep.subr.bf16.mxu0 %v17073_v18  ;;  %11601 = vmatprep.subr.bf16.mxu1 %v17073_v18 }
 0x914   : > { %11582 = vmatpush3.bf16.msra.mxu0 %v16310_v60  ;;  %11602 = vmatpush3.bf16.msra.mxu1 %v11979_v46  ;;  %v16471_v60 = vld [vmem:[%s16816_s2 + $0x4b8] sm:$0xff]   ;;  %v12002_v46 = vld [vmem:[%s16816_s2 + $0x528] sm:$0xff]  }
 0x915   : > { %11583 = vmatprep.subr.bf16.mxu0 %v17073_v18  ;;  %11603 = vmatprep.subr.bf16.mxu1 %v17073_v18 }
 0x918   : > { %11584 = vmatpush3.bf16.msra.mxu0 %v16324_v56  ;;  %11604 = vmatpush3.bf16.msra.mxu1 %v11980_v21  ;;  %v16478_v56 = vld [vmem:[%s16816_s2 + $0x4f0] sm:$0xff]   ;;  %v12003_v21 = vld [vmem:[%s16816_s2 + $0x520] sm:$0xff]  }
 0x919   : > { %11585 = vmatprep.subr.bf16.mxu0 %v17073_v18  ;;  %11605 = vmatprep.subr.bf16.mxu1 %v17073_v18 }
 0x91c   : > { %11586 = vmatpush3.bf16.msra.mxu0 %v16338_v38  ;;  %11606 = vmatpush3.bf16.msra.mxu1 %v11981_v57  ;;  %v16483_v38 = vld [vmem:[%s16816_s2 + $0x4b0] sm:$0xff]   ;;  %v12004_v57 = vld [vmem:[%s16816_s2 + $0x518] sm:$0xff]  }
 0x91d   : > { %11587 = vmatprep.subr.bf16.mxu0 %v17073_v18  ;;  %11607 = vmatprep.subr.bf16.mxu1 %v17073_v18 }
 0x920   : > { %11588 = vmatpush3.bf16.msra.mxu0 %v16352_v37  ;;  %11608 = vmatpush3.bf16.msra.mxu1 %v11982_v52  ;;  %v16497_v37 = vld [vmem:[%s16816_s2 + $0x4a8] sm:$0xff]   ;;  %v12005_v52 = vld [vmem:[%s16816_s2 + $0x510] sm:$0xff]  }
 0x921   : > { %11589 = vmatprep.subr.bf16.mxu0 %v17073_v18  ;;  %11609 = vmatprep.subr.bf16.mxu1 %v17073_v18 }
 0x924   : > { %11590 = vmatpush3.bf16.msra.mxu0 %v16364_v35  ;;  %11610 = vmatpush3.bf16.msra.mxu1 %v11983_v11  ;;  %v16513_v35 = vld [vmem:[%s16816_s2 + $0x4a0] sm:$0xff]   ;;  %v12006_v11 = vld [vmem:[%s16816_s2 + $0x508] sm:$0xff]  }
 0x925   : > { %11615 = vmatprep.subr.bf16.mxu0 %v17073_v18  ;;  %11635 = vmatprep.subr.bf16.mxu1 %v17073_v18 }
 0x927   : > { %11592 = vmatmul.mubr.bf16.vlgmr.msra.gmra.mxu0 %v16378_v63  ;;  %11612 = vmatmul.mubr.bf16.vlgmr.msra.gmra.mxu1 %v7994_v42 }
 0x928   : > { %11631 = vmatprep.mubr.msk.bf16.mxu0 %vm12139_vm0, %v17073_v18  ;;  %11651 = vmatprep.mubr.msk.bf16.mxu1 %vm12139_vm0, %v17073_v18 }
 0x929   : > { %11616 = vmatpush3.bf16.msra.mxu0 %v16466_v62  ;;  %11636 = vmatpush3.bf16.msra.mxu1 %v16471_v60 }
 0x92a   : > { %11617 = vmatprep.subr.bf16.mxu0 %v17073_v18  ;;  %11637 = vmatprep.subr.bf16.mxu1 %v17073_v18 }
 0x92d   : > { %11618 = vmatpush3.bf16.msra.mxu0 %v16478_v56  ;;  %11638 = vmatpush3.bf16.msra.mxu1 %v16483_v38 }
 0x92e   : > { %11619 = vmatprep.subr.bf16.mxu0 %v17073_v18  ;;  %11639 = vmatprep.subr.bf16.mxu1 %v17073_v18 }
 0x931   : > { %11620 = vmatpush3.bf16.msra.mxu0 %v16492_v17  ;;  %11640 = vmatpush3.bf16.msra.mxu1 %v16497_v37 }
 0x932   : > { %11621 = vmatprep.subr.bf16.mxu0 %v17073_v18  ;;  %11641 = vmatprep.subr.bf16.mxu1 %v17073_v18 }
 0x935   : > { %11622 = vmatpush3.bf16.msra.mxu0 %v16508_v51  ;;  %11642 = vmatpush3.bf16.msra.mxu1 %v16513_v35 }
 0x936   : > { %11623 = vmatprep.subr.bf16.mxu0 %v17073_v18  ;;  %11643 = vmatprep.subr.bf16.mxu1 %v17073_v18 }
 0x939   : > { %11624 = vmatpush3.bf16.msra.mxu0 %v16522_v45  ;;  %11644 = vmatpush3.bf16.msra.mxu1 %v16527_v48 }
 0x93a   : > { %11625 = vmatprep.subr.bf16.mxu0 %v17073_v18  ;;  %11645 = vmatprep.subr.bf16.mxu1 %v17073_v18 }
 0x93d   : > { %11626 = vmatpush3.bf16.msra.mxu0 %v16536_v47  ;;  %11646 = vmatpush3.bf16.msra.mxu1 %v16541_v41 }
 0x93e   : > { %11627 = vmatprep.subr.bf16.mxu0 %v17073_v18  ;;  %11647 = vmatprep.subr.bf16.mxu1 %v17073_v18 }
 0x941   : > { %11628 = vmatpush3.bf16.msra.mxu0 %v16550_v19  ;;  %11648 = vmatpush3.bf16.msra.mxu1 %v16555_v59 }
 0x942   : > { %11629 = vmatprep.subr.bf16.mxu0 %v17073_v18  ;;  %11649 = vmatprep.subr.bf16.mxu1 %v17073_v18 }
 0x945   : > { %11630 = vmatpush3.bf16.msra.mxu0 %v16562_v61  ;;  %11650 = vmatpush3.bf16.msra.mxu1 %v16567_v16 }
 0x946   : > { %11655 = vmatprep.subr.bf16.mxu0 %v17073_v18  ;;  %11675 = vmatprep.subr.bf16.mxu1 %v17073_v18 }
 0x9a7   : > { %v8077_v15 = vpop.f32.mrf.mxu0  ;;  %v8165_v2 = vpop.f32.mrf.mxu1 }
 0x9a8   : > { %v8166_v7 = vadd.f32 %v8165_v2, %v8077_v15  ;;  %v12023_v15 = vld [vmem:[%s16818_s4 + $0x40] sm:$0xff]  }
 0x9a9   : > { %v11513_v5 = vpop.f32.mrf.mxu0  ;;  %v11533_v53 = vpop.f32.mrf.mxu1 }
 0x9ab   : > { %v8080_v40 = vpop.f32.mrf.mxu0  ;;  %v8168_v4 = vpop.f32.mrf.mxu1 }
 0x9ad   : > { %v11514_v22 = vpop.f32.mrf.mxu0  ;;  %v11534_v28 = vpop.f32.mrf.mxu1 }
 0x9c7   : > { %v8253_v30 = vpop.f32.mrf.mxu0  ;;  %v8294_v39 = vpop.f32.mrf.mxu1 }
 0x9c8   : > { %v8259_v32 = vadd.f32 %v8253_v30, %v8166_v7 }
 0x9c9   : > { %v11553_v25 = vpop.f32.mrf.mxu0  ;;  %v11573_v33 = vpop.f32.mrf.mxu1 }
 0x9cb   : > { %v8256_v6 = vpop.f32.mrf.mxu0  ;;  %v8297_v55 = vpop.f32.mrf.mxu1 }
 0x9cd   : > { %v11554_v29 = vpop.f32.mrf.mxu0  ;;  %v11574_v8 = vpop.f32.mrf.mxu1 }
 0x9e7   : > { %v8334_v0 = vpop.f32.mrf.mxu0  ;;  %v8374_v1 = vpop.f32.mrf.mxu1 }
 0x9e8   : > { %v8335_v34 = vadd.f32 %v8334_v0, %v8294_v39 }
 0x9e9   : > { %v11593_v50 = vpop.f32.mrf.mxu0  ;;  %v11613_v24 = vpop.f32.mrf.mxu1 }
 0x9ea   : > { %v8380_v20 = vadd.f32 %v8374_v1, %v8335_v34 }
 0x9eb   : > { %v8337_v43 = vpop.f32.mrf.mxu0  ;;  %v8377_v26 = vpop.f32.mrf.mxu1 }
 0x9ec   : > { %v8381_v58 = vmax.f32 %v8259_v32, %v8380_v20  ;;  %v10010_v43 = vld [vmem:[%s16817_s3 + $0x7] ss:$0 sm:$0xff] }
 0x9ed   : > { %v11594_v44 = vpop.f32.mrf.mxu0  ;;  %v11614_v3 = vpop.f32.mrf.mxu1 }
 0x9ee   : > { %v8388_v36 = vadd.f32 %v9936_v13, %v8381_v58 }
 0x9f0   : > { %v8389_v12 = vmax.f32 %v8388_v36, 0.0 }
 0x9f2   : > { %8390 = vst [vmem:[#allocation2] sm:$0xff] %v8389_v12 }
 0x9f9   : > { %v8446_v23 = vld [vmem:[#allocation2 + $0x1] ss:$2 sm:$0x7]  ;;  %v8444_v63 = vld [vmem:[#allocation2] ss:$2 sm:$0x7] }
 0x9fa   : > { %v16581_v31 = vpack.c.bf16 %v8446_v23, %v8446_v23  ;;  %v8445_v9 = vpack.c.bf16 %v8444_v63, %v8444_v63  ;;  %v8448_v54 = vld [vmem:[#allocation2 + $0x2] ss:$2 sm:$0x7]  ;;  %v8450_v42 = vld [vmem:[#allocation2 + $0x3] ss:$2 sm:$0x7] }
 0x9fb   : > { %v8449_v27 = vpack.c.bf16 %v8448_v54, %v8448_v54  ;;  %v12024_v23 = vld [vmem:[%s16818_s4 + $0xb8] sm:$0xff]  }
 0x9fc   : > { %11632 = vmatmul.mubr.bf16.vlgmr.msra.gmra.mxu0 %v16581_v31  ;;  %11652 = vmatmul.mubr.bf16.vlgmr.msra.gmra.mxu1 %v8445_v9  ;;  %v12025_v9 = vld [vmem:[%s16818_s4 + $0xb0] sm:$0xff]  }
 0x9fd   : > { %11656 = vmatpush3.bf16.msra.mxu0 %v12000_v49  ;;  %11676 = vmatpush3.bf16.msra.mxu1 %v16466_v62  ;;  %v8451_v62 = vpack.c.bf16 %v8450_v42, %v8450_v42 }
 0x9fe   : > { %11657 = vmatprep.subr.bf16.mxu0 %v17073_v18  ;;  %11677 = vmatprep.subr.bf16.mxu1 %v17073_v18 }
 0x9ff   : > { %11671 = vmatprep.mubr.msk.bf16.mxu0 %vm12139_vm0, %v17073_v18  ;;  %11691 = vmatprep.mubr.msk.bf16.mxu1 %vm12139_vm0, %v17073_v18 }
 0xa01   : > { %11658 = vmatpush3.bf16.msra.mxu0 %v12001_v10  ;;  %11678 = vmatpush3.bf16.msra.mxu1 %v16478_v56  ;;  %v12009_v56 = vld [vmem:[%s16818_s4 + $0x78] sm:$0xff]  }
 0xa02   : > { %11659 = vmatprep.subr.bf16.mxu0 %v17073_v18  ;;  %11679 = vmatprep.subr.bf16.mxu1 %v17073_v18 }
 0xa05   : > { %11660 = vmatpush3.bf16.msra.mxu0 %v12002_v46  ;;  %11680 = vmatpush3.bf16.msra.mxu1 %v16492_v17  ;;  %v12011_v17 = vld [vmem:[%s16818_s4 + $0x70] sm:$0xff]  }
 0xa06   : > { %11661 = vmatprep.subr.bf16.mxu0 %v17073_v18  ;;  %11681 = vmatprep.subr.bf16.mxu1 %v17073_v18 }
 0xa09   : > { %11662 = vmatpush3.bf16.msra.mxu0 %v12003_v21  ;;  %11682 = vmatpush3.bf16.msra.mxu1 %v16508_v51  ;;  %v12013_v51 = vld [vmem:[%s16818_s4 + $0x68] sm:$0xff]  }
 0xa0a   : > { %11663 = vmatprep.subr.bf16.mxu0 %v17073_v18  ;;  %11683 = vmatprep.subr.bf16.mxu1 %v17073_v18 }
 0xa0d   : > { %11664 = vmatpush3.bf16.msra.mxu0 %v12004_v57  ;;  %11684 = vmatpush3.bf16.msra.mxu1 %v16522_v45  ;;  %v12015_v45 = vld [vmem:[%s16818_s4 + $0x60] sm:$0xff]  }
 0xa0e   : > { %11665 = vmatprep.subr.bf16.mxu0 %v17073_v18  ;;  %11685 = vmatprep.subr.bf16.mxu1 %v17073_v18 }
 0xa11   : > { %11666 = vmatpush3.bf16.msra.mxu0 %v12005_v52  ;;  %11686 = vmatpush3.bf16.msra.mxu1 %v16536_v47  ;;  %v12017_v47 = vld [vmem:[%s16818_s4 + $0x58] sm:$0xff]  }
 0xa12   : > { %11667 = vmatprep.subr.bf16.mxu0 %v17073_v18  ;;  %11687 = vmatprep.subr.bf16.mxu1 %v17073_v18 }
 0xa15   : > { %11668 = vmatpush3.bf16.msra.mxu0 %v12006_v11  ;;  %11688 = vmatpush3.bf16.msra.mxu1 %v16550_v19  ;;  %v12019_v19 = vld [vmem:[%s16818_s4 + $0x50] sm:$0xff]  }
 0xa16   : > { %11669 = vmatprep.subr.bf16.mxu0 %v17073_v18  ;;  %11689 = vmatprep.subr.bf16.mxu1 %v17073_v18 }
 0xa19   : > { %11670 = vmatpush3.bf16.msra.mxu0 %v12007_v14  ;;  %11690 = vmatpush3.bf16.msra.mxu1 %v16562_v61  ;;  %v12021_v61 = vld [vmem:[%s16818_s4 + $0x48] sm:$0xff]  }
 0xa1a   : > { %11695 = vmatprep.subr.bf16.mxu0 %v17073_v18  ;;  %11715 = vmatprep.subr.bf16.mxu1 %v17073_v18 }
 0xa1c   : > { %11672 = vmatmul.mubr.bf16.vlgmr.msra.gmra.mxu0 %v8449_v27  ;;  %11692 = vmatmul.mubr.bf16.vlgmr.msra.gmra.mxu1 %v8449_v27 }
 0xa1d   : > { %11696 = vmatpush3.bf16.msra.mxu0 %v16471_v60  ;;  %11716 = vmatpush3.bf16.msra.mxu1 %v12000_v49  ;;  %v12008_v60 = vld [vmem:[%s16818_s4 + $0x38] sm:$0xff]  }
 0xa1e   : > { %11697 = vmatprep.subr.bf16.mxu0 %v17073_v18  ;;  %11717 = vmatprep.subr.bf16.mxu1 %v17073_v18 }
 0xa1f   : > { %11711 = vmatprep.mubr.msk.bf16.mxu0 %vm12139_vm0, %v17073_v18  ;;  %11731 = vmatprep.mubr.msk.bf16.mxu1 %vm12139_vm0, %v17073_v18 }
 0xa21   : > { %11698 = vmatpush3.bf16.msra.mxu0 %v16483_v38  ;;  %11718 = vmatpush3.bf16.msra.mxu1 %v12001_v10  ;;  %v12010_v38 = vld [vmem:[%s16818_s4 + $0x30] sm:$0xff]   ;;  %v12026_v10 = vld [vmem:[%s16818_s4 + $0xa8] sm:$0xff]  }
 0xa22   : > { %11699 = vmatprep.subr.bf16.mxu0 %v17073_v18  ;;  %11719 = vmatprep.subr.bf16.mxu1 %v17073_v18 }
 0xa25   : > { %11700 = vmatpush3.bf16.msra.mxu0 %v16497_v37  ;;  %11720 = vmatpush3.bf16.msra.mxu1 %v12002_v46  ;;  %v12012_v37 = vld [vmem:[%s16818_s4 + $0x28] sm:$0xff]   ;;  %v12027_v46 = vld [vmem:[%s16818_s4 + $0xa0] sm:$0xff]  }
 0xa26   : > { %11701 = vmatprep.subr.bf16.mxu0 %v17073_v18  ;;  %11721 = vmatprep.subr.bf16.mxu1 %v17073_v18 }
 0xa29   : > { %11702 = vmatpush3.bf16.msra.mxu0 %v16513_v35  ;;  %11722 = vmatpush3.bf16.msra.mxu1 %v12003_v21  ;;  %v12014_v35 = vld [vmem:[%s16818_s4 + $0x20] sm:$0xff]   ;;  %v12028_v21 = vld [vmem:[%s16818_s4 + $0x98] sm:$0xff]  }
 0xa2a   : > { %11703 = vmatprep.subr.bf16.mxu0 %v17073_v18  ;;  %11723 = vmatprep.subr.bf16.mxu1 %v17073_v18 }
 0xa2d   : > { %11704 = vmatpush3.bf16.msra.mxu0 %v16527_v48  ;;  %11724 = vmatpush3.bf16.msra.mxu1 %v12004_v57  ;;  %v12016_v48 = vld [vmem:[%s16818_s4 + $0x18] sm:$0xff]   ;;  %v12029_v57 = vld [vmem:[%s16818_s4 + $0x90] sm:$0xff]  }
 0xa2e   : > { %11705 = vmatprep.subr.bf16.mxu0 %v17073_v18  ;;  %11725 = vmatprep.subr.bf16.mxu1 %v17073_v18 }
 0xa31   : > { %11706 = vmatpush3.bf16.msra.mxu0 %v16541_v41  ;;  %11726 = vmatpush3.bf16.msra.mxu1 %v12005_v52  ;;  %v12018_v41 = vld [vmem:[%s16818_s4 + $0x10] sm:$0xff]   ;;  %v12030_v52 = vld [vmem:[%s16818_s4 + $0x88] sm:$0xff]  }
 0xa32   : > { %11707 = vmatprep.subr.bf16.mxu0 %v17073_v18  ;;  %11727 = vmatprep.subr.bf16.mxu1 %v17073_v18 }
 0xa35   : > { %11708 = vmatpush3.bf16.msra.mxu0 %v16555_v59  ;;  %11728 = vmatpush3.bf16.msra.mxu1 %v12006_v11  ;;  %v12020_v59 = vld [vmem:[%s16818_s4 + $0x8] sm:$0xff]   ;;  %v12031_v11 = vld [vmem:[%s16818_s4 + $0x80] sm:$0xff]  }
 0xa36   : > { %11709 = vmatprep.subr.bf16.mxu0 %v17073_v18  ;;  %11729 = vmatprep.subr.bf16.mxu1 %v17073_v18 }
 0xa39   : > { %11710 = vmatpush3.bf16.msra.mxu0 %v16567_v16  ;;  %11730 = vmatpush3.bf16.msra.mxu1 %v12007_v14  ;;  %v12022_v16 = vld [vmem:[%s16818_s4] sm:$0xff]  }
 0xa3a   : > { %11735 = vmatprep.subr.bf16.mxu0 %v17073_v18  ;;  %11755 = vmatprep.subr.bf16.mxu1 %v17073_v18 }
 0xa3c   : > { %11712 = vmatmul.mubr.bf16.vlgmr.msra.gmra.mxu0 %v16581_v31  ;;  %11732 = vmatmul.mubr.bf16.vlgmr.msra.gmra.mxu1 %v8451_v62 }
 0xa3d   : > { %11751 = vmatprep.mubr.msk.bf16.mxu0 %vm12139_vm0, %v17073_v18  ;;  %11771 = vmatprep.mubr.msk.bf16.mxu1 %vm12139_vm0, %v17073_v18 }
 0xa3e   : > { %11736 = vmatpush3.bf16.msra.mxu0 %v12008_v60  ;;  %11756 = vmatpush3.bf16.msra.mxu1 %v12009_v56 }
 0xa3f   : > { %11737 = vmatprep.subr.bf16.mxu0 %v17073_v18  ;;  %11757 = vmatprep.subr.bf16.mxu1 %v17073_v18 }
 0xa42   : > { %11738 = vmatpush3.bf16.msra.mxu0 %v12010_v38  ;;  %11758 = vmatpush3.bf16.msra.mxu1 %v12011_v17 }
 0xa43   : > { %11739 = vmatprep.subr.bf16.mxu0 %v17073_v18  ;;  %11759 = vmatprep.subr.bf16.mxu1 %v17073_v18 }
 0xa46   : > { %11740 = vmatpush3.bf16.msra.mxu0 %v12012_v37  ;;  %11760 = vmatpush3.bf16.msra.mxu1 %v12013_v51  ;;  %v8847_v37 = vld [vmem:[%s16819_s5] sm:$0x1] }
 0xa47   : > { %11741 = vmatprep.subr.bf16.mxu0 %v17073_v18  ;;  %11761 = vmatprep.subr.bf16.mxu1 %v17073_v18 }
 0xa4a   : > { %11742 = vmatpush3.bf16.msra.mxu0 %v12014_v35  ;;  %11762 = vmatpush3.bf16.msra.mxu1 %v12015_v45 }
 0xa4b   : > { %11743 = vmatprep.subr.bf16.mxu0 %v17073_v18  ;;  %11763 = vmatprep.subr.bf16.mxu1 %v17073_v18 }
 0xa4e   : > { %11744 = vmatpush3.bf16.msra.mxu0 %v12016_v48  ;;  %11764 = vmatpush3.bf16.msra.mxu1 %v12017_v47 }
 0xa4f   : > { %11745 = vmatprep.subr.bf16.mxu0 %v17073_v18  ;;  %11765 = vmatprep.subr.bf16.mxu1 %v17073_v18 }
 0xa52   : > { %11746 = vmatpush3.bf16.msra.mxu0 %v12018_v41  ;;  %11766 = vmatpush3.bf16.msra.mxu1 %v12019_v19 }
 0xa53   : > { %11747 = vmatprep.subr.bf16.mxu0 %v17073_v18  ;;  %11767 = vmatprep.subr.bf16.mxu1 %v17073_v18 }
 0xa56   : > { %11748 = vmatpush3.bf16.msra.mxu0 %v12020_v59  ;;  %11768 = vmatpush3.bf16.msra.mxu1 %v12021_v61 }
 0xa57   : > { %11749 = vmatprep.subr.bf16.mxu0 %v17073_v18  ;;  %11769 = vmatprep.subr.bf16.mxu1 %v17073_v18 }
 0xa5a   : > { %11750 = vmatpush3.bf16.msra.mxu0 %v12022_v16  ;;  %11770 = vmatpush3.bf16.msra.mxu1 %v12023_v15 }
 0xa5b   : > { %11775 = vmatprep.subr.bf16.mxu0 %v17073_v18 }
 0xabc   : > { %v8534_v2 = vpop.f32.mrf.mxu0  ;;  %v8622_v7 = vpop.f32.mrf.mxu1 }
 0xabd   : > { %v8623_v5 = vadd.f32 %v8622_v7, %v8534_v2 }
 0xabe   : > { %v11633_v53 = vpop.f32.mrf.mxu0  ;;  %v11653_v40 = vpop.f32.mrf.mxu1 }
 0xac0   : > { %v8537_v4 = vpop.f32.mrf.mxu0  ;;  %v8625_v22 = vpop.f32.mrf.mxu1 }
 0xac2   : > { %v11634_v28 = vpop.f32.mrf.mxu0  ;;  %v11654_v30 = vpop.f32.mrf.mxu1 }
 0xadc   : > { %v8710_v39 = vpop.f32.mrf.mxu0  ;;  %v8751_v25 = vpop.f32.mrf.mxu1 }
 0xadd   : > { %v8716_v20 = vadd.f32 %v8710_v39, %v8623_v5 }
 0xade   : > { %v11673_v33 = vpop.f32.mrf.mxu0  ;;  %v11693_v6 = vpop.f32.mrf.mxu1 }
 0xae0   : > { %v8713_v55 = vpop.f32.mrf.mxu0  ;;  %v8754_v29 = vpop.f32.mrf.mxu1 }
 0xae2   : > { %v11674_v8 = vpop.f32.mrf.mxu0  ;;  %v11694_v0 = vpop.f32.mrf.mxu1 }
 0xafc   : > { %v8791_v1 = vpop.f32.mrf.mxu0  ;;  %v8831_v34 = vpop.f32.mrf.mxu1 }
 0xafd   : > { %v8792_v50 = vadd.f32 %v8791_v1, %v8751_v25 }
 0xafe   : > { %v11713_v24 = vpop.f32.mrf.mxu0  ;;  %v11733_v32 = vpop.f32.mrf.mxu1 }
 0xaff   : > { %v8837_v13 = vadd.f32 %v8831_v34, %v8792_v50 }
 0xb00   : > { %v8794_v26 = vpop.f32.mrf.mxu0  ;;  %v8834_v58 = vpop.f32.mrf.mxu1 }
 0xb01   : > { %v8838_v44 = vmax.f32 %v8716_v20, %v8837_v13 }
 0xb02   : > { %v11714_v3 = vpop.f32.mrf.mxu0  ;;  %v11734_v36 = vpop.f32.mrf.mxu1 }
 0xb03   : > { %v8845_v12 = vadd.f32 %v10010_v43, %v8838_v44 }
 0xb05   : > { %v8846_v49 = vmax.f32 %v8845_v12, 0.0 }
 0xb07   : > { %v8848_v63 = vpack.c.bf16 %v8846_v49, %v8846_v49 }
 0xb09   : > { %v8972_v31 = vshrl.u32 %v8848_v63, 16  ;;  %11752 = vmatmul.mubr.bf16.vlgmr.msra.gmra.mxu0 %v8848_v63  ;;  %v9082_v14 = vrot.slane %v8848_v63, 1 }
 0xb0a   : > { %11776 = vmatpush3.bf16.msra.mxu0 %v12024_v23  ;;  %11791 = vmatprep.mubr.msk.bf16.mxu0 %vm12139_vm0, %v17073_v18 }
 0xb0b   : > { %11772 = vmatmul.mubr.bf16.vlgmr.msra.gmra.mxu1 %v8972_v31  ;;  %11777 = vmatprep.subr.bf16.mxu0 %v17073_v18 }
 0xb0e   : > { %11778 = vmatpush3.bf16.msra.mxu0 %v12025_v9 }
 0xb0f   : > { %11779 = vmatprep.subr.bf16.mxu0 %v17073_v18 }
 0xb12   : > { %11780 = vmatpush3.bf16.msra.mxu0 %v12026_v10 }
 0xb13   : > { %11781 = vmatprep.subr.bf16.mxu0 %v17073_v18 }
 0xb16   : > { %11782 = vmatpush3.bf16.msra.mxu0 %v12027_v46 }
 0xb17   : > { %11783 = vmatprep.subr.bf16.mxu0 %v17073_v18 }
 0xb1a   : > { %11784 = vmatpush3.bf16.msra.mxu0 %v12028_v21 }
 0xb1b   : > { %11785 = vmatprep.subr.bf16.mxu0 %v17073_v18 }
 0xb1e   : > { %11786 = vmatpush3.bf16.msra.mxu0 %v12029_v57 }
 0xb1f   : > { %11787 = vmatprep.subr.bf16.mxu0 %v17073_v18 }
 0xb22   : > { %11788 = vmatpush3.bf16.msra.mxu0 %v12030_v52 }
 0xb23   : > { %11789 = vmatprep.subr.bf16.mxu0 %v17073_v18 }
 0xb26   : > { %11790 = vmatpush3.bf16.msra.mxu0 %v12031_v11 }
 0xb29   : > { %11792 = vmatmul.mubr.bf16.vlgmr.msra.gmra.mxu0 %v9082_v14 }
 0xbc9   : > { %v8947_v54 = vpop.f32.mrf.mxu0 }
 0xbca   : > { %v8953_v51 = vadd.f32 %v8947_v54, %v8847_v37 }
 0xbcb   : > { %v11753_v27 = vpop.f32.mrf.mxu0  ;;  %v9057_v42 = vpop.f32.mrf.mxu1 }
 0xbcc   : > { %v9063_v18 = vadd.f32 %v9057_v42, %v8953_v51 }
 0xbcd   : > { %v8950_v62 = vpop.f32.mrf.mxu0  ;;  %v11773_v60 = vpop.f32.mrf.mxu1 }
 0xbcf   : > { %v11754_v56 = vpop.f32.mrf.mxu0  ;;  %v9060_v38 = vpop.f32.mrf.mxu1 }
 0xbd1   : > { %v11774_v17 = vpop.f32.mrf.mxu1 }
 0xbe9   : > { %v9166_v35 = vpop.f32.mrf.mxu0 }
 0xbea   : > { %v9172_v45 = vadd.f32 %v9166_v35, %v9063_v18 }
 0xbeb   : > { %v11793_v48 = vpop.f32.mrf.mxu0 }
 0xbec   : > { %9173 = vst [vmem:[%s243_s20] sm:$0x1] %v9172_v45 }
 0xbed   : > { %v9169_v47 = vpop.f32.mrf.mxu0 }
 0xbee   : > { %12088 = shalt.err (!%p12085_p3)
}
 0xbef   : > { %s12089_s15 = scalar_lea.hbm %s16773_s9, 16  ;;  %s12093_s17 = scalar_lea.hbm %s16820_s6, 32 }
 0xbf0   : > { %p12090_p4 = scmp.ne.s32.totalorder %s16773_s9, %s12089_s15  ;;  %p12094_p9 = scmp.lt.s32.totalorder %s16773_s9, %s16820_s6 }
 0xbf1   : > { %p12095_p10 = scmp.lt.s32.totalorder %s12093_s17, %s12089_s15 }
 0xbf2   : > { %p12091_p7 = pnand %p12090_p4, %p12214_p5 }
 0xbf3   : > { %p12096_p11 = por %p12095_p10, %p12094_p9 }
 0xbf4   : > { %p12092_p8 = pneg %p12091_p7 }
 0xbf6   : > { %p12097_p12 = pnand %p12096_p11, %p12092_p8 }
 0xbf8   : > { %12100 = shalt.err (!%p12097_p12)
}
 0xbf9   : > { %11796 = dma.vmem_to_hbm [thread:$0]  (%p12214_p5), %s16775_s26, 16, %s16773_s9, %s9175_s10   ;;  %v11794_v41 = vpop.f32.mrf.mxu0 }
 0xbfa PF: > { %p11802_p13 = scmp.ge.s32.totalorder %s12135_s24, 2  ;;  %s9199_s20 = sand.u32 1, %s12123_s21  }
 0xbfb   : > { %s9200_s28 = scalar_lea.sflag [#allocation5], %s9199_s20 }
 0xbfc   : > { %p11799_p0 = pnand %p11802_p13, %p12218_p6 }
 0xbfe   : > { %p11800_p1 = pneg %p11799_p0 }
 0xc00   : > { %12118 = dma.done.wait (%p11800_p1), %s9200_s28, 16  }
 0xc01   : > { %12120 = vsyncadd (%p11800_p1), %s9200_s28, 4294967280  ;;  %p16_p2 = scmp.ge.s32.totalorder %s12201_s27, 4   ;;  %s17108_s21 = smov %s12127_s22 }
 0xc02   : > { %s17109_s22 = smov %s12131_s23  ;;  %s17110_s23 = smov %s12212_s30 }
 0xc03   : > { %s17111_s24 = smov %s12201_s27  ;;  %18 = sbr.rel (!%p16_p2) target bundleno = 3 (0x3), region = 316 }
 0xc08   :  { %9204 = vsyncpa [#allocation5], 1 }
 0xc09   :  { %9206 = vsyncpa [#allocation5 + $0x1], 1 }

</bundles_post_ra>
